<compile_context>
chip_gen: v7x
topology: tpu7x:2x2x1
jax: 0.10.0
libtpu: 0.0.40
codegen_flags: <defaults>
</compile_context>

<pallas_src>
import jax
import jax.numpy as jnp
from jax.experimental import pallas as pl
from jax.experimental.pallas import tpu as pltpu

SLOPE = 0.2  # LeakyReLU negative slope used by FFTConvBlock


def _leaky(t):
    return jnp.where(t >= 0, t, SLOPE * t)


# ----------------------------------------------------------------------------
# Pallas kernel
# ----------------------------------------------------------------------------
def _skip_blocks_kernel(xpad_ref,
                        w1a_ref, b1a_ref, w2a_ref, b2a_ref, wia_ref, bia_ref,
                        w1b_ref, b1b_ref, w2b_ref, b2b_ref, wib_ref, bib_ref,
                        ws_ref, bs_ref,
                        out_ref,
                        stage_ref):
    """One grid step = one full image.

    xpad_ref  : (1, H+2, W+2, Cin)        input, zero-padded by 1 in H and W
    out_ref   : (1, H, W, Cp)             Cp = out channels padded to a mult. of 128
    stage_ref : VMEM (H+2, W+2, Cstage)   shared zero-halo staging buffer
    """
    _, H, W, Cp = out_ref.shape
    hw = H * W
    Cin = xpad_ref.shape[-1]
    Cmid = w1a_ref.shape[-1]

    xp = xpad_ref[0]                                          # (H+2, W+2, Cin)
    x_flat = xp[1:H + 1, 1:W + 1, :].reshape(hw, Cin)         # un-padded x, flattened

    def conv3x3_value(padded, w_ref, b_ref, n_out):
        """3x3 same-conv of an already-padded VALUE: 9 shifted matmuls + bias."""
        acc = jnp.zeros((hw, n_out), jnp.float32)
        for dy in range(3):
            for dx in range(3):
                p = padded[dy:dy + H, dx:dx + W, :]
                acc = acc + jnp.dot(p.reshape(hw, p.shape[-1]), w_ref[dy, dx],
                                    preferred_element_type=jnp.float32)
        return acc + b_ref[...]

    def conv3x3_stage(n_in, w_ref, b_ref, n_out):
        """3x3 same-conv reading shifted patches from the zero-haloed VMEM stage."""
        acc = jnp.zeros((hw, n_out), jnp.float32)
        for dy in range(3):
            for dx in range(3):
                p = stage_ref[dy:dy + H, dx:dx + W, :n_in]    # (H, W, n_in)
                acc = acc + jnp.dot(p.reshape(hw, n_in), w_ref[dy, dx],
                                    preferred_element_type=jnp.float32)
        return acc + b_ref[...]

    # Zero the staging buffer (only the halo actually needs to stay zero; the
    # interior is fully overwritten before every read).  Scratch contents are not
    # guaranteed across cores/iterations, so zero every grid step.
    stage_ref[...] = jnp.zeros_like(stage_ref)

    # ---------------- block 1: FFTConvBlock(Cin -> Cmid) ----------------
    t1 = _leaky(conv3x3_value(xp, w1a_ref, b1a_ref, Cmid))
    stage_ref[1:H + 1, 1:W + 1, :Cmid] = t1.reshape(H, W, Cmid)
    t2 = _leaky(conv3x3_stage(Cmid, w2a_ref, b2a_ref, Cmid))
    y1 = (t2
          + jnp.dot(x_flat, wia_ref[...], preferred_element_type=jnp.float32)
          + bia_ref[...])                                     # + identity_1x1(x)

    # ---------------- block 2: FFTConvBlock(Cmid -> Cp) -----------------
    stage_ref[1:H + 1, 1:W + 1, :Cmid] = y1.reshape(H, W, Cmid)
    u1 = _leaky(conv3x3_stage(Cmid, w1b_ref, b1b_ref, Cp))
    stage_ref[1:H + 1, 1:W + 1, :Cp] = u1.reshape(H, W, Cp)
    u2 = _leaky(conv3x3_stage(Cp, w2b_ref, b2b_ref, Cp))
    y2 = (u2
          + jnp.dot(y1, wib_ref[...], preferred_element_type=jnp.float32)
          + bib_ref[...])                                     # + identity_1x1(y1)

    # ---------------- outer shortcut: 1x1 on the original x -------------
    out = (y2
           + jnp.dot(x_flat, ws_ref[...], preferred_element_type=jnp.float32)
           + bs_ref[...])
    out_ref[0] = out.reshape(H, W, Cp).astype(out_ref.dtype)


# ----------------------------------------------------------------------------
# pallas_call wrapper
# ----------------------------------------------------------------------------
def _pad_out_channels(a, axis, cp):
    if a.shape[axis] == cp:
        return a
    cfg = [(0, 0)] * a.ndim
    cfg[axis] = (0, cp - a.shape[axis])
    return jnp.pad(a, cfg)


def skip_blocks_forward(x_nhwc, p):
    """skip_blocks.forward.  x_nhwc: (N, H, W, Cin) f32 -> (N, H, W, Cout) f32."""
    N, H, W, Cin = x_nhwc.shape
    Cmid = p["w1a"].shape[-1]
    Cout = p["ws"].shape[-1]
    Cp = ((Cout + 127) // 128) * 128          # lane-dense output channel count
    Cstage = max(Cmid, Cp)

    # Zero-pad H/W by 1 once (halo for the first 3x3 conv); all later halos are VMEM.
    xpad = jnp.pad(x_nhwc, ((0, 0), (1, 1), (1, 1), (0, 0)))

    # Zero-pad block-2 / shortcut params so stored output tiles are lane-dense
    # (padded channels compute to exactly 0 and are sliced off below).
    w1b = _pad_out_channels(p["w1b"], 3, Cp)
    b1b = _pad_out_channels(p["b1b"], 1, Cp)
    w2b = _pad_out_channels(_pad_out_channels(p["w2b"], 3, Cp), 2, Cp)
    b2b = _pad_out_channels(p["b2b"], 1, Cp)
    wib = _pad_out_channels(p["wib"], 1, Cp)
    bib = _pad_out_channels(p["bib"], 1, Cp)
    ws = _pad_out_channels(p["ws"], 1, Cp)
    bs = _pad_out_channels(p["bs"], 1, Cp)

    def whole(shape):
        nd = len(shape)

        def imap(n):
            return (0,) * nd

        return pl.BlockSpec(tuple(shape), imap)

    out = pl.pallas_call(
        _skip_blocks_kernel,
        out_shape=jax.ShapeDtypeStruct((N, H, W, Cp), jnp.float32),
        grid_spec=pltpu.PrefetchScalarGridSpec(
            num_scalar_prefetch=0,
            grid=(N,),
            in_specs=[
                pl.BlockSpec((1, H + 2, W + 2, Cin), lambda n: (n, 0, 0, 0)),
                whole(p["w1a"].shape), whole(p["b1a"].shape),
                whole(p["w2a"].shape), whole(p["b2a"].shape),
                whole(p["wia"].shape), whole(p["bia"].shape),
                whole(w1b.shape), whole(b1b.shape),
                whole(w2b.shape), whole(b2b.shape),
                whole(wib.shape), whole(bib.shape),
                whole(ws.shape), whole(bs.shape),
            ],
            out_specs=pl.BlockSpec((1, H, W, Cp), lambda n: (n, 0, 0, 0)),
            scratch_shapes=[
                pltpu.VMEM((H + 2, W + 2, Cstage), jnp.float32),
            ],
        ),
        compiler_params=pltpu.CompilerParams(
            dimension_semantics=("parallel",),
        ),
    )(xpad, p["w1a"], p["b1a"], p["w2a"], p["b2a"], p["wia"], p["bia"],
      w1b, b1b, w2b, b2b, wib, bib, ws, bs)

    return out[..., :Cout]


# ----------------------------------------------------------------------------
# Pure-JAX reference (for correctness checking)
# ----------------------------------------------------------------------------
def skip_blocks_reference(x_nhwc, p):
    hp = jax.lax.Precision.HIGHEST

    def conv3x3(z, w, b):
        y = jax.lax.conv_general_dilated(
            z, w, window_strides=(1, 1), padding=((1, 1), (1, 1)),
            dimension_numbers=("NHWC", "HWIO", "NHWC"), precision=hp)
        return y + b.reshape(1, 1, 1, -1)

    def conv1x1(z, w, b):
        return jnp.einsum("nhwc,cd->nhwd", z, w, precision=hp) + b.reshape(1, 1, 1, -1)

    def fft_conv_block(z, w1, b1, w2, b2, wi, bi):
        t = _leaky(conv3x3(z, w1, b1))
        t = _leaky(conv3x3(t, w2, b2))
        return t + conv1x1(z, wi, bi)

    sc = conv1x1(x_nhwc, p["ws"], p["bs"])
    y = fft_conv_block(x_nhwc, p["w1a"], p["b1a"], p["w2a"], p["b2a"],
                       p["wia"], p["bia"])
    y = fft_conv_block(y, p["w1b"], p["b1b"], p["w2b"], p["b2b"],
                       p["wib"], p["bib"])
    return y + sc


# ----------------------------------------------------------------------------
def make_params(key, cin, cmid, cout):
    ks = jax.random.split(key, 14)
    s = 0.1

    def nrm(k, shape):
        return s * jax.random.normal(k, shape, jnp.float32)

    return {
        # block 1: FFTConvBlock(cin -> cmid)
        "w1a": nrm(ks[0], (3, 3, cin, cmid)), "b1a": nrm(ks[1], (1, cmid)),
        "w2a": nrm(ks[2], (3, 3, cmid, cmid)), "b2a": nrm(ks[3], (1, cmid)),
        "wia": nrm(ks[4], (cin, cmid)), "bia": nrm(ks[5], (1, cmid)),
        # block 2: FFTConvBlock(cmid -> cout)
        "w1b": nrm(ks[6], (3, 3, cmid, cout)), "b1b": nrm(ks[7], (1, cout)),
        "w2b": nrm(ks[8], (3, 3, cout, cout)), "b2b": nrm(ks[9], (1, cout)),
        "wib": nrm(ks[10], (cmid, cout)), "bib": nrm(ks[11], (1, cout)),
        # outer shortcut 1x1 (cin -> cout, bias=True)
        "ws": nrm(ks[12], (cin, cout)), "bs": nrm(ks[13], (1, cout)),
    }


if __name__ == "__main__":
    N, Cin, Cout, H, W = 2, 4, 8, 16, 16
    Cmid = 128  # skip_blocks hard-codes mid_c = 128

    key = jax.random.PRNGKey(0)
    kx, kp = jax.random.split(key)
    # PyTorch forward takes NCHW; build it that way, then transpose to NHWC.
    x_nchw = jax.random.normal(kx, (N, Cin, H, W), jnp.float32)
    x_nhwc = jnp.transpose(x_nchw, (0, 2, 3, 1))

    params = make_params(kp, Cin, Cmid, Cout)

    out = jax.block_until_ready(skip_blocks_forward(x_nhwc, params))
    ref = jax.block_until_ready(skip_blocks_reference(x_nhwc, params))

    assert out.shape == (N, H, W, Cout), out.shape
    if not jnp.allclose(out, ref, atol=2e-2, rtol=2e-2):
        max_err = float(jnp.max(jnp.abs(out - ref)))
        raise AssertionError(f"Pallas output mismatch vs reference, max|err|={max_err}")

    print("KERNEL_OK")
</pallas_src>

<mosaic_0001>
module attributes {stable_mosaic.version = 11 : i64} {
  func.func @_skip_blocks_kernel(%arg0: i32, %arg1: memref<1x18x18x4xf32, #tpu.memory_space<vmem>>, %arg2: memref<3x3x4x128xf32, #tpu.memory_space<vmem>>, %arg3: memref<1x128xf32, #tpu.memory_space<vmem>>, %arg4: memref<3x3x128x128xf32, #tpu.memory_space<vmem>>, %arg5: memref<1x128xf32, #tpu.memory_space<vmem>>, %arg6: memref<4x128xf32, #tpu.memory_space<vmem>>, %arg7: memref<1x128xf32, #tpu.memory_space<vmem>>, %arg8: memref<3x3x128x128xf32, #tpu.memory_space<vmem>>, %arg9: memref<1x128xf32, #tpu.memory_space<vmem>>, %arg10: memref<3x3x128x128xf32, #tpu.memory_space<vmem>>, %arg11: memref<1x128xf32, #tpu.memory_space<vmem>>, %arg12: memref<128x128xf32, #tpu.memory_space<vmem>>, %arg13: memref<1x128xf32, #tpu.memory_space<vmem>>, %arg14: memref<4x128xf32, #tpu.memory_space<vmem>>, %arg15: memref<1x128xf32, #tpu.memory_space<vmem>>, %arg16: memref<1x16x16x128xf32, #tpu.memory_space<vmem>>, %arg17: memref<18x18x128xf32, #tpu.memory_space<vmem>>) attributes {dimension_semantics = [#tpu.dimension_semantics<parallel>], iteration_bounds = array<i64: 2>, scalar_prefetch = 0 : i64, scratch_operands = 1 : i64, tpu.core_type = #tpu.core_type<tc>, window_params = [{transform_indices = @transform_0, window_bounds = array<i64: 1, 18, 18, 4>}, {pipeline_mode = #tpu.pipeline_mode<synchronous>, transform_indices = @transform_1, window_bounds = array<i64: 3, 3, 4, 128>}, {pipeline_mode = #tpu.pipeline_mode<synchronous>, transform_indices = @transform_2, window_bounds = array<i64: 1, 128>}, {pipeline_mode = #tpu.pipeline_mode<synchronous>, transform_indices = @transform_3, window_bounds = array<i64: 3, 3, 128, 128>}, {pipeline_mode = #tpu.pipeline_mode<synchronous>, transform_indices = @transform_4, window_bounds = array<i64: 1, 128>}, {pipeline_mode = #tpu.pipeline_mode<synchronous>, transform_indices = @transform_5, window_bounds = array<i64: 4, 128>}, {pipeline_mode = #tpu.pipeline_mode<synchronous>, transform_indices = @transform_6, window_bounds = array<i64: 1, 128>}, {pipeline_mode = #tpu.pipeline_mode<synchronous>, transform_indices = @transform_7, window_bounds = array<i64: 3, 3, 128, 128>}, {pipeline_mode = #tpu.pipeline_mode<synchronous>, transform_indices = @transform_8, window_bounds = array<i64: 1, 128>}, {pipeline_mode = #tpu.pipeline_mode<synchronous>, transform_indices = @transform_9, window_bounds = array<i64: 3, 3, 128, 128>}, {pipeline_mode = #tpu.pipeline_mode<synchronous>, transform_indices = @transform_10, window_bounds = array<i64: 1, 128>}, {pipeline_mode = #tpu.pipeline_mode<synchronous>, transform_indices = @transform_11, window_bounds = array<i64: 128, 128>}, {pipeline_mode = #tpu.pipeline_mode<synchronous>, transform_indices = @transform_12, window_bounds = array<i64: 1, 128>}, {pipeline_mode = #tpu.pipeline_mode<synchronous>, transform_indices = @transform_13, window_bounds = array<i64: 4, 128>}, {pipeline_mode = #tpu.pipeline_mode<synchronous>, transform_indices = @transform_14, window_bounds = array<i64: 1, 128>}, {transform_indices = @transform_15, window_bounds = array<i64: 1, 16, 16, 128>}]} {
    %c0 = arith.constant 0 : index
    %c0_0 = arith.constant 0 : index
    %c0_1 = arith.constant 0 : index
    %c0_2 = arith.constant 0 : index
    %0 = vector.load %arg1[%c0, %c0_0, %c0_1, %c0_2] : memref<1x18x18x4xf32, #tpu.memory_space<vmem>>, vector<1x18x18x4xf32>
    %1 = vector.shape_cast %0 : vector<1x18x18x4xf32> to vector<18x18x4xf32>
    %2 = vector.extract_strided_slice %1 {offsets = [1, 1, 0], sizes = [16, 16, 4], strides = [1, 1, 1]} : vector<18x18x4xf32> to vector<16x16x4xf32>
    %3 = vector.shape_cast %2 : vector<16x16x4xf32> to vector<256x4xf32>
    %cst = arith.constant 0.000000e+00 : f32
    %4 = vector.broadcast %cst : f32 to vector<18x18x128xf32>
    %c0_3 = arith.constant 0 : index
    %c0_4 = arith.constant 0 : index
    %c0_5 = arith.constant 0 : index
    %5 = vector.load %arg17[%c0_3, %c0_4, %c0_5] : memref<18x18x128xf32, #tpu.memory_space<vmem>>, vector<18x18x128xf32>
    tpu.vector_store %arg17[%c0_3, %c0_4, %c0_5], %4 {strides = array<i32>} : memref<18x18x128xf32, #tpu.memory_space<vmem>>, vector<18x18x128xf32>,
    %cst_6 = arith.constant 0.000000e+00 : f32
    %6 = vector.broadcast %cst_6 : f32 to vector<256x128xf32>
    %7 = vector.extract_strided_slice %1 {offsets = [0, 0, 0], sizes = [16, 16, 4], strides = [1, 1, 1]} : vector<18x18x4xf32> to vector<16x16x4xf32>
    %8 = vector.shape_cast %7 : vector<16x16x4xf32> to vector<256x4xf32>
    %c0_7 = arith.constant 0 : index
    %c0_8 = arith.constant 0 : index
    %c0_9 = arith.constant 0 : index
    %c0_10 = arith.constant 0 : index
    %9 = vector.load %arg2[%c0_7, %c0_8, %c0_9, %c0_10] : memref<3x3x4x128xf32, #tpu.memory_space<vmem>>, vector<1x1x4x128xf32>
    %10 = vector.shape_cast %9 : vector<1x1x4x128xf32> to vector<4x128xf32>
    %cst_11 = arith.constant dense<0.000000e+00> : vector<256x128xf32>
    %11 = tpu.matmul %8, %10, %cst_11 {dimension_numbers = #tpu.dot_dimension_numbers<[1], [0], [0], [1], [0, 0, 1, 1], [], []>} : vector<256x4xf32>, vector<4x128xf32>, vector<256x128xf32> -> vector<256x128xf32>
    %12 = arith.addf %6, %11 : vector<256x128xf32>
    %13 = vector.extract_strided_slice %1 {offsets = [0, 1, 0], sizes = [16, 16, 4], strides = [1, 1, 1]} : vector<18x18x4xf32> to vector<16x16x4xf32>
    %14 = vector.shape_cast %13 : vector<16x16x4xf32> to vector<256x4xf32>
    %c0_12 = arith.constant 0 : index
    %c1 = arith.constant 1 : index
    %c0_13 = arith.constant 0 : index
    %c0_14 = arith.constant 0 : index
    %15 = vector.load %arg2[%c0_12, %c1, %c0_13, %c0_14] : memref<3x3x4x128xf32, #tpu.memory_space<vmem>>, vector<1x1x4x128xf32>
    %16 = vector.shape_cast %15 : vector<1x1x4x128xf32> to vector<4x128xf32>
    %cst_15 = arith.constant dense<0.000000e+00> : vector<256x128xf32>
    %17 = tpu.matmul %14, %16, %cst_15 {dimension_numbers = #tpu.dot_dimension_numbers<[1], [0], [0], [1], [0, 0, 1, 1], [], []>} : vector<256x4xf32>, vector<4x128xf32>, vector<256x128xf32> -> vector<256x128xf32>
    %18 = arith.addf %12, %17 : vector<256x128xf32>
    %19 = vector.extract_strided_slice %1 {offsets = [0, 2, 0], sizes = [16, 16, 4], strides = [1, 1, 1]} : vector<18x18x4xf32> to vector<16x16x4xf32>
    %20 = vector.shape_cast %19 : vector<16x16x4xf32> to vector<256x4xf32>
    %c0_16 = arith.constant 0 : index
    %c2 = arith.constant 2 : index
    %c0_17 = arith.constant 0 : index
    %c0_18 = arith.constant 0 : index
    %21 = vector.load %arg2[%c0_16, %c2, %c0_17, %c0_18] : memref<3x3x4x128xf32, #tpu.memory_space<vmem>>, vector<1x1x4x128xf32>
    %22 = vector.shape_cast %21 : vector<1x1x4x128xf32> to vector<4x128xf32>
    %cst_19 = arith.constant dense<0.000000e+00> : vector<256x128xf32>
    %23 = tpu.matmul %20, %22, %cst_19 {dimension_numbers = #tpu.dot_dimension_numbers<[1], [0], [0], [1], [0, 0, 1, 1], [], []>} : vector<256x4xf32>, vector<4x128xf32>, vector<256x128xf32> -> vector<256x128xf32>
    %24 = arith.addf %18, %23 : vector<256x128xf32>
    %25 = vector.extract_strided_slice %1 {offsets = [1, 0, 0], sizes = [16, 16, 4], strides = [1, 1, 1]} : vector<18x18x4xf32> to vector<16x16x4xf32>
    %26 = vector.shape_cast %25 : vector<16x16x4xf32> to vector<256x4xf32>
    %c1_20 = arith.constant 1 : index
    %c0_21 = arith.constant 0 : index
    %c0_22 = arith.constant 0 : index
    %c0_23 = arith.constant 0 : index
    %27 = vector.load %arg2[%c1_20, %c0_21, %c0_22, %c0_23] : memref<3x3x4x128xf32, #tpu.memory_space<vmem>>, vector<1x1x4x128xf32>
    %28 = vector.shape_cast %27 : vector<1x1x4x128xf32> to vector<4x128xf32>
    %cst_24 = arith.constant dense<0.000000e+00> : vector<256x128xf32>
    %29 = tpu.matmul %26, %28, %cst_24 {dimension_numbers = #tpu.dot_dimension_numbers<[1], [0], [0], [1], [0, 0, 1, 1], [], []>} : vector<256x4xf32>, vector<4x128xf32>, vector<256x128xf32> -> vector<256x128xf32>
    %30 = arith.addf %24, %29 : vector<256x128xf32>
    %31 = vector.extract_strided_slice %1 {offsets = [1, 1, 0], sizes = [16, 16, 4], strides = [1, 1, 1]} : vector<18x18x4xf32> to vector<16x16x4xf32>
    %32 = vector.shape_cast %31 : vector<16x16x4xf32> to vector<256x4xf32>
    %c1_25 = arith.constant 1 : index
    %c1_26 = arith.constant 1 : index
    %c0_27 = arith.constant 0 : index
    %c0_28 = arith.constant 0 : index
    %33 = vector.load %arg2[%c1_25, %c1_26, %c0_27, %c0_28] : memref<3x3x4x128xf32, #tpu.memory_space<vmem>>, vector<1x1x4x128xf32>
    %34 = vector.shape_cast %33 : vector<1x1x4x128xf32> to vector<4x128xf32>
    %cst_29 = arith.constant dense<0.000000e+00> : vector<256x128xf32>
    %35 = tpu.matmul %32, %34, %cst_29 {dimension_numbers = #tpu.dot_dimension_numbers<[1], [0], [0], [1], [0, 0, 1, 1], [], []>} : vector<256x4xf32>, vector<4x128xf32>, vector<256x128xf32> -> vector<256x128xf32>
    %36 = arith.addf %30, %35 : vector<256x128xf32>
    %37 = vector.extract_strided_slice %1 {offsets = [1, 2, 0], sizes = [16, 16, 4], strides = [1, 1, 1]} : vector<18x18x4xf32> to vector<16x16x4xf32>
    %38 = vector.shape_cast %37 : vector<16x16x4xf32> to vector<256x4xf32>
    %c1_30 = arith.constant 1 : index
    %c2_31 = arith.constant 2 : index
    %c0_32 = arith.constant 0 : index
    %c0_33 = arith.constant 0 : index
    %39 = vector.load %arg2[%c1_30, %c2_31, %c0_32, %c0_33] : memref<3x3x4x128xf32, #tpu.memory_space<vmem>>, vector<1x1x4x128xf32>
    %40 = vector.shape_cast %39 : vector<1x1x4x128xf32> to vector<4x128xf32>
    %cst_34 = arith.constant dense<0.000000e+00> : vector<256x128xf32>
    %41 = tpu.matmul %38, %40, %cst_34 {dimension_numbers = #tpu.dot_dimension_numbers<[1], [0], [0], [1], [0, 0, 1, 1], [], []>} : vector<256x4xf32>, vector<4x128xf32>, vector<256x128xf32> -> vector<256x128xf32>
    %42 = arith.addf %36, %41 : vector<256x128xf32>
    %43 = vector.extract_strided_slice %1 {offsets = [2, 0, 0], sizes = [16, 16, 4], strides = [1, 1, 1]} : vector<18x18x4xf32> to vector<16x16x4xf32>
    %44 = vector.shape_cast %43 : vector<16x16x4xf32> to vector<256x4xf32>
    %c2_35 = arith.constant 2 : index
    %c0_36 = arith.constant 0 : index
    %c0_37 = arith.constant 0 : index
    %c0_38 = arith.constant 0 : index
    %45 = vector.load %arg2[%c2_35, %c0_36, %c0_37, %c0_38] : memref<3x3x4x128xf32, #tpu.memory_space<vmem>>, vector<1x1x4x128xf32>
    %46 = vector.shape_cast %45 : vector<1x1x4x128xf32> to vector<4x128xf32>
    %cst_39 = arith.constant dense<0.000000e+00> : vector<256x128xf32>
    %47 = tpu.matmul %44, %46, %cst_39 {dimension_numbers = #tpu.dot_dimension_numbers<[1], [0], [0], [1], [0, 0, 1, 1], [], []>} : vector<256x4xf32>, vector<4x128xf32>, vector<256x128xf32> -> vector<256x128xf32>
    %48 = arith.addf %42, %47 : vector<256x128xf32>
    %49 = vector.extract_strided_slice %1 {offsets = [2, 1, 0], sizes = [16, 16, 4], strides = [1, 1, 1]} : vector<18x18x4xf32> to vector<16x16x4xf32>
    %50 = vector.shape_cast %49 : vector<16x16x4xf32> to vector<256x4xf32>
    %c2_40 = arith.constant 2 : index
    %c1_41 = arith.constant 1 : index
    %c0_42 = arith.constant 0 : index
    %c0_43 = arith.constant 0 : index
    %51 = vector.load %arg2[%c2_40, %c1_41, %c0_42, %c0_43] : memref<3x3x4x128xf32, #tpu.memory_space<vmem>>, vector<1x1x4x128xf32>
    %52 = vector.shape_cast %51 : vector<1x1x4x128xf32> to vector<4x128xf32>
    %cst_44 = arith.constant dense<0.000000e+00> : vector<256x128xf32>
    %53 = tpu.matmul %50, %52, %cst_44 {dimension_numbers = #tpu.dot_dimension_numbers<[1], [0], [0], [1], [0, 0, 1, 1], [], []>} : vector<256x4xf32>, vector<4x128xf32>, vector<256x128xf32> -> vector<256x128xf32>
    %54 = arith.addf %48, %53 : vector<256x128xf32>
    %55 = vector.extract_strided_slice %1 {offsets = [2, 2, 0], sizes = [16, 16, 4], strides = [1, 1, 1]} : vector<18x18x4xf32> to vector<16x16x4xf32>
    %56 = vector.shape_cast %55 : vector<16x16x4xf32> to vector<256x4xf32>
    %c2_45 = arith.constant 2 : index
    %c2_46 = arith.constant 2 : index
    %c0_47 = arith.constant 0 : index
    %c0_48 = arith.constant 0 : index
    %57 = vector.load %arg2[%c2_45, %c2_46, %c0_47, %c0_48] : memref<3x3x4x128xf32, #tpu.memory_space<vmem>>, vector<1x1x4x128xf32>
    %58 = vector.shape_cast %57 : vector<1x1x4x128xf32> to vector<4x128xf32>
    %cst_49 = arith.constant dense<0.000000e+00> : vector<256x128xf32>
    %59 = tpu.matmul %56, %58, %cst_49 {dimension_numbers = #tpu.dot_dimension_numbers<[1], [0], [0], [1], [0, 0, 1, 1], [], []>} : vector<256x4xf32>, vector<4x128xf32>, vector<256x128xf32> -> vector<256x128xf32>
    %60 = arith.addf %54, %59 : vector<256x128xf32>
    %c0_50 = arith.constant 0 : index
    %c0_51 = arith.constant 0 : index
    %61 = vector.load %arg3[%c0_50, %c0_51] : memref<1x128xf32, #tpu.memory_space<vmem>>, vector<1x128xf32>
    %62 = vector.broadcast %61 : vector<1x128xf32> to vector<256x128xf32>
    %63 = arith.addf %60, %62 : vector<256x128xf32>
    %cst_52 = arith.constant 0.000000e+00 : f32
    %64 = vector.broadcast %cst_52 : f32 to vector<256x128xf32>
    %65 = arith.cmpf oge, %63, %64 : vector<256x128xf32>
    %cst_53 = arith.constant 2.000000e-01 : f32
    %66 = vector.broadcast %cst_53 : f32 to vector<256x128xf32>
    %67 = arith.mulf %66, %63 : vector<256x128xf32>
    %68 = arith.select %65, %63, %67 : vector<256x128xi1>, vector<256x128xf32>
    %69 = vector.shape_cast %68 : vector<256x128xf32> to vector<16x16x128xf32>
    %c1_54 = arith.constant 1 : index
    %c1_55 = arith.constant 1 : index
    %c0_56 = arith.constant 0 : index
    %70 = vector.load %arg17[%c1_54, %c1_55, %c0_56] : memref<18x18x128xf32, #tpu.memory_space<vmem>>, vector<16x16x128xf32>
    tpu.vector_store %arg17[%c1_54, %c1_55, %c0_56], %69 {strides = array<i32>} : memref<18x18x128xf32, #tpu.memory_space<vmem>>, vector<16x16x128xf32>,
    %cst_57 = arith.constant 0.000000e+00 : f32
    %71 = vector.broadcast %cst_57 : f32 to vector<256x128xf32>
    %c0_58 = arith.constant 0 : index
    %c0_59 = arith.constant 0 : index
    %c0_60 = arith.constant 0 : index
    %72 = vector.load %arg17[%c0_58, %c0_59, %c0_60] : memref<18x18x128xf32, #tpu.memory_space<vmem>>, vector<16x16x128xf32>
    %73 = vector.shape_cast %72 : vector<16x16x128xf32> to vector<256x128xf32>
    %c0_61 = arith.constant 0 : index
    %c0_62 = arith.constant 0 : index
    %c0_63 = arith.constant 0 : index
    %c0_64 = arith.constant 0 : index
    %74 = vector.load %arg4[%c0_61, %c0_62, %c0_63, %c0_64] : memref<3x3x128x128xf32, #tpu.memory_space<vmem>>, vector<1x1x128x128xf32>
    %75 = vector.shape_cast %74 : vector<1x1x128x128xf32> to vector<128x128xf32>
    %cst_65 = arith.constant dense<0.000000e+00> : vector<256x128xf32>
    %76 = tpu.matmul %73, %75, %cst_65 {dimension_numbers = #tpu.dot_dimension_numbers<[1], [0], [0], [1], [0, 0, 1, 1], [], []>} : vector<256x128xf32>, vector<128x128xf32>, vector<256x128xf32> -> vector<256x128xf32>
    %77 = arith.addf %71, %76 : vector<256x128xf32>
    %c0_66 = arith.constant 0 : index
    %c1_67 = arith.constant 1 : index
    %c0_68 = arith.constant 0 : index
    %78 = vector.load %arg17[%c0_66, %c1_67, %c0_68] : memref<18x18x128xf32, #tpu.memory_space<vmem>>, vector<16x16x128xf32>
    %79 = vector.shape_cast %78 : vector<16x16x128xf32> to vector<256x128xf32>
    %c0_69 = arith.constant 0 : index
    %c1_70 = arith.constant 1 : index
    %c0_71 = arith.constant 0 : index
    %c0_72 = arith.constant 0 : index
    %80 = vector.load %arg4[%c0_69, %c1_70, %c0_71, %c0_72] : memref<3x3x128x128xf32, #tpu.memory_space<vmem>>, vector<1x1x128x128xf32>
    %81 = vector.shape_cast %80 : vector<1x1x128x128xf32> to vector<128x128xf32>
    %cst_73 = arith.constant dense<0.000000e+00> : vector<256x128xf32>
    %82 = tpu.matmul %79, %81, %cst_73 {dimension_numbers = #tpu.dot_dimension_numbers<[1], [0], [0], [1], [0, 0, 1, 1], [], []>} : vector<256x128xf32>, vector<128x128xf32>, vector<256x128xf32> -> vector<256x128xf32>
    %83 = arith.addf %77, %82 : vector<256x128xf32>
    %c0_74 = arith.constant 0 : index
    %c2_75 = arith.constant 2 : index
    %c0_76 = arith.constant 0 : index
    %84 = vector.load %arg17[%c0_74, %c2_75, %c0_76] : memref<18x18x128xf32, #tpu.memory_space<vmem>>, vector<16x16x128xf32>
    %85 = vector.shape_cast %84 : vector<16x16x128xf32> to vector<256x128xf32>
    %c0_77 = arith.constant 0 : index
    %c2_78 = arith.constant 2 : index
    %c0_79 = arith.constant 0 : index
    %c0_80 = arith.constant 0 : index
    %86 = vector.load %arg4[%c0_77, %c2_78, %c0_79, %c0_80] : memref<3x3x128x128xf32, #tpu.memory_space<vmem>>, vector<1x1x128x128xf32>
    %87 = vector.shape_cast %86 : vector<1x1x128x128xf32> to vector<128x128xf32>
    %cst_81 = arith.constant dense<0.000000e+00> : vector<256x128xf32>
    %88 = tpu.matmul %85, %87, %cst_81 {dimension_numbers = #tpu.dot_dimension_numbers<[1], [0], [0], [1], [0, 0, 1, 1], [], []>} : vector<256x128xf32>, vector<128x128xf32>, vector<256x128xf32> -> vector<256x128xf32>
    %89 = arith.addf %83, %88 : vector<256x128xf32>
    %c1_82 = arith.constant 1 : index
    %c0_83 = arith.constant 0 : index
    %c0_84 = arith.constant 0 : index
    %90 = vector.load %arg17[%c1_82, %c0_83, %c0_84] : memref<18x18x128xf32, #tpu.memory_space<vmem>>, vector<16x16x128xf32>
    %91 = vector.shape_cast %90 : vector<16x16x128xf32> to vector<256x128xf32>
    %c1_85 = arith.constant 1 : index
    %c0_86 = arith.constant 0 : index
    %c0_87 = arith.constant 0 : index
    %c0_88 = arith.constant 0 : index
    %92 = vector.load %arg4[%c1_85, %c0_86, %c0_87, %c0_88] : memref<3x3x128x128xf32, #tpu.memory_space<vmem>>, vector<1x1x128x128xf32>
    %93 = vector.shape_cast %92 : vector<1x1x128x128xf32> to vector<128x128xf32>
    %cst_89 = arith.constant dense<0.000000e+00> : vector<256x128xf32>
    %94 = tpu.matmul %91, %93, %cst_89 {dimension_numbers = #tpu.dot_dimension_numbers<[1], [0], [0], [1], [0, 0, 1, 1], [], []>} : vector<256x128xf32>, vector<128x128xf32>, vector<256x128xf32> -> vector<256x128xf32>
    %95 = arith.addf %89, %94 : vector<256x128xf32>
    %c1_90 = arith.constant 1 : index
    %c1_91 = arith.constant 1 : index
    %c0_92 = arith.constant 0 : index
    %96 = vector.load %arg17[%c1_90, %c1_91, %c0_92] : memref<18x18x128xf32, #tpu.memory_space<vmem>>, vector<16x16x128xf32>
    %97 = vector.shape_cast %96 : vector<16x16x128xf32> to vector<256x128xf32>
    %c1_93 = arith.constant 1 : index
    %c1_94 = arith.constant 1 : index
    %c0_95 = arith.constant 0 : index
    %c0_96 = arith.constant 0 : index
    %98 = vector.load %arg4[%c1_93, %c1_94, %c0_95, %c0_96] : memref<3x3x128x128xf32, #tpu.memory_space<vmem>>, vector<1x1x128x128xf32>
    %99 = vector.shape_cast %98 : vector<1x1x128x128xf32> to vector<128x128xf32>
    %cst_97 = arith.constant dense<0.000000e+00> : vector<256x128xf32>
    %100 = tpu.matmul %97, %99, %cst_97 {dimension_numbers = #tpu.dot_dimension_numbers<[1], [0], [0], [1], [0, 0, 1, 1], [], []>} : vector<256x128xf32>, vector<128x128xf32>, vector<256x128xf32> -> vector<256x128xf32>
    %101 = arith.addf %95, %100 : vector<256x128xf32>
    %c1_98 = arith.constant 1 : index
    %c2_99 = arith.constant 2 : index
    %c0_100 = arith.constant 0 : index
    %102 = vector.load %arg17[%c1_98, %c2_99, %c0_100] : memref<18x18x128xf32, #tpu.memory_space<vmem>>, vector<16x16x128xf32>
    %103 = vector.shape_cast %102 : vector<16x16x128xf32> to vector<256x128xf32>
    %c1_101 = arith.constant 1 : index
    %c2_102 = arith.constant 2 : index
    %c0_103 = arith.constant 0 : index
    %c0_104 = arith.constant 0 : index
    %104 = vector.load %arg4[%c1_101, %c2_102, %c0_103, %c0_104] : memref<3x3x128x128xf32, #tpu.memory_space<vmem>>, vector<1x1x128x128xf32>
    %105 = vector.shape_cast %104 : vector<1x1x128x128xf32> to vector<128x128xf32>
    %cst_105 = arith.constant dense<0.000000e+00> : vector<256x128xf32>
    %106 = tpu.matmul %103, %105, %cst_105 {dimension_numbers = #tpu.dot_dimension_numbers<[1], [0], [0], [1], [0, 0, 1, 1], [], []>} : vector<256x128xf32>, vector<128x128xf32>, vector<256x128xf32> -> vector<256x128xf32>
    %107 = arith.addf %101, %106 : vector<256x128xf32>
    %c2_106 = arith.constant 2 : index
    %c0_107 = arith.constant 0 : index
    %c0_108 = arith.constant 0 : index
    %108 = vector.load %arg17[%c2_106, %c0_107, %c0_108] : memref<18x18x128xf32, #tpu.memory_space<vmem>>, vector<16x16x128xf32>
    %109 = vector.shape_cast %108 : vector<16x16x128xf32> to vector<256x128xf32>
    %c2_109 = arith.constant 2 : index
    %c0_110 = arith.constant 0 : index
    %c0_111 = arith.constant 0 : index
    %c0_112 = arith.constant 0 : index
    %110 = vector.load %arg4[%c2_109, %c0_110, %c0_111, %c0_112] : memref<3x3x128x128xf32, #tpu.memory_space<vmem>>, vector<1x1x128x128xf32>
    %111 = vector.shape_cast %110 : vector<1x1x128x128xf32> to vector<128x128xf32>
    %cst_113 = arith.constant dense<0.000000e+00> : vector<256x128xf32>
    %112 = tpu.matmul %109, %111, %cst_113 {dimension_numbers = #tpu.dot_dimension_numbers<[1], [0], [0], [1], [0, 0, 1, 1], [], []>} : vector<256x128xf32>, vector<128x128xf32>, vector<256x128xf32> -> vector<256x128xf32>
    %113 = arith.addf %107, %112 : vector<256x128xf32>
    %c2_114 = arith.constant 2 : index
    %c1_115 = arith.constant 1 : index
    %c0_116 = arith.constant 0 : index
    %114 = vector.load %arg17[%c2_114, %c1_115, %c0_116] : memref<18x18x128xf32, #tpu.memory_space<vmem>>, vector<16x16x128xf32>
    %115 = vector.shape_cast %114 : vector<16x16x128xf32> to vector<256x128xf32>
    %c2_117 = arith.constant 2 : index
    %c1_118 = arith.constant 1 : index
    %c0_119 = arith.constant 0 : index
    %c0_120 = arith.constant 0 : index
    %116 = vector.load %arg4[%c2_117, %c1_118, %c0_119, %c0_120] : memref<3x3x128x128xf32, #tpu.memory_space<vmem>>, vector<1x1x128x128xf32>
    %117 = vector.shape_cast %116 : vector<1x1x128x128xf32> to vector<128x128xf32>
    %cst_121 = arith.constant dense<0.000000e+00> : vector<256x128xf32>
    %118 = tpu.matmul %115, %117, %cst_121 {dimension_numbers = #tpu.dot_dimension_numbers<[1], [0], [0], [1], [0, 0, 1, 1], [], []>} : vector<256x128xf32>, vector<128x128xf32>, vector<256x128xf32> -> vector<256x128xf32>
    %119 = arith.addf %113, %118 : vector<256x128xf32>
    %c2_122 = arith.constant 2 : index
    %c2_123 = arith.constant 2 : index
    %c0_124 = arith.constant 0 : index
    %120 = vector.load %arg17[%c2_122, %c2_123, %c0_124] : memref<18x18x128xf32, #tpu.memory_space<vmem>>, vector<16x16x128xf32>
    %121 = vector.shape_cast %120 : vector<16x16x128xf32> to vector<256x128xf32>
    %c2_125 = arith.constant 2 : index
    %c2_126 = arith.constant 2 : index
    %c0_127 = arith.constant 0 : index
    %c0_128 = arith.constant 0 : index
    %122 = vector.load %arg4[%c2_125, %c2_126, %c0_127, %c0_128] : memref<3x3x128x128xf32, #tpu.memory_space<vmem>>, vector<1x1x128x128xf32>
    %123 = vector.shape_cast %122 : vector<1x1x128x128xf32> to vector<128x128xf32>
    %cst_129 = arith.constant dense<0.000000e+00> : vector<256x128xf32>
    %124 = tpu.matmul %121, %123, %cst_129 {dimension_numbers = #tpu.dot_dimension_numbers<[1], [0], [0], [1], [0, 0, 1, 1], [], []>} : vector<256x128xf32>, vector<128x128xf32>, vector<256x128xf32> -> vector<256x128xf32>
    %125 = arith.addf %119, %124 : vector<256x128xf32>
    %c0_130 = arith.constant 0 : index
    %c0_131 = arith.constant 0 : index
    %126 = vector.load %arg5[%c0_130, %c0_131] : memref<1x128xf32, #tpu.memory_space<vmem>>, vector<1x128xf32>
    %127 = vector.broadcast %126 : vector<1x128xf32> to vector<256x128xf32>
    %128 = arith.addf %125, %127 : vector<256x128xf32>
    %cst_132 = arith.constant 0.000000e+00 : f32
    %129 = vector.broadcast %cst_132 : f32 to vector<256x128xf32>
    %130 = arith.cmpf oge, %128, %129 : vector<256x128xf32>
    %cst_133 = arith.constant 2.000000e-01 : f32
    %131 = vector.broadcast %cst_133 : f32 to vector<256x128xf32>
    %132 = arith.mulf %131, %128 : vector<256x128xf32>
    %133 = arith.select %130, %128, %132 : vector<256x128xi1>, vector<256x128xf32>
    %c0_134 = arith.constant 0 : index
    %c0_135 = arith.constant 0 : index
    %134 = vector.load %arg6[%c0_134, %c0_135] : memref<4x128xf32, #tpu.memory_space<vmem>>, vector<4x128xf32>
    %cst_136 = arith.constant dense<0.000000e+00> : vector<256x128xf32>
    %135 = tpu.matmul %3, %134, %cst_136 {dimension_numbers = #tpu.dot_dimension_numbers<[1], [0], [0], [1], [0, 0, 1, 1], [], []>} : vector<256x4xf32>, vector<4x128xf32>, vector<256x128xf32> -> vector<256x128xf32>
    %136 = arith.addf %133, %135 : vector<256x128xf32>
    %c0_137 = arith.constant 0 : index
    %c0_138 = arith.constant 0 : index
    %137 = vector.load %arg7[%c0_137, %c0_138] : memref<1x128xf32, #tpu.memory_space<vmem>>, vector<1x128xf32>
    %138 = vector.broadcast %137 : vector<1x128xf32> to vector<256x128xf32>
    %139 = arith.addf %136, %138 : vector<256x128xf32>
    %140 = vector.shape_cast %139 : vector<256x128xf32> to vector<16x16x128xf32>
    %c1_139 = arith.constant 1 : index
    %c1_140 = arith.constant 1 : index
    %c0_141 = arith.constant 0 : index
    %141 = vector.load %arg17[%c1_139, %c1_140, %c0_141] : memref<18x18x128xf32, #tpu.memory_space<vmem>>, vector<16x16x128xf32>
    tpu.vector_store %arg17[%c1_139, %c1_140, %c0_141], %140 {strides = array<i32>} : memref<18x18x128xf32, #tpu.memory_space<vmem>>, vector<16x16x128xf32>,
    %cst_142 = arith.constant 0.000000e+00 : f32
    %142 = vector.broadcast %cst_142 : f32 to vector<256x128xf32>
    %c0_143 = arith.constant 0 : index
    %c0_144 = arith.constant 0 : index
    %c0_145 = arith.constant 0 : index
    %143 = vector.load %arg17[%c0_143, %c0_144, %c0_145] : memref<18x18x128xf32, #tpu.memory_space<vmem>>, vector<16x16x128xf32>
    %144 = vector.shape_cast %143 : vector<16x16x128xf32> to vector<256x128xf32>
    %c0_146 = arith.constant 0 : index
    %c0_147 = arith.constant 0 : index
    %c0_148 = arith.constant 0 : index
    %c0_149 = arith.constant 0 : index
    %145 = vector.load %arg8[%c0_146, %c0_147, %c0_148, %c0_149] : memref<3x3x128x128xf32, #tpu.memory_space<vmem>>, vector<1x1x128x128xf32>
    %146 = vector.shape_cast %145 : vector<1x1x128x128xf32> to vector<128x128xf32>
    %cst_150 = arith.constant dense<0.000000e+00> : vector<256x128xf32>
    %147 = tpu.matmul %144, %146, %cst_150 {dimension_numbers = #tpu.dot_dimension_numbers<[1], [0], [0], [1], [0, 0, 1, 1], [], []>} : vector<256x128xf32>, vector<128x128xf32>, vector<256x128xf32> -> vector<256x128xf32>
    %148 = arith.addf %142, %147 : vector<256x128xf32>
    %c0_151 = arith.constant 0 : index
    %c1_152 = arith.constant 1 : index
    %c0_153 = arith.constant 0 : index
    %149 = vector.load %arg17[%c0_151, %c1_152, %c0_153] : memref<18x18x128xf32, #tpu.memory_space<vmem>>, vector<16x16x128xf32>
    %150 = vector.shape_cast %149 : vector<16x16x128xf32> to vector<256x128xf32>
    %c0_154 = arith.constant 0 : index
    %c1_155 = arith.constant 1 : index
    %c0_156 = arith.constant 0 : index
    %c0_157 = arith.constant 0 : index
    %151 = vector.load %arg8[%c0_154, %c1_155, %c0_156, %c0_157] : memref<3x3x128x128xf32, #tpu.memory_space<vmem>>, vector<1x1x128x128xf32>
    %152 = vector.shape_cast %151 : vector<1x1x128x128xf32> to vector<128x128xf32>
    %cst_158 = arith.constant dense<0.000000e+00> : vector<256x128xf32>
    %153 = tpu.matmul %150, %152, %cst_158 {dimension_numbers = #tpu.dot_dimension_numbers<[1], [0], [0], [1], [0, 0, 1, 1], [], []>} : vector<256x128xf32>, vector<128x128xf32>, vector<256x128xf32> -> vector<256x128xf32>
    %154 = arith.addf %148, %153 : vector<256x128xf32>
    %c0_159 = arith.constant 0 : index
    %c2_160 = arith.constant 2 : index
    %c0_161 = arith.constant 0 : index
    %155 = vector.load %arg17[%c0_159, %c2_160, %c0_161] : memref<18x18x128xf32, #tpu.memory_space<vmem>>, vector<16x16x128xf32>
    %156 = vector.shape_cast %155 : vector<16x16x128xf32> to vector<256x128xf32>
    %c0_162 = arith.constant 0 : index
    %c2_163 = arith.constant 2 : index
    %c0_164 = arith.constant 0 : index
    %c0_165 = arith.constant 0 : index
    %157 = vector.load %arg8[%c0_162, %c2_163, %c0_164, %c0_165] : memref<3x3x128x128xf32, #tpu.memory_space<vmem>>, vector<1x1x128x128xf32>
    %158 = vector.shape_cast %157 : vector<1x1x128x128xf32> to vector<128x128xf32>
    %cst_166 = arith.constant dense<0.000000e+00> : vector<256x128xf32>
    %159 = tpu.matmul %156, %158, %cst_166 {dimension_numbers = #tpu.dot_dimension_numbers<[1], [0], [0], [1], [0, 0, 1, 1], [], []>} : vector<256x128xf32>, vector<128x128xf32>, vector<256x128xf32> -> vector<256x128xf32>
    %160 = arith.addf %154, %159 : vector<256x128xf32>
    %c1_167 = arith.constant 1 : index
    %c0_168 = arith.constant 0 : index
    %c0_169 = arith.constant 0 : index
    %161 = vector.load %arg17[%c1_167, %c0_168, %c0_169] : memref<18x18x128xf32, #tpu.memory_space<vmem>>, vector<16x16x128xf32>
    %162 = vector.shape_cast %161 : vector<16x16x128xf32> to vector<256x128xf32>
    %c1_170 = arith.constant 1 : index
    %c0_171 = arith.constant 0 : index
    %c0_172 = arith.constant 0 : index
    %c0_173 = arith.constant 0 : index
    %163 = vector.load %arg8[%c1_170, %c0_171, %c0_172, %c0_173] : memref<3x3x128x128xf32, #tpu.memory_space<vmem>>, vector<1x1x128x128xf32>
    %164 = vector.shape_cast %163 : vector<1x1x128x128xf32> to vector<128x128xf32>
    %cst_174 = arith.constant dense<0.000000e+00> : vector<256x128xf32>
    %165 = tpu.matmul %162, %164, %cst_174 {dimension_numbers = #tpu.dot_dimension_numbers<[1], [0], [0], [1], [0, 0, 1, 1], [], []>} : vector<256x128xf32>, vector<128x128xf32>, vector<256x128xf32> -> vector<256x128xf32>
    %166 = arith.addf %160, %165 : vector<256x128xf32>
    %c1_175 = arith.constant 1 : index
    %c1_176 = arith.constant 1 : index
    %c0_177 = arith.constant 0 : index
    %167 = vector.load %arg17[%c1_175, %c1_176, %c0_177] : memref<18x18x128xf32, #tpu.memory_space<vmem>>, vector<16x16x128xf32>
    %168 = vector.shape_cast %167 : vector<16x16x128xf32> to vector<256x128xf32>
    %c1_178 = arith.constant 1 : index
    %c1_179 = arith.constant 1 : index
    %c0_180 = arith.constant 0 : index
    %c0_181 = arith.constant 0 : index
    %169 = vector.load %arg8[%c1_178, %c1_179, %c0_180, %c0_181] : memref<3x3x128x128xf32, #tpu.memory_space<vmem>>, vector<1x1x128x128xf32>
    %170 = vector.shape_cast %169 : vector<1x1x128x128xf32> to vector<128x128xf32>
    %cst_182 = arith.constant dense<0.000000e+00> : vector<256x128xf32>
    %171 = tpu.matmul %168, %170, %cst_182 {dimension_numbers = #tpu.dot_dimension_numbers<[1], [0], [0], [1], [0, 0, 1, 1], [], []>} : vector<256x128xf32>, vector<128x128xf32>, vector<256x128xf32> -> vector<256x128xf32>
    %172 = arith.addf %166, %171 : vector<256x128xf32>
    %c1_183 = arith.constant 1 : index
    %c2_184 = arith.constant 2 : index
    %c0_185 = arith.constant 0 : index
    %173 = vector.load %arg17[%c1_183, %c2_184, %c0_185] : memref<18x18x128xf32, #tpu.memory_space<vmem>>, vector<16x16x128xf32>
    %174 = vector.shape_cast %173 : vector<16x16x128xf32> to vector<256x128xf32>
    %c1_186 = arith.constant 1 : index
    %c2_187 = arith.constant 2 : index
    %c0_188 = arith.constant 0 : index
    %c0_189 = arith.constant 0 : index
    %175 = vector.load %arg8[%c1_186, %c2_187, %c0_188, %c0_189] : memref<3x3x128x128xf32, #tpu.memory_space<vmem>>, vector<1x1x128x128xf32>
    %176 = vector.shape_cast %175 : vector<1x1x128x128xf32> to vector<128x128xf32>
    %cst_190 = arith.constant dense<0.000000e+00> : vector<256x128xf32>
    %177 = tpu.matmul %174, %176, %cst_190 {dimension_numbers = #tpu.dot_dimension_numbers<[1], [0], [0], [1], [0, 0, 1, 1], [], []>} : vector<256x128xf32>, vector<128x128xf32>, vector<256x128xf32> -> vector<256x128xf32>
    %178 = arith.addf %172, %177 : vector<256x128xf32>
    %c2_191 = arith.constant 2 : index
    %c0_192 = arith.constant 0 : index
    %c0_193 = arith.constant 0 : index
    %179 = vector.load %arg17[%c2_191, %c0_192, %c0_193] : memref<18x18x128xf32, #tpu.memory_space<vmem>>, vector<16x16x128xf32>
    %180 = vector.shape_cast %179 : vector<16x16x128xf32> to vector<256x128xf32>
    %c2_194 = arith.constant 2 : index
    %c0_195 = arith.constant 0 : index
    %c0_196 = arith.constant 0 : index
    %c0_197 = arith.constant 0 : index
    %181 = vector.load %arg8[%c2_194, %c0_195, %c0_196, %c0_197] : memref<3x3x128x128xf32, #tpu.memory_space<vmem>>, vector<1x1x128x128xf32>
    %182 = vector.shape_cast %181 : vector<1x1x128x128xf32> to vector<128x128xf32>
    %cst_198 = arith.constant dense<0.000000e+00> : vector<256x128xf32>
    %183 = tpu.matmul %180, %182, %cst_198 {dimension_numbers = #tpu.dot_dimension_numbers<[1], [0], [0], [1], [0, 0, 1, 1], [], []>} : vector<256x128xf32>, vector<128x128xf32>, vector<256x128xf32> -> vector<256x128xf32>
    %184 = arith.addf %178, %183 : vector<256x128xf32>
    %c2_199 = arith.constant 2 : index
    %c1_200 = arith.constant 1 : index
    %c0_201 = arith.constant 0 : index
    %185 = vector.load %arg17[%c2_199, %c1_200, %c0_201] : memref<18x18x128xf32, #tpu.memory_space<vmem>>, vector<16x16x128xf32>
    %186 = vector.shape_cast %185 : vector<16x16x128xf32> to vector<256x128xf32>
    %c2_202 = arith.constant 2 : index
    %c1_203 = arith.constant 1 : index
    %c0_204 = arith.constant 0 : index
    %c0_205 = arith.constant 0 : index
    %187 = vector.load %arg8[%c2_202, %c1_203, %c0_204, %c0_205] : memref<3x3x128x128xf32, #tpu.memory_space<vmem>>, vector<1x1x128x128xf32>
    %188 = vector.shape_cast %187 : vector<1x1x128x128xf32> to vector<128x128xf32>
    %cst_206 = arith.constant dense<0.000000e+00> : vector<256x128xf32>
    %189 = tpu.matmul %186, %188, %cst_206 {dimension_numbers = #tpu.dot_dimension_numbers<[1], [0], [0], [1], [0, 0, 1, 1], [], []>} : vector<256x128xf32>, vector<128x128xf32>, vector<256x128xf32> -> vector<256x128xf32>
    %190 = arith.addf %184, %189 : vector<256x128xf32>
    %c2_207 = arith.constant 2 : index
    %c2_208 = arith.constant 2 : index
    %c0_209 = arith.constant 0 : index
    %191 = vector.load %arg17[%c2_207, %c2_208, %c0_209] : memref<18x18x128xf32, #tpu.memory_space<vmem>>, vector<16x16x128xf32>
    %192 = vector.shape_cast %191 : vector<16x16x128xf32> to vector<256x128xf32>
    %c2_210 = arith.constant 2 : index
    %c2_211 = arith.constant 2 : index
    %c0_212 = arith.constant 0 : index
    %c0_213 = arith.constant 0 : index
    %193 = vector.load %arg8[%c2_210, %c2_211, %c0_212, %c0_213] : memref<3x3x128x128xf32, #tpu.memory_space<vmem>>, vector<1x1x128x128xf32>
    %194 = vector.shape_cast %193 : vector<1x1x128x128xf32> to vector<128x128xf32>
    %cst_214 = arith.constant dense<0.000000e+00> : vector<256x128xf32>
    %195 = tpu.matmul %192, %194, %cst_214 {dimension_numbers = #tpu.dot_dimension_numbers<[1], [0], [0], [1], [0, 0, 1, 1], [], []>} : vector<256x128xf32>, vector<128x128xf32>, vector<256x128xf32> -> vector<256x128xf32>
    %196 = arith.addf %190, %195 : vector<256x128xf32>
    %c0_215 = arith.constant 0 : index
    %c0_216 = arith.constant 0 : index
    %197 = vector.load %arg9[%c0_215, %c0_216] : memref<1x128xf32, #tpu.memory_space<vmem>>, vector<1x128xf32>
    %198 = vector.broadcast %197 : vector<1x128xf32> to vector<256x128xf32>
    %199 = arith.addf %196, %198 : vector<256x128xf32>
    %cst_217 = arith.constant 0.000000e+00 : f32
    %200 = vector.broadcast %cst_217 : f32 to vector<256x128xf32>
    %201 = arith.cmpf oge, %199, %200 : vector<256x128xf32>
    %cst_218 = arith.constant 2.000000e-01 : f32
    %202 = vector.broadcast %cst_218 : f32 to vector<256x128xf32>
    %203 = arith.mulf %202, %199 : vector<256x128xf32>
    %204 = arith.select %201, %199, %203 : vector<256x128xi1>, vector<256x128xf32>
    %205 = vector.shape_cast %204 : vector<256x128xf32> to vector<16x16x128xf32>
    %c1_219 = arith.constant 1 : index
    %c1_220 = arith.constant 1 : index
    %c0_221 = arith.constant 0 : index
    %206 = vector.load %arg17[%c1_219, %c1_220, %c0_221] : memref<18x18x128xf32, #tpu.memory_space<vmem>>, vector<16x16x128xf32>
    tpu.vector_store %arg17[%c1_219, %c1_220, %c0_221], %205 {strides = array<i32>} : memref<18x18x128xf32, #tpu.memory_space<vmem>>, vector<16x16x128xf32>,
    %cst_222 = arith.constant 0.000000e+00 : f32
    %207 = vector.broadcast %cst_222 : f32 to vector<256x128xf32>
    %c0_223 = arith.constant 0 : index
    %c0_224 = arith.constant 0 : index
    %c0_225 = arith.constant 0 : index
    %208 = vector.load %arg17[%c0_223, %c0_224, %c0_225] : memref<18x18x128xf32, #tpu.memory_space<vmem>>, vector<16x16x128xf32>
    %209 = vector.shape_cast %208 : vector<16x16x128xf32> to vector<256x128xf32>
    %c0_226 = arith.constant 0 : index
    %c0_227 = arith.constant 0 : index
    %c0_228 = arith.constant 0 : index
    %c0_229 = arith.constant 0 : index
    %210 = vector.load %arg10[%c0_226, %c0_227, %c0_228, %c0_229] : memref<3x3x128x128xf32, #tpu.memory_space<vmem>>, vector<1x1x128x128xf32>
    %211 = vector.shape_cast %210 : vector<1x1x128x128xf32> to vector<128x128xf32>
    %cst_230 = arith.constant dense<0.000000e+00> : vector<256x128xf32>
    %212 = tpu.matmul %209, %211, %cst_230 {dimension_numbers = #tpu.dot_dimension_numbers<[1], [0], [0], [1], [0, 0, 1, 1], [], []>} : vector<256x128xf32>, vector<128x128xf32>, vector<256x128xf32> -> vector<256x128xf32>
    %213 = arith.addf %207, %212 : vector<256x128xf32>
    %c0_231 = arith.constant 0 : index
    %c1_232 = arith.constant 1 : index
    %c0_233 = arith.constant 0 : index
    %214 = vector.load %arg17[%c0_231, %c1_232, %c0_233] : memref<18x18x128xf32, #tpu.memory_space<vmem>>, vector<16x16x128xf32>
    %215 = vector.shape_cast %214 : vector<16x16x128xf32> to vector<256x128xf32>
    %c0_234 = arith.constant 0 : index
    %c1_235 = arith.constant 1 : index
    %c0_236 = arith.constant 0 : index
    %c0_237 = arith.constant 0 : index
    %216 = vector.load %arg10[%c0_234, %c1_235, %c0_236, %c0_237] : memref<3x3x128x128xf32, #tpu.memory_space<vmem>>, vector<1x1x128x128xf32>
    %217 = vector.shape_cast %216 : vector<1x1x128x128xf32> to vector<128x128xf32>
    %cst_238 = arith.constant dense<0.000000e+00> : vector<256x128xf32>
    %218 = tpu.matmul %215, %217, %cst_238 {dimension_numbers = #tpu.dot_dimension_numbers<[1], [0], [0], [1], [0, 0, 1, 1], [], []>} : vector<256x128xf32>, vector<128x128xf32>, vector<256x128xf32> -> vector<256x128xf32>
    %219 = arith.addf %213, %218 : vector<256x128xf32>
    %c0_239 = arith.constant 0 : index
    %c2_240 = arith.constant 2 : index
    %c0_241 = arith.constant 0 : index
    %220 = vector.load %arg17[%c0_239, %c2_240, %c0_241] : memref<18x18x128xf32, #tpu.memory_space<vmem>>, vector<16x16x128xf32>
    %221 = vector.shape_cast %220 : vector<16x16x128xf32> to vector<256x128xf32>
    %c0_242 = arith.constant 0 : index
    %c2_243 = arith.constant 2 : index
    %c0_244 = arith.constant 0 : index
    %c0_245 = arith.constant 0 : index
    %222 = vector.load %arg10[%c0_242, %c2_243, %c0_244, %c0_245] : memref<3x3x128x128xf32, #tpu.memory_space<vmem>>, vector<1x1x128x128xf32>
    %223 = vector.shape_cast %222 : vector<1x1x128x128xf32> to vector<128x128xf32>
    %cst_246 = arith.constant dense<0.000000e+00> : vector<256x128xf32>
    %224 = tpu.matmul %221, %223, %cst_246 {dimension_numbers = #tpu.dot_dimension_numbers<[1], [0], [0], [1], [0, 0, 1, 1], [], []>} : vector<256x128xf32>, vector<128x128xf32>, vector<256x128xf32> -> vector<256x128xf32>
    %225 = arith.addf %219, %224 : vector<256x128xf32>
    %c1_247 = arith.constant 1 : index
    %c0_248 = arith.constant 0 : index
    %c0_249 = arith.constant 0 : index
    %226 = vector.load %arg17[%c1_247, %c0_248, %c0_249] : memref<18x18x128xf32, #tpu.memory_space<vmem>>, vector<16x16x128xf32>
    %227 = vector.shape_cast %226 : vector<16x16x128xf32> to vector<256x128xf32>
    %c1_250 = arith.constant 1 : index
    %c0_251 = arith.constant 0 : index
    %c0_252 = arith.constant 0 : index
    %c0_253 = arith.constant 0 : index
    %228 = vector.load %arg10[%c1_250, %c0_251, %c0_252, %c0_253] : memref<3x3x128x128xf32, #tpu.memory_space<vmem>>, vector<1x1x128x128xf32>
    %229 = vector.shape_cast %228 : vector<1x1x128x128xf32> to vector<128x128xf32>
    %cst_254 = arith.constant dense<0.000000e+00> : vector<256x128xf32>
    %230 = tpu.matmul %227, %229, %cst_254 {dimension_numbers = #tpu.dot_dimension_numbers<[1], [0], [0], [1], [0, 0, 1, 1], [], []>} : vector<256x128xf32>, vector<128x128xf32>, vector<256x128xf32> -> vector<256x128xf32>
    %231 = arith.addf %225, %230 : vector<256x128xf32>
    %c1_255 = arith.constant 1 : index
    %c1_256 = arith.constant 1 : index
    %c0_257 = arith.constant 0 : index
    %232 = vector.load %arg17[%c1_255, %c1_256, %c0_257] : memref<18x18x128xf32, #tpu.memory_space<vmem>>, vector<16x16x128xf32>
    %233 = vector.shape_cast %232 : vector<16x16x128xf32> to vector<256x128xf32>
    %c1_258 = arith.constant 1 : index
    %c1_259 = arith.constant 1 : index
    %c0_260 = arith.constant 0 : index
    %c0_261 = arith.constant 0 : index
    %234 = vector.load %arg10[%c1_258, %c1_259, %c0_260, %c0_261] : memref<3x3x128x128xf32, #tpu.memory_space<vmem>>, vector<1x1x128x128xf32>
    %235 = vector.shape_cast %234 : vector<1x1x128x128xf32> to vector<128x128xf32>
    %cst_262 = arith.constant dense<0.000000e+00> : vector<256x128xf32>
    %236 = tpu.matmul %233, %235, %cst_262 {dimension_numbers = #tpu.dot_dimension_numbers<[1], [0], [0], [1], [0, 0, 1, 1], [], []>} : vector<256x128xf32>, vector<128x128xf32>, vector<256x128xf32> -> vector<256x128xf32>
    %237 = arith.addf %231, %236 : vector<256x128xf32>
    %c1_263 = arith.constant 1 : index
    %c2_264 = arith.constant 2 : index
    %c0_265 = arith.constant 0 : index
    %238 = vector.load %arg17[%c1_263, %c2_264, %c0_265] : memref<18x18x128xf32, #tpu.memory_space<vmem>>, vector<16x16x128xf32>
    %239 = vector.shape_cast %238 : vector<16x16x128xf32> to vector<256x128xf32>
    %c1_266 = arith.constant 1 : index
    %c2_267 = arith.constant 2 : index
    %c0_268 = arith.constant 0 : index
    %c0_269 = arith.constant 0 : index
    %240 = vector.load %arg10[%c1_266, %c2_267, %c0_268, %c0_269] : memref<3x3x128x128xf32, #tpu.memory_space<vmem>>, vector<1x1x128x128xf32>
    %241 = vector.shape_cast %240 : vector<1x1x128x128xf32> to vector<128x128xf32>
    %cst_270 = arith.constant dense<0.000000e+00> : vector<256x128xf32>
    %242 = tpu.matmul %239, %241, %cst_270 {dimension_numbers = #tpu.dot_dimension_numbers<[1], [0], [0], [1], [0, 0, 1, 1], [], []>} : vector<256x128xf32>, vector<128x128xf32>, vector<256x128xf32> -> vector<256x128xf32>
    %243 = arith.addf %237, %242 : vector<256x128xf32>
    %c2_271 = arith.constant 2 : index
    %c0_272 = arith.constant 0 : index
    %c0_273 = arith.constant 0 : index
    %244 = vector.load %arg17[%c2_271, %c0_272, %c0_273] : memref<18x18x128xf32, #tpu.memory_space<vmem>>, vector<16x16x128xf32>
    %245 = vector.shape_cast %244 : vector<16x16x128xf32> to vector<256x128xf32>
    %c2_274 = arith.constant 2 : index
    %c0_275 = arith.constant 0 : index
    %c0_276 = arith.constant 0 : index
    %c0_277 = arith.constant 0 : index
    %246 = vector.load %arg10[%c2_274, %c0_275, %c0_276, %c0_277] : memref<3x3x128x128xf32, #tpu.memory_space<vmem>>, vector<1x1x128x128xf32>
    %247 = vector.shape_cast %246 : vector<1x1x128x128xf32> to vector<128x128xf32>
    %cst_278 = arith.constant dense<0.000000e+00> : vector<256x128xf32>
    %248 = tpu.matmul %245, %247, %cst_278 {dimension_numbers = #tpu.dot_dimension_numbers<[1], [0], [0], [1], [0, 0, 1, 1], [], []>} : vector<256x128xf32>, vector<128x128xf32>, vector<256x128xf32> -> vector<256x128xf32>
    %249 = arith.addf %243, %248 : vector<256x128xf32>
    %c2_279 = arith.constant 2 : index
    %c1_280 = arith.constant 1 : index
    %c0_281 = arith.constant 0 : index
    %250 = vector.load %arg17[%c2_279, %c1_280, %c0_281] : memref<18x18x128xf32, #tpu.memory_space<vmem>>, vector<16x16x128xf32>
    %251 = vector.shape_cast %250 : vector<16x16x128xf32> to vector<256x128xf32>
    %c2_282 = arith.constant 2 : index
    %c1_283 = arith.constant 1 : index
    %c0_284 = arith.constant 0 : index
    %c0_285 = arith.constant 0 : index
    %252 = vector.load %arg10[%c2_282, %c1_283, %c0_284, %c0_285] : memref<3x3x128x128xf32, #tpu.memory_space<vmem>>, vector<1x1x128x128xf32>
    %253 = vector.shape_cast %252 : vector<1x1x128x128xf32> to vector<128x128xf32>
    %cst_286 = arith.constant dense<0.000000e+00> : vector<256x128xf32>
    %254 = tpu.matmul %251, %253, %cst_286 {dimension_numbers = #tpu.dot_dimension_numbers<[1], [0], [0], [1], [0, 0, 1, 1], [], []>} : vector<256x128xf32>, vector<128x128xf32>, vector<256x128xf32> -> vector<256x128xf32>
    %255 = arith.addf %249, %254 : vector<256x128xf32>
    %c2_287 = arith.constant 2 : index
    %c2_288 = arith.constant 2 : index
    %c0_289 = arith.constant 0 : index
    %256 = vector.load %arg17[%c2_287, %c2_288, %c0_289] : memref<18x18x128xf32, #tpu.memory_space<vmem>>, vector<16x16x128xf32>
    %257 = vector.shape_cast %256 : vector<16x16x128xf32> to vector<256x128xf32>
    %c2_290 = arith.constant 2 : index
    %c2_291 = arith.constant 2 : index
    %c0_292 = arith.constant 0 : index
    %c0_293 = arith.constant 0 : index
    %258 = vector.load %arg10[%c2_290, %c2_291, %c0_292, %c0_293] : memref<3x3x128x128xf32, #tpu.memory_space<vmem>>, vector<1x1x128x128xf32>
    %259 = vector.shape_cast %258 : vector<1x1x128x128xf32> to vector<128x128xf32>
    %cst_294 = arith.constant dense<0.000000e+00> : vector<256x128xf32>
    %260 = tpu.matmul %257, %259, %cst_294 {dimension_numbers = #tpu.dot_dimension_numbers<[1], [0], [0], [1], [0, 0, 1, 1], [], []>} : vector<256x128xf32>, vector<128x128xf32>, vector<256x128xf32> -> vector<256x128xf32>
    %261 = arith.addf %255, %260 : vector<256x128xf32>
    %c0_295 = arith.constant 0 : index
    %c0_296 = arith.constant 0 : index
    %262 = vector.load %arg11[%c0_295, %c0_296] : memref<1x128xf32, #tpu.memory_space<vmem>>, vector<1x128xf32>
    %263 = vector.broadcast %262 : vector<1x128xf32> to vector<256x128xf32>
    %264 = arith.addf %261, %263 : vector<256x128xf32>
    %cst_297 = arith.constant 0.000000e+00 : f32
    %265 = vector.broadcast %cst_297 : f32 to vector<256x128xf32>
    %266 = arith.cmpf oge, %264, %265 : vector<256x128xf32>
    %cst_298 = arith.constant 2.000000e-01 : f32
    %267 = vector.broadcast %cst_298 : f32 to vector<256x128xf32>
    %268 = arith.mulf %267, %264 : vector<256x128xf32>
    %269 = arith.select %266, %264, %268 : vector<256x128xi1>, vector<256x128xf32>
    %c0_299 = arith.constant 0 : index
    %c0_300 = arith.constant 0 : index
    %270 = vector.load %arg12[%c0_299, %c0_300] : memref<128x128xf32, #tpu.memory_space<vmem>>, vector<128x128xf32>
    %cst_301 = arith.constant dense<0.000000e+00> : vector<256x128xf32>
    %271 = tpu.matmul %139, %270, %cst_301 {dimension_numbers = #tpu.dot_dimension_numbers<[1], [0], [0], [1], [0, 0, 1, 1], [], []>} : vector<256x128xf32>, vector<128x128xf32>, vector<256x128xf32> -> vector<256x128xf32>
    %272 = arith.addf %269, %271 : vector<256x128xf32>
    %c0_302 = arith.constant 0 : index
    %c0_303 = arith.constant 0 : index
    %273 = vector.load %arg13[%c0_302, %c0_303] : memref<1x128xf32, #tpu.memory_space<vmem>>, vector<1x128xf32>
    %274 = vector.broadcast %273 : vector<1x128xf32> to vector<256x128xf32>
    %275 = arith.addf %272, %274 : vector<256x128xf32>
    %c0_304 = arith.constant 0 : index
    %c0_305 = arith.constant 0 : index
    %276 = vector.load %arg14[%c0_304, %c0_305] : memref<4x128xf32, #tpu.memory_space<vmem>>, vector<4x128xf32>
    %cst_306 = arith.constant dense<0.000000e+00> : vector<256x128xf32>
    %277 = tpu.matmul %3, %276, %cst_306 {dimension_numbers = #tpu.dot_dimension_numbers<[1], [0], [0], [1], [0, 0, 1, 1], [], []>} : vector<256x4xf32>, vector<4x128xf32>, vector<256x128xf32> -> vector<256x128xf32>
    %278 = arith.addf %275, %277 : vector<256x128xf32>
    %c0_307 = arith.constant 0 : index
    %c0_308 = arith.constant 0 : index
    %279 = vector.load %arg15[%c0_307, %c0_308] : memref<1x128xf32, #tpu.memory_space<vmem>>, vector<1x128xf32>
    %280 = vector.broadcast %279 : vector<1x128xf32> to vector<256x128xf32>
    %281 = arith.addf %278, %280 : vector<256x128xf32>
    %282 = vector.shape_cast %281 : vector<256x128xf32> to vector<16x16x128xf32>
    %c0_309 = arith.constant 0 : index
    %c0_310 = arith.constant 0 : index
    %c0_311 = arith.constant 0 : index
    %c0_312 = arith.constant 0 : index
    %283 = vector.load %arg16[%c0_309, %c0_310, %c0_311, %c0_312] : memref<1x16x16x128xf32, #tpu.memory_space<vmem>>, vector<1x16x16x128xf32>
    %284 = vector.shape_cast %283 : vector<1x16x16x128xf32> to vector<16x16x128xf32>
    %285 = vector.shape_cast %282 : vector<16x16x128xf32> to vector<1x16x16x128xf32>
    tpu.vector_store %arg16[%c0_309, %c0_310, %c0_311, %c0_312], %285 {strides = array<i32>} : memref<1x16x16x128xf32, #tpu.memory_space<vmem>>, vector<1x16x16x128xf32>,
    return
  }
  func.func @transform_0(%arg0: i32) -> (i32, i32, i32, i32) {
    %c0_i32 = arith.constant 0 : i32
    %c0_i32_0 = arith.constant 0 : i32
    %c0_i32_1 = arith.constant 0 : i32
    %c0_i32_2 = arith.constant 0 : i32
    return %arg0, %c0_i32, %c0_i32_0, %c0_i32_1 : i32, i32, i32, i32
  }
  func.func @transform_1(%arg0: i32) -> (i32, i32, i32, i32) {
    %c0_i32 = arith.constant 0 : i32
    %c0_i32_0 = arith.constant 0 : i32
    %c0_i32_1 = arith.constant 0 : i32
    %c0_i32_2 = arith.constant 0 : i32
    %c0_i32_3 = arith.constant 0 : i32
    return %c0_i32, %c0_i32_0, %c0_i32_1, %c0_i32_2 : i32, i32, i32, i32
  }
  func.func @transform_2(%arg0: i32) -> (i32, i32) {
    %c0_i32 = arith.constant 0 : i32
    %c0_i32_0 = arith.constant 0 : i32
    %c0_i32_1 = arith.constant 0 : i32
    return %c0_i32, %c0_i32_0 : i32, i32
  }
  func.func @transform_3(%arg0: i32) -> (i32, i32, i32, i32) {
    %c0_i32 = arith.constant 0 : i32
    %c0_i32_0 = arith.constant 0 : i32
    %c0_i32_1 = arith.constant 0 : i32
    %c0_i32_2 = arith.constant 0 : i32
    %c0_i32_3 = arith.constant 0 : i32
    return %c0_i32, %c0_i32_0, %c0_i32_1, %c0_i32_2 : i32, i32, i32, i32
  }
  func.func @transform_4(%arg0: i32) -> (i32, i32) {
    %c0_i32 = arith.constant 0 : i32
    %c0_i32_0 = arith.constant 0 : i32
    %c0_i32_1 = arith.constant 0 : i32
    return %c0_i32, %c0_i32_0 : i32, i32
  }
  func.func @transform_5(%arg0: i32) -> (i32, i32) {
    %c0_i32 = arith.constant 0 : i32
    %c0_i32_0 = arith.constant 0 : i32
    %c0_i32_1 = arith.constant 0 : i32
    return %c0_i32, %c0_i32_0 : i32, i32
  }
  func.func @transform_6(%arg0: i32) -> (i32, i32) {
    %c0_i32 = arith.constant 0 : i32
    %c0_i32_0 = arith.constant 0 : i32
    %c0_i32_1 = arith.constant 0 : i32
    return %c0_i32, %c0_i32_0 : i32, i32
  }
  func.func @transform_7(%arg0: i32) -> (i32, i32, i32, i32) {
    %c0_i32 = arith.constant 0 : i32
    %c0_i32_0 = arith.constant 0 : i32
    %c0_i32_1 = arith.constant 0 : i32
    %c0_i32_2 = arith.constant 0 : i32
    %c0_i32_3 = arith.constant 0 : i32
    return %c0_i32, %c0_i32_0, %c0_i32_1, %c0_i32_2 : i32, i32, i32, i32
  }
  func.func @transform_8(%arg0: i32) -> (i32, i32) {
    %c0_i32 = arith.constant 0 : i32
    %c0_i32_0 = arith.constant 0 : i32
    %c0_i32_1 = arith.constant 0 : i32
    return %c0_i32, %c0_i32_0 : i32, i32
  }
  func.func @transform_9(%arg0: i32) -> (i32, i32, i32, i32) {
    %c0_i32 = arith.constant 0 : i32
    %c0_i32_0 = arith.constant 0 : i32
    %c0_i32_1 = arith.constant 0 : i32
    %c0_i32_2 = arith.constant 0 : i32
    %c0_i32_3 = arith.constant 0 : i32
    return %c0_i32, %c0_i32_0, %c0_i32_1, %c0_i32_2 : i32, i32, i32, i32
  }
  func.func @transform_10(%arg0: i32) -> (i32, i32) {
    %c0_i32 = arith.constant 0 : i32
    %c0_i32_0 = arith.constant 0 : i32
    %c0_i32_1 = arith.constant 0 : i32
    return %c0_i32, %c0_i32_0 : i32, i32
  }
  func.func @transform_11(%arg0: i32) -> (i32, i32) {
    %c0_i32 = arith.constant 0 : i32
    %c0_i32_0 = arith.constant 0 : i32
    %c0_i32_1 = arith.constant 0 : i32
    return %c0_i32, %c0_i32_0 : i32, i32
  }
  func.func @transform_12(%arg0: i32) -> (i32, i32) {
    %c0_i32 = arith.constant 0 : i32
    %c0_i32_0 = arith.constant 0 : i32
    %c0_i32_1 = arith.constant 0 : i32
    return %c0_i32, %c0_i32_0 : i32, i32
  }
  func.func @transform_13(%arg0: i32) -> (i32, i32) {
    %c0_i32 = arith.constant 0 : i32
    %c0_i32_0 = arith.constant 0 : i32
    %c0_i32_1 = arith.constant 0 : i32
    return %c0_i32, %c0_i32_0 : i32, i32
  }
  func.func @transform_14(%arg0: i32) -> (i32, i32) {
    %c0_i32 = arith.constant 0 : i32
    %c0_i32_0 = arith.constant 0 : i32
    %c0_i32_1 = arith.constant 0 : i32
    return %c0_i32, %c0_i32_0 : i32, i32
  }
  func.func @transform_15(%arg0: i32) -> (i32, i32, i32, i32) {
    %c0_i32 = arith.constant 0 : i32
    %c0_i32_0 = arith.constant 0 : i32
    %c0_i32_1 = arith.constant 0 : i32
    %c0_i32_2 = arith.constant 0 : i32
    return %arg0, %c0_i32, %c0_i32_0, %c0_i32_1 : i32, i32, i32, i32
  }
}

</mosaic_0001>

<bundles_post_ra>
// kernel: tpu_custom_call.1
= control target key start
LH: loop header
LB: loop body
LE: loop exit
PB: predicated region body
PF: predicated region fallthrough
CT: control target
= control target key end

     0   :  { %s23920_s0 = inlined_call_operand.vmem [shape: f32[2,18,18,4], index: 0, kind: input, shape index: {}]   ;;  %s23921_s1 = inlined_call_operand.vmem [shape: f32[3,3,4,128], index: 1, kind: input, shape index: {}]   ;;  %s23922_s2 = inlined_call_operand.vmem [shape: f32[1,128], index: 2, kind: input, shape index: {}]   ;;  %s23923_s3 = inlined_call_operand.hbm [shape: f32[3,3,128,128], index: 3, kind: input, shape index: {}]   ;;  %s23924_s4 = inlined_call_operand.vmem [shape: f32[1,128], index: 4, kind: input, shape index: {}]   ;;  %s23925_s5 = inlined_call_operand.vmem [shape: f32[4,128], index: 5, kind: input, shape index: {}]   ;;  %s23926_s6 = inlined_call_operand.vmem [shape: f32[1,128], index: 6, kind: input, shape index: {}]   ;;  %s23927_s7 = inlined_call_operand.hbm [shape: f32[3,3,128,128], index: 7, kind: input, shape index: {}]   ;;  %s23928_s8 = inlined_call_operand.vmem [shape: f32[1,128], index: 8, kind: input, shape index: {}]   ;;  %s23929_s9 = inlined_call_operand.hbm [shape: f32[3,3,128,128], index: 9, kind: input, shape index: {}]   ;;  %s23930_s10 = inlined_call_operand.vmem [shape: f32[1,128], index: 10, kind: input, shape index: {}]   ;;  %s23931_s11 = inlined_call_operand.vmem [shape: f32[128,128], index: 11, kind: input, shape index: {}]   ;;  %s23932_s12 = inlined_call_operand.vmem [shape: f32[1,128], index: 12, kind: input, shape index: {}]   ;;  %s23933_s13 = inlined_call_operand.vmem [shape: f32[4,128], index: 13, kind: input, shape index: {}]   ;;  %s23934_s14 = inlined_call_operand.vmem [shape: f32[1,128], index: 14, kind: input, shape index: {}]   ;;  %s23935_s15 = inlined_call_operand.hbm [shape: f32[2,16,16,128], index: 15, kind: output, shape index: {}]  }
   0x1   :  { %24157 = sst [smem:[#allocation104_spill]] %s23932_s12 }
   0x2   :  { %24158 = sst [smem:[#allocation105_spill]] %s23934_s14 }
   0x3   :  { %24159 = sst [smem:[#allocation106_spill]] %s23935_s15 }
   0x4   :  { %20 = vsyncpa [#allocation4], 0 }
   0x5   :  { %21 = vsyncpa [#allocation7], 0 }
   0x6   :  { %22 = vsyncpa [#allocation5], 0 }
   0x7   :  { %24 = vsyncpa [#allocation5 + $0x1], 0  ;;  %s20409_s18 = smov 0   ;;  %s20411_s19 = smov 0  }
   0x8   :  { %s20413_s20 = smov 0   ;;  %s20415_s21 = smov 0  }
   0x9 LB: > { %24160 = sst [smem:[#allocation13_spill]] %s20306_s18  ;;  %s20430_s22 = sadd.s32 4294967295, %s20318_s21   ;;  %s20318_s21 = sphi %s20415_s21, %s24638_s21   ;;  %s20314_s20 = sphi %s20413_s20, %s24641_s20   ;;  %s20310_s19 = sphi %s20411_s19, %s24640_s19   ;;  %s20306_s18 = sphi %s20409_s18, %s24639_s18  }
   0xa   : > { %24161 = sst [smem:[#allocation14_spill]] %s20310_s19  ;;  %s13148_s23 = sadd.s32 4294967294, %s20318_s21  }
   0xb   : > { %24162 = sst [smem:[#allocation15_spill]] %s20314_s20  ;;  %s20434_s24 = sadd.s32 1, %s20318_s21  }
   0xc   : > { %24163 = sst [smem:[#allocation16_spill]] %s20318_s21  ;;  %s357_s25 = sadd.s32 1, %s20314_s20 }
   0xd   : > { %24164 = sst [smem:[#allocation17_spill]] %s20434_s24  ;;  %s354_s26 = ssub.s32 %s20318_s21, %s20434_s24 }
   0xe   : > { %p367_p0 = scmp.ne.s32.totalorder %s20314_s20, %s20310_s19  ;;  %p355_p1 = scmp.eq.s32.totalorder %s354_s26, 0 }
   0xf   : > { %p368_p2 = scmp.eq.s32.totalorder %s20430_s22, 1  ;;  %p373_p3 = scmp.ne.s32.totalorder %s20310_s19, %s20306_s18 }
  0x10   : > { %p374_p4 = scmp.eq.s32.totalorder %s13148_s23, 1  ;;  %p13149_p7 = scmp.ge.s32.totalorder %s20318_s21, 1 }
  0x11   : > { %s20445_s27 = scalar_select %p355_p1, %s20314_s20, %s357_s25  }
  0x12   : > { %p20447_p5 = por %p368_p2, %p367_p0  ;;  %p20451_p6 = por %p374_p4, %p373_p3 }
  0x13   : > { %24165 = sst [smem:[#allocation18_spill]] %s20445_s27  ;;  %p381_p8 = scmp.lt.s32.totalorder %s20318_s21, 3 }
  0x14   : > { %s24166_s28 = scalar_select %p20447_p5, 1, 0 }
  0x15   : > { %s24168_s29 = scalar_select %p20451_p6, 1, 0 }
  0x16   : > { %24167 = sst [smem:[#allocation19_spill]] %s24166_s28  ;;  %p23943_p9 = scmp.eq.s32.totalorder %s20430_s22, 0 }
  0x17   : > { %24169 = sst [smem:[#allocation20_spill]] %s24168_s29  ;;  %p20458_p10 = pnand %p13149_p7, %p381_p8 }
  0x18   : > { %s20320_s16 = smov [#allocation6]   ;;  %s20321_s25 = smov [#allocation3]  }
  0x19   : > { %s24170_s30 = scalar_select %p20458_p10, 1, 0 }
  0x1a   : > { %p20088_p11 = pneg %p20458_p10  ;;  %s421_s17 = sshll.u32 %s20320_s16, 4  ;;  %s20464_s17 = int_to_ptr.vmem [resolvable:$true] %s421_s17 }
  0x1b   : > { %s399_s26 = sshll.u32 %s20321_s25, 4  ;;  %s20322_s27 = smov [#allocation8]   ;;  %s20472_s26 = int_to_ptr.vmem [resolvable:$true] %s399_s26 }
  0x1c   : > { %p20468_p12 = pnand %p23943_p9, %p20088_p11  ;;  %s20474_s20 = sshll.u32 %s20322_s27, 4  ;;  %s438_s20 = int_to_ptr.vmem [resolvable:$true] %s20474_s20 }
  0x1d   : > { %s20164_s18 = scalar_lea.hbm %s23927_s7, 18432 }
  0x1e   : > { %p20165_p13 = scmp.ne.s32.totalorder %s23927_s7, %s20164_s18  ;;  %p20484_p0 = pneg %p20468_p12 }
  0x1f   : > { %p20171_p3 = scmp.lt.u32.totalorder %s20164_s18, %s23927_s7 }
  0x20   : > { %p20167_p1 = pnand %p20484_p0, %p20165_p13 }
  0x22   : > { %p20168_p2 = pneg %p20167_p1 }
  0x24   : > { %p20173_p4 = pnand %p20171_p3, %p20168_p2 }
  0x26   : > { %20176 = shalt.err (!%p20173_p4)
}
  0x27   : > { %s20177_s21 = scalar_lea.vmem %s20464_s17, 18432  ;;  %p20185_p9 = scmp.lt.s32.totalorder %s20464_s17, %s20464_s17 }
  0x28   : > { %p20178_p7 = scmp.ne.s32.totalorder %s20464_s17, %s20177_s21  ;;  %p20186_p6 = scmp.lt.s32.totalorder %s20177_s21, %s20177_s21 }
  0x2a   : > { %p20180_p8 = pnand %p20178_p7, %p20484_p0  ;;  %p20187_p13 = por %p20186_p6, %p20185_p9 }
  0x2c   : > { %p20181_p11 = pneg %p20180_p8 }
  0x2e   : > { %p20188_p1 = pnand %p20187_p13, %p20181_p11 }
  0x30   : > { %20191 = shalt.err (!%p20188_p1)
}
  0x31   : > { %s20323_s24 = smov 128   ;;  %s20324_s18 = smov 8  }
  0x32   : > { %20094 = dma.hbm_to_vmem [thread:$0]  (!%p20468_p12), %s23927_s7, 18432, %s20464_s17, [#allocation7], %s20323_s24, %s20323_s24, %s20324_s18  }
  0x33   : > { %s20192_s21 = scalar_lea.hbm %s23923_s3, 18432 }
  0x34   : > { %p20193_p6 = scmp.ne.s32.totalorder %s23923_s3, %s20192_s21  ;;  %p20199_p3 = scmp.lt.u32.totalorder %s20192_s21, %s23923_s3 }
  0x36   : > { %p20195_p9 = pnand %p20193_p6, %p20484_p0 }
  0x38   : > { %p20196_p2 = pneg %p20195_p9 }
  0x3a   : > { %p20201_p4 = pnand %p20199_p3, %p20196_p2 }
  0x3c   : > { %20204 = shalt.err (!%p20201_p4)
}
  0x3d   : > { %s20205_s17 = scalar_lea.vmem %s20472_s26, 18432  ;;  %p20213_p13 = scmp.lt.s32.totalorder %s20472_s26, %s20472_s26 }
  0x3e   : > { %p20206_p7 = scmp.ne.s32.totalorder %s20472_s26, %s20205_s17  ;;  %p20214_p1 = scmp.lt.s32.totalorder %s20205_s17, %s20205_s17 }
  0x40   : > { %p20208_p8 = pnand %p20206_p7, %p20484_p0  ;;  %p20215_p6 = por %p20214_p1, %p20213_p13 }
  0x42   : > { %p20209_p11 = pneg %p20208_p8 }
  0x44   : > { %p20216_p9 = pnand %p20215_p6, %p20209_p11 }
  0x46   : > { %20219 = shalt.err (!%p20216_p9)
}
  0x47   : > { %20091 = dma.hbm_to_vmem [thread:$0]  (!%p20468_p12), %s23923_s3, 18432, %s20472_s26, [#allocation4], %s20323_s24, %s20323_s24, %s20324_s18  }
  0x48   : > { %s20220_s29 = scalar_lea.hbm %s23929_s9, 18432 }
  0x49   : > { %p20221_p2 = scmp.ne.s32.totalorder %s23929_s9, %s20220_s29  ;;  %p20227_p7 = scmp.lt.u32.totalorder %s20220_s29, %s23929_s9 }
  0x4b   : > { %p20223_p3 = pnand %p20221_p2, %p20484_p0 }
  0x4d   : > { %p20224_p4 = pneg %p20223_p3 }
  0x4f   : > { %p20229_p8 = pnand %p20227_p7, %p20224_p4 }
  0x51   : > { %20232 = shalt.err (!%p20229_p8)
}
  0x52   : > { %s20233_s17 = scalar_lea.vmem %s438_s20, 18432  ;;  %p20241_p6 = scmp.lt.s32.totalorder %s438_s20, %s438_s20 }
  0x53   : > { %p20234_p11 = scmp.ne.s32.totalorder %s438_s20, %s20233_s17  ;;  %p20242_p9 = scmp.lt.s32.totalorder %s20233_s17, %s20233_s17 }
  0x55   : > { %p20236_p13 = pnand %p20234_p11, %p20484_p0  ;;  %p20243_p5 = por %p20242_p9, %p20241_p6 }
  0x57   : > { %p20237_p1 = pneg %p20236_p13 }
  0x59   : > { %p20244_p10 = pnand %p20243_p5, %p20237_p1 }
  0x5b   : > { %20247 = shalt.err (!%p20244_p10)
}
  0x5c   : > { %20097 = dma.hbm_to_vmem [thread:$0]  (!%p20468_p12), %s23929_s9, 18432, %s438_s20, [#allocation7], %s20323_s24, %s20323_s24, %s20324_s18  }
  0x5d   : > { %p24173_p2 = scmp.ne.s32.totalorder %s24170_s30, 0 }
  0x5f   : > { %476 = sbr.rel (%p24173_p2) target bundleno = 3157 (0xc55), region = 80 }
  0x66   : > { %p24174_p0 = scmp.eq.s32.totalorder %s20430_s22, 0 }
  0x68   : > { %20293 = dma.done.wait (%p24174_p0), [#allocation4], 18432   ;;  %p24175_p3 = pmov %p24174_p0 }
  0x69   : > { %p24176_p5 = pmov %p24174_p0 }
  0x6a   : > { %20295 = vsyncadd (%p24175_p3), [#allocation4], 4294948864 }
  0x6b   : > { %20297 = dma.done.wait (%p24176_p5), [#allocation7], 36864   ;;  %p24177_p10 = pmov %p24174_p0 }
  0x6c   : > { %p532_p4 = scmp.lt.s32.totalorder %s20430_s22, 1  ;;  %vm850_vm0 = vcmask 1043456   ;;  %v13160_v0 = vld [vmem:[%s23921_s1 + $0x4] sm:$0xf]  ;;  %vm639_vm1 = vcmask 1046528   ;;  %vm785_vm2 = vcmask 31744  }
  0x6d   : > { %20299 = vsyncadd (%p24177_p10), [#allocation7], 4294930432  ;;  %15251 = vmatprep.subr.msk.mxu0 %vm850_vm0, %v13160_v0  ;;  %v774_v5 = vld [vmem:[%s23921_s1] sm:$0xf]  ;;  %v20714_v54 = vld [vmem:[%s23921_s1 + $0x8] sm:$0xf] }
  0x6e   : > { %s533_s15 = scalar_select %p532_p4, %s20430_s22, 1  ;;  %15252 = vmatpush3.msk.msra.mxu0 %vm850_vm0, %v13160_v0  ;;  %vm1371_vm3 = vcmask 1045504  }
  0x6f   : > { %15301 = vmatprep.subr.msk.mxu0 %vm850_vm0, %v774_v5  ;;  %s24597_s14 = sld [smem:[#allocation104_spill]]  ;;  %s24598_s29 = sld [smem:[#allocation105_spill]] }
  0x70   : > { %s20073_s20 = smul.u32 432, %s533_s15  ;;  %s24629_s25 = sld [smem:[#allocation19_spill]] }
  0x71   : > { %s13543_s27 = sshll.u32 %s20430_s22, 12  ;;  %s24632_s12 = sld [smem:[#allocation106_spill]] }
  0x72   : > { %s20571_s24 = scalar_lea.vmem %s23920_s0, %s20073_s20  ;;  %s24596_s20 = sld [smem:[#allocation14_spill]] }
  0x73   : > { %v20577_v1 = vld [vmem:[%s20571_s24] sm:$0xff]  ;;  %v20580_v2 = vld [vmem:[%s20571_s24 + $0x8] sm:$0xff]  ;;  %v20589_v6 = vld [vmem:[%s20571_s24 + $0x10] sm:$0x3]  ;;  %s20326_s18 = smov [#allocation9]  }
  0x74   : > { %v778_v3 = vrot.slane %v20577_v1, 1  ;;  %v779_v4 = vrot.slane %v20580_v2, 1  ;;  %v781_v7 = vrot.slane %v20589_v6, 1  ;;  %v20594_v8 = vld [vmem:[%s20571_s24 + $0x18] sm:$0xff]  ;;  %v20597_v9 = vld [vmem:[%s20571_s24 + $0x20] sm:$0xff]  ;;  %v20608_v15 = vld [vmem:[%s20571_s24 + $0x30] sm:$0xff] }
  0x75   : > { %v20600_v10 = vld [vmem:[%s20571_s24 + $0x28] sm:$0x3]  ;;  %v640_v12 = vrot.slane %v20594_v8, 1  ;;  %v641_v13 = vrot.slane %v20597_v9, 1  ;;  %v20611_v16 = vld [vmem:[%s20571_s24 + $0x38] sm:$0xff]  ;;  %v645_v18 = vrot.slane %v20608_v15, 1 }
  0x76   : > { %v780_v11 = vsel %vm639_vm1, %v778_v3, %v779_v4  ;;  %v643_v14 = vrot.slane %v20600_v10, 1  ;;  %v782_v17 = vsel %vm639_vm1, %v779_v4, %v781_v7  ;;  %v646_v19 = vrot.slane %v20611_v16, 1  ;;  %v20618_v20 = vld [vmem:[%s20571_s24 + $0x40] sm:$0x3]  ;;  %v20621_v21 = vld [vmem:[%s20571_s24 + $0x48] sm:$0xff]  ;;  %v20624_v22 = vld [vmem:[%s20571_s24 + $0x50] sm:$0xff] }
  0x77   : > { %15253 = vmatprep.mubr.msk.f32.mxu0 %vm785_vm2, %v780_v11  ;;  %v20628_v23 = vsel %vm639_vm1, %v640_v12, %v641_v13  ;;  %v648_v25 = vrot.slane %v20618_v20, 1  ;;  %v650_v27 = vrot.slane %v20621_v21, 1  ;;  %v651_v28 = vrot.slane %v20624_v22, 1  ;;  %v20643_v29 = vld [vmem:[%s20571_s24 + $0x58] sm:$0x3]  ;;  %v20646_v30 = vld [vmem:[%s20571_s24 + $0x60] sm:$0xff]  ;;  %s23870_s15 = scalar_lea.hbm %s24632_s12, %s13543_s27 }
  0x78   : > { %15254 = vmatmul.mubr.msk.f32.vlgmr.msra.gmra.mrb[0].mxu0 %vm785_vm2, %v782_v17  ;;  %24178 = vst [vmem:[#allocation21_spill] sm:$0xff] %v20628_v23  ;;  %v20634_v24 = vsel %vm639_vm1, %v641_v13, %v643_v14  ;;  %v20638_v26 = vsel %vm639_vm1, %v645_v18, %v646_v19  ;;  %v20649_v31 = vld [vmem:[%s20571_s24 + $0x68] sm:$0xff]  ;;  %v653_v33 = vrot.slane %v20643_v29, 1  ;;  %v655_v35 = vrot.slane %v20646_v30, 1  ;;  %v20665_v37 = vld [vmem:[%s20571_s24 + $0x70] sm:$0x3] }
  0x79   : > { %15302 = vmatpush3.msk.msra.mxu0 %vm850_vm0, %v774_v5  ;;  %15256 = vmatprep.mubr.msk.f32.mxu0 %vm785_vm2, %v20628_v23  ;;  %24179 = vst [vmem:[#allocation22_spill] sm:$0xff] %v20634_v24  ;;  %24180 = vst [vmem:[#allocation23_spill] sm:$0xff] %v20638_v26  ;;  %v20656_v32 = vsel %vm639_vm1, %v646_v19, %v648_v25  ;;  %v20660_v34 = vsel %vm639_vm1, %v650_v27, %v651_v28  ;;  %v656_v36 = vrot.slane %v20649_v31, 1  ;;  %v20668_v38 = vld [vmem:[%s20571_s24 + $0x78] sm:$0xff]  ;;  %v20671_v39 = vld [vmem:[%s20571_s24 + $0x80] sm:$0xff]  ;;  %s529_s30 = sand.u32 1, %s24596_s20  }
  0x7a   : > { %24181 = vst [vmem:[#allocation24_spill] sm:$0xff] %v20656_v32  ;;  %24182 = vst [vmem:[#allocation25_spill] sm:$0xff] %v20660_v34  ;;  %v20678_v40 = vsel %vm639_vm1, %v651_v28, %v653_v33  ;;  %v658_v41 = vrot.slane %v20665_v37, 1  ;;  %v660_v43 = vrot.slane %v20668_v38, 1  ;;  %v661_v44 = vrot.slane %v20671_v39, 1  ;;  %v20690_v46 = vld [vmem:[%s20571_s24 + $0x90] sm:$0xff]  ;;  %15351 = vmatprep.subr.msk.mxu0 %vm850_vm0, %v20714_v54 }
  0x7b   : > { %24183 = vst [vmem:[#allocation26_spill] sm:$0xff] %v20678_v40  ;;  %v20682_v42 = vsel %vm639_vm1, %v655_v35, %v656_v36  ;;  %v20687_v45 = vld [vmem:[%s20571_s24 + $0x88] sm:$0x3]  ;;  %v20693_v47 = vld [vmem:[%s20571_s24 + $0x98] sm:$0xff]  ;;  %v665_v51 = vrot.slane %v20690_v46, 1  ;;  %v20720_v56 = vld [vmem:[%s20571_s24 + $0xb0] sm:$0xff] }
  0x7c   : > { %15257 = vmatmul.mubr.msk.f32.gmra.mrb[2].mxu0 %vm785_vm2, %v20634_v24  ;;  %24184 = vst [vmem:[#allocation27_spill] sm:$0xff] %v20682_v42  ;;  %v20700_v48 = vsel %vm639_vm1, %v656_v36, %v658_v41  ;;  %v663_v49 = vrot.slane %v20687_v45, 1  ;;  %v20704_v50 = vsel %vm639_vm1, %v660_v43, %v661_v44  ;;  %v666_v52 = vrot.slane %v20693_v47, 1  ;;  %v20709_v53 = vld [vmem:[%s20571_s24 + $0xa0] sm:$0x3]  ;;  %v20717_v55 = vld [vmem:[%s20571_s24 + $0xa8] sm:$0xff] }
  0x7d   : > { %15259 = vmatprep.mubr.msk.f32.mxu0 %vm785_vm2, %v20638_v26  ;;  %24185 = vst [vmem:[#allocation28_spill] sm:$0xff] %v20700_v48  ;;  %24186 = vst [vmem:[#allocation29_spill] sm:$0xff] %v20704_v50  ;;  %v668_v58 = vrot.slane %v20709_v53, 1  ;;  %v670_v60 = vrot.slane %v20717_v55, 1  ;;  %v671_v61 = vrot.slane %v20720_v56, 1  ;;  %v20741_v63 = vld [vmem:[%s20571_s24 + $0xc0] sm:$0xff] }
  0x7e   : > { %v20729_v57 = vsel %vm639_vm1, %v661_v44, %v663_v49  ;;  %v20733_v59 = vsel %vm639_vm1, %v665_v51, %v666_v52  ;;  %v20738_v62 = vld [vmem:[%s20571_s24 + $0xb8] sm:$0x3]  ;;  %v20744_v0 = vld [vmem:[%s20571_s24 + $0xc8] sm:$0xff]  ;;  %v675_v7 = vrot.slane %v20741_v63, 1  ;;  %v20760_v12 = vld [vmem:[%s20571_s24 + $0xd0] sm:$0x3] }
  0x7f   : > { %24187 = vst [vmem:[#allocation30_spill] sm:$0xff] %v20729_v57  ;;  %24188 = vst [vmem:[#allocation31_spill] sm:$0xff] %v20733_v59  ;;  %v20751_v3 = vsel %vm639_vm1, %v666_v52, %v668_v58  ;;  %v673_v4 = vrot.slane %v20738_v62, 1  ;;  %v20755_v5 = vsel %vm639_vm1, %v670_v60, %v671_v61  ;;  %v676_v11 = vrot.slane %v20744_v0, 1  ;;  %v20763_v13 = vld [vmem:[%s20571_s24 + $0xd8] sm:$0xff]  ;;  %v20766_v14 = vld [vmem:[%s20571_s24 + $0xe0] sm:$0xff] }
  0x80   : > { %15260 = vmatmul.mubr.msk.f32.gmra.mrb[4].mxu0 %vm785_vm2, %v20656_v32  ;;  %24189 = vst [vmem:[#allocation32_spill] sm:$0xff] %v20751_v3  ;;  %24190 = vst [vmem:[#allocation33_spill] sm:$0xff] %v20755_v5  ;;  %v678_v18 = vrot.slane %v20760_v12, 1  ;;  %v680_v25 = vrot.slane %v20763_v13, 1  ;;  %v681_v27 = vrot.slane %v20766_v14, 1  ;;  %v20785_v33 = vld [vmem:[%s20571_s24 + $0xf0] sm:$0xff] }
  0x81   : > { %15262 = vmatprep.mubr.msk.f32.mxu0 %vm785_vm2, %v20660_v34  ;;  %v20773_v17 = vsel %vm639_vm1, %v671_v61, %v673_v4  ;;  %v20777_v19 = vsel %vm639_vm1, %v675_v7, %v676_v11  ;;  %v20782_v28 = vld [vmem:[%s20571_s24 + $0xe8] sm:$0x3]  ;;  %v20788_v35 = vld [vmem:[%s20571_s24 + $0xf8] sm:$0xff]  ;;  %v685_v44 = vrot.slane %v20785_v33, 1  ;;  %v20804_v51 = vld [vmem:[%s20571_s24 + $0x100] sm:$0x3] }
  0x82   : > { %24191 = vst [vmem:[#allocation34_spill] sm:$0xff] %v20773_v17  ;;  %24192 = vst [vmem:[#allocation35_spill] sm:$0xff] %v20777_v19  ;;  %v20795_v36 = vsel %vm639_vm1, %v676_v11, %v678_v18  ;;  %v683_v41 = vrot.slane %v20782_v28, 1  ;;  %v20799_v43 = vsel %vm639_vm1, %v680_v25, %v681_v27  ;;  %v686_v49 = vrot.slane %v20788_v35, 1  ;;  %v20807_v52 = vld [vmem:[%s20571_s24 + $0x108] sm:$0xff]  ;;  %v20810_v58 = vld [vmem:[%s20571_s24 + $0x110] sm:$0xff] }
  0x83   : > { %24193 = vst [vmem:[#allocation36_spill] sm:$0xff] %v20795_v36  ;;  %24194 = vst [vmem:[#allocation37_spill] sm:$0xff] %v20799_v43  ;;  %v688_v61 = vrot.slane %v20804_v51, 1  ;;  %v690_v7 = vrot.slane %v20807_v52, 1  ;;  %v691_v11 = vrot.slane %v20810_v58, 1  ;;  %v20829_v25 = vld [vmem:[%s20571_s24 + $0x120] sm:$0xff] }
  0x84   : > { %15263 = vmatmul.mubr.msk.f32.gmra.mrb[6].mxu0 %vm785_vm2, %v20678_v40  ;;  %v20817_v60 = vsel %vm639_vm1, %v681_v27, %v683_v41  ;;  %v20821_v4 = vsel %vm639_vm1, %v685_v44, %v686_v49  ;;  %v20826_v18 = vld [vmem:[%s20571_s24 + $0x118] sm:$0x3]  ;;  %s23879_s22 = scalar_lea.sflag [#allocation5], %s529_s30  ;;  %p24633_p7 = scmp.ne.s32.totalorder %s24629_s25, 0 }
  0x85   : > { %15265 = vmatprep.mubr.msk.f32.mxu0 %vm785_vm2, %v20682_v42  ;;  %24195 = vst [vmem:[#allocation38_spill] sm:$0xff] %v20817_v60  ;;  %24196 = vst [vmem:[#allocation39_spill] sm:$0xff] %v20821_v4  ;;  %v20839_v27 = vsel %vm639_vm1, %v686_v49, %v688_v61  ;;  %v693_v41 = vrot.slane %v20826_v18, 1  ;;  %v20843_v44 = vsel %vm639_vm1, %v690_v7, %v691_v11  ;;  %v20895_v42 = vld [vmem:[%s20571_s24 + $0x168] sm:$0xff]  ;;  %v20914_v34 = vld [vmem:[%s20571_s24 + $0x178] sm:$0x3] }
  0x86   : > { %24197 = vst [vmem:[#allocation40_spill] sm:$0xff] %v20839_v27  ;;  %24198 = vst [vmem:[#allocation41_spill] sm:$0xff] %v20843_v44 }
  0x87   : > { %v20861_v49 = vsel %vm639_vm1, %v691_v11, %v693_v41 }
  0x88   : > { %15266 = vmatmul.mubr.msk.f32.gmra.mrb[8].mxu0 %vm785_vm2, %v20700_v48  ;;  %24199 = vst [vmem:[#allocation42_spill] sm:$0xff] %v20861_v49  ;;  %v20892_v48 = vld [vmem:[%s20571_s24 + $0x160] sm:$0x3] }
  0x89   : > { %15268 = vmatprep.mubr.msk.f32.mxu0 %vm785_vm2, %v20704_v50 }
  0x8c   : > { %15269 = vmatmul.mubr.msk.f32.gmra.mrb[10].mxu0 %vm785_vm2, %v20729_v57 }
  0x8d   : > { %15271 = vmatprep.mubr.msk.f32.mxu0 %vm785_vm2, %v20733_v59  ;;  %v20870_v59 = vld [vmem:[%s20571_s24 + $0x148] sm:$0x3] }
  0x8e   : > { %v703_v11 = vrot.slane %v20870_v59, 1 }
  0x90   : > { %15272 = vmatmul.mubr.msk.f32.gmra.mrb[12].mxu0 %vm785_vm2, %v20751_v3 }
  0x91   : > { %15274 = vmatprep.mubr.msk.f32.mxu0 %vm785_vm2, %v20755_v5 }
  0x94   : > { %15275 = vmatmul.mubr.msk.f32.gmra.mrb[14].mxu0 %vm785_vm2, %v20773_v17  ;;  %v20848_v17 = vld [vmem:[%s20571_s24 + $0x130] sm:$0x3] }
  0x95   : > { %15277 = vmatprep.mubr.msk.f32.mxu0 %vm785_vm2, %v20777_v19  ;;  %v698_v61 = vrot.slane %v20848_v17, 1 }
  0x98   : > { %15278 = vmatmul.mubr.msk.f32.gmra.mrb[16].mxu0 %vm785_vm2, %v20795_v36  ;;  %v695_v36 = vrot.slane %v20829_v25, 1 }
  0x99   : > { %15280 = vmatprep.mubr.msk.f32.mxu0 %vm785_vm2, %v20799_v43  ;;  %v20832_v43 = vld [vmem:[%s20571_s24 + $0x128] sm:$0xff] }
  0x9a   : > { %v696_v19 = vrot.slane %v20832_v43, 1 }
  0x9c   : > { %15281 = vmatmul.mubr.msk.f32.gmra.mrb[18].mxu0 %vm785_vm2, %v20817_v60  ;;  %v20851_v60 = vld [vmem:[%s20571_s24 + $0x138] sm:$0xff]  ;;  %v20865_v7 = vsel %vm639_vm1, %v695_v36, %v696_v19  ;;  %v20883_v36 = vsel %vm639_vm1, %v696_v19, %v698_v61 }
  0x9d   : > { %15283 = vmatprep.mubr.msk.f32.mxu0 %vm785_vm2, %v20821_v4  ;;  %v20854_v4 = vld [vmem:[%s20571_s24 + $0x140] sm:$0xff]  ;;  %24200 = vst [vmem:[#allocation43_spill] sm:$0xff] %v20865_v7  ;;  %v700_v5 = vrot.slane %v20851_v60, 1  ;;  %24201 = vst [vmem:[#allocation44_spill] sm:$0xff] %v20883_v36 }
  0x9e   : > { %v701_v3 = vrot.slane %v20854_v4, 1 }
  0xa0   : > { %15284 = vmatmul.mubr.msk.f32.gmra.mrb[20].mxu0 %vm785_vm2, %v20839_v27  ;;  %v20873_v27 = vld [vmem:[%s20571_s24 + $0x150] sm:$0xff]  ;;  %v20887_v41 = vsel %vm639_vm1, %v700_v5, %v701_v3  ;;  %v20905_v19 = vsel %vm639_vm1, %v701_v3, %v703_v11  ;;  %v708_v5 = vrot.slane %v20892_v48, 1  ;;  %v713_v11 = vrot.slane %v20914_v34, 1 }
  0xa1   : > { %15286 = vmatprep.mubr.msk.f32.mxu0 %vm785_vm2, %v20843_v44  ;;  %v20876_v44 = vld [vmem:[%s20571_s24 + $0x158] sm:$0xff]  ;;  %24202 = vst [vmem:[#allocation45_spill] sm:$0xff] %v20887_v41  ;;  %v705_v57 = vrot.slane %v20873_v27, 1  ;;  %24203 = vst [vmem:[#allocation46_spill] sm:$0xff] %v20905_v19 }
  0xa2   : > { %v706_v50 = vrot.slane %v20876_v44, 1 }
  0xa4   : > { %15287 = vmatmul.mubr.msk.f32.gmra.mrb[22].mxu0 %vm785_vm2, %v20861_v49  ;;  %v20898_v49 = vld [vmem:[%s20571_s24 + $0x170] sm:$0xff]  ;;  %v20909_v61 = vsel %vm639_vm1, %v705_v57, %v706_v50  ;;  %v20921_v3 = vsel %vm639_vm1, %v706_v50, %v708_v5  ;;  %v13261_v50 = vld [vmem:[%s23921_s1 + $0xc] sm:$0xf] }
  0xa5   : > { %15289 = vmatprep.mubr.msk.f32.mxu0 %vm785_vm2, %v20865_v7  ;;  %24204 = vst [vmem:[#allocation47_spill] sm:$0xff] %v20909_v61  ;;  %v710_v7 = vrot.slane %v20895_v42, 1  ;;  %v711_v40 = vrot.slane %v20898_v49, 1  ;;  %24205 = vst [vmem:[#allocation48_spill] sm:$0xff] %v20921_v3 }
  0xa7   : > { %v20925_v57 = vsel %vm639_vm1, %v710_v7, %v711_v40  ;;  %v1375_v7 = vrot.slane %v20589_v6, 2 }
  0xa8   : > { %15290 = vmatmul.mubr.msk.f32.gmra.mrb[24].mxu0 %vm785_vm2, %v20883_v36  ;;  %24206 = vst [vmem:[#allocation49_spill] sm:$0xff] %v20925_v57 }
  0xa9   : > { %15292 = vmatprep.mubr.msk.f32.mxu0 %vm785_vm2, %v20887_v41  ;;  %v20932_v41 = vsel %vm639_vm1, %v711_v40, %v713_v11  ;;  %v1372_v40 = vrot.slane %v20577_v1, 2  ;;  %v1377_v11 = vrot.slane %v20594_v8, 2 }
  0xaa   : > { %24207 = vst [vmem:[#allocation50_spill] sm:$0xff] %v20932_v41 }
  0xac   : > { %15293 = vmatmul.mubr.msk.f32.gmra.mrb[26].mxu0 %vm785_vm2, %v20905_v19 }
  0xad   : > { %15295 = vmatprep.mubr.msk.f32.mxu0 %vm785_vm2, %v20909_v61 }
  0xb0   : > { %15296 = vmatmul.mubr.msk.f32.gmra.mrb[28].mxu0 %vm785_vm2, %v20921_v3  ;;  %v21023_v3 = vld [vmem:[%s23921_s1 + $0x10] sm:$0xf] }
  0xb1   : > { %15298 = vmatprep.mubr.msk.f32.mxu0 %vm785_vm2, %v20925_v57  ;;  %v1382_v57 = vrot.slane %v20608_v15, 2 }
  0xb4   : > { %15299 = vmatmul.mubr.msk.f32.gmra.mrb[30].mxu0 %vm785_vm2, %v20932_v41  ;;  %v1378_v41 = vrot.slane %v20597_v9, 2 }
  0xb5   : > { %15303 = vmatprep.mubr.msk.f32.mxu0 %vm785_vm2, %v20577_v1 }
  0xb6   : > { %v21016_v6 = vsel %vm1371_vm3, %v1377_v11, %v1378_v41  ;;  %v1388_v11 = vrot.slane %v20624_v22, 2 }
  0xb8   : > { %15304 = vmatmul.mubr.msk.f32.vlgmr.msra.gmra.mrb[0].mxu0 %vm785_vm2, %v20580_v2 }
  0xb9   : > { %15352 = vmatpush3.msk.msra.mxu0 %vm850_vm0, %v20714_v54  ;;  %15306 = vmatprep.mubr.msk.f32.mxu0 %vm785_vm2, %v20594_v8  ;;  %v1373_v54 = vrot.slane %v20580_v2, 2  ;;  %v1380_v2 = vrot.slane %v20600_v10, 2 }
  0xba   : > { %15401 = vmatprep.subr.msk.mxu0 %vm850_vm0, %v13261_v50 }
  0xbb   : > { %v1374_v5 = vsel %vm1371_vm3, %v1372_v40, %v1373_v54  ;;  %v1376_v1 = vsel %vm1371_vm3, %v1373_v54, %v1375_v7  ;;  %v1383_v40 = vrot.slane %v20611_v16, 2  ;;  %v21030_v10 = vsel %vm1371_vm3, %v1378_v41, %v1380_v2 }
  0xbc   : > { %15307 = vmatmul.mubr.msk.f32.gmra.mrb[2].mxu0 %vm785_vm2, %v20597_v9  ;;  %v1385_v54 = vrot.slane %v20618_v20, 2  ;;  %v1390_v20 = vrot.slane %v20643_v29, 2 }
  0xbd   : > { %15309 = vmatprep.mubr.msk.f32.mxu0 %vm785_vm2, %v20608_v15  ;;  %v21034_v7 = vsel %vm1371_vm3, %v1382_v57, %v1383_v40 }
  0xbe   : > { %v21045_v41 = vsel %vm1371_vm3, %v1383_v40, %v1385_v54  ;;  %v21058_v2 = vsel %vm1371_vm3, %v1388_v11, %v1390_v20  ;;  %v1395_v40 = vrot.slane %v20665_v37, 2  ;;  %v1397_v54 = vrot.slane %v20668_v38, 2 }
  0xbf   : > { %v1402_v20 = vrot.slane %v20690_v46, 2 }
  0xc0   : > { %15310 = vmatmul.mubr.msk.f32.gmra.mrb[4].mxu0 %vm785_vm2, %v20611_v16 }
  0xc1   : > { %15312 = vmatprep.mubr.msk.f32.mxu0 %vm785_vm2, %v20621_v21 }
  0xc4   : > { %15313 = vmatmul.mubr.msk.f32.gmra.mrb[6].mxu0 %vm785_vm2, %v20624_v22 }
  0xc5   : > { %15315 = vmatprep.mubr.msk.f32.mxu0 %vm785_vm2, %v20646_v30 }
  0xc8   : > { %15316 = vmatmul.mubr.msk.f32.gmra.mrb[8].mxu0 %vm785_vm2, %v20649_v31 }
  0xc9   : > { %15318 = vmatprep.mubr.msk.f32.mxu0 %vm785_vm2, %v20668_v38 }
  0xcc   : > { %15319 = vmatmul.mubr.msk.f32.gmra.mrb[10].mxu0 %vm785_vm2, %v20671_v39 }
  0xcd   : > { %15321 = vmatprep.mubr.msk.f32.mxu0 %vm785_vm2, %v20690_v46 }
  0xd0   : > { %15322 = vmatmul.mubr.msk.f32.gmra.mrb[12].mxu0 %vm785_vm2, %v20693_v47 }
  0xd1   : > { %15324 = vmatprep.mubr.msk.f32.mxu0 %vm785_vm2, %v20717_v55 }
  0xd4   : > { %15325 = vmatmul.mubr.msk.f32.gmra.mrb[14].mxu0 %vm785_vm2, %v20720_v56 }
  0xd5   : > { %15327 = vmatprep.mubr.msk.f32.mxu0 %vm785_vm2, %v20741_v63 }
  0xd8   : > { %15328 = vmatmul.mubr.msk.f32.gmra.mrb[16].mxu0 %vm785_vm2, %v20744_v0 }
  0xd9   : > { %15330 = vmatprep.mubr.msk.f32.mxu0 %vm785_vm2, %v20763_v13 }
  0xdc   : > { %15331 = vmatmul.mubr.msk.f32.gmra.mrb[18].mxu0 %vm785_vm2, %v20766_v14 }
  0xdd   : > { %15333 = vmatprep.mubr.msk.f32.mxu0 %vm785_vm2, %v20785_v33 }
  0xe0   : > { %15334 = vmatmul.mubr.msk.f32.gmra.mrb[20].mxu0 %vm785_vm2, %v20788_v35 }
  0xe1   : > { %15336 = vmatprep.mubr.msk.f32.mxu0 %vm785_vm2, %v20807_v52 }
  0xe4   : > { %15337 = vmatmul.mubr.msk.f32.gmra.mrb[22].mxu0 %vm785_vm2, %v20810_v58 }
  0xe5   : > { %15339 = vmatprep.mubr.msk.f32.mxu0 %vm785_vm2, %v20829_v25 }
  0xe8   : > { %15340 = vmatmul.mubr.msk.f32.gmra.mrb[24].mxu0 %vm785_vm2, %v20832_v43 }
  0xe9   : > { %15342 = vmatprep.mubr.msk.f32.mxu0 %vm785_vm2, %v20851_v60 }
  0xec   : > { %15343 = vmatmul.mubr.msk.f32.gmra.mrb[26].mxu0 %vm785_vm2, %v20854_v4 }
  0xed   : > { %15345 = vmatprep.mubr.msk.f32.mxu0 %vm785_vm2, %v20873_v27 }
  0xf0   : > { %15346 = vmatmul.mubr.msk.f32.gmra.mrb[28].mxu0 %vm785_vm2, %v20876_v44 }
  0xf1   : > { %15348 = vmatprep.mubr.msk.f32.mxu0 %vm785_vm2, %v20895_v42 }
  0xf4   : > { %15349 = vmatmul.mubr.msk.f32.gmra.mrb[30].mxu0 %vm785_vm2, %v20898_v49 }
  0xf5   : > { %15353 = vmatprep.mubr.msk.f32.mxu0 %vm785_vm2, %v1374_v5  ;;  %v1387_v5 = vrot.slane %v20621_v21, 2 }
  0xf7   : > { %v21049_v57 = vsel %vm1371_vm3, %v1387_v5, %v1388_v11  ;;  %v1398_v5 = vrot.slane %v20671_v39, 2  ;;  %v1400_v11 = vrot.slane %v20687_v45, 2 }
  0xf8   : > { %15354 = vmatmul.mubr.msk.f32.vlgmr.msra.gmra.mrb[0].mxu0 %vm785_vm2, %v1376_v1  ;;  %24208 = vst [vmem:[#allocation51_spill] sm:$0xff] %v21049_v57  ;;  %v1393_v1 = vrot.slane %v20649_v31, 2 }
  0xf9   : > { %15402 = vmatpush3.msk.msra.mxu0 %vm850_vm0, %v13261_v50  ;;  %15356 = vmatprep.mubr.msk.f32.mxu0 %vm785_vm2, %v21016_v6  ;;  %v1392_v50 = vrot.slane %v20646_v30, 2  ;;  %v21075_v37 = vsel %vm1371_vm3, %v1397_v54, %v1398_v5  ;;  %v1408_v54 = vrot.slane %v20720_v56, 2 }
  0xfa   : > { %15451 = vmatprep.subr.msk.mxu0 %vm850_vm0, %v21023_v3  ;;  %24210 = vst [vmem:[#allocation53_spill] sm:$0xff] %v21075_v37 }
  0xfb   : > { %v21062_v29 = vsel %vm1371_vm3, %v1392_v50, %v1393_v1  ;;  %v1403_v50 = vrot.slane %v20693_v47, 2 }
  0xfc   : > { %15357 = vmatmul.mubr.msk.f32.gmra.mrb[2].mxu0 %vm785_vm2, %v21030_v10  ;;  %24209 = vst [vmem:[#allocation52_spill] sm:$0xff] %v21062_v29 }
  0xfd   : > { %15359 = vmatprep.mubr.msk.f32.mxu0 %vm785_vm2, %v21034_v7  ;;  %v21088_v45 = vsel %vm1371_vm3, %v1402_v20, %v1403_v50  ;;  %v1413_v20 = vrot.slane %v20744_v0, 2 }
  0xfe   : > { %24211 = vst [vmem:[#allocation54_spill] sm:$0xff] %v21088_v45 }
 0x100   : > { %15360 = vmatmul.mubr.msk.f32.gmra.mrb[4].mxu0 %vm785_vm2, %v21045_v41 }
 0x101   : > { %15362 = vmatprep.mubr.msk.f32.mxu0 %vm785_vm2, %v21049_v57  ;;  %v21071_v57 = vsel %vm1371_vm3, %v1393_v1, %v1395_v40  ;;  %v1405_v1 = vrot.slane %v20709_v53, 2  ;;  %v1407_v40 = vrot.slane %v20717_v55, 2 }
 0x103   : > { %v21101_v53 = vsel %vm1371_vm3, %v1407_v40, %v1408_v54  ;;  %v1418_v40 = vrot.slane %v20766_v14, 2 }
 0x104   : > { %15363 = vmatmul.mubr.msk.f32.gmra.mrb[6].mxu0 %vm785_vm2, %v21058_v2  ;;  %24212 = vst [vmem:[#allocation55_spill] sm:$0xff] %v21101_v53 }
 0x105   : > { %15365 = vmatprep.mubr.msk.f32.mxu0 %vm785_vm2, %v21062_v29  ;;  %v21084_v29 = vsel %vm1371_vm3, %v1398_v5, %v1400_v11  ;;  %v1410_v5 = vrot.slane %v20738_v62, 2  ;;  %v1412_v11 = vrot.slane %v20741_v63, 2 }
 0x107   : > { %v21114_v62 = vsel %vm1371_vm3, %v1412_v11, %v1413_v20  ;;  %v1423_v11 = vrot.slane %v20788_v35, 2 }
 0x108   : > { %15366 = vmatmul.mubr.msk.f32.gmra.mrb[8].mxu0 %vm785_vm2, %v21071_v57  ;;  %24213 = vst [vmem:[#allocation56_spill] sm:$0xff] %v21114_v62 }
 0x109   : > { %15368 = vmatprep.mubr.msk.f32.mxu0 %vm785_vm2, %v21075_v37  ;;  %v21097_v37 = vsel %vm1371_vm3, %v1403_v50, %v1405_v1  ;;  %v1415_v50 = vrot.slane %v20760_v12, 2  ;;  %v1417_v1 = vrot.slane %v20763_v13, 2 }
 0x10b   : > { %v21127_v12 = vsel %vm1371_vm3, %v1417_v1, %v1418_v40  ;;  %v1428_v1 = vrot.slane %v20810_v58, 2 }
 0x10c   : > { %15369 = vmatmul.mubr.msk.f32.gmra.mrb[10].mxu0 %vm785_vm2, %v21084_v29  ;;  %24214 = vst [vmem:[#allocation57_spill] sm:$0xff] %v21127_v12 }
 0x10d   : > { %15371 = vmatprep.mubr.msk.f32.mxu0 %vm785_vm2, %v21088_v45  ;;  %v21110_v45 = vsel %vm1371_vm3, %v1408_v54, %v1410_v5  ;;  %v1420_v54 = vrot.slane %v20782_v28, 2  ;;  %v1422_v5 = vrot.slane %v20785_v33, 2 }
 0x10f   : > { %v21140_v28 = vsel %vm1371_vm3, %v1422_v5, %v1423_v11  ;;  %v1433_v5 = vrot.slane %v20832_v43, 2 }
 0x110   : > { %15372 = vmatmul.mubr.msk.f32.gmra.mrb[12].mxu0 %vm785_vm2, %v21097_v37  ;;  %24215 = vst [vmem:[#allocation58_spill] sm:$0xff] %v21140_v28 }
 0x111   : > { %15374 = vmatprep.mubr.msk.f32.mxu0 %vm785_vm2, %v21101_v53  ;;  %v21123_v53 = vsel %vm1371_vm3, %v1413_v20, %v1415_v50  ;;  %v1425_v20 = vrot.slane %v20804_v51, 2  ;;  %v1427_v50 = vrot.slane %v20807_v52, 2 }
 0x113   : > { %v21153_v51 = vsel %vm1371_vm3, %v1427_v50, %v1428_v1  ;;  %v1438_v50 = vrot.slane %v20854_v4, 2 }
 0x114   : > { %15375 = vmatmul.mubr.msk.f32.gmra.mrb[14].mxu0 %vm785_vm2, %v21110_v45  ;;  %24217 = vst [vmem:[#allocation60_spill] sm:$0xff] %v21153_v51 }
 0x115   : > { %15377 = vmatprep.mubr.msk.f32.mxu0 %vm785_vm2, %v21114_v62  ;;  %v21136_v62 = vsel %vm1371_vm3, %v1418_v40, %v1420_v54  ;;  %v1430_v40 = vrot.slane %v20826_v18, 2  ;;  %v1432_v54 = vrot.slane %v20829_v25, 2 }
 0x117   : > { %v21166_v18 = vsel %vm1371_vm3, %v1432_v54, %v1433_v5  ;;  %v1443_v54 = vrot.slane %v20876_v44, 2 }
 0x118   : > { %15378 = vmatmul.mubr.msk.f32.gmra.mrb[16].mxu0 %vm785_vm2, %v21123_v53  ;;  %24218 = vst [vmem:[#allocation61_spill] sm:$0xff] %v21166_v18 }
 0x119   : > { %15380 = vmatprep.mubr.msk.f32.mxu0 %vm785_vm2, %v21127_v12  ;;  %v21149_v12 = vsel %vm1371_vm3, %v1423_v11, %v1425_v20  ;;  %v1435_v11 = vrot.slane %v20848_v17, 2  ;;  %v1437_v20 = vrot.slane %v20851_v60, 2 }
 0x11a   : > { %24216 = vst [vmem:[#allocation59_spill] sm:$0xff] %v21149_v12 }
 0x11b   : > { %v21179_v17 = vsel %vm1371_vm3, %v1437_v20, %v1438_v50  ;;  %v1448_v20 = vrot.slane %v20898_v49, 2 }
 0x11c   : > { %15381 = vmatmul.mubr.msk.f32.gmra.mrb[18].mxu0 %vm785_vm2, %v21136_v62  ;;  %24220 = vst [vmem:[#allocation63_spill] sm:$0xff] %v21179_v17 }
 0x11d   : > { %15383 = vmatprep.mubr.msk.f32.mxu0 %vm785_vm2, %v21140_v28  ;;  %v21162_v28 = vsel %vm1371_vm3, %v1428_v1, %v1430_v40  ;;  %v1440_v1 = vrot.slane %v20870_v59, 2  ;;  %v1442_v40 = vrot.slane %v20873_v27, 2 }
 0x11f   : > { %v21192_v59 = vsel %vm1371_vm3, %v1442_v40, %v1443_v54  ;;  %v24222_v40 = vld [vmem:[#allocation25_spill] sm:$0xff] }
 0x120   : > { %15384 = vmatmul.mubr.msk.f32.gmra.mrb[20].mxu0 %vm785_vm2, %v21149_v12  ;;  %24221 = vst [vmem:[#allocation64_spill] sm:$0xff] %v21192_v59 }
 0x121   : > { %15386 = vmatprep.mubr.msk.f32.mxu0 %vm785_vm2, %v21153_v51  ;;  %v21175_v51 = vsel %vm1371_vm3, %v1433_v5, %v1435_v11  ;;  %v1445_v5 = vrot.slane %v20892_v48, 2  ;;  %v1447_v11 = vrot.slane %v20895_v42, 2 }
 0x122   : > { %24219 = vst [vmem:[#allocation62_spill] sm:$0xff] %v21175_v51 }
 0x123   : > { %v21205_v48 = vsel %vm1371_vm3, %v1447_v11, %v1448_v20  ;;  %v24225_v11 = vld [vmem:[#allocation28_spill] sm:$0xff] }
 0x124   : > { %15387 = vmatmul.mubr.msk.f32.gmra.mrb[22].mxu0 %vm785_vm2, %v21162_v28 }
 0x125   : > { %15389 = vmatprep.mubr.msk.f32.mxu0 %vm785_vm2, %v21166_v18  ;;  %v21188_v18 = vsel %vm1371_vm3, %v1438_v50, %v1440_v1  ;;  %v1450_v50 = vrot.slane %v20914_v34, 2  ;;  %v13329_v34 = vld [vmem:[%s23921_s1 + $0x14] sm:$0xf] }
 0x127   : > { %v21212_v1 = vsel %vm1371_vm3, %v1448_v20, %v1450_v50  ;;  %v24226_v20 = vld [vmem:[#allocation29_spill] sm:$0xff]  ;;  %v24227_v50 = vld [vmem:[#allocation30_spill] sm:$0xff] }
 0x128   : > { %15390 = vmatmul.mubr.msk.f32.gmra.mrb[24].mxu0 %vm785_vm2, %v21175_v51 }
 0x129   : > { %15392 = vmatprep.mubr.msk.f32.mxu0 %vm785_vm2, %v21179_v17  ;;  %v21201_v17 = vsel %vm1371_vm3, %v1443_v54, %v1445_v5  ;;  %v24223_v54 = vld [vmem:[#allocation26_spill] sm:$0xff]  ;;  %v24224_v5 = vld [vmem:[#allocation27_spill] sm:$0xff] }
 0x12c   : > { %15393 = vmatmul.mubr.msk.f32.gmra.mrb[26].mxu0 %vm785_vm2, %v21188_v18 }
 0x12d   : > { %15395 = vmatprep.mubr.msk.f32.mxu0 %vm785_vm2, %v21192_v59 }
 0x130   : > { %15396 = vmatmul.mubr.msk.f32.gmra.mrb[28].mxu0 %vm785_vm2, %v21201_v17 }
 0x131   : > { %15398 = vmatprep.mubr.msk.f32.mxu0 %vm785_vm2, %v21205_v48 }
 0x134   : > { %15399 = vmatmul.mubr.msk.f32.gmra.mrb[30].mxu0 %vm785_vm2, %v21212_v1 }
 0x135   : > { %15403 = vmatprep.mubr.msk.f32.mxu0 %vm785_vm2, %v20594_v8  ;;  %v21281_v8 = vld [vmem:[%s20571_s24 + $0x180] sm:$0xff] }
 0x138   : > { %15404 = vmatmul.mubr.msk.f32.vlgmr.msra.gmra.mrb[0].mxu0 %vm785_vm2, %v20597_v9  ;;  %v21288_v9 = vld [vmem:[%s20571_s24 + $0x188] sm:$0xff] }
 0x139   : > { %15452 = vmatpush3.msk.msra.mxu0 %vm850_vm0, %v21023_v3  ;;  %15406 = vmatprep.mubr.msk.f32.mxu0 %vm785_vm2, %v20608_v15  ;;  %v13363_v3 = vld [vmem:[%s23921_s1 + $0x18] sm:$0xf] }
 0x13a   : > { %15501 = vmatprep.subr.msk.mxu0 %vm850_vm0, %v13329_v34 }
 0x13c   : > { %15407 = vmatmul.mubr.msk.f32.gmra.mrb[2].mxu0 %vm785_vm2, %v20611_v16 }
 0x13d   : > { %15409 = vmatprep.mubr.msk.f32.mxu0 %vm785_vm2, %v20621_v21 }
 0x140   : > { %15410 = vmatmul.mubr.msk.f32.gmra.mrb[4].mxu0 %vm785_vm2, %v20624_v22 }
 0x141   : > { %15412 = vmatprep.mubr.msk.f32.mxu0 %vm785_vm2, %v20646_v30 }
 0x144   : > { %15413 = vmatmul.mubr.msk.f32.gmra.mrb[6].mxu0 %vm785_vm2, %v20649_v31 }
 0x145   : > { %15415 = vmatprep.mubr.msk.f32.mxu0 %vm785_vm2, %v20668_v38 }
 0x148   : > { %15416 = vmatmul.mubr.msk.f32.gmra.mrb[8].mxu0 %vm785_vm2, %v20671_v39 }
 0x149   : > { %15418 = vmatprep.mubr.msk.f32.mxu0 %vm785_vm2, %v20690_v46 }
 0x14c   : > { %15419 = vmatmul.mubr.msk.f32.gmra.mrb[10].mxu0 %vm785_vm2, %v20693_v47 }
 0x14d   : > { %15421 = vmatprep.mubr.msk.f32.mxu0 %vm785_vm2, %v20717_v55 }
 0x150   : > { %15422 = vmatmul.mubr.msk.f32.gmra.mrb[12].mxu0 %vm785_vm2, %v20720_v56 }
 0x151   : > { %15424 = vmatprep.mubr.msk.f32.mxu0 %vm785_vm2, %v20741_v63 }
 0x154   : > { %15425 = vmatmul.mubr.msk.f32.gmra.mrb[14].mxu0 %vm785_vm2, %v20744_v0 }
 0x155   : > { %15427 = vmatprep.mubr.msk.f32.mxu0 %vm785_vm2, %v20763_v13 }
 0x158   : > { %15428 = vmatmul.mubr.msk.f32.gmra.mrb[16].mxu0 %vm785_vm2, %v20766_v14 }
 0x159   : > { %15430 = vmatprep.mubr.msk.f32.mxu0 %vm785_vm2, %v20785_v33 }
 0x15c   : > { %15431 = vmatmul.mubr.msk.f32.gmra.mrb[18].mxu0 %vm785_vm2, %v20788_v35 }
 0x15d   : > { %15433 = vmatprep.mubr.msk.f32.mxu0 %vm785_vm2, %v20807_v52 }
 0x160   : > { %15434 = vmatmul.mubr.msk.f32.gmra.mrb[20].mxu0 %vm785_vm2, %v20810_v58 }
 0x161   : > { %15436 = vmatprep.mubr.msk.f32.mxu0 %vm785_vm2, %v20829_v25 }
 0x164   : > { %15437 = vmatmul.mubr.msk.f32.gmra.mrb[22].mxu0 %vm785_vm2, %v20832_v43 }
 0x165   : > { %15439 = vmatprep.mubr.msk.f32.mxu0 %vm785_vm2, %v20851_v60 }
 0x168   : > { %15440 = vmatmul.mubr.msk.f32.gmra.mrb[24].mxu0 %vm785_vm2, %v20854_v4 }
 0x169   : > { %15442 = vmatprep.mubr.msk.f32.mxu0 %vm785_vm2, %v20873_v27 }
 0x16c   : > { %15443 = vmatmul.mubr.msk.f32.gmra.mrb[26].mxu0 %vm785_vm2, %v20876_v44 }
 0x16d   : > { %15445 = vmatprep.mubr.msk.f32.mxu0 %vm785_vm2, %v20895_v42 }
 0x170   : > { %15446 = vmatmul.mubr.msk.f32.gmra.mrb[28].mxu0 %vm785_vm2, %v20898_v49 }
 0x171   : > { %15448 = vmatprep.mubr.msk.f32.mxu0 %vm785_vm2, %v21281_v8 }
 0x174   : > { %15449 = vmatmul.mubr.msk.f32.gmra.mrb[30].mxu0 %vm785_vm2, %v21288_v9 }
 0x175   : > { %15453 = vmatprep.mubr.msk.f32.mxu0 %vm785_vm2, %v20628_v23  ;;  %v24230_v23 = vld [vmem:[#allocation33_spill] sm:$0xff] }
 0x178   : > { %15454 = vmatmul.mubr.msk.f32.vlgmr.msra.gmra.mrb[0].mxu0 %vm785_vm2, %v20634_v24  ;;  %v24229_v24 = vld [vmem:[#allocation32_spill] sm:$0xff] }
 0x179   : > { %15502 = vmatpush3.msk.msra.mxu0 %vm850_vm0, %v13329_v34  ;;  %15456 = vmatprep.mubr.msk.f32.mxu0 %vm785_vm2, %v20638_v26  ;;  %v24228_v34 = vld [vmem:[#allocation31_spill] sm:$0xff] }
 0x17a   : > { %15551 = vmatprep.subr.msk.mxu0 %vm850_vm0, %v13363_v3 }
 0x17c   : > { %15457 = vmatmul.mubr.msk.f32.gmra.mrb[2].mxu0 %vm785_vm2, %v20656_v32 }
 0x17d   : > { %15459 = vmatprep.mubr.msk.f32.mxu0 %vm785_vm2, %v24222_v40 }
 0x180   : > { %15460 = vmatmul.mubr.msk.f32.gmra.mrb[4].mxu0 %vm785_vm2, %v24223_v54  ;;  %v24231_v54 = vld [vmem:[#allocation34_spill] sm:$0xff] }
 0x181   : > { %15462 = vmatprep.mubr.msk.f32.mxu0 %vm785_vm2, %v24224_v5  ;;  %v24232_v5 = vld [vmem:[#allocation35_spill] sm:$0xff] }
 0x184   : > { %15463 = vmatmul.mubr.msk.f32.gmra.mrb[6].mxu0 %vm785_vm2, %v24225_v11  ;;  %v24239_v11 = vld [vmem:[#allocation42_spill] sm:$0xff] }
 0x185   : > { %15465 = vmatprep.mubr.msk.f32.mxu0 %vm785_vm2, %v24226_v20  ;;  %v24233_v20 = vld [vmem:[#allocation36_spill] sm:$0xff] }
 0x188   : > { %15466 = vmatmul.mubr.msk.f32.gmra.mrb[8].mxu0 %vm785_vm2, %v24227_v50  ;;  %v24234_v50 = vld [vmem:[#allocation37_spill] sm:$0xff] }
 0x189   : > { %15468 = vmatprep.mubr.msk.f32.mxu0 %vm785_vm2, %v24228_v34  ;;  %v24235_v34 = vld [vmem:[#allocation38_spill] sm:$0xff] }
 0x18c   : > { %15469 = vmatmul.mubr.msk.f32.gmra.mrb[10].mxu0 %vm785_vm2, %v24229_v24  ;;  %v24236_v24 = vld [vmem:[#allocation39_spill] sm:$0xff] }
 0x18d   : > { %15471 = vmatprep.mubr.msk.f32.mxu0 %vm785_vm2, %v24230_v23  ;;  %v24237_v23 = vld [vmem:[#allocation40_spill] sm:$0xff] }
 0x190   : > { %15472 = vmatmul.mubr.msk.f32.gmra.mrb[12].mxu0 %vm785_vm2, %v24231_v54  ;;  %v24238_v54 = vld [vmem:[#allocation41_spill] sm:$0xff] }
 0x191   : > { %15474 = vmatprep.mubr.msk.f32.mxu0 %vm785_vm2, %v24232_v5  ;;  %v24240_v5 = vld [vmem:[#allocation43_spill] sm:$0xff] }
 0x194   : > { %15475 = vmatmul.mubr.msk.f32.gmra.mrb[14].mxu0 %vm785_vm2, %v24233_v20 }
 0x195   : > { %15477 = vmatprep.mubr.msk.f32.mxu0 %vm785_vm2, %v24234_v50  ;;  %v24241_v50 = vld [vmem:[#allocation45_spill] sm:$0xff] }
 0x198   : > { %15478 = vmatmul.mubr.msk.f32.gmra.mrb[16].mxu0 %vm785_vm2, %v24235_v34  ;;  %v24245_v34 = vld [vmem:[#allocation50_spill] sm:$0xff] }
 0x199   : > { %15480 = vmatprep.mubr.msk.f32.mxu0 %vm785_vm2, %v24236_v24  ;;  %v24242_v24 = vld [vmem:[#allocation48_spill] sm:$0xff] }
 0x19c   : > { %15481 = vmatmul.mubr.msk.f32.gmra.mrb[18].mxu0 %vm785_vm2, %v24237_v23  ;;  %v716_v23 = vrot.slane %v21288_v9, 1 }
 0x19d   : > { %15483 = vmatprep.mubr.msk.f32.mxu0 %vm785_vm2, %v24238_v54  ;;  %v715_v54 = vrot.slane %v21281_v8, 1 }
 0x1a0   : > { %15484 = vmatmul.mubr.msk.f32.gmra.mrb[20].mxu0 %vm785_vm2, %v24239_v11  ;;  %v587_v11 = vld [vmem:[%s20571_s24 + $0x190] sm:$0x3] }
 0x1a1   : > { %15486 = vmatprep.mubr.msk.f32.mxu0 %vm785_vm2, %v24240_v5  ;;  %v24243_v5 = vld [vmem:[#allocation49_spill] sm:$0xff] }
 0x1a4   : > { %15487 = vmatmul.mubr.msk.f32.gmra.mrb[22].mxu0 %vm785_vm2, %v20883_v36  ;;  %v718_v36 = vrot.slane %v587_v11, 1 }
 0x1a5   : > { %15489 = vmatprep.mubr.msk.f32.mxu0 %vm785_vm2, %v24241_v50  ;;  %v21359_v50 = vsel %vm639_vm1, %v715_v54, %v716_v23  ;;  %v13397_v54 = vld [vmem:[%s23921_s1 + $0x1c] sm:$0xf] }
 0x1a6   : > { %24244 = vst [vmem:[#allocation65_spill] sm:$0xff] %v21359_v50 }
 0x1a8   : > { %15490 = vmatmul.mubr.msk.f32.gmra.mrb[24].mxu0 %vm785_vm2, %v20905_v19 }
 0x1a9   : > { %15492 = vmatprep.mubr.msk.f32.mxu0 %vm785_vm2, %v20909_v61  ;;  %v21366_v61 = vsel %vm639_vm1, %v716_v23, %v718_v36  ;;  %v24247_v23 = vld [vmem:[#allocation51_spill] sm:$0xff]  ;;  %v24248_v36 = vld [vmem:[#allocation52_spill] sm:$0xff] }
 0x1aa   : > { %24246 = vst [vmem:[#allocation66_spill] sm:$0xff] %v21366_v61 }
 0x1ac   : > { %15493 = vmatmul.mubr.msk.f32.gmra.mrb[26].mxu0 %vm785_vm2, %v24242_v24 }
 0x1ad   : > { %15495 = vmatprep.mubr.msk.f32.mxu0 %vm785_vm2, %v24243_v5 }
 0x1b0   : > { %15496 = vmatmul.mubr.msk.f32.gmra.mrb[28].mxu0 %vm785_vm2, %v24245_v34 }
 0x1b1   : > { %15498 = vmatprep.mubr.msk.f32.mxu0 %vm785_vm2, %v21359_v50 }
 0x1b4   : > { %15499 = vmatmul.mubr.msk.f32.gmra.mrb[30].mxu0 %vm785_vm2, %v21366_v61 }
 0x1b5   : > { %15503 = vmatprep.mubr.msk.f32.mxu0 %vm785_vm2, %v21016_v6  ;;  %v24249_v6 = vld [vmem:[#allocation53_spill] sm:$0xff] }
 0x1b8   : > { %15504 = vmatmul.mubr.msk.f32.vlgmr.msra.gmra.mrb[0].mxu0 %vm785_vm2, %v21030_v10  ;;  %v24250_v10 = vld [vmem:[#allocation54_spill] sm:$0xff] }
 0x1b9   : > { %15552 = vmatpush3.msk.msra.mxu0 %vm850_vm0, %v13363_v3  ;;  %15506 = vmatprep.mubr.msk.f32.mxu0 %vm785_vm2, %v21034_v7  ;;  %v24251_v3 = vld [vmem:[#allocation55_spill] sm:$0xff] }
 0x1ba   : > { %15601 = vmatprep.subr.msk.mxu0 %vm850_vm0, %v13397_v54 }
 0x1bc   : > { %15507 = vmatmul.mubr.msk.f32.gmra.mrb[2].mxu0 %vm785_vm2, %v21045_v41 }
 0x1bd   : > { %15509 = vmatprep.mubr.msk.f32.mxu0 %vm785_vm2, %v24247_v23 }
 0x1c0   : > { %15510 = vmatmul.mubr.msk.f32.gmra.mrb[4].mxu0 %vm785_vm2, %v21058_v2 }
 0x1c1   : > { %15512 = vmatprep.mubr.msk.f32.mxu0 %vm785_vm2, %v24248_v36  ;;  %v24252_v36 = vld [vmem:[#allocation56_spill] sm:$0xff] }
 0x1c4   : > { %15513 = vmatmul.mubr.msk.f32.gmra.mrb[6].mxu0 %vm785_vm2, %v21071_v57 }
 0x1c5   : > { %15515 = vmatprep.mubr.msk.f32.mxu0 %vm785_vm2, %v24249_v6  ;;  %v24253_v6 = vld [vmem:[#allocation57_spill] sm:$0xff] }
 0x1c8   : > { %15516 = vmatmul.mubr.msk.f32.gmra.mrb[8].mxu0 %vm785_vm2, %v21084_v29 }
 0x1c9   : > { %15518 = vmatprep.mubr.msk.f32.mxu0 %vm785_vm2, %v24250_v10  ;;  %v24254_v10 = vld [vmem:[#allocation58_spill] sm:$0xff] }
 0x1cc   : > { %15519 = vmatmul.mubr.msk.f32.gmra.mrb[10].mxu0 %vm785_vm2, %v21097_v37 }
 0x1cd   : > { %15521 = vmatprep.mubr.msk.f32.mxu0 %vm785_vm2, %v24251_v3  ;;  %v24255_v3 = vld [vmem:[#allocation60_spill] sm:$0xff] }
 0x1d0   : > { %15522 = vmatmul.mubr.msk.f32.gmra.mrb[12].mxu0 %vm785_vm2, %v21110_v45 }
 0x1d1   : > { %15524 = vmatprep.mubr.msk.f32.mxu0 %vm785_vm2, %v24252_v36  ;;  %v24256_v36 = vld [vmem:[#allocation61_spill] sm:$0xff] }
 0x1d4   : > { %15525 = vmatmul.mubr.msk.f32.gmra.mrb[14].mxu0 %vm785_vm2, %v21123_v53 }
 0x1d5   : > { %15527 = vmatprep.mubr.msk.f32.mxu0 %vm785_vm2, %v24253_v6  ;;  %v24257_v6 = vld [vmem:[#allocation63_spill] sm:$0xff] }
 0x1d8   : > { %15528 = vmatmul.mubr.msk.f32.gmra.mrb[16].mxu0 %vm785_vm2, %v21136_v62 }
 0x1d9   : > { %15530 = vmatprep.mubr.msk.f32.mxu0 %vm785_vm2, %v24254_v10 }
 0x1dc   : > { %15531 = vmatmul.mubr.msk.f32.gmra.mrb[18].mxu0 %vm785_vm2, %v21149_v12  ;;  %v2311_v12 = vrot.slane %v21288_v9, 2 }
 0x1dd   : > { %15533 = vmatprep.mubr.msk.f32.mxu0 %vm785_vm2, %v24255_v3  ;;  %v2310_v3 = vrot.slane %v21281_v8, 2 }
 0x1e0   : > { %15534 = vmatmul.mubr.msk.f32.gmra.mrb[20].mxu0 %vm785_vm2, %v21162_v28 }
 0x1e1   : > { %15536 = vmatprep.mubr.msk.f32.mxu0 %vm785_vm2, %v24256_v36  ;;  %v21436_v36 = vsel %vm1371_vm3, %v2310_v3, %v2311_v12  ;;  %v24270_v3 = vld [vmem:[#allocation39_spill] sm:$0xff] }
 0x1e4   : > { %15537 = vmatmul.mubr.msk.f32.gmra.mrb[22].mxu0 %vm785_vm2, %v21175_v51  ;;  %v2313_v51 = vrot.slane %v587_v11, 2  ;;  %v21452_v11 = vld [vmem:[%s23921_s1 + $0x20] sm:$0xf] }
 0x1e5   : > { %15539 = vmatprep.mubr.msk.f32.mxu0 %vm785_vm2, %v24257_v6 }
 0x1e8   : > { %15540 = vmatmul.mubr.msk.f32.gmra.mrb[24].mxu0 %vm785_vm2, %v21188_v18 }
 0x1e9   : > { %15542 = vmatprep.mubr.msk.f32.mxu0 %vm785_vm2, %v21192_v59  ;;  %v21443_v59 = vsel %vm1371_vm3, %v2311_v12, %v2313_v51  ;;  %v24265_v12 = vld [vmem:[#allocation33_spill] sm:$0xff]  ;;  %v24266_v51 = vld [vmem:[#allocation34_spill] sm:$0xff] }
 0x1ec   : > { %15543 = vmatmul.mubr.msk.f32.gmra.mrb[26].mxu0 %vm785_vm2, %v21201_v17 }
 0x1ed   : > { %15545 = vmatprep.mubr.msk.f32.mxu0 %vm785_vm2, %v21205_v48 }
 0x1f0   : > { %15546 = vmatmul.mubr.msk.f32.gmra.mrb[28].mxu0 %vm785_vm2, %v21212_v1 }
 0x1f1   : > { %15548 = vmatprep.mubr.msk.f32.mxu0 %vm785_vm2, %v21436_v36 }
 0x1f4   : > { %15549 = vmatmul.mubr.msk.f32.gmra.mrb[30].mxu0 %vm785_vm2, %v21443_v59 }
 0x1f5   : > { %15553 = vmatprep.mubr.msk.f32.mxu0 %vm785_vm2, %v20608_v15  ;;  %v21514_v15 = vld [vmem:[%s20571_s24 + $0x198] sm:$0xff] }
 0x1f8   : > { %15554 = vmatmul.mubr.msk.f32.vlgmr.msra.gmra.mrb[0].mxu0 %vm785_vm2, %v20611_v16  ;;  %v21521_v16 = vld [vmem:[%s20571_s24 + $0x1a0] sm:$0xff] }
 0x1f9   : > { %15602 = vmatpush3.msk.msra.mxu0 %vm850_vm0, %v13397_v54  ;;  %15556 = vmatprep.mubr.msk.f32.mxu0 %vm785_vm2, %v20621_v21  ;;  %v3641_v21 = vld [vmem:[#allocation3 + $0x80] sm:$0xff]  ;;  %v24269_v54 = vld [vmem:[#allocation38_spill] sm:$0xff] }
 0x1fa   : > { %15651 = vmatprep.subr.msk.mxu0 %vm850_vm0, %v21452_v11 }
 0x1fc   : > { %15557 = vmatmul.mubr.msk.f32.gmra.mrb[2].mxu0 %vm785_vm2, %v20624_v22  ;;  %v3642_v22 = vld [vmem:[#allocation3 + $0x88] sm:$0xff] }
 0x1fd   : > { %15559 = vmatprep.mubr.msk.f32.mxu0 %vm785_vm2, %v20646_v30  ;;  %v3643_v30 = vld [vmem:[#allocation3 + $0x90] sm:$0xff] }
 0x200   : > { %15560 = vmatmul.mubr.msk.f32.gmra.mrb[4].mxu0 %vm785_vm2, %v20649_v31  ;;  %v18041_v31 = vpack.c.bf16 %v3642_v22, %v3641_v21  ;;  %v24272_v21 = vld [vmem:[#allocation41_spill] sm:$0xff]  ;;  %v24273_v22 = vld [vmem:[#allocation42_spill] sm:$0xff] }
 0x201   : > { %15562 = vmatprep.mubr.msk.f32.mxu0 %vm785_vm2, %v20668_v38  ;;  %v3644_v38 = vld [vmem:[#allocation3 + $0x98] sm:$0xff] }
 0x202   : > { %18042 = vmatprep.subr.bf16.mxu1 %v18041_v31 }
 0x203   : > { %18044 = vmatpush3.bf16.msra.mxu1 %v18041_v31  ;;  %v24275_v31 = vld [vmem:[#allocation44_spill] sm:$0xff] }
 0x204   : > { %15563 = vmatmul.mubr.msk.f32.gmra.mrb[6].mxu0 %vm785_vm2, %v20671_v39  ;;  %v20325_v39 = vmov 0.0  }
 0x205   : > { %15565 = vmatprep.mubr.msk.f32.mxu0 %vm785_vm2, %v20690_v46  ;;  %724 = vst [vmem:[#allocation2 + $0x20] sm:$0xff] %v20325_v39  ;;  %725 = vst [vmem:[#allocation2 + $0x28] sm:$0x3] %v20325_v39  ;;  %v3645_v46 = vld [vmem:[#allocation3 + $0xa0] sm:$0xff] }
 0x206   : > { %720 = vst [vmem:[#allocation2] sm:$0xff] %v20325_v39  ;;  %721 = vst [vmem:[#allocation2 + $0x8] sm:$0xff] %v20325_v39 }
 0x207   : > { %722 = vst [vmem:[#allocation2 + $0x10] sm:$0x3] %v20325_v39  ;;  %723 = vst [vmem:[#allocation2 + $0x18] sm:$0xff] %v20325_v39 }
 0x208   : > { %15566 = vmatmul.mubr.msk.f32.gmra.mrb[8].mxu0 %vm785_vm2, %v20693_v47  ;;  %726 = vst [vmem:[#allocation2 + $0x30] sm:$0xff] %v20325_v39  ;;  %727 = vst [vmem:[#allocation2 + $0x38] sm:$0xff] %v20325_v39  ;;  %v3646_v47 = vld [vmem:[#allocation3 + $0xa8] sm:$0xff] }
 0x209   : > { %15568 = vmatprep.mubr.msk.f32.mxu0 %vm785_vm2, %v20717_v55  ;;  %728 = vst [vmem:[#allocation2 + $0x40] sm:$0x3] %v20325_v39  ;;  %729 = vst [vmem:[#allocation2 + $0x48] sm:$0xff] %v20325_v39  ;;  %v18049_v55 = vpack.c.bf16 %v3646_v47, %v3645_v46  ;;  %v2850_v46 = vrot.slane %v21514_v15, 1  ;;  %v2851_v47 = vrot.slane %v21521_v16, 1 }
 0x20a   : > { %730 = vst [vmem:[#allocation2 + $0x50] sm:$0xff] %v20325_v39  ;;  %731 = vst [vmem:[#allocation2 + $0x58] sm:$0x3] %v20325_v39 }
 0x20b   : > { %732 = vst [vmem:[#allocation2 + $0x60] sm:$0xff] %v20325_v39  ;;  %733 = vst [vmem:[#allocation2 + $0x68] sm:$0xff] %v20325_v39 }
 0x20c   : > { %15569 = vmatmul.mubr.msk.f32.gmra.mrb[10].mxu0 %vm785_vm2, %v20720_v56  ;;  %734 = vst [vmem:[#allocation2 + $0x70] sm:$0x3] %v20325_v39  ;;  %735 = vst [vmem:[#allocation2 + $0x78] sm:$0xff] %v20325_v39  ;;  %v3647_v56 = vld [vmem:[#allocation3 + $0xb0] sm:$0xff] }
 0x20d   : > { %15571 = vmatprep.mubr.msk.f32.mxu0 %vm785_vm2, %v20741_v63  ;;  %736 = vst [vmem:[#allocation2 + $0x80] sm:$0xff] %v20325_v39  ;;  %737 = vst [vmem:[#allocation2 + $0x88] sm:$0x3] %v20325_v39  ;;  %v3648_v63 = vld [vmem:[#allocation3 + $0xb8] sm:$0xff] }
 0x20e   : > { %738 = vst [vmem:[#allocation2 + $0x90] sm:$0xff] %v20325_v39  ;;  %739 = vst [vmem:[#allocation2 + $0x98] sm:$0xff] %v20325_v39 }
 0x20f   : > { %740 = vst [vmem:[#allocation2 + $0xa0] sm:$0x3] %v20325_v39  ;;  %741 = vst [vmem:[#allocation2 + $0xa8] sm:$0xff] %v20325_v39 }
 0x210   : > { %15572 = vmatmul.mubr.msk.f32.gmra.mrb[12].mxu0 %vm785_vm2, %v20744_v0  ;;  %742 = vst [vmem:[#allocation2 + $0xb0] sm:$0xff] %v20325_v39  ;;  %743 = vst [vmem:[#allocation2 + $0xb8] sm:$0x3] %v20325_v39  ;;  %v24258_v0 = vld [vmem:[#allocation26_spill] sm:$0xff] }
 0x211   : > { %15574 = vmatprep.mubr.msk.f32.mxu0 %vm785_vm2, %v20763_v13  ;;  %744 = vst [vmem:[#allocation2 + $0xc0] sm:$0xff] %v20325_v39  ;;  %745 = vst [vmem:[#allocation2 + $0xc8] sm:$0xff] %v20325_v39  ;;  %v24259_v13 = vld [vmem:[#allocation27_spill] sm:$0xff] }
 0x212   : > { %746 = vst [vmem:[#allocation2 + $0xd0] sm:$0x3] %v20325_v39  ;;  %747 = vst [vmem:[#allocation2 + $0xd8] sm:$0xff] %v20325_v39 }
 0x213   : > { %748 = vst [vmem:[#allocation2 + $0xe0] sm:$0xff] %v20325_v39  ;;  %749 = vst [vmem:[#allocation2 + $0xe8] sm:$0x3] %v20325_v39 }
 0x214   : > { %15575 = vmatmul.mubr.msk.f32.gmra.mrb[14].mxu0 %vm785_vm2, %v20766_v14  ;;  %750 = vst [vmem:[#allocation2 + $0xf0] sm:$0xff] %v20325_v39  ;;  %751 = vst [vmem:[#allocation2 + $0xf8] sm:$0xff] %v20325_v39  ;;  %v18053_v14 = vpack.c.bf16 %v3648_v63, %v3647_v56  ;;  %v2852_v63 = vsel %vm639_vm1, %v2850_v46, %v2851_v47 }
 0x215   : > { %15577 = vmatprep.mubr.msk.f32.mxu0 %vm785_vm2, %v20785_v33  ;;  %752 = vst [vmem:[#allocation2 + $0x100] sm:$0x3] %v20325_v39  ;;  %753 = vst [vmem:[#allocation2 + $0x108] sm:$0xff] %v20325_v39  ;;  %v3649_v33 = vld [vmem:[#allocation3 + $0xc0] sm:$0xff] }
 0x216   : > { %754 = vst [vmem:[#allocation2 + $0x110] sm:$0xff] %v20325_v39  ;;  %755 = vst [vmem:[#allocation2 + $0x118] sm:$0x3] %v20325_v39 }
 0x217   : > { %756 = vst [vmem:[#allocation2 + $0x120] sm:$0xff] %v20325_v39  ;;  %757 = vst [vmem:[#allocation2 + $0x128] sm:$0xff] %v20325_v39 }
 0x218   : > { %15578 = vmatmul.mubr.msk.f32.gmra.mrb[16].mxu0 %vm785_vm2, %v20788_v35  ;;  %758 = vst [vmem:[#allocation2 + $0x130] sm:$0x3] %v20325_v39  ;;  %759 = vst [vmem:[#allocation2 + $0x138] sm:$0xff] %v20325_v39  ;;  %v3650_v35 = vld [vmem:[#allocation3 + $0xc8] sm:$0xff] }
 0x219   : > { %15580 = vmatprep.mubr.msk.f32.mxu0 %vm785_vm2, %v20807_v52  ;;  %760 = vst [vmem:[#allocation2 + $0x140] sm:$0xff] %v20325_v39  ;;  %761 = vst [vmem:[#allocation2 + $0x148] sm:$0x3] %v20325_v39  ;;  %v24261_v52 = vld [vmem:[#allocation29_spill] sm:$0xff] }
 0x21a   : > { %762 = vst [vmem:[#allocation2 + $0x150] sm:$0xff] %v20325_v39  ;;  %763 = vst [vmem:[#allocation2 + $0x158] sm:$0xff] %v20325_v39 }
 0x21b   : > { %764 = vst [vmem:[#allocation2 + $0x160] sm:$0x3] %v20325_v39  ;;  %765 = vst [vmem:[#allocation2 + $0x168] sm:$0xff] %v20325_v39 }
 0x21c   : > { %15581 = vmatmul.mubr.msk.f32.gmra.mrb[18].mxu0 %vm785_vm2, %v20810_v58  ;;  %766 = vst [vmem:[#allocation2 + $0x170] sm:$0xff] %v20325_v39  ;;  %767 = vst [vmem:[#allocation2 + $0x178] sm:$0x3] %v20325_v39  ;;  %v18057_v58 = vpack.c.bf16 %v3650_v35, %v3649_v33  ;;  %v24278_v33 = vld [vmem:[#allocation52_spill] sm:$0xff]  ;;  %v24279_v35 = vld [vmem:[#allocation53_spill] sm:$0xff] }
 0x21d   : > { %15583 = vmatprep.mubr.msk.f32.mxu0 %vm785_vm2, %v20829_v25  ;;  %768 = vst [vmem:[#allocation2 + $0x180] sm:$0xff] %v20325_v39  ;;  %769 = vst [vmem:[#allocation2 + $0x188] sm:$0xff] %v20325_v39  ;;  %v24262_v25 = vld [vmem:[#allocation30_spill] sm:$0xff] }
 0x21e   : > { %770 = vst [vmem:[#allocation2 + $0x190] sm:$0x3] %v20325_v39  ;;  %771 = vst [vmem:[#allocation2 + $0x198] sm:$0xff] %v20325_v39 }
 0x21f   : > { %772 = vst [vmem:[#allocation2 + $0x1a0] sm:$0xff] %v20325_v39  ;;  %773 = vst [vmem:[#allocation2 + $0x1a8] sm:$0x3] %v20325_v39 }
 0x220   : > { %15584 = vmatmul.mubr.msk.f32.gmra.mrb[20].mxu0 %vm785_vm2, %v20832_v43  ;;  %v24260_v43 = vld [vmem:[#allocation28_spill] sm:$0xff] }
 0x221   : > { %15586 = vmatprep.mubr.msk.f32.mxu0 %vm785_vm2, %v20851_v60  ;;  %v3651_v60 = vld [vmem:[#allocation3 + $0xd0] sm:$0xff] }
 0x224   : > { %15587 = vmatmul.mubr.msk.f32.gmra.mrb[22].mxu0 %vm785_vm2, %v20854_v4  ;;  %v3652_v4 = vld [vmem:[#allocation3 + $0xd8] sm:$0xff] }
 0x225   : > { %15589 = vmatprep.mubr.msk.f32.mxu0 %vm785_vm2, %v20873_v27  ;;  %v24263_v27 = vld [vmem:[#allocation31_spill] sm:$0xff] }
 0x228   : > { %15590 = vmatmul.mubr.msk.f32.gmra.mrb[24].mxu0 %vm785_vm2, %v20876_v44  ;;  %v18061_v44 = vpack.c.bf16 %v3652_v4, %v3651_v60  ;;  %v3609_v60 = vld [vmem:[#allocation2 + $0x9] sm:$0xff] }
 0x229   : > { %15592 = vmatprep.mubr.msk.f32.mxu0 %vm785_vm2, %v20895_v42  ;;  %v18045_v42 = vpack.c.bf16 %v3644_v38, %v3643_v30  ;;  %v24274_v30 = vld [vmem:[#allocation43_spill] sm:$0xff]  ;;  %v24276_v38 = vld [vmem:[#allocation45_spill] sm:$0xff] }
 0x22a   : > { %v3592_v4 = vld [vmem:[#allocation3] sm:$0xff] }
 0x22b   : > { %18046 = vmatprep.subr.bf16.mxu1 %v18045_v42 }
 0x22c   : > { %15593 = vmatmul.mubr.msk.f32.gmra.mrb[26].mxu0 %vm785_vm2, %v20898_v49  ;;  %18048 = vmatpush3.bf16.msra.mxu1 %v18045_v42  ;;  %v24264_v49 = vld [vmem:[#allocation32_spill] sm:$0xff]  ;;  %v24277_v42 = vld [vmem:[#allocation47_spill] sm:$0xff] }
 0x22d   : > { %15595 = vmatprep.mubr.msk.f32.mxu0 %vm785_vm2, %v21281_v8  ;;  %18050 = vmatprep.subr.bf16.mxu1 %v18049_v55  ;;  %v24267_v8 = vld [vmem:[#allocation35_spill] sm:$0xff] }
 0x230   : > { %15596 = vmatmul.mubr.msk.f32.gmra.mrb[28].mxu0 %vm785_vm2, %v21288_v9  ;;  %18052 = vmatpush3.bf16.msra.mxu1 %v18049_v55  ;;  %v24268_v9 = vld [vmem:[#allocation37_spill] sm:$0xff]  ;;  %v590_v55 = vld [vmem:[%s20571_s24 + $0x1a8] sm:$0x3]  ;;  %s13158_s24 = sshll.u32 %s529_s30, 8 }
 0x231   : > { %15598 = vmatprep.mubr.msk.f32.mxu0 %vm785_vm2, %v21514_v15  ;;  %18054 = vmatprep.subr.bf16.mxu1 %v18053_v14  ;;  %v2853_v56 = vrot.slane %v590_v55, 1  ;;  %s23678_s16 = scalar_lea.vmem [#allocation9], %s13158_s24 }
 0x232   : > { %s13055_s21 = sshll.u32 %s23678_s16, 4  ;;  %s23872_s21 = int_to_ptr.vmem [resolvable:$true] %s13055_s21 }
 0x233   : > { %s20248_s23 = scalar_lea.vmem %s23872_s21, 4096 }
 0x234   : > { %15599 = vmatmul.mubr.msk.f32.gmra.mrb[30].mxu0 %vm785_vm2, %v21521_v16  ;;  %18056 = vmatpush3.bf16.msra.mxu1 %v18053_v14  ;;  %v2854_v14 = vsel %vm639_vm1, %v2851_v47, %v2853_v56  ;;  %v3594_v47 = vld [vmem:[#allocation3 + $0x10] sm:$0xff]  ;;  %p20249_p12 = scmp.ne.s32.totalorder %s23872_s21, %s20248_s23 }
 0x235   : > { %15603 = vmatprep.mubr.msk.f32.mxu0 %vm785_vm2, %v20638_v26  ;;  %18058 = vmatprep.subr.bf16.mxu1 %v18057_v58 }
 0x236   : > { %p20250_p8 = pnand %p20249_p12, %p24633_p7 }
 0x238   : > { %15604 = vmatmul.mubr.msk.f32.vlgmr.msra.gmra.mrb[0].mxu0 %vm785_vm2, %v20656_v32  ;;  %18060 = vmatpush3.bf16.msra.mxu1 %v18057_v58  ;;  %v4461_v32 = vld [vmem:[#allocation3 + $0x1f8] sm:$0xff]  ;;  %p20251_p11 = pneg %p20250_p8 }
 0x239   : > { %15652 = vmatpush3.msk.msra.mxu0 %vm850_vm0, %v21452_v11  ;;  %15606 = vmatprep.mubr.msk.f32.mxu0 %vm785_vm2, %v24222_v40  ;;  %v24271_v11 = vld [vmem:[#allocation40_spill] sm:$0xff]  ;;  %v4460_v40 = vld [vmem:[#allocation3 + $0x1f0] sm:$0xff] }
 0x23a   : > { %18062 = vmatprep.subr.bf16.mxu1 %v18061_v44 }
 0x23c   : > { %15607 = vmatmul.mubr.msk.f32.gmra.mrb[2].mxu0 %vm785_vm2, %v24258_v0  ;;  %18064 = vmatpush3.bf16.msra.mxu1 %v18061_v44  ;;  %v3593_v44 = vld [vmem:[#allocation3 + $0x8] sm:$0xff] }
 0x23d   : > { %15609 = vmatprep.mubr.msk.f32.mxu0 %vm785_vm2, %v24259_v13  ;;  %v18073_v46 = vpack.c.bf16 %v3593_v44, %v3592_v4  ;;  %v4458_v13 = vld [vmem:[#allocation3 + $0x1e0] sm:$0xff]  ;;  %v4459_v0 = vld [vmem:[#allocation3 + $0x1e8] sm:$0xff] }
 0x240   : > { %15610 = vmatmul.mubr.msk.f32.gmra.mrb[4].mxu0 %vm785_vm2, %v24260_v43  ;;  %v4457_v43 = vld [vmem:[#allocation3 + $0x1d8] sm:$0xff] }
 0x241   : > { %15612 = vmatprep.mubr.msk.f32.mxu0 %vm785_vm2, %v24261_v52  ;;  %v4456_v52 = vld [vmem:[#allocation3 + $0x1d0] sm:$0xff] }
 0x244   : > { %15613 = vmatmul.mubr.msk.f32.gmra.mrb[6].mxu0 %vm785_vm2, %v24262_v25 }
 0x245   : > { %15615 = vmatprep.mubr.msk.f32.mxu0 %vm785_vm2, %v24263_v27  ;;  %v4453_v27 = vld [vmem:[#allocation3 + $0x1b8] sm:$0xff] }
 0x248   : > { %15616 = vmatmul.mubr.msk.f32.gmra.mrb[8].mxu0 %vm785_vm2, %v24264_v49  ;;  %v4452_v49 = vld [vmem:[#allocation3 + $0x1b0] sm:$0xff] }
 0x249   : > { %15618 = vmatprep.mubr.msk.f32.mxu0 %vm785_vm2, %v24265_v12 }
 0x24c   : > { %15619 = vmatmul.mubr.msk.f32.gmra.mrb[10].mxu0 %vm785_vm2, %v24266_v51 }
 0x24d   : > { %15621 = vmatprep.mubr.msk.f32.mxu0 %vm785_vm2, %v24267_v8 }
 0x250   : > { %15622 = vmatmul.mubr.msk.f32.gmra.mrb[12].mxu0 %vm785_vm2, %v24233_v20  ;;  %v4451_v20 = vld [vmem:[#allocation3 + $0x1a8] sm:$0xff] }
 0x251   : > { %15624 = vmatprep.mubr.msk.f32.mxu0 %vm785_vm2, %v24268_v9  ;;  %v4450_v9 = vld [vmem:[#allocation3 + $0x1a0] sm:$0xff] }
 0x252   : > { %v18145_v51 = vpack.c.bf16 %v4451_v20, %v4450_v9 }
 0x254   : > { %15625 = vmatmul.mubr.msk.f32.gmra.mrb[14].mxu0 %vm785_vm2, %v24269_v54 }
 0x255   : > { %15627 = vmatprep.mubr.msk.f32.mxu0 %vm785_vm2, %v24270_v3  ;;  %v4108_v3 = vld [vmem:[#allocation2 + $0xa] sm:$0xff] }
 0x258   : > { %15628 = vmatmul.mubr.msk.f32.gmra.mrb[16].mxu0 %vm785_vm2, %v24271_v11  ;;  %v4449_v11 = vld [vmem:[#allocation3 + $0x198] sm:$0xff] }
 0x259   : > { %15630 = vmatprep.mubr.msk.f32.mxu0 %vm785_vm2, %v24272_v21  ;;  %v4448_v21 = vld [vmem:[#allocation3 + $0x190] sm:$0xff] }
 0x25a   : > { %v18141_v54 = vpack.c.bf16 %v4449_v11, %v4448_v21  ;;  %v4454_v21 = vld [vmem:[#allocation3 + $0x1c0] sm:$0xff] }
 0x25c   : > { %15631 = vmatmul.mubr.msk.f32.gmra.mrb[18].mxu0 %vm785_vm2, %v24273_v22 }
 0x25d   : > { %15633 = vmatprep.mubr.msk.f32.mxu0 %vm785_vm2, %v24274_v30  ;;  %v4107_v30 = vld [vmem:[#allocation2 + $0x2] sm:$0xff] }
 0x260   : > { %15634 = vmatmul.mubr.msk.f32.gmra.mrb[20].mxu0 %vm785_vm2, %v24275_v31 }
 0x261   : > { %15636 = vmatprep.mubr.msk.f32.mxu0 %vm785_vm2, %v24276_v38 }
 0x264   : > { %15637 = vmatmul.mubr.msk.f32.gmra.mrb[22].mxu0 %vm785_vm2, %v20905_v19 }
 0x265   : > { %15639 = vmatprep.mubr.msk.f32.mxu0 %vm785_vm2, %v24277_v42 }
 0x268   : > { %15640 = vmatmul.mubr.msk.f32.gmra.mrb[24].mxu0 %vm785_vm2, %v24242_v24 }
 0x269   : > { %15642 = vmatprep.mubr.msk.f32.mxu0 %vm785_vm2, %v24243_v5 }
 0x26c   : > { %15643 = vmatmul.mubr.msk.f32.gmra.mrb[26].mxu0 %vm785_vm2, %v24245_v34 }
 0x26d   : > { %15645 = vmatprep.mubr.msk.f32.mxu0 %vm785_vm2, %v21359_v50 }
 0x270   : > { %15646 = vmatmul.mubr.msk.f32.gmra.mrb[28].mxu0 %vm785_vm2, %v21366_v61  ;;  %v4447_v61 = vld [vmem:[#allocation3 + $0x188] sm:$0xff] }
 0x271   : > { %15648 = vmatprep.mubr.msk.f32.mxu0 %vm785_vm2, %v2852_v63  ;;  %v3596_v63 = vld [vmem:[#allocation3 + $0x20] sm:$0xff] }
 0x274   : > { %15649 = vmatmul.mubr.msk.f32.gmra.mrb[30].mxu0 %vm785_vm2, %v2854_v14  ;;  %v3597_v14 = vld [vmem:[#allocation3 + $0x28] sm:$0xff] }
 0x275   : > { %15653 = vmatprep.mubr.msk.f32.mxu0 %vm785_vm2, %v21034_v7  ;;  %v24280_v7 = vld [vmem:[#allocation54_spill] sm:$0xff] }
 0x278   : > { %15654 = vmatmul.mubr.msk.f32.vlgmr.msra.gmra.mrb[0].mxu0 %vm785_vm2, %v21045_v41  ;;  %v24281_v41 = vld [vmem:[#allocation55_spill] sm:$0xff] }
 0x279   : > { %15656 = vmatprep.mubr.msk.f32.mxu0 %vm785_vm2, %v24247_v23  ;;  %v3122_v23 = vrot.slane %v21521_v16, 2  ;;  %v3656_v16 = vld [vmem:[#allocation3 + $0xf8] sm:$0xff] }
 0x27c   : > { %15657 = vmatmul.mubr.msk.f32.gmra.mrb[2].mxu0 %vm785_vm2, %v21058_v2  ;;  %v24282_v2 = vld [vmem:[#allocation56_spill] sm:$0xff] }
 0x27d   : > { %15659 = vmatprep.mubr.msk.f32.mxu0 %vm785_vm2, %v24278_v33  ;;  %v18081_v33 = vpack.c.bf16 %v3597_v14, %v3596_v63 }
 0x280   : > { %15660 = vmatmul.mubr.msk.f32.gmra.mrb[4].mxu0 %vm785_vm2, %v21071_v57  ;;  %v24283_v57 = vld [vmem:[#allocation57_spill] sm:$0xff] }
 0x281   : > { %15662 = vmatprep.mubr.msk.f32.mxu0 %vm785_vm2, %v24279_v35  ;;  %v3598_v35 = vld [vmem:[#allocation3 + $0x30] sm:$0xff] }
 0x284   : > { %15663 = vmatmul.mubr.msk.f32.gmra.mrb[6].mxu0 %vm785_vm2, %v21084_v29  ;;  %v24284_v29 = vld [vmem:[#allocation59_spill] sm:$0xff] }
 0x285   : > { %15665 = vmatprep.mubr.msk.f32.mxu0 %vm785_vm2, %v24280_v7  ;;  %v3599_v7 = vld [vmem:[#allocation3 + $0x38] sm:$0xff] }
 0x288   : > { %15666 = vmatmul.mubr.msk.f32.gmra.mrb[8].mxu0 %vm785_vm2, %v21097_v37  ;;  %v24285_v37 = vld [vmem:[#allocation60_spill] sm:$0xff] }
 0x289   : > { %15668 = vmatprep.mubr.msk.f32.mxu0 %vm785_vm2, %v24281_v41  ;;  %v18085_v41 = vpack.c.bf16 %v3599_v7, %v3598_v35 }
 0x28c   : > { %15669 = vmatmul.mubr.msk.f32.gmra.mrb[10].mxu0 %vm785_vm2, %v21110_v45  ;;  %v24286_v45 = vld [vmem:[#allocation61_spill] sm:$0xff] }
 0x28d   : > { %15671 = vmatprep.mubr.msk.f32.mxu0 %vm785_vm2, %v24282_v2  ;;  %v3600_v2 = vld [vmem:[#allocation3 + $0x40] sm:$0xff] }
 0x290   : > { %15672 = vmatmul.mubr.msk.f32.gmra.mrb[12].mxu0 %vm785_vm2, %v21123_v53  ;;  %v24287_v53 = vld [vmem:[#allocation62_spill] sm:$0xff] }
 0x291   : > { %15674 = vmatprep.mubr.msk.f32.mxu0 %vm785_vm2, %v24283_v57  ;;  %v3601_v57 = vld [vmem:[#allocation3 + $0x48] sm:$0xff] }
 0x294   : > { %15675 = vmatmul.mubr.msk.f32.gmra.mrb[14].mxu0 %vm785_vm2, %v21136_v62  ;;  %v24288_v62 = vld [vmem:[#allocation64_spill] sm:$0xff] }
 0x295   : > { %15677 = vmatprep.mubr.msk.f32.mxu0 %vm785_vm2, %v24254_v10  ;;  %v3653_v10 = vld [vmem:[#allocation3 + $0xe0] sm:$0xff] }
 0x298   : > { %15678 = vmatmul.mubr.msk.f32.gmra.mrb[16].mxu0 %vm785_vm2, %v24284_v29  ;;  %v18089_v29 = vpack.c.bf16 %v3601_v57, %v3600_v2 }
 0x299   : > { %15680 = vmatprep.mubr.msk.f32.mxu0 %vm785_vm2, %v24285_v37  ;;  %v3602_v37 = vld [vmem:[#allocation3 + $0x50] sm:$0xff] }
 0x29c   : > { %15681 = vmatmul.mubr.msk.f32.gmra.mrb[18].mxu0 %vm785_vm2, %v21162_v28  ;;  %v3121_v28 = vrot.slane %v21514_v15, 2 }
 0x29d   : > { %15683 = vmatprep.mubr.msk.f32.mxu0 %vm785_vm2, %v24286_v45  ;;  %v3603_v45 = vld [vmem:[#allocation3 + $0x58] sm:$0xff] }
 0x2a0   : > { %15684 = vmatmul.mubr.msk.f32.gmra.mrb[20].mxu0 %vm785_vm2, %v24287_v53  ;;  %v18093_v53 = vpack.c.bf16 %v3603_v45, %v3602_v37 }
 0x2a1   : > { %15686 = vmatprep.mubr.msk.f32.mxu0 %vm785_vm2, %v24257_v6  ;;  %v3123_v6 = vsel %vm1371_vm3, %v3121_v28, %v3122_v23  ;;  %v3605_v28 = vld [vmem:[#allocation3 + $0x68] sm:$0xff] }
 0x2a4   : > { %15687 = vmatmul.mubr.msk.f32.gmra.mrb[22].mxu0 %vm785_vm2, %v21188_v18  ;;  %v3124_v18 = vrot.slane %v590_v55, 2  ;;  %v3595_v55 = vld [vmem:[#allocation3 + $0x18] sm:$0xff] }
 0x2a5   : > { %15689 = vmatprep.mubr.msk.f32.mxu0 %vm785_vm2, %v24288_v62  ;;  %v18077_v56 = vpack.c.bf16 %v3595_v55, %v3594_v47  ;;  %v3604_v62 = vld [vmem:[#allocation3 + $0x60] sm:$0xff] }
 0x2a8   : > { %15690 = vmatmul.mubr.msk.f32.gmra.mrb[24].mxu0 %vm785_vm2, %v21201_v17  ;;  %v3125_v17 = vsel %vm1371_vm3, %v3122_v23, %v3124_v18  ;;  %v18097_v23 = vpack.c.bf16 %v3605_v28, %v3604_v62  ;;  %v3606_v18 = vld [vmem:[#allocation3 + $0x70] sm:$0xff] }
 0x2a9   : > { %15692 = vmatprep.mubr.msk.f32.mxu0 %vm785_vm2, %v21205_v48  ;;  %v24289_v48 = vld [vmem:[#allocation21_spill] sm:$0xff] }
 0x2ac   : > { %15693 = vmatmul.mubr.msk.f32.gmra.mrb[26].mxu0 %vm785_vm2, %v21212_v1  ;;  %v3654_v1 = vld [vmem:[#allocation3 + $0xe8] sm:$0xff] }
 0x2ad   : > { %15695 = vmatprep.mubr.msk.f32.mxu0 %vm785_vm2, %v21436_v36  ;;  %v18065_v15 = vpack.c.bf16 %v3654_v1, %v3653_v10  ;;  %v3655_v36 = vld [vmem:[#allocation3 + $0xf0] sm:$0xff]  ;;  %v4140_v10 = vld [vmem:[#allocation3 + $0x100] sm:$0xff]  ;;  %v4141_v1 = vld [vmem:[#allocation3 + $0x108] sm:$0xff] }
 0x2ae   : > { %v18069_v58 = vpack.c.bf16 %v3656_v16, %v3655_v36  ;;  %v21722_v36 = vld [vmem:[%s23922_s2] ss:$0 sm:$0xff] }
 0x2af   : > { %18066 = vmatprep.subr.bf16.mxu1 %v18065_v15 }
 0x2b0   : > { %15696 = vmatmul.mubr.msk.f32.gmra.mrb[28].mxu0 %vm785_vm2, %v21443_v59  ;;  %18068 = vmatpush3.bf16.msra.mxu1 %v18065_v15  ;;  %v3608_v59 = vld [vmem:[#allocation2 + $0x1] sm:$0xff]  ;;  %v21716_v15 = vpack.c.bf16 %v4141_v1, %v4140_v10 }
 0x2b1   : > { %15698 = vmatprep.mubr.msk.f32.mxu0 %vm785_vm2, %v3123_v6  ;;  %18070 = vmatprep.subr.bf16.mxu1 %v18069_v58  ;;  %v3607_v6 = vld [vmem:[#allocation3 + $0x78] sm:$0xff] }
 0x2b2   : > { %15733 = vmatprep.mubr.f32.mxu1 %v3608_v59 }
 0x2b4   : > { %15699 = vmatmul.mubr.msk.f32.gmra.mrb[30].mxu0 %vm785_vm2, %v3125_v17  ;;  %18072 = vmatpush3.bf16.msra.mxu1 %v18069_v58  ;;  %v18101_v17 = vpack.c.bf16 %v3607_v6, %v3606_v18 }
 0x2b5   : > { %16423 = vmatprep.mubr.msk.f32.mxu0 %vm785_vm2, %v24289_v48  ;;  %18074 = vmatprep.subr.bf16.mxu1 %v18073_v46  ;;  %v4446_v48 = vld [vmem:[#allocation3 + $0x180] sm:$0xff] }
 0x2b7   : > { %15734 = vmatmul.mubr.f32.vlgmr.msra.gmra.mrb[0].mxu1 %v3609_v60 }
 0x2b8   : > { %18076 = vmatpush3.bf16.msra.mxu1 %v18073_v46 }
 0x2b9   : > { %18078 = vmatprep.subr.bf16.mxu1 %v18077_v56 }
 0x2bc   : > { %18080 = vmatpush3.bf16.msra.mxu1 %v18077_v56 }
 0x2bd   : > { %18082 = vmatprep.subr.bf16.mxu1 %v18081_v33 }
 0x2c0   : > { %18084 = vmatpush3.bf16.msra.mxu1 %v18081_v33 }
 0x2c1   : > { %18086 = vmatprep.subr.bf16.mxu1 %v18085_v41 }
 0x2c4   : > { %18088 = vmatpush3.bf16.msra.mxu1 %v18085_v41 }
 0x2c5   : > { %18090 = vmatprep.subr.bf16.mxu1 %v18089_v29 }
 0x2c8   : > { %18092 = vmatpush3.bf16.msra.mxu1 %v18089_v29 }
 0x2c9   : > { %18094 = vmatprep.subr.bf16.mxu1 %v18093_v53 }
 0x2cc   : > { %18096 = vmatpush3.bf16.msra.mxu1 %v18093_v53 }
 0x2cd   : > { %18098 = vmatprep.subr.bf16.mxu1 %v18097_v23 }
 0x2d0   : > { %18100 = vmatpush3.bf16.msra.mxu1 %v18097_v23 }
 0x2d1   : > { %18102 = vmatprep.subr.bf16.mxu1 %v18101_v17 }
 0x2d4   : > { %18104 = vmatpush3.bf16.msra.mxu1 %v18101_v17 }
 0x2d5   : > { %18106 = vmatprep.subr.bf16.mxu1 %v21716_v15 }
 0x34b   : > { %v15655_v16 = vpop.f32.mrb[0].mxu0 }
 0x34c   : > { %v3400_v58 = vadd.f32 %v15655_v16, %v21722_v36  ;;  %v3201_v59 = vpop.f32.mrb[1].mxu0 }
 0x34d   : > { %v3399_v60 = vadd.f32 %v21722_v36, %v3201_v59 }
 0x34e   : > { %vm3432_vm4 = vcmp.ge.f32.partialorder %v3400_v58, 0.0  ;;  %v3464_v4 = vmul.f32 0.2, %v3400_v58 }
 0x34f   : > { %vm3431_vm5 = vcmp.ge.f32.partialorder %v3399_v60, 0.0  ;;  %v3463_v44 = vmul.f32 0.2, %v3399_v60  ;;  %v15658_v46 = vpop.f32.mrb[2].mxu0 }
 0x350   : > { %v3496_v47 = vsel %vm3432_vm4, %v3400_v58, %v3464_v4  ;;  %v3402_v55 = vadd.f32 %v15658_v46, %v21722_v36  ;;  %v3211_v56 = vpop.f32.mrb[3].mxu0 }
 0x351   : > { %3529 = vst [vmem:[#allocation2 + $0x21] sm:$0xff] %v3496_v47  ;;  %v3495_v63 = vsel %vm3431_vm5, %v3399_v60, %v3463_v44  ;;  %v3401_v14 = vadd.f32 %v21722_v36, %v3211_v56 }
 0x352   : > { %3528 = vst [vmem:[#allocation2 + $0x19] sm:$0xff] %v3495_v63  ;;  %vm3434_vm6 = vcmp.ge.f32.partialorder %v3402_v55, 0.0  ;;  %v3466_v33 = vmul.f32 0.2, %v3402_v55  ;;  %15736 = vmatprep.mubr.f32.mxu1 %v3495_v63 }
 0x353   : > { %vm3433_vm7 = vcmp.ge.f32.partialorder %v3401_v14, 0.0  ;;  %v3465_v35 = vmul.f32 0.2, %v3401_v14  ;;  %v15661_v7 = vpop.f32.mrb[4].mxu0  ;;  %15737 = vmatmul.mubr.f32.gmra.mrb[2].mxu1 %v3496_v47 }
 0x354   : > { %v3498_v41 = vsel %vm3434_vm6, %v3402_v55, %v3466_v33  ;;  %v3404_v2 = vadd.f32 %v15661_v7, %v21722_v36  ;;  %v3221_v57 = vpop.f32.mrb[5].mxu0 }
 0x355   : > { %3531 = vst [vmem:[#allocation2 + $0x39] sm:$0xff] %v3498_v41  ;;  %v3497_v29 = vsel %vm3433_vm7, %v3401_v14, %v3465_v35  ;;  %v3403_v37 = vadd.f32 %v21722_v36, %v3221_v57 }
 0x356   : > { %3530 = vst [vmem:[#allocation2 + $0x31] sm:$0xff] %v3497_v29  ;;  %vm3436_vm8 = vcmp.ge.f32.partialorder %v3404_v2, 0.0  ;;  %v3468_v45 = vmul.f32 0.2, %v3404_v2  ;;  %15739 = vmatprep.mubr.f32.mxu1 %v3497_v29 }
 0x357   : > { %vm3435_vm9 = vcmp.ge.f32.partialorder %v3403_v37, 0.0  ;;  %v3467_v53 = vmul.f32 0.2, %v3403_v37  ;;  %v15664_v62 = vpop.f32.mrb[6].mxu0  ;;  %15740 = vmatmul.mubr.f32.gmra.mrb[4].mxu1 %v3498_v41 }
 0x358   : > { %v3500_v28 = vsel %vm3436_vm8, %v3404_v2, %v3468_v45  ;;  %v3406_v23 = vadd.f32 %v15664_v62, %v21722_v36  ;;  %v3231_v18 = vpop.f32.mrb[7].mxu0  ;;  %v21902_v12 = vld [vmem:[#allocation2 + $0x22] sm:$0xff] }
 0x359   : > { %3533 = vst [vmem:[#allocation2 + $0x51] sm:$0xff] %v3500_v28  ;;  %v3499_v6 = vsel %vm3435_vm9, %v3403_v37, %v3467_v53  ;;  %v3405_v17 = vadd.f32 %v21722_v36, %v3231_v18  ;;  %v21899_v8 = vld [vmem:[#allocation2 + $0x1a] sm:$0xff] }
 0x35a   : > { %3532 = vst [vmem:[#allocation2 + $0x49] sm:$0xff] %v3499_v6  ;;  %vm3438_vm10 = vcmp.ge.f32.partialorder %v3406_v23, 0.0  ;;  %v3470_v10 = vmul.f32 0.2, %v3406_v23  ;;  %15742 = vmatprep.mubr.f32.mxu1 %v3499_v6 }
 0x35b   : > { %vm3437_vm11 = vcmp.ge.f32.partialorder %v3405_v17, 0.0  ;;  %v3469_v1 = vmul.f32 0.2, %v3405_v17  ;;  %v15667_v16 = vpop.f32.mrb[8].mxu0  ;;  %15743 = vmatmul.mubr.f32.gmra.mrb[6].mxu1 %v3500_v28 }
 0x35c   : > { %v3502_v58 = vsel %vm3438_vm10, %v3406_v23, %v3470_v10  ;;  %v3408_v59 = vadd.f32 %v15667_v16, %v21722_v36  ;;  %v3241_v60 = vpop.f32.mrb[9].mxu0  ;;  %v21908_v11 = vld [vmem:[#allocation2 + $0x3a] sm:$0xff] }
 0x35d   : > { %3535 = vst [vmem:[#allocation2 + $0x69] sm:$0xff] %v3502_v58  ;;  %v3501_v4 = vsel %vm3437_vm11, %v3405_v17, %v3469_v1  ;;  %v3407_v44 = vadd.f32 %v21722_v36, %v3241_v60  ;;  %v21905_v25 = vld [vmem:[#allocation2 + $0x32] sm:$0xff] }
 0x35e   : > { %3534 = vst [vmem:[#allocation2 + $0x61] sm:$0xff] %v3501_v4  ;;  %vm3440_vm12 = vcmp.ge.f32.partialorder %v3408_v59, 0.0  ;;  %v3472_v46 = vmul.f32 0.2, %v3408_v59  ;;  %15745 = vmatprep.mubr.f32.mxu1 %v3501_v4 }
 0x35f   : > { %vm3439_vm13 = vcmp.ge.f32.partialorder %v3407_v44, 0.0  ;;  %v3471_v47 = vmul.f32 0.2, %v3407_v44  ;;  %v15670_v55 = vpop.f32.mrb[10].mxu0  ;;  %15746 = vmatmul.mubr.f32.gmra.mrb[8].mxu1 %v3502_v58 }
 0x360   : > { %v3504_v56 = vsel %vm3440_vm12, %v3408_v59, %v3472_v46  ;;  %v3410_v63 = vadd.f32 %v15670_v55, %v21722_v36  ;;  %v3251_v14 = vpop.f32.mrb[11].mxu0 }
 0x361   : > { %3537 = vst [vmem:[#allocation2 + $0x81] sm:$0xff] %v3504_v56  ;;  %v3503_v33 = vsel %vm3439_vm13, %v3407_v44, %v3471_v47  ;;  %v3409_v35 = vadd.f32 %v21722_v36, %v3251_v14  ;;  %v21911_v20 = vld [vmem:[#allocation2 + $0x4a] sm:$0xff] }
 0x362   : > { %3536 = vst [vmem:[#allocation2 + $0x79] sm:$0xff] %v3503_v33  ;;  %vm3442_vm14 = vcmp.ge.f32.partialorder %v3410_v63, 0.0  ;;  %v3474_v7 = vmul.f32 0.2, %v3410_v63  ;;  %15748 = vmatprep.mubr.f32.mxu1 %v3503_v33 }
 0x363   : > { %vm3441_vm15 = vcmp.ge.f32.partialorder %v3409_v35, 0.0  ;;  %v3473_v41 = vmul.f32 0.2, %v3409_v35  ;;  %v15673_v2 = vpop.f32.mrb[12].mxu0  ;;  %15749 = vmatmul.mubr.f32.gmra.mrb[10].mxu1 %v3504_v56 }
 0x364   : > { %v3506_v57 = vsel %vm3442_vm14, %v3410_v63, %v3474_v7  ;;  %v3412_v29 = vadd.f32 %v15673_v2, %v21722_v36  ;;  %v3261_v37 = vpop.f32.mrb[13].mxu0 }
 0x365   : > { %3539 = vst [vmem:[#allocation2 + $0x99] sm:$0xff] %v3506_v57  ;;  %v3505_v45 = vsel %vm3441_vm15, %v3409_v35, %v3473_v41  ;;  %v3411_v53 = vadd.f32 %v21722_v36, %v3261_v37 }
 0x366   : > { %3538 = vst [vmem:[#allocation2 + $0x91] sm:$0xff] %v3505_v45  ;;  %vm3444_vm1 = vcmp.ge.f32.partialorder %v3412_v29, 0.0  ;;  %v3476_v62 = vmul.f32 0.2, %v3412_v29  ;;  %15751 = vmatprep.mubr.f32.mxu1 %v3505_v45 }
 0x367   : > { %vm3443_vm3 = vcmp.ge.f32.partialorder %v3411_v53, 0.0  ;;  %v3475_v28 = vmul.f32 0.2, %v3411_v53  ;;  %v15676_v23 = vpop.f32.mrb[14].mxu0  ;;  %15752 = vmatmul.mubr.f32.gmra.mrb[12].mxu1 %v3506_v57 }
 0x368   : > { %v3508_v18 = vsel %vm3444_vm1, %v3412_v29, %v3476_v62  ;;  %v3414_v6 = vadd.f32 %v15676_v23, %v21722_v36  ;;  %v3271_v17 = vpop.f32.mrb[15].mxu0 }
 0x369   : > { %3541 = vst [vmem:[#allocation2 + $0xb1] sm:$0xff] %v3508_v18  ;;  %v3507_v10 = vsel %vm3443_vm3, %v3411_v53, %v3475_v28  ;;  %v3413_v1 = vadd.f32 %v21722_v36, %v3271_v17 }
 0x36a   : > { %3540 = vst [vmem:[#allocation2 + $0xa9] sm:$0xff] %v3507_v10  ;;  %vm3446_vm4 = vcmp.ge.f32.partialorder %v3414_v6, 0.0  ;;  %v3478_v16 = vmul.f32 0.2, %v3414_v6  ;;  %15754 = vmatprep.mubr.f32.mxu1 %v3507_v10 }
 0x36b   : > { %vm3445_vm5 = vcmp.ge.f32.partialorder %v3413_v1, 0.0  ;;  %v3477_v58 = vmul.f32 0.2, %v3413_v1  ;;  %v15679_v59 = vpop.f32.mrb[16].mxu0  ;;  %15755 = vmatmul.mubr.f32.gmra.mrb[14].mxu1 %v3508_v18 }
 0x36c   : > { %v3510_v60 = vsel %vm3446_vm4, %v3414_v6, %v3478_v16  ;;  %v3416_v4 = vadd.f32 %v15679_v59, %v21722_v36  ;;  %v3281_v44 = vpop.f32.mrb[17].mxu0 }
 0x36d   : > { %3543 = vst [vmem:[#allocation2 + $0xc9] sm:$0xff] %v3510_v60  ;;  %v3509_v46 = vsel %vm3445_vm5, %v3413_v1, %v3477_v58  ;;  %v3415_v47 = vadd.f32 %v21722_v36, %v3281_v44 }
 0x36e   : > { %3542 = vst [vmem:[#allocation2 + $0xc1] sm:$0xff] %v3509_v46  ;;  %vm3448_vm6 = vcmp.ge.f32.partialorder %v3416_v4, 0.0  ;;  %v3480_v55 = vmul.f32 0.2, %v3416_v4  ;;  %15757 = vmatprep.mubr.f32.mxu1 %v3509_v46 }
 0x36f   : > { %vm3447_vm7 = vcmp.ge.f32.partialorder %v3415_v47, 0.0  ;;  %v3479_v56 = vmul.f32 0.2, %v3415_v47  ;;  %v15682_v63 = vpop.f32.mrb[18].mxu0  ;;  %15758 = vmatmul.mubr.f32.gmra.mrb[16].mxu1 %v3510_v60 }
 0x370   : > { %v3512_v14 = vsel %vm3448_vm6, %v3416_v4, %v3480_v55  ;;  %v3418_v33 = vadd.f32 %v15682_v63, %v21722_v36  ;;  %v3291_v35 = vpop.f32.mrb[19].mxu0 }
 0x371   : > { %3545 = vst [vmem:[#allocation2 + $0xe1] sm:$0xff] %v3512_v14  ;;  %v3511_v7 = vsel %vm3447_vm7, %v3415_v47, %v3479_v56  ;;  %v3417_v41 = vadd.f32 %v21722_v36, %v3291_v35 }
 0x372   : > { %3544 = vst [vmem:[#allocation2 + $0xd9] sm:$0xff] %v3511_v7  ;;  %vm3450_vm8 = vcmp.ge.f32.partialorder %v3418_v33, 0.0  ;;  %v3482_v2 = vmul.f32 0.2, %v3418_v33  ;;  %15760 = vmatprep.mubr.f32.mxu1 %v3511_v7 }
 0x373   : > { %vm3449_vm9 = vcmp.ge.f32.partialorder %v3417_v41, 0.0  ;;  %v3481_v57 = vmul.f32 0.2, %v3417_v41  ;;  %v15685_v29 = vpop.f32.mrb[20].mxu0  ;;  %15761 = vmatmul.mubr.f32.gmra.mrb[18].mxu1 %v3512_v14 }
 0x374   : > { %v3514_v37 = vsel %vm3450_vm8, %v3418_v33, %v3482_v2  ;;  %v3420_v45 = vadd.f32 %v15685_v29, %v21722_v36  ;;  %v3301_v53 = vpop.f32.mrb[21].mxu0 }
 0x375   : > { %3547 = vst [vmem:[#allocation2 + $0xf9] sm:$0xff] %v3514_v37  ;;  %v21745_v62 = vsel %vm3449_vm9, %v3417_v41, %v3481_v57  ;;  %v3419_v28 = vadd.f32 %v21722_v36, %v3301_v53 }
 0x376   : > { %3546 = vst [vmem:[#allocation2 + $0xf1] sm:$0xff] %v21745_v62  ;;  %vm3452_vm10 = vcmp.ge.f32.partialorder %v3420_v45, 0.0  ;;  %v3484_v23 = vmul.f32 0.2, %v3420_v45  ;;  %15763 = vmatprep.mubr.f32.mxu1 %v21745_v62 }
 0x377   : > { %vm3451_vm11 = vcmp.ge.f32.partialorder %v3419_v28, 0.0  ;;  %v3483_v18 = vmul.f32 0.2, %v3419_v28  ;;  %v15688_v6 = vpop.f32.mrb[22].mxu0  ;;  %15764 = vmatmul.mubr.f32.gmra.mrb[20].mxu1 %v3514_v37 }
 0x378   : > { %v21750_v17 = vsel %vm3452_vm10, %v3420_v45, %v3484_v23  ;;  %v3422_v10 = vadd.f32 %v15688_v6, %v21722_v36  ;;  %v3311_v1 = vpop.f32.mrb[23].mxu0 }
 0x379   : > { %3549 = vst [vmem:[#allocation2 + $0x111] sm:$0xff] %v21750_v17  ;;  %v21754_v16 = vsel %vm3451_vm11, %v3419_v28, %v3483_v18  ;;  %v3421_v58 = vadd.f32 %v21722_v36, %v3311_v1 }
 0x37a   : > { %3548 = vst [vmem:[#allocation2 + $0x109] sm:$0xff] %v21754_v16  ;;  %vm3454_vm12 = vcmp.ge.f32.partialorder %v3422_v10, 0.0  ;;  %v3486_v59 = vmul.f32 0.2, %v3422_v10  ;;  %15766 = vmatprep.mubr.f32.mxu1 %v21754_v16 }
 0x37b   : > { %vm3453_vm13 = vcmp.ge.f32.partialorder %v3421_v58, 0.0  ;;  %v3485_v60 = vmul.f32 0.2, %v3421_v58  ;;  %v15691_v4 = vpop.f32.mrb[24].mxu0  ;;  %15767 = vmatmul.mubr.f32.gmra.mrb[22].mxu1 %v21750_v17 }
 0x37c   : > { %v21760_v44 = vsel %vm3454_vm12, %v3422_v10, %v3486_v59  ;;  %v3424_v46 = vadd.f32 %v15691_v4, %v21722_v36  ;;  %v3321_v47 = vpop.f32.mrb[25].mxu0 }
 0x37d   : > { %3551 = vst [vmem:[#allocation2 + $0x129] sm:$0xff] %v21760_v44  ;;  %v21764_v55 = vsel %vm3453_vm13, %v3421_v58, %v3485_v60  ;;  %v3423_v56 = vadd.f32 %v21722_v36, %v3321_v47 }
 0x37e   : > { %3550 = vst [vmem:[#allocation2 + $0x121] sm:$0xff] %v21764_v55  ;;  %vm3456_vm14 = vcmp.ge.f32.partialorder %v3424_v46, 0.0  ;;  %v3488_v63 = vmul.f32 0.2, %v3424_v46  ;;  %15769 = vmatprep.mubr.f32.mxu1 %v21764_v55 }
 0x37f   : > { %vm3455_vm15 = vcmp.ge.f32.partialorder %v3423_v56, 0.0  ;;  %v3487_v14 = vmul.f32 0.2, %v3423_v56  ;;  %v15694_v33 = vpop.f32.mrb[26].mxu0  ;;  %15770 = vmatmul.mubr.f32.gmra.mrb[24].mxu1 %v21760_v44 }
 0x380   : > { %v21770_v35 = vsel %vm3456_vm14, %v3424_v46, %v3488_v63  ;;  %v3426_v7 = vadd.f32 %v15694_v33, %v21722_v36  ;;  %v3331_v41 = vpop.f32.mrb[27].mxu0  ;;  %v4142_v63 = vld [vmem:[#allocation3 + $0x110] sm:$0xff] }
 0x381   : > { %3553 = vst [vmem:[#allocation2 + $0x141] sm:$0xff] %v21770_v35  ;;  %v21774_v2 = vsel %vm3455_vm15, %v3423_v56, %v3487_v14  ;;  %v3425_v57 = vadd.f32 %v21722_v36, %v3331_v41  ;;  %v4143_v14 = vld [vmem:[#allocation3 + $0x118] sm:$0xff]  ;;  %v21872_v50 = vld [vmem:[#allocation2 + $0x110] sm:$0xff] }
 0x382   : > { %3552 = vst [vmem:[#allocation2 + $0x139] sm:$0xff] %v21774_v2  ;;  %vm3458_vm1 = vcmp.ge.f32.partialorder %v3426_v7, 0.0  ;;  %v3490_v29 = vmul.f32 0.2, %v3426_v7  ;;  %15772 = vmatprep.mubr.f32.mxu1 %v21774_v2 }
 0x383   : > { %vm3457_vm3 = vcmp.ge.f32.partialorder %v3425_v57, 0.0  ;;  %v3489_v37 = vmul.f32 0.2, %v3425_v57  ;;  %v15697_v45 = vpop.f32.mrb[28].mxu0  ;;  %15773 = vmatmul.mubr.f32.gmra.mrb[26].mxu1 %v21770_v35 }
 0x384   : > { %v21780_v53 = vsel %vm3458_vm1, %v3426_v7, %v3490_v29  ;;  %v3428_v28 = vadd.f32 %v15697_v45, %v21722_v36  ;;  %v3341_v23 = vpop.f32.mrb[29].mxu0  ;;  %v4145_v29 = vld [vmem:[#allocation3 + $0x128] sm:$0xff] }
 0x385   : > { %3555 = vst [vmem:[#allocation2 + $0x159] sm:$0xff] %v21780_v53  ;;  %v21784_v18 = vsel %vm3457_vm3, %v3425_v57, %v3489_v37  ;;  %v3427_v6 = vadd.f32 %v21722_v36, %v3341_v23  ;;  %v4144_v57 = vld [vmem:[#allocation3 + $0x120] sm:$0xff]  ;;  %v21808_v37 = vld [vmem:[#allocation2 + $0x18] sm:$0xff]  ;;  %v4146_v23 = vld [vmem:[#allocation3 + $0x130] sm:$0xff] }
 0x386   : > { %3554 = vst [vmem:[#allocation2 + $0x151] sm:$0xff] %v21784_v18  ;;  %vm3460_vm4 = vcmp.ge.f32.partialorder %v3428_v28, 0.0  ;;  %v3492_v10 = vmul.f32 0.2, %v3428_v28  ;;  %15775 = vmatprep.mubr.f32.mxu1 %v21784_v18  ;;  %v18113_v45 = vpack.c.bf16 %v4145_v29, %v4144_v57  ;;  %v4152_v57 = vld [vmem:[#allocation3 + $0x160] sm:$0xff]  ;;  %v4153_v29 = vld [vmem:[#allocation3 + $0x168] sm:$0xff] }
 0x387   : > { %vm3459_vm5 = vcmp.ge.f32.partialorder %v3427_v6, 0.0  ;;  %v3491_v1 = vmul.f32 0.2, %v3427_v6  ;;  %v15700_v58 = vpop.f32.mrb[30].mxu0  ;;  %15776 = vmatmul.mubr.f32.gmra.mrb[28].mxu1 %v21780_v53  ;;  %v21875_v34 = vld [vmem:[#allocation2 + $0x120] sm:$0xff]  ;;  %v21878_v5 = vld [vmem:[#allocation2 + $0x128] sm:$0xff] }
 0x388   : > { %v21790_v59 = vsel %vm3460_vm4, %v3428_v28, %v3492_v10  ;;  %v3430_v60 = vadd.f32 %v15700_v58, %v21722_v36  ;;  %v3351_v4 = vpop.f32.mrb[31].mxu0  ;;  %v21812_v28 = vld [vmem:[#allocation2 + $0x20] sm:$0xff]  ;;  %v21815_v10 = vld [vmem:[#allocation2 + $0x30] sm:$0xff]  ;;  %v4149_v58 = vld [vmem:[#allocation3 + $0x148] sm:$0xff] }
 0x389   : > { %3557 = vst [vmem:[#allocation2 + $0x171] sm:$0xff] %v21790_v59  ;;  %v21794_v46 = vsel %vm3459_vm5, %v3427_v6, %v3491_v1  ;;  %v3429_v47 = vadd.f32 %v21722_v36, %v3351_v4  ;;  %v18109_v36 = vpack.c.bf16 %v4143_v14, %v4142_v63  ;;  %v4147_v6 = vld [vmem:[#allocation3 + $0x138] sm:$0xff]  ;;  %v21818_v1 = vld [vmem:[#allocation2 + $0x38] sm:$0xff]  ;;  %v21827_v14 = vld [vmem:[#allocation2 + $0x60] sm:$0xff] }
 0x38a   : > { %3556 = vst [vmem:[#allocation2 + $0x169] sm:$0xff] %v21794_v46  ;;  %vm3462_vm6 = vcmp.ge.f32.partialorder %v3430_v60, 0.0  ;;  %v3494_v56 = vmul.f32 0.2, %v3430_v60  ;;  %15778 = vmatprep.mubr.f32.mxu1 %v21794_v46  ;;  %v4151_v63 = vld [vmem:[#allocation3 + $0x158] sm:$0xff]  ;;  %v21881_v24 = vld [vmem:[#allocation2 + $0x138] sm:$0xff] }
 0x38b   : > { %vm3461_vm7 = vcmp.ge.f32.partialorder %v3429_v47, 0.0  ;;  %v3493_v33 = vmul.f32 0.2, %v3429_v47  ;;  %15779 = vmatmul.mubr.f32.gmra.mrb[30].mxu1 %v21790_v59  ;;  %v21884_v42 = vld [vmem:[#allocation2 + $0x140] sm:$0xff] }
 0x38c   : > { %v21800_v7 = vsel %vm3462_vm6, %v3430_v60, %v3494_v56  ;;  %15813 = vmatprep.mubr.f32.mxu1 %v20325_v39  ;;  %v21821_v60 = vld [vmem:[#allocation2 + $0x48] sm:$0xff]  ;;  %v4150_v56 = vld [vmem:[#allocation3 + $0x150] sm:$0xff] }
 0x38d   : > { %3559 = vst [vmem:[#allocation2 + $0x189] sm:$0xff] %v21800_v7  ;;  %v21804_v41 = vsel %vm3461_vm7, %v3429_v47, %v3493_v33  ;;  %v21824_v47 = vld [vmem:[#allocation2 + $0x50] sm:$0xff]  ;;  %v18125_v33 = vpack.c.bf16 %v4151_v63, %v4150_v56  ;;  %v21842_v63 = vld [vmem:[#allocation2 + $0x98] sm:$0xff] }
 0x38e   : > { %3558 = vst [vmem:[#allocation2 + $0x181] sm:$0xff] %v21804_v41  ;;  %v21887_v19 = vld [vmem:[#allocation2 + $0x150] sm:$0xff]  ;;  %v21890_v38 = vld [vmem:[#allocation2 + $0x158] sm:$0xff] }
 0x38f   : > { %15814 = vmatmul.mubr.f32.vlgmr.msra.gmra.mrb[0].mxu1 %v20325_v39  ;;  %v18117_v39 = vpack.c.bf16 %v4147_v6, %v4146_v23  ;;  %v18129_v23 = vpack.c.bf16 %v4153_v29, %v4152_v57  ;;  %v21836_v6 = vld [vmem:[#allocation2 + $0x80] sm:$0xff]  ;;  %v18137_v57 = vpack.c.bf16 %v4447_v61, %v4446_v48  ;;  %v21848_v29 = vld [vmem:[#allocation2 + $0xb0] sm:$0xff]  ;;  %v21866_v48 = vld [vmem:[#allocation2 + $0xf8] sm:$0xff] }
 0x390   : > { %18108 = vmatpush3.bf16.msra.mxu1 %v21716_v15  ;;  %15816 = vmatprep.mubr.f32.mxu1 %v21808_v37  ;;  %v4148_v15 = vld [vmem:[#allocation3 + $0x140] sm:$0xff] }
 0x391   : > { %18110 = vmatprep.subr.bf16.mxu1 %v18109_v36  ;;  %v18121_v4 = vpack.c.bf16 %v4149_v58, %v4148_v15  ;;  %v4154_v15 = vld [vmem:[#allocation3 + $0x170] sm:$0xff]  ;;  %v4155_v58 = vld [vmem:[#allocation3 + $0x178] sm:$0xff]  ;;  %v21863_v61 = vld [vmem:[#allocation2 + $0xf0] sm:$0xff] }
 0x392   : > { %v18133_v56 = vpack.c.bf16 %v4155_v58, %v4154_v15  ;;  %v21854_v15 = vld [vmem:[#allocation2 + $0xc8] sm:$0xff]  ;;  %v21857_v58 = vld [vmem:[#allocation2 + $0xd8] sm:$0xff]  ;;  %v21896_v22 = vld [vmem:[#allocation2 + $0x170] sm:$0xff] }
 0x393   : > { %15817 = vmatmul.mubr.f32.gmra.mrb[2].mxu1 %v21812_v28  ;;  %v21893_v31 = vld [vmem:[#allocation2 + $0x168] sm:$0xff]  ;;  %24291 = vst [vmem:[#allocation58_spill] sm:$0xff] %v21896_v22 }
 0x394   : > { %15819 = vmatprep.mubr.f32.mxu1 %v21815_v10  ;;  %18112 = vmatpush3.bf16.msra.mxu1 %v18109_v36  ;;  %v21830_v36 = vld [vmem:[#allocation2 + $0x68] sm:$0xff]  ;;  %24290 = vst [vmem:[#allocation51_spill] sm:$0xff] %v21893_v31 }
 0x395   : > { %18114 = vmatprep.subr.bf16.mxu1 %v18113_v45 }
 0x397   : > { %15820 = vmatmul.mubr.f32.gmra.mrb[4].mxu1 %v21818_v1 }
 0x398   : > { %15822 = vmatprep.mubr.f32.mxu1 %v21821_v60  ;;  %18116 = vmatpush3.bf16.msra.mxu1 %v18113_v45  ;;  %v21833_v45 = vld [vmem:[#allocation2 + $0x78] sm:$0xff] }
 0x399   : > { %18118 = vmatprep.subr.bf16.mxu1 %v18117_v39 }
 0x39b   : > { %15823 = vmatmul.mubr.f32.gmra.mrb[6].mxu1 %v21824_v47 }
 0x39c   : > { %15825 = vmatprep.mubr.f32.mxu1 %v21827_v14  ;;  %18120 = vmatpush3.bf16.msra.mxu1 %v18117_v39  ;;  %v21839_v39 = vld [vmem:[#allocation2 + $0x90] sm:$0xff] }
 0x39d   : > { %18122 = vmatprep.subr.bf16.mxu1 %v18121_v4 }
 0x39f   : > { %15826 = vmatmul.mubr.f32.gmra.mrb[8].mxu1 %v21830_v36 }
 0x3a0   : > { %15828 = vmatprep.mubr.f32.mxu1 %v21833_v45  ;;  %18124 = vmatpush3.bf16.msra.mxu1 %v18121_v4  ;;  %v21845_v4 = vld [vmem:[#allocation2 + $0xa8] sm:$0xff] }
 0x3a1   : > { %18126 = vmatprep.subr.bf16.mxu1 %v18125_v33 }
 0x3a3   : > { %15829 = vmatmul.mubr.f32.gmra.mrb[10].mxu1 %v21836_v6 }
 0x3a4   : > { %15831 = vmatprep.mubr.f32.mxu1 %v21839_v39  ;;  %18128 = vmatpush3.bf16.msra.mxu1 %v18125_v33  ;;  %v21851_v33 = vld [vmem:[#allocation2 + $0xc0] sm:$0xff] }
 0x3a5   : > { %18130 = vmatprep.subr.bf16.mxu1 %v18129_v23 }
 0x3a7   : > { %15832 = vmatmul.mubr.f32.gmra.mrb[12].mxu1 %v21842_v63 }
 0x3a8   : > { %15834 = vmatprep.mubr.f32.mxu1 %v21845_v4  ;;  %18132 = vmatpush3.bf16.msra.mxu1 %v18129_v23  ;;  %v21860_v23 = vld [vmem:[#allocation2 + $0xe0] sm:$0xff] }
 0x3a9   : > { %18134 = vmatprep.subr.bf16.mxu1 %v18133_v56 }
 0x3ab   : > { %15835 = vmatmul.mubr.f32.gmra.mrb[14].mxu1 %v21848_v29 }
 0x3ac   : > { %15837 = vmatprep.mubr.f32.mxu1 %v21851_v33  ;;  %18136 = vmatpush3.bf16.msra.mxu1 %v18133_v56  ;;  %v21869_v56 = vld [vmem:[#allocation2 + $0x108] sm:$0xff] }
 0x3ad   : > { %18138 = vmatprep.subr.bf16.mxu1 %v18137_v57 }
 0x3af   : > { %15838 = vmatmul.mubr.f32.gmra.mrb[16].mxu1 %v21854_v15 }
 0x3b0   : > { %15840 = vmatprep.mubr.f32.mxu1 %v21857_v58 }
 0x3b3   : > { %15841 = vmatmul.mubr.f32.gmra.mrb[18].mxu1 %v21860_v23 }
 0x3b4   : > { %15843 = vmatprep.mubr.f32.mxu1 %v21863_v61 }
 0x3b7   : > { %15844 = vmatmul.mubr.f32.gmra.mrb[20].mxu1 %v21866_v48 }
 0x3b8   : > { %15846 = vmatprep.mubr.f32.mxu1 %v21869_v56 }
 0x3bb   : > { %15847 = vmatmul.mubr.f32.gmra.mrb[22].mxu1 %v21872_v50 }
 0x3bc   : > { %15849 = vmatprep.mubr.f32.mxu1 %v21875_v34 }
 0x3bf   : > { %15850 = vmatmul.mubr.f32.gmra.mrb[24].mxu1 %v21878_v5 }
 0x3c0   : > { %15852 = vmatprep.mubr.f32.mxu1 %v21881_v24 }
 0x3c3   : > { %15853 = vmatmul.mubr.f32.gmra.mrb[26].mxu1 %v21884_v42 }
 0x3c4   : > { %15855 = vmatprep.mubr.f32.mxu1 %v21887_v19 }
 0x3c7   : > { %15856 = vmatmul.mubr.f32.gmra.mrb[28].mxu1 %v21890_v38 }
 0x3c8   : > { %15858 = vmatprep.mubr.f32.mxu1 %v21893_v31 }
 0x3cb   : > { %15859 = vmatmul.mubr.f32.gmra.mrb[30].mxu1 %v21896_v22 }
 0x3cc   : > { %15893 = vmatprep.mubr.f32.mxu1 %v4107_v30  ;;  %v4455_v30 = vld [vmem:[#allocation3 + $0x1c8] sm:$0xff] }
 0x3cd   : > { %v18153_v9 = vpack.c.bf16 %v4455_v30, %v4454_v21  ;;  %v18161_v21 = vpack.c.bf16 %v4459_v0, %v4458_v13  ;;  %v21926_v30 = vld [vmem:[#allocation2 + $0x82] sm:$0xff]  ;;  %v21935_v0 = vld [vmem:[#allocation2 + $0xaa] sm:$0xff] }
 0x3ce   : > { %24294 = vst [vmem:[#allocation53_spill] sm:$0xff] %v21935_v0 }
 0x3cf   : > { %15894 = vmatmul.mubr.f32.vlgmr.msra.gmra.mrb[0].mxu1 %v4108_v3  ;;  %v18149_v3 = vpack.c.bf16 %v4453_v27, %v4452_v49  ;;  %v21917_v27 = vld [vmem:[#allocation2 + $0x62] sm:$0xff]  ;;  %v18157_v49 = vpack.c.bf16 %v4457_v43, %v4456_v52  ;;  %v21929_v43 = vld [vmem:[#allocation2 + $0x92] sm:$0xff]  ;;  %v18165_v52 = vpack.c.bf16 %v4461_v32, %v4460_v40  ;;  %v21944_v32 = vld [vmem:[#allocation2 + $0xca] sm:$0xff] }
 0x3d0   : > { %18140 = vmatpush3.bf16.msra.mxu1 %v18137_v57  ;;  %15896 = vmatprep.mubr.f32.mxu1 %v21899_v8  ;;  %v21914_v57 = vld [vmem:[#allocation2 + $0x52] sm:$0xff]  ;;  %24297 = vst [vmem:[#allocation56_spill] sm:$0xff] %v21944_v32  ;;  %v21947_v40 = vld [vmem:[#allocation2 + $0xda] sm:$0xff] }
 0x3d1   : > { %18142 = vmatprep.subr.bf16.mxu1 %v18141_v54  ;;  %24298 = vst [vmem:[#allocation57_spill] sm:$0xff] %v21947_v40 }
 0x3d3   : > { %15897 = vmatmul.mubr.f32.gmra.mrb[2].mxu1 %v21902_v12 }
 0x3d4   : > { %15899 = vmatprep.mubr.f32.mxu1 %v21905_v25  ;;  %18144 = vmatpush3.bf16.msra.mxu1 %v18141_v54  ;;  %v21920_v54 = vld [vmem:[#allocation2 + $0x6a] sm:$0xff] }
 0x3d5   : > { %18146 = vmatprep.subr.bf16.mxu1 %v18145_v51  ;;  %24292 = vst [vmem:[#allocation63_spill] sm:$0xff] %v21920_v54 }
 0x3d7   : > { %15900 = vmatmul.mubr.f32.gmra.mrb[4].mxu1 %v21908_v11 }
 0x3d8   : > { %15902 = vmatprep.mubr.f32.mxu1 %v21911_v20  ;;  %18148 = vmatpush3.bf16.msra.mxu1 %v18145_v51  ;;  %v21923_v51 = vld [vmem:[#allocation2 + $0x7a] sm:$0xff] }
 0x3d9   : > { %18150 = vmatprep.subr.bf16.mxu1 %v18149_v3  ;;  %24293 = vst [vmem:[#allocation52_spill] sm:$0xff] %v21923_v51 }
 0x3db   : > { %15903 = vmatmul.mubr.f32.gmra.mrb[6].mxu1 %v21914_v57 }
 0x3dc   : > { %15905 = vmatprep.mubr.f32.mxu1 %v21917_v27  ;;  %18152 = vmatpush3.bf16.msra.mxu1 %v18149_v3  ;;  %v21932_v3 = vld [vmem:[#allocation2 + $0x9a] sm:$0xff] }
 0x3dd   : > { %18154 = vmatprep.subr.bf16.mxu1 %v18153_v9 }
 0x3df   : > { %15906 = vmatmul.mubr.f32.gmra.mrb[8].mxu1 %v21920_v54  ;;  %v4752_v54 = vld [vmem:[#allocation3 + $0x200] sm:$0xff] }
 0x3e0   : > { %15908 = vmatprep.mubr.f32.mxu1 %v21923_v51  ;;  %18156 = vmatpush3.bf16.msra.mxu1 %v18153_v9  ;;  %v4753_v51 = vld [vmem:[#allocation3 + $0x208] sm:$0xff] }
 0x3e1   : > { %18158 = vmatprep.subr.bf16.mxu1 %v18157_v49  ;;  %v18169_v13 = vpack.c.bf16 %v4753_v51, %v4752_v54  ;;  %v21938_v9 = vld [vmem:[#allocation2 + $0xb2] sm:$0xff]  ;;  %v21956_v51 = vld [vmem:[#allocation2 + $0xfa] sm:$0xff] }
 0x3e2   : > { %24295 = vst [vmem:[#allocation54_spill] sm:$0xff] %v21938_v9  ;;  %v21953_v54 = vld [vmem:[#allocation2 + $0xf2] sm:$0xff]  ;;  %24301 = vst [vmem:[#allocation61_spill] sm:$0xff] %v21956_v51 }
 0x3e3   : > { %15909 = vmatmul.mubr.f32.gmra.mrb[10].mxu1 %v21926_v30  ;;  %24300 = vst [vmem:[#allocation60_spill] sm:$0xff] %v21953_v54 }
 0x3e4   : > { %15911 = vmatprep.mubr.f32.mxu1 %v21929_v43  ;;  %18160 = vmatpush3.bf16.msra.mxu1 %v18157_v49  ;;  %v21941_v49 = vld [vmem:[#allocation2 + $0xc2] sm:$0xff] }
 0x3e5   : > { %18162 = vmatprep.subr.bf16.mxu1 %v18161_v21  ;;  %24296 = vst [vmem:[#allocation55_spill] sm:$0xff] %v21941_v49 }
 0x3e7   : > { %15912 = vmatmul.mubr.f32.gmra.mrb[12].mxu1 %v21932_v3 }
 0x3e8   : > { %15914 = vmatprep.mubr.f32.mxu1 %v21935_v0  ;;  %18164 = vmatpush3.bf16.msra.mxu1 %v18161_v21  ;;  %v21950_v21 = vld [vmem:[#allocation2 + $0xe2] sm:$0xff]  ;;  %v4757_v0 = vld [vmem:[#allocation3 + $0x228] sm:$0xff] }
 0x3e9   : > { %18166 = vmatprep.subr.bf16.mxu1 %v18165_v52  ;;  %24299 = vst [vmem:[#allocation59_spill] sm:$0xff] %v21950_v21 }
 0x3eb   : > { %15915 = vmatmul.mubr.f32.gmra.mrb[14].mxu1 %v21938_v9  ;;  %v4756_v9 = vld [vmem:[#allocation3 + $0x220] sm:$0xff] }
 0x3ec   : > { %15917 = vmatprep.mubr.f32.mxu1 %v21941_v49  ;;  %18168 = vmatpush3.bf16.msra.mxu1 %v18165_v52  ;;  %v21959_v52 = vld [vmem:[#allocation2 + $0x10a] sm:$0xff]  ;;  %v4754_v49 = vld [vmem:[#allocation3 + $0x210] sm:$0xff] }
 0x3ed   : > { %18170 = vmatprep.subr.bf16.mxu1 %v18169_v13  ;;  %24302 = vst [vmem:[#allocation62_spill] sm:$0xff] %v21959_v52 }
 0x3ef   : > { %15918 = vmatmul.mubr.f32.gmra.mrb[16].mxu1 %v21944_v32  ;;  %v21962_v32 = vld [vmem:[#allocation2 + $0x112] sm:$0xff] }
 0x3f0   : > { %15920 = vmatprep.mubr.f32.mxu1 %v21947_v40  ;;  %24303 = vst [vmem:[#allocation64_spill] sm:$0xff] %v21962_v32  ;;  %v21965_v40 = vld [vmem:[#allocation2 + $0x122] sm:$0xff] }
 0x3f1   : > { %24304 = vst [vmem:[#allocation67_spill] sm:$0xff] %v21965_v40 }
 0x3f3   : > { %15921 = vmatmul.mubr.f32.gmra.mrb[18].mxu1 %v21950_v21  ;;  %v21968_v21 = vld [vmem:[#allocation2 + $0x12a] sm:$0xff] }
 0x3f4   : > { %15923 = vmatprep.mubr.f32.mxu1 %v21953_v54  ;;  %24305 = vst [vmem:[#allocation68_spill] sm:$0xff] %v21968_v21  ;;  %v21971_v54 = vld [vmem:[#allocation2 + $0x13a] sm:$0xff] }
 0x3f5   : > { %24306 = vst [vmem:[#allocation69_spill] sm:$0xff] %v21971_v54 }
 0x3f7   : > { %15924 = vmatmul.mubr.f32.gmra.mrb[20].mxu1 %v21956_v51  ;;  %v21974_v51 = vld [vmem:[#allocation2 + $0x142] sm:$0xff] }
 0x3f8   : > { %15926 = vmatprep.mubr.f32.mxu1 %v21959_v52  ;;  %24307 = vst [vmem:[#allocation70_spill] sm:$0xff] %v21974_v51  ;;  %v21977_v52 = vld [vmem:[#allocation2 + $0x152] sm:$0xff] }
 0x3f9   : > { %24308 = vst [vmem:[#allocation71_spill] sm:$0xff] %v21977_v52 }
 0x3fb   : > { %15927 = vmatmul.mubr.f32.gmra.mrb[22].mxu1 %v21962_v32  ;;  %v21980_v32 = vld [vmem:[#allocation2 + $0x15a] sm:$0xff] }
 0x3fc   : > { %15929 = vmatprep.mubr.f32.mxu1 %v21965_v40  ;;  %24309 = vst [vmem:[#allocation72_spill] sm:$0xff] %v21980_v32  ;;  %v21983_v40 = vld [vmem:[#allocation2 + $0x16a] sm:$0xff] }
 0x3fd   : > { %24310 = vst [vmem:[#allocation73_spill] sm:$0xff] %v21983_v40 }
 0x3ff   : > { %15930 = vmatmul.mubr.f32.gmra.mrb[24].mxu1 %v21968_v21  ;;  %v21986_v21 = vld [vmem:[#allocation2 + $0x172] sm:$0xff] }
 0x400   : > { %15932 = vmatprep.mubr.f32.mxu1 %v21971_v54  ;;  %24311 = vst [vmem:[#allocation74_spill] sm:$0xff] %v21986_v21  ;;  %v4755_v54 = vld [vmem:[#allocation3 + $0x218] sm:$0xff] }
 0x403   : > { %15933 = vmatmul.mubr.f32.gmra.mrb[26].mxu1 %v21974_v51  ;;  %v18173_v51 = vpack.c.bf16 %v4755_v54, %v4754_v49  ;;  %v4761_v49 = vld [vmem:[#allocation3 + $0x248] sm:$0xff]  ;;  %v4764_v54 = vld [vmem:[#allocation3 + $0x260] sm:$0xff] }
 0x404   : > { %15935 = vmatprep.mubr.f32.mxu1 %v21977_v52  ;;  %v4758_v52 = vld [vmem:[#allocation3 + $0x230] sm:$0xff] }
 0x407   : > { %15936 = vmatmul.mubr.f32.gmra.mrb[28].mxu1 %v21980_v32  ;;  %v18177_v32 = vpack.c.bf16 %v4757_v0, %v4756_v9  ;;  %v4763_v0 = vld [vmem:[#allocation3 + $0x258] sm:$0xff] }
 0x408   : > { %15938 = vmatprep.mubr.f32.mxu1 %v21983_v40  ;;  %v4759_v40 = vld [vmem:[#allocation3 + $0x238] sm:$0xff] }
 0x40b   : > { %15939 = vmatmul.mubr.f32.gmra.mrb[30].mxu1 %v21986_v21  ;;  %v18181_v21 = vpack.c.bf16 %v4759_v40, %v4758_v52  ;;  %v4765_v40 = vld [vmem:[#allocation3 + $0x268] sm:$0xff]  ;;  %v4767_v52 = vld [vmem:[#allocation3 + $0x278] sm:$0xff] }
 0x40c   : > { %15973 = vmatprep.mubr.f32.mxu1 %v21808_v37  ;;  %v4760_v37 = vld [vmem:[#allocation3 + $0x240] sm:$0xff] }
 0x40f   : > { %15974 = vmatmul.mubr.f32.vlgmr.msra.gmra.mrb[0].mxu1 %v21812_v28  ;;  %v18185_v28 = vpack.c.bf16 %v4761_v49, %v4760_v37  ;;  %v5058_v37 = vld [vmem:[#allocation3 + $0x280] sm:$0xff]  ;;  %v5059_v49 = vld [vmem:[#allocation3 + $0x288] sm:$0xff] }
 0x410   : > { %18172 = vmatpush3.bf16.msra.mxu1 %v18169_v13  ;;  %15976 = vmatprep.mubr.f32.mxu1 %v21815_v10  ;;  %v4762_v13 = vld [vmem:[#allocation3 + $0x250] sm:$0xff] }
 0x411   : > { %18174 = vmatprep.subr.bf16.mxu1 %v18173_v51  ;;  %v18189_v9 = vpack.c.bf16 %v4763_v0, %v4762_v13  ;;  %v22019_v13 = vld [vmem:[#allocation2 + $0x180] sm:$0xff]  ;;  %v22022_v0 = vld [vmem:[#allocation2 + $0x188] sm:$0xff] }
 0x412   : > { %24312 = vst [vmem:[#allocation75_spill] sm:$0xff] %v22019_v13  ;;  %24313 = vst [vmem:[#allocation76_spill] sm:$0xff] %v22022_v0 }
 0x413   : > { %15977 = vmatmul.mubr.f32.gmra.mrb[2].mxu1 %v21818_v1 }
 0x414   : > { %15979 = vmatprep.mubr.f32.mxu1 %v21821_v60  ;;  %18176 = vmatpush3.bf16.msra.mxu1 %v18173_v51  ;;  %v4766_v51 = vld [vmem:[#allocation3 + $0x270] sm:$0xff] }
 0x415   : > { %18178 = vmatprep.subr.bf16.mxu1 %v18177_v32 }
 0x417   : > { %15980 = vmatmul.mubr.f32.gmra.mrb[4].mxu1 %v21824_v47 }
 0x418   : > { %15982 = vmatprep.mubr.f32.mxu1 %v21827_v14  ;;  %18180 = vmatpush3.bf16.msra.mxu1 %v18177_v32  ;;  %v18193_v32 = vpack.c.bf16 %v4765_v40, %v4764_v54  ;;  %v5061_v54 = vld [vmem:[#allocation3 + $0x298] sm:$0xff]  ;;  %v4719_v40 = vld [vmem:[#allocation2 + $0x19] sm:$0xff] }
 0x419   : > { %18182 = vmatprep.subr.bf16.mxu1 %v18181_v21 }
 0x41b   : > { %15983 = vmatmul.mubr.f32.gmra.mrb[6].mxu1 %v21830_v36 }
 0x41c   : > { %15985 = vmatprep.mubr.f32.mxu1 %v21833_v45  ;;  %18184 = vmatpush3.bf16.msra.mxu1 %v18181_v21  ;;  %v18197_v21 = vpack.c.bf16 %v4767_v52, %v4766_v51  ;;  %v4720_v51 = vld [vmem:[#allocation2 + $0x21] sm:$0xff]  ;;  %v5062_v52 = vld [vmem:[#allocation3 + $0x2a0] sm:$0xff] }
 0x41d   : > { %18186 = vmatprep.subr.bf16.mxu1 %v18185_v28 }
 0x41f   : > { %15986 = vmatmul.mubr.f32.gmra.mrb[8].mxu1 %v21836_v6 }
 0x420   : > { %15988 = vmatprep.mubr.f32.mxu1 %v21839_v39  ;;  %18188 = vmatpush3.bf16.msra.mxu1 %v18185_v28  ;;  %v18201_v28 = vpack.c.bf16 %v5059_v49, %v5058_v37  ;;  %v22025_v37 = vld [vmem:[#allocation2 + $0x31] sm:$0xff] }
 0x421   : > { %18190 = vmatprep.subr.bf16.mxu1 %v18189_v9 }
 0x423   : > { %15989 = vmatmul.mubr.f32.gmra.mrb[10].mxu1 %v21842_v63 }
 0x424   : > { %15991 = vmatprep.mubr.f32.mxu1 %v21845_v4  ;;  %18192 = vmatpush3.bf16.msra.mxu1 %v18189_v9  ;;  %v5060_v9 = vld [vmem:[#allocation3 + $0x290] sm:$0xff] }
 0x425   : > { %18194 = vmatprep.subr.bf16.mxu1 %v18193_v32 }
 0x427   : > { %15992 = vmatmul.mubr.f32.gmra.mrb[12].mxu1 %v21848_v29 }
 0x428   : > { %15994 = vmatprep.mubr.f32.mxu1 %v21851_v33  ;;  %18196 = vmatpush3.bf16.msra.mxu1 %v18193_v32  ;;  %v18205_v32 = vpack.c.bf16 %v5061_v54, %v5060_v9  ;;  %v22034_v54 = vld [vmem:[#allocation2 + $0x51] sm:$0xff] }
 0x429   : > { %18198 = vmatprep.subr.bf16.mxu1 %v18197_v21  ;;  %24316 = vst [vmem:[#allocation79_spill] sm:$0xff] %v22034_v54 }
 0x42b   : > { %15995 = vmatmul.mubr.f32.gmra.mrb[14].mxu1 %v21854_v15 }
 0x42c   : > { %15997 = vmatprep.mubr.f32.mxu1 %v21857_v58  ;;  %18200 = vmatpush3.bf16.msra.mxu1 %v18197_v21  ;;  %v5063_v21 = vld [vmem:[#allocation3 + $0x2a8] sm:$0xff] }
 0x42d   : > { %18202 = vmatprep.subr.bf16.mxu1 %v18201_v28  ;;  %v18209_v49 = vpack.c.bf16 %v5063_v21, %v5062_v52  ;;  %v22040_v21 = vld [vmem:[#allocation2 + $0x69] sm:$0xff] }
 0x42e   : > { %24318 = vst [vmem:[#allocation81_spill] sm:$0xff] %v22040_v21 }
 0x42f   : > { %15998 = vmatmul.mubr.f32.gmra.mrb[16].mxu1 %v21860_v23 }
 0x430   : > { %16000 = vmatprep.mubr.f32.mxu1 %v21863_v61 }
 0x433   : > { %16001 = vmatmul.mubr.f32.gmra.mrb[18].mxu1 %v21866_v48 }
 0x434   : > { %16003 = vmatprep.mubr.f32.mxu1 %v21869_v56 }
 0x437   : > { %16004 = vmatmul.mubr.f32.gmra.mrb[20].mxu1 %v21872_v50 }
 0x438   : > { %16006 = vmatprep.mubr.f32.mxu1 %v21875_v34 }
 0x43b   : > { %16007 = vmatmul.mubr.f32.gmra.mrb[22].mxu1 %v21878_v5 }
 0x43c   : > { %16009 = vmatprep.mubr.f32.mxu1 %v21881_v24 }
 0x43f   : > { %16010 = vmatmul.mubr.f32.gmra.mrb[24].mxu1 %v21884_v42 }
 0x440   : > { %16012 = vmatprep.mubr.f32.mxu1 %v21887_v19 }
 0x443   : > { %16013 = vmatmul.mubr.f32.gmra.mrb[26].mxu1 %v21890_v38 }
 0x444   : > { %16015 = vmatprep.mubr.f32.mxu1 %v21893_v31  ;;  %v5065_v31 = vld [vmem:[#allocation3 + $0x2b8] sm:$0xff] }
 0x447   : > { %16016 = vmatmul.mubr.f32.gmra.mrb[28].mxu1 %v21896_v22  ;;  %v5064_v22 = vld [vmem:[#allocation3 + $0x2b0] sm:$0xff] }
 0x448   : > { %16018 = vmatprep.mubr.f32.mxu1 %v22019_v13  ;;  %v22028_v13 = vld [vmem:[#allocation2 + $0x39] sm:$0xff]  ;;  %v18213_v9 = vpack.c.bf16 %v5065_v31, %v5064_v22 }
 0x449   : > { %24314 = vst [vmem:[#allocation77_spill] sm:$0xff] %v22028_v13  ;;  %v22043_v22 = vld [vmem:[#allocation2 + $0x79] sm:$0xff] }
 0x44a   : > { %24319 = vst [vmem:[#allocation82_spill] sm:$0xff] %v22043_v22 }
 0x44b   : > { %16019 = vmatmul.mubr.f32.gmra.mrb[30].mxu1 %v22022_v0  ;;  %v22031_v0 = vld [vmem:[#allocation2 + $0x49] sm:$0xff] }
 0x44c   : > { %16053 = vmatprep.mubr.f32.mxu1 %v4719_v40  ;;  %24315 = vst [vmem:[#allocation78_spill] sm:$0xff] %v22031_v0  ;;  %v5067_v40 = vld [vmem:[#allocation3 + $0x2c8] sm:$0xff] }
 0x44f   : > { %16054 = vmatmul.mubr.f32.vlgmr.msra.gmra.mrb[0].mxu1 %v4720_v51  ;;  %v22037_v51 = vld [vmem:[#allocation2 + $0x61] sm:$0xff] }
 0x450   : > { %18204 = vmatpush3.bf16.msra.mxu1 %v18201_v28  ;;  %16056 = vmatprep.mubr.f32.mxu1 %v22025_v37  ;;  %v5066_v28 = vld [vmem:[#allocation3 + $0x2c0] sm:$0xff]  ;;  %24317 = vst [vmem:[#allocation80_spill] sm:$0xff] %v22037_v51 }
 0x451   : > { %18206 = vmatprep.subr.bf16.mxu1 %v18205_v32  ;;  %v18217_v52 = vpack.c.bf16 %v5067_v40, %v5066_v28  ;;  %v22052_v40 = vld [vmem:[#allocation2 + $0x99] sm:$0xff] }
 0x453   : > { %16057 = vmatmul.mubr.f32.gmra.mrb[2].mxu1 %v22028_v13  ;;  %v5068_v13 = vld [vmem:[#allocation3 + $0x2d0] sm:$0xff] }
 0x454   : > { %16059 = vmatprep.mubr.f32.mxu1 %v22031_v0  ;;  %18208 = vmatpush3.bf16.msra.mxu1 %v18205_v32  ;;  %v5069_v0 = vld [vmem:[#allocation3 + $0x2d8] sm:$0xff] }
 0x455   : > { %18210 = vmatprep.subr.bf16.mxu1 %v18209_v49  ;;  %v18221_v31 = vpack.c.bf16 %v5069_v0, %v5068_v13  ;;  %v22046_v32 = vld [vmem:[#allocation2 + $0x81] sm:$0xff]  ;;  %v22055_v13 = vld [vmem:[#allocation2 + $0xa9] sm:$0xff] }
 0x456   : > { %24320 = vst [vmem:[#allocation83_spill] sm:$0xff] %v22046_v32 }
 0x457   : > { %16060 = vmatmul.mubr.f32.gmra.mrb[4].mxu1 %v22034_v54  ;;  %v5070_v54 = vld [vmem:[#allocation3 + $0x2e0] sm:$0xff] }
 0x458   : > { %16062 = vmatprep.mubr.f32.mxu1 %v22037_v51  ;;  %18212 = vmatpush3.bf16.msra.mxu1 %v18209_v49  ;;  %v5071_v51 = vld [vmem:[#allocation3 + $0x2e8] sm:$0xff] }
 0x459   : > { %18214 = vmatprep.subr.bf16.mxu1 %v18213_v9  ;;  %v22049_v49 = vld [vmem:[#allocation2 + $0x91] sm:$0xff]  ;;  %v18225_v28 = vpack.c.bf16 %v5071_v51, %v5070_v54  ;;  %v22061_v54 = vld [vmem:[#allocation2 + $0xc1] sm:$0xff] }
 0x45a   : > { %24321 = vst [vmem:[#allocation84_spill] sm:$0xff] %v22049_v49 }
 0x45b   : > { %16063 = vmatmul.mubr.f32.gmra.mrb[6].mxu1 %v22040_v21  ;;  %v5072_v21 = vld [vmem:[#allocation3 + $0x2f0] sm:$0xff] }
 0x45c   : > { %16065 = vmatprep.mubr.f32.mxu1 %v22043_v22  ;;  %18216 = vmatpush3.bf16.msra.mxu1 %v18213_v9  ;;  %v5073_v22 = vld [vmem:[#allocation3 + $0x2f8] sm:$0xff]  ;;  %v22058_v9 = vld [vmem:[#allocation2 + $0xb1] sm:$0xff] }
 0x45d   : > { %18218 = vmatprep.subr.bf16.mxu1 %v18217_v52  ;;  %v18229_v0 = vpack.c.bf16 %v5073_v22, %v5072_v21  ;;  %v22070_v21 = vld [vmem:[#allocation2 + $0xe1] sm:$0xff]  ;;  %v22074_v22 = vld [vmem:[#allocation2 + $0xf9] sm:$0xff] }
 0x45f   : > { %16066 = vmatmul.mubr.f32.gmra.mrb[8].mxu1 %v22046_v32  ;;  %v5365_v32 = vld [vmem:[#allocation3 + $0x300] sm:$0xff] }
 0x460   : > { %16068 = vmatprep.mubr.f32.mxu1 %v22049_v49  ;;  %18220 = vmatpush3.bf16.msra.mxu1 %v18217_v52  ;;  %v5366_v49 = vld [vmem:[#allocation3 + $0x308] sm:$0xff]  ;;  %v22064_v52 = vld [vmem:[#allocation2 + $0xc9] sm:$0xff] }
 0x461   : > { %18222 = vmatprep.subr.bf16.mxu1 %v18221_v31  ;;  %v18233_v51 = vpack.c.bf16 %v5366_v49, %v5365_v32  ;;  %v24325_v32 = vld [vmem:[#allocation52_spill] sm:$0xff]  ;;  %v24326_v49 = vld [vmem:[#allocation25_spill] sm:$0xff] }
 0x463   : > { %16069 = vmatmul.mubr.f32.gmra.mrb[10].mxu1 %v22052_v40 }
 0x464   : > { %16071 = vmatprep.mubr.f32.mxu1 %v22055_v13  ;;  %18224 = vmatpush3.bf16.msra.mxu1 %v18221_v31  ;;  %v22067_v31 = vld [vmem:[#allocation2 + $0xd9] sm:$0xff] }
 0x465   : > { %18226 = vmatprep.subr.bf16.mxu1 %v18225_v28 }
 0x467   : > { %16072 = vmatmul.mubr.f32.gmra.mrb[12].mxu1 %v22058_v9 }
 0x468   : > { %16074 = vmatprep.mubr.f32.mxu1 %v22061_v54  ;;  %18228 = vmatpush3.bf16.msra.mxu1 %v18225_v28  ;;  %v5378_v28 = vld [vmem:[#allocation3 + $0x368] sm:$0xff] }
 0x469   : > { %18230 = vmatprep.subr.bf16.mxu1 %v18229_v0 }
 0x46b   : > { %16075 = vmatmul.mubr.f32.gmra.mrb[14].mxu1 %v22064_v52 }
 0x46c   : > { %16077 = vmatprep.mubr.f32.mxu1 %v22067_v31  ;;  %18232 = vmatpush3.bf16.msra.mxu1 %v18229_v0  ;;  %v24327_v0 = vld [vmem:[#allocation26_spill] sm:$0xff] }
 0x46d   : > { %18234 = vmatprep.subr.bf16.mxu1 %v18233_v51 }
 0x46f   : > { %16078 = vmatmul.mubr.f32.gmra.mrb[16].mxu1 %v22070_v21 }
 0x470   : > { %16080 = vmatprep.mubr.f32.mxu1 %v21745_v62  ;;  %v5367_v62 = vld [vmem:[#allocation3 + $0x310] sm:$0xff] }
 0x473   : > { %16081 = vmatmul.mubr.f32.gmra.mrb[18].mxu1 %v22074_v22 }
 0x474   : > { %16083 = vmatprep.mubr.f32.mxu1 %v21754_v16 }
 0x477   : > { %16084 = vmatmul.mubr.f32.gmra.mrb[20].mxu1 %v21750_v17  ;;  %v5368_v17 = vld [vmem:[#allocation3 + $0x318] sm:$0xff] }
 0x478   : > { %16086 = vmatprep.mubr.f32.mxu1 %v21764_v55  ;;  %v18237_v16 = vpack.c.bf16 %v5368_v17, %v5367_v62  ;;  %v5370_v55 = vld [vmem:[#allocation3 + $0x328] sm:$0xff]  ;;  %v24328_v62 = vld [vmem:[#allocation27_spill] sm:$0xff] }
 0x479   : > { %v5379_v17 = vld [vmem:[#allocation3 + $0x370] sm:$0xff] }
 0x47b   : > { %16087 = vmatmul.mubr.f32.gmra.mrb[22].mxu1 %v21760_v44  ;;  %v5369_v44 = vld [vmem:[#allocation3 + $0x320] sm:$0xff] }
 0x47c   : > { %16089 = vmatprep.mubr.f32.mxu1 %v21774_v2  ;;  %v5371_v2 = vld [vmem:[#allocation3 + $0x330] sm:$0xff] }
 0x47f   : > { %16090 = vmatmul.mubr.f32.gmra.mrb[24].mxu1 %v21770_v35  ;;  %v18241_v35 = vpack.c.bf16 %v5370_v55, %v5369_v44  ;;  %v24329_v44 = vld [vmem:[#allocation28_spill] sm:$0xff]  ;;  %v24330_v55 = vld [vmem:[#allocation53_spill] sm:$0xff] }
 0x480   : > { %16092 = vmatprep.mubr.f32.mxu1 %v21784_v18  ;;  %v6385_v18 = vld [vmem:[%s23925_s5] sm:$0xf] }
 0x481   : > { %16421 = vmatprep.subr.msk.mxu0 %vm850_vm0, %v6385_v18 }
 0x482   : > { %16422 = vmatpush3.msk.msra.mxu0 %vm850_vm0, %v6385_v18  ;;  %v24333_v18 = vld [vmem:[#allocation30_spill] sm:$0xff] }
 0x483   : > { %16093 = vmatmul.mubr.f32.gmra.mrb[26].mxu1 %v21780_v53  ;;  %v5372_v53 = vld [vmem:[#allocation3 + $0x338] sm:$0xff] }
 0x484   : > { %16095 = vmatprep.mubr.f32.mxu1 %v21794_v46 }
 0x487   : > { %16096 = vmatmul.mubr.f32.gmra.mrb[28].mxu1 %v21790_v59  ;;  %v5374_v59 = vld [vmem:[#allocation3 + $0x348] sm:$0xff] }
 0x488   : > { %16098 = vmatprep.mubr.f32.mxu1 %v21804_v41  ;;  %v5376_v41 = vld [vmem:[#allocation3 + $0x358] sm:$0xff] }
 0x48b   : > { %16099 = vmatmul.mubr.f32.gmra.mrb[30].mxu1 %v21800_v7  ;;  %v5375_v7 = vld [vmem:[#allocation3 + $0x350] sm:$0xff] }
 0x48c   : > { %16133 = vmatprep.mubr.f32.mxu1 %v21899_v8  ;;  %v18245_v8 = vpack.c.bf16 %v5372_v53, %v5371_v2  ;;  %v5672_v2 = vld [vmem:[#allocation3 + $0x388] sm:$0xff] }
 0x48d   : > { %v24332_v53 = vld [vmem:[#allocation54_spill] sm:$0xff] }
 0x48f   : > { %16134 = vmatmul.mubr.f32.vlgmr.msra.gmra.mrb[0].mxu1 %v21902_v12  ;;  %v5373_v12 = vld [vmem:[#allocation3 + $0x340] sm:$0xff] }
 0x490   : > { %18236 = vmatpush3.bf16.msra.mxu1 %v18233_v51  ;;  %16136 = vmatprep.mubr.f32.mxu1 %v21905_v25  ;;  %v24322_v25 = vld [vmem:[#allocation22_spill] sm:$0xff]  ;;  %v18249_v46 = vpack.c.bf16 %v5374_v59, %v5373_v12  ;;  %v24335_v12 = vld [vmem:[#allocation31_spill] sm:$0xff]  ;;  %v24336_v59 = vld [vmem:[#allocation56_spill] sm:$0xff] }
 0x491   : > { %18238 = vmatprep.subr.bf16.mxu1 %v18237_v16  ;;  %16424 = vmatmul.mubr.msk.f32.vlgmr.msra.gmra.mrb[32].mxu0 %vm785_vm2, %v24322_v25 }
 0x492   : > { %16426 = vmatprep.mubr.msk.f32.mxu0 %vm785_vm2, %v20638_v26 }
 0x493   : > { %16137 = vmatmul.mubr.f32.gmra.mrb[2].mxu1 %v21908_v11  ;;  %v24323_v11 = vld [vmem:[#allocation63_spill] sm:$0xff] }
 0x494   : > { %16139 = vmatprep.mubr.f32.mxu1 %v21911_v20  ;;  %18240 = vmatpush3.bf16.msra.mxu1 %v18237_v16  ;;  %v24324_v20 = vld [vmem:[#allocation24_spill] sm:$0xff] }
 0x495   : > { %18242 = vmatprep.subr.bf16.mxu1 %v18241_v35  ;;  %16427 = vmatmul.mubr.msk.f32.gmra.mrb[34].mxu0 %vm785_vm2, %v24324_v20  ;;  %v5380_v16 = vld [vmem:[#allocation3 + $0x378] sm:$0xff]  ;;  %v7910_v20 = vld [vmem:[#allocation6 + $0x208] sm:$0xff] }
 0x496   : > { %16429 = vmatprep.mubr.msk.f32.mxu0 %vm785_vm2, %v24326_v49  ;;  %v7909_v49 = vld [vmem:[#allocation6 + $0x200] sm:$0xff] }
 0x497   : > { %16140 = vmatmul.mubr.f32.gmra.mrb[4].mxu1 %v21914_v57  ;;  %v18253_v57 = vpack.c.bf16 %v5376_v41, %v5375_v7  ;;  %v24338_v7 = vld [vmem:[#allocation57_spill] sm:$0xff] }
 0x498   : > { %16142 = vmatprep.mubr.f32.mxu1 %v21917_v27  ;;  %18244 = vmatpush3.bf16.msra.mxu1 %v18241_v35  ;;  %v5377_v27 = vld [vmem:[#allocation3 + $0x360] sm:$0xff] }
 0x499   : > { %18246 = vmatprep.subr.bf16.mxu1 %v18245_v8  ;;  %16430 = vmatmul.mubr.msk.f32.gmra.mrb[36].mxu0 %vm785_vm2, %v24327_v0  ;;  %v18257_v51 = vpack.c.bf16 %v5378_v28, %v5377_v27  ;;  %v24331_v35 = vld [vmem:[#allocation29_spill] sm:$0xff]  ;;  %v24343_v27 = vld [vmem:[#allocation35_spill] sm:$0xff]  ;;  %v7618_v0 = vld [vmem:[#allocation6 + $0x1f8] sm:$0xff] }
 0x49a   : > { %16432 = vmatprep.mubr.msk.f32.mxu0 %vm785_vm2, %v24328_v62  ;;  %v24339_v41 = vld [vmem:[#allocation33_spill] sm:$0xff]  ;;  %v7617_v62 = vld [vmem:[#allocation6 + $0x1f0] sm:$0xff] }
 0x49b   : > { %16143 = vmatmul.mubr.f32.gmra.mrb[6].mxu1 %v24323_v11  ;;  %v24340_v11 = vld [vmem:[#allocation59_spill] sm:$0xff]  ;;  %v24344_v28 = vld [vmem:[#allocation61_spill] sm:$0xff] }
 0x49c   : > { %16145 = vmatprep.mubr.f32.mxu1 %v24325_v32  ;;  %18248 = vmatpush3.bf16.msra.mxu1 %v18245_v8  ;;  %v24334_v8 = vld [vmem:[#allocation55_spill] sm:$0xff]  ;;  %v24341_v32 = vld [vmem:[#allocation34_spill] sm:$0xff] }
 0x49d   : > { %18250 = vmatprep.subr.bf16.mxu1 %v18249_v46  ;;  %16433 = vmatmul.mubr.msk.f32.gmra.mrb[38].mxu0 %vm785_vm2, %v24329_v44  ;;  %v7616_v44 = vld [vmem:[#allocation6 + $0x1e8] sm:$0xff] }
 0x49e   : > { %16435 = vmatprep.mubr.msk.f32.mxu0 %vm785_vm2, %v24331_v35  ;;  %v7615_v35 = vld [vmem:[#allocation6 + $0x1e0] sm:$0xff] }
 0x49f   : > { %16146 = vmatmul.mubr.f32.gmra.mrb[8].mxu1 %v21926_v30  ;;  %v18261_v30 = vpack.c.bf16 %v5380_v16, %v5379_v17  ;;  %v24346_v17 = vld [vmem:[#allocation62_spill] sm:$0xff]  ;;  %v24347_v16 = vld [vmem:[#allocation37_spill] sm:$0xff] }
 0x4a0   : > { %16148 = vmatprep.mubr.f32.mxu1 %v21929_v43  ;;  %18252 = vmatpush3.bf16.msra.mxu1 %v18249_v46  ;;  %v5671_v43 = vld [vmem:[#allocation3 + $0x380] sm:$0xff]  ;;  %v24337_v46 = vld [vmem:[#allocation32_spill] sm:$0xff] }
 0x4a1   : > { %18254 = vmatprep.subr.bf16.mxu1 %v18253_v57  ;;  %16436 = vmatmul.mubr.msk.f32.gmra.mrb[40].mxu0 %vm785_vm2, %v24333_v18  ;;  %v7614_v18 = vld [vmem:[#allocation6 + $0x1d8] sm:$0xff] }
 0x4a2   : > { %16438 = vmatprep.mubr.msk.f32.mxu0 %vm785_vm2, %v24335_v12  ;;  %v7613_v12 = vld [vmem:[#allocation6 + $0x1d0] sm:$0xff] }
 0x4a3   : > { %16149 = vmatmul.mubr.f32.gmra.mrb[10].mxu1 %v21932_v3  ;;  %v18265_v3 = vpack.c.bf16 %v5672_v2, %v5671_v43  ;;  %v24350_v43 = vld [vmem:[#allocation67_spill] sm:$0xff] }
 0x4a4   : > { %16151 = vmatprep.mubr.f32.mxu1 %v24330_v55  ;;  %18256 = vmatpush3.bf16.msra.mxu1 %v18253_v57  ;;  %v24342_v57 = vld [vmem:[#allocation60_spill] sm:$0xff]  ;;  %v24351_v2 = vld [vmem:[#allocation39_spill] sm:$0xff] }
 0x4a5   : > { %18258 = vmatprep.subr.bf16.mxu1 %v18257_v51  ;;  %16439 = vmatmul.mubr.msk.f32.gmra.mrb[42].mxu0 %vm785_vm2, %v24337_v46  ;;  %v24348_v55 = vld [vmem:[#allocation64_spill] sm:$0xff] }
 0x4a6   : > { %16441 = vmatprep.mubr.msk.f32.mxu0 %vm785_vm2, %v24339_v41  ;;  %v7610_v41 = vld [vmem:[#allocation6 + $0x1b8] sm:$0xff] }
 0x4a7   : > { %16152 = vmatmul.mubr.f32.gmra.mrb[12].mxu1 %v24332_v53  ;;  %v24352_v53 = vld [vmem:[#allocation68_spill] sm:$0xff] }
 0x4a8   : > { %16154 = vmatprep.mubr.f32.mxu1 %v24334_v8  ;;  %18260 = vmatpush3.bf16.msra.mxu1 %v18257_v51  ;;  %v24345_v51 = vld [vmem:[#allocation36_spill] sm:$0xff] }
 0x4a9   : > { %18262 = vmatprep.subr.bf16.mxu1 %v18261_v30  ;;  %16442 = vmatmul.mubr.msk.f32.gmra.mrb[44].mxu0 %vm785_vm2, %v24341_v32  ;;  %v24353_v8 = vld [vmem:[#allocation40_spill] sm:$0xff]  ;;  %v7609_v32 = vld [vmem:[#allocation6 + $0x1b0] sm:$0xff] }
 0x4aa   : > { %16444 = vmatprep.mubr.msk.f32.mxu0 %vm785_vm2, %v24343_v27 }
 0x4ab   : > { %16155 = vmatmul.mubr.f32.gmra.mrb[14].mxu1 %v24336_v59  ;;  %v24354_v59 = vld [vmem:[#allocation69_spill] sm:$0xff] }
 0x4ac   : > { %16157 = vmatprep.mubr.f32.mxu1 %v24338_v7  ;;  %18264 = vmatpush3.bf16.msra.mxu1 %v18261_v30  ;;  %v24349_v30 = vld [vmem:[#allocation38_spill] sm:$0xff]  ;;  %v24355_v7 = vld [vmem:[#allocation41_spill] sm:$0xff] }
 0x4ad   : > { %18266 = vmatprep.subr.bf16.mxu1 %v18265_v3  ;;  %16445 = vmatmul.mubr.msk.f32.gmra.mrb[46].mxu0 %vm785_vm2, %v24345_v51 }
 0x4ae   : > { %16447 = vmatprep.mubr.msk.f32.mxu0 %vm785_vm2, %v24347_v16 }
 0x4af   : > { %16158 = vmatmul.mubr.f32.gmra.mrb[16].mxu1 %v24340_v11  ;;  %v24356_v11 = vld [vmem:[#allocation70_spill] sm:$0xff] }
 0x4b0   : > { %16160 = vmatprep.mubr.f32.mxu1 %v24342_v57  ;;  %v24357_v57 = vld [vmem:[#allocation42_spill] sm:$0xff] }
 0x4b1   : > { %16448 = vmatmul.mubr.msk.f32.gmra.mrb[48].mxu0 %vm785_vm2, %v24349_v30  ;;  %v24370_v30 = vld [vmem:[#allocation65_spill] sm:$0xff] }
 0x4b2   : > { %16450 = vmatprep.mubr.msk.f32.mxu0 %vm785_vm2, %v24351_v2 }
 0x4b3   : > { %16161 = vmatmul.mubr.f32.gmra.mrb[18].mxu1 %v24344_v28  ;;  %v24358_v28 = vld [vmem:[#allocation71_spill] sm:$0xff] }
 0x4b4   : > { %16163 = vmatprep.mubr.f32.mxu1 %v24346_v17  ;;  %v24359_v17 = vld [vmem:[#allocation43_spill] sm:$0xff] }
 0x4b5   : > { %16451 = vmatmul.mubr.msk.f32.gmra.mrb[50].mxu0 %vm785_vm2, %v24353_v8  ;;  %v5676_v8 = vld [vmem:[#allocation3 + $0x3a8] sm:$0xff] }
 0x4b6   : > { %16453 = vmatprep.mubr.msk.f32.mxu0 %vm785_vm2, %v24355_v7  ;;  %v24364_v7 = vld [vmem:[#allocation74_spill] sm:$0xff] }
 0x4b7   : > { %16164 = vmatmul.mubr.f32.gmra.mrb[20].mxu1 %v24348_v55  ;;  %v24360_v55 = vld [vmem:[#allocation72_spill] sm:$0xff] }
 0x4b8   : > { %16166 = vmatprep.mubr.f32.mxu1 %v24350_v43  ;;  %v24361_v43 = vld [vmem:[#allocation44_spill] sm:$0xff] }
 0x4b9   : > { %16454 = vmatmul.mubr.msk.f32.gmra.mrb[52].mxu0 %vm785_vm2, %v24357_v57  ;;  %v24365_v57 = vld [vmem:[#allocation46_spill] sm:$0xff] }
 0x4ba   : > { %16456 = vmatprep.mubr.msk.f32.mxu0 %vm785_vm2, %v24359_v17  ;;  %v5674_v17 = vld [vmem:[#allocation3 + $0x398] sm:$0xff] }
 0x4bb   : > { %16167 = vmatmul.mubr.f32.gmra.mrb[22].mxu1 %v24352_v53  ;;  %v24362_v53 = vld [vmem:[#allocation73_spill] sm:$0xff] }
 0x4bc   : > { %16169 = vmatprep.mubr.f32.mxu1 %v24354_v59  ;;  %v24363_v59 = vld [vmem:[#allocation45_spill] sm:$0xff] }
 0x4bd   : > { %16457 = vmatmul.mubr.msk.f32.gmra.mrb[54].mxu0 %vm785_vm2, %v24361_v43  ;;  %v5673_v43 = vld [vmem:[#allocation3 + $0x390] sm:$0xff] }
 0x4be   : > { %16459 = vmatprep.mubr.msk.f32.mxu0 %vm785_vm2, %v24363_v59  ;;  %v5675_v59 = vld [vmem:[#allocation3 + $0x3a0] sm:$0xff] }
 0x4bf   : > { %16170 = vmatmul.mubr.f32.gmra.mrb[24].mxu1 %v24356_v11  ;;  %v22172_v11 = vld [vmem:[#allocation2 + $0x182] sm:$0xff]  ;;  %v18273_v2 = vpack.c.bf16 %v5676_v8, %v5675_v59 }
 0x4c0   : > { %16172 = vmatprep.mubr.f32.mxu1 %v24358_v28  ;;  %v24366_v28 = vld [vmem:[#allocation47_spill] sm:$0xff]  ;;  %v5682_v59 = vld [vmem:[#allocation3 + $0x3d8] sm:$0xff] }
 0x4c1   : > { %16460 = vmatmul.mubr.msk.f32.gmra.mrb[56].mxu0 %vm785_vm2, %v24365_v57  ;;  %v18269_v57 = vpack.c.bf16 %v5674_v17, %v5673_v43  ;;  %v24371_v17 = vld [vmem:[#allocation66_spill] sm:$0xff]  ;;  %v5681_v8 = vld [vmem:[#allocation3 + $0x3d0] sm:$0xff] }
 0x4c2   : > { %16462 = vmatprep.mubr.msk.f32.mxu0 %vm785_vm2, %v24366_v28  ;;  %v24369_v28 = vld [vmem:[#allocation50_spill] sm:$0xff] }
 0x4c3   : > { %16173 = vmatmul.mubr.f32.gmra.mrb[26].mxu1 %v24360_v55  ;;  %v22179_v55 = vld [vmem:[#allocation2 + $0x18a] sm:$0xff]  ;;  %v5680_v43 = vld [vmem:[#allocation3 + $0x3c8] sm:$0xff] }
 0x4c4   : > { %16175 = vmatprep.mubr.f32.mxu1 %v24362_v53  ;;  %v24367_v53 = vld [vmem:[#allocation48_spill] sm:$0xff] }
 0x4c5   : > { %16463 = vmatmul.mubr.msk.f32.gmra.mrb[58].mxu0 %vm785_vm2, %v24367_v53  ;;  %v5678_v53 = vld [vmem:[#allocation3 + $0x3b8] sm:$0xff] }
 0x4c7   : > { %16176 = vmatmul.mubr.f32.gmra.mrb[28].mxu1 %v24364_v7  ;;  %v24368_v7 = vld [vmem:[#allocation49_spill] sm:$0xff] }
 0x4c8   : > { %16178 = vmatprep.mubr.f32.mxu1 %v22172_v11  ;;  %16465 = vmatprep.mubr.msk.f32.mxu0 %vm785_vm2, %v24368_v7 }
 0x4c9   : > { %16466 = vmatmul.mubr.msk.f32.gmra.mrb[60].mxu0 %vm785_vm2, %v24369_v28 }
 0x4ca   : > { %16468 = vmatprep.mubr.msk.f32.mxu0 %vm785_vm2, %v24370_v30 }
 0x4cb   : > { %16179 = vmatmul.mubr.f32.gmra.mrb[30].mxu1 %v22179_v55 }
 0x4cc   : > { %16213 = vmatprep.mubr.f32.mxu1 %v21815_v10  ;;  %v5677_v10 = vld [vmem:[#allocation3 + $0x3b0] sm:$0xff] }
 0x4cd   : > { %16469 = vmatmul.mubr.msk.f32.gmra.mrb[62].mxu0 %vm785_vm2, %v24371_v17 }
 0x4cf   : > { %16214 = vmatmul.mubr.f32.vlgmr.msra.gmra.mrb[0].mxu1 %v21818_v1  ;;  %v18277_v1 = vpack.c.bf16 %v5678_v53, %v5677_v10  ;;  %v5978_v53 = vld [vmem:[#allocation3 + $0x408] sm:$0xff]  ;;  %v24379_v10 = vld [vmem:[#allocation80_spill] sm:$0xff] }
 0x4d0   : > { %18268 = vmatpush3.bf16.msra.mxu1 %v18265_v3  ;;  %16216 = vmatprep.mubr.f32.mxu1 %v21821_v60  ;;  %v5679_v3 = vld [vmem:[#allocation3 + $0x3c0] sm:$0xff] }
 0x4d1   : > { %18270 = vmatprep.subr.bf16.mxu1 %v18269_v57  ;;  %v18281_v60 = vpack.c.bf16 %v5680_v43, %v5679_v3  ;;  %v5986_v3 = vld [vmem:[#allocation3 + $0x448] sm:$0xff]  ;;  %v24380_v43 = vld [vmem:[#allocation81_spill] sm:$0xff] }
 0x4d3   : > { %16217 = vmatmul.mubr.f32.gmra.mrb[2].mxu1 %v21824_v47  ;;  %v18285_v47 = vpack.c.bf16 %v5682_v59, %v5681_v8  ;;  %v5987_v59 = vld [vmem:[#allocation3 + $0x450] sm:$0xff] }
 0x4d4   : > { %16219 = vmatprep.mubr.f32.mxu1 %v21827_v14  ;;  %18272 = vmatpush3.bf16.msra.mxu1 %v18269_v57  ;;  %v5683_v14 = vld [vmem:[#allocation3 + $0x3e0] sm:$0xff]  ;;  %v5684_v57 = vld [vmem:[#allocation3 + $0x3e8] sm:$0xff] }
 0x4d5   : > { %18274 = vmatprep.subr.bf16.mxu1 %v18273_v2 }
 0x4d7   : > { %16220 = vmatmul.mubr.f32.gmra.mrb[4].mxu1 %v21830_v36  ;;  %v18289_v36 = vpack.c.bf16 %v5684_v57, %v5683_v14  ;;  %v24382_v14 = vld [vmem:[#allocation83_spill] sm:$0xff]  ;;  %v24383_v57 = vld [vmem:[#allocation84_spill] sm:$0xff] }
 0x4d8   : > { %16222 = vmatprep.mubr.f32.mxu1 %v21833_v45  ;;  %18276 = vmatpush3.bf16.msra.mxu1 %v18273_v2  ;;  %v5685_v45 = vld [vmem:[#allocation3 + $0x3f0] sm:$0xff]  ;;  %v5686_v2 = vld [vmem:[#allocation3 + $0x3f8] sm:$0xff] }
 0x4d9   : > { %18278 = vmatprep.subr.bf16.mxu1 %v18277_v1 }
 0x4db   : > { %16223 = vmatmul.mubr.f32.gmra.mrb[6].mxu1 %v21836_v6  ;;  %v18293_v6 = vpack.c.bf16 %v5686_v2, %v5685_v45  ;;  %v5989_v45 = vld [vmem:[#allocation3 + $0x460] sm:$0xff]  ;;  %v5990_v2 = vld [vmem:[#allocation3 + $0x468] sm:$0xff] }
 0x4dc   : > { %16225 = vmatprep.mubr.f32.mxu1 %v21839_v39  ;;  %18280 = vmatpush3.bf16.msra.mxu1 %v18277_v1  ;;  %v5977_v39 = vld [vmem:[#allocation3 + $0x400] sm:$0xff] }
 0x4dd   : > { %18282 = vmatprep.subr.bf16.mxu1 %v18281_v60 }
 0x4df   : > { %16226 = vmatmul.mubr.f32.gmra.mrb[8].mxu1 %v21842_v63  ;;  %v18297_v63 = vpack.c.bf16 %v5978_v53, %v5977_v39  ;;  %v5991_v39 = vld [vmem:[#allocation3 + $0x470] sm:$0xff]  ;;  %v5992_v53 = vld [vmem:[#allocation3 + $0x478] sm:$0xff] }
 0x4e0   : > { %16228 = vmatprep.mubr.f32.mxu1 %v21845_v4  ;;  %18284 = vmatpush3.bf16.msra.mxu1 %v18281_v60  ;;  %v24372_v4 = vld [vmem:[#allocation51_spill] sm:$0xff]  ;;  %v24381_v60 = vld [vmem:[#allocation82_spill] sm:$0xff] }
 0x4e1   : > { %18286 = vmatprep.subr.bf16.mxu1 %v18285_v47 }
 0x4e3   : > { %16229 = vmatmul.mubr.f32.gmra.mrb[10].mxu1 %v21848_v29  ;;  %v24373_v29 = vld [vmem:[#allocation58_spill] sm:$0xff] }
 0x4e4   : > { %16231 = vmatprep.mubr.f32.mxu1 %v21851_v33  ;;  %18288 = vmatpush3.bf16.msra.mxu1 %v18285_v47  ;;  %v24374_v33 = vld [vmem:[#allocation75_spill] sm:$0xff]  ;;  %v5988_v47 = vld [vmem:[#allocation3 + $0x458] sm:$0xff] }
 0x4e5   : > { %18290 = vmatprep.subr.bf16.mxu1 %v18289_v36 }
 0x4e7   : > { %16232 = vmatmul.mubr.f32.gmra.mrb[12].mxu1 %v21854_v15  ;;  %v24375_v15 = vld [vmem:[#allocation76_spill] sm:$0xff] }
 0x4e8   : > { %16234 = vmatprep.mubr.f32.mxu1 %v21857_v58  ;;  %18292 = vmatpush3.bf16.msra.mxu1 %v18289_v36  ;;  %v24376_v58 = vld [vmem:[#allocation77_spill] sm:$0xff]  ;;  %v18317_v36 = vpack.c.bf16 %v5988_v47, %v5987_v59 }
 0x4e9   : > { %18294 = vmatprep.subr.bf16.mxu1 %v18293_v6  ;;  %v5949_v47 = vld [vmem:[#allocation2 + $0x6a] sm:$0xff] }
 0x4eb   : > { %16235 = vmatmul.mubr.f32.gmra.mrb[14].mxu1 %v21860_v23 }
 0x4ec   : > { %16237 = vmatprep.mubr.f32.mxu1 %v21863_v61  ;;  %18296 = vmatpush3.bf16.msra.mxu1 %v18293_v6  ;;  %v5983_v61 = vld [vmem:[#allocation3 + $0x430] sm:$0xff]  ;;  %v18321_v6 = vpack.c.bf16 %v5990_v2, %v5989_v45 }
 0x4ed   : > { %18298 = vmatprep.subr.bf16.mxu1 %v18297_v63  ;;  %v5951_v2 = vld [vmem:[#allocation2 + $0x82] sm:$0xff] }
 0x4ef   : > { %16238 = vmatmul.mubr.f32.gmra.mrb[16].mxu1 %v21866_v48  ;;  %v5984_v48 = vld [vmem:[#allocation3 + $0x438] sm:$0xff] }
 0x4f0   : > { %16240 = vmatprep.mubr.f32.mxu1 %v21869_v56  ;;  %v24378_v56 = vld [vmem:[#allocation79_spill] sm:$0xff]  ;;  %v18309_v1 = vpack.c.bf16 %v5984_v48, %v5983_v61 }
 0x4f1   : > { %v5945_v48 = vld [vmem:[#allocation2 + $0x3a] sm:$0xff] }
 0x4f3   : > { %16241 = vmatmul.mubr.f32.gmra.mrb[18].mxu1 %v21872_v50  ;;  %v20149_v50 = vld [vmem:[#allocation2] sm:$0xff] }
 0x4f4   : > { %16243 = vmatprep.mubr.f32.mxu1 %v21875_v34  ;;  %v5979_v34 = vld [vmem:[#allocation3 + $0x410] sm:$0xff] }
 0x4f7   : > { %16244 = vmatmul.mubr.f32.gmra.mrb[20].mxu1 %v21878_v5  ;;  %v5980_v5 = vld [vmem:[#allocation3 + $0x418] sm:$0xff] }
 0x4f8   : > { %16246 = vmatprep.mubr.f32.mxu1 %v21881_v24  ;;  %v18301_v24 = vpack.c.bf16 %v5980_v5, %v5979_v34  ;;  %v5664_v34 = vld [vmem:[#allocation2 + $0x169] sm:$0xff]  ;;  %v5665_v5 = vld [vmem:[#allocation2 + $0x171] sm:$0xff] }
 0x4fb   : > { %16247 = vmatmul.mubr.f32.gmra.mrb[22].mxu1 %v21884_v42  ;;  %v5981_v42 = vld [vmem:[#allocation3 + $0x420] sm:$0xff] }
 0x4fc   : > { %16249 = vmatprep.mubr.f32.mxu1 %v21887_v19  ;;  %v5982_v19 = vld [vmem:[#allocation3 + $0x428] sm:$0xff] }
 0x4fd   : > { %v18305_v23 = vpack.c.bf16 %v5982_v19, %v5981_v42  ;;  %v5667_v42 = vld [vmem:[#allocation2 + $0x189] sm:$0xff]  ;;  %v5669_v19 = vld [vmem:[#allocation2 + $0x1a1] sm:$0xff] }
 0x4ff   : > { %16250 = vmatmul.mubr.f32.gmra.mrb[24].mxu1 %v21890_v38  ;;  %v24377_v38 = vld [vmem:[#allocation78_spill] sm:$0xff] }
 0x500   : > { %16252 = vmatprep.mubr.f32.mxu1 %v24372_v4  ;;  %v6798_v4 = vld [vmem:[#allocation6 + $0x80] sm:$0xff] }
 0x503   : > { %16253 = vmatmul.mubr.f32.gmra.mrb[26].mxu1 %v24373_v29  ;;  %v6799_v29 = vld [vmem:[#allocation6 + $0x88] sm:$0xff] }
 0x504   : > { %16255 = vmatprep.mubr.f32.mxu1 %v24374_v33  ;;  %v5658_v33 = vld [vmem:[#allocation2 + $0x121] sm:$0xff] }
 0x507   : > { %16256 = vmatmul.mubr.f32.gmra.mrb[28].mxu1 %v24375_v15  ;;  %v5661_v15 = vld [vmem:[#allocation2 + $0x141] sm:$0xff] }
 0x508   : > { %16258 = vmatprep.mubr.f32.mxu1 %v20149_v50 }
 0x50b   : > { %16259 = vmatmul.mubr.f32.gmra.mrb[30].mxu1 %v20149_v50  ;;  %v5662_v50 = vld [vmem:[#allocation2 + $0x151] sm:$0xff] }
 0x50c   : > { %16293 = vmatprep.mubr.f32.mxu1 %v22025_v37  ;;  %v5985_v37 = vld [vmem:[#allocation3 + $0x440] sm:$0xff] }
 0x50d   : > { %v18313_v8 = vpack.c.bf16 %v5986_v3, %v5985_v37  ;;  %v5947_v3 = vld [vmem:[#allocation2 + $0x52] sm:$0xff] }
 0x50f   : > { %16294 = vmatmul.mubr.f32.vlgmr.msra.gmra.mrb[0].mxu1 %v24376_v58  ;;  %v6800_v58 = vld [vmem:[#allocation6 + $0x90] sm:$0xff] }
 0x510   : > { %18300 = vmatpush3.bf16.msra.mxu1 %v18297_v63  ;;  %16296 = vmatprep.mubr.f32.mxu1 %v24377_v38  ;;  %v18325_v63 = vpack.c.bf16 %v5992_v53, %v5991_v39  ;;  %v6801_v38 = vld [vmem:[#allocation6 + $0x98] sm:$0xff]  ;;  %v5952_v53 = vld [vmem:[#allocation2 + $0x92] sm:$0xff] }
 0x511   : > { %18302 = vmatprep.subr.bf16.mxu1 %v18301_v24  ;;  %v18333_v61 = vpack.c.bf16 %v6801_v38, %v6800_v58  ;;  %v6809_v39 = vld [vmem:[#allocation6 + $0xd8] sm:$0xff]  ;;  %v5968_v58 = vld [vmem:[#allocation2 + $0x152] sm:$0xff]  ;;  %v5969_v38 = vld [vmem:[#allocation2 + $0x15a] sm:$0xff] }
 0x513   : > { %16297 = vmatmul.mubr.f32.gmra.mrb[2].mxu1 %v24378_v56  ;;  %v6802_v56 = vld [vmem:[#allocation6 + $0xa0] sm:$0xff] }
 0x514   : > { %16299 = vmatprep.mubr.f32.mxu1 %v24379_v10  ;;  %18304 = vmatpush3.bf16.msra.mxu1 %v18301_v24  ;;  %v5668_v24 = vld [vmem:[#allocation2 + $0x199] sm:$0xff] }
 0x515   : > { %18306 = vmatprep.subr.bf16.mxu1 %v18305_v23  ;;  %v6803_v10 = vld [vmem:[#allocation6 + $0xa8] sm:$0xff] }
 0x516   : > { %v18337_v37 = vpack.c.bf16 %v6803_v10, %v6802_v56  ;;  %v5975_v56 = vld [vmem:[#allocation2 + $0x1a2] sm:$0xff] }
 0x517   : > { %16300 = vmatmul.mubr.f32.gmra.mrb[4].mxu1 %v24380_v43  ;;  %v6804_v43 = vld [vmem:[#allocation6 + $0xb0] sm:$0xff] }
 0x518   : > { %16302 = vmatprep.mubr.f32.mxu1 %v24381_v60  ;;  %18308 = vmatpush3.bf16.msra.mxu1 %v18305_v23  ;;  %v5944_v23 = vld [vmem:[#allocation2 + $0x32] sm:$0xff]  ;;  %v6805_v60 = vld [vmem:[#allocation6 + $0xb8] sm:$0xff]  ;;  %v6812_v10 = vld [vmem:[#allocation6 + $0xf0] sm:$0xff] }
 0x519   : > { %18310 = vmatprep.subr.bf16.mxu1 %v18309_v1  ;;  %v18341_v59 = vpack.c.bf16 %v6805_v60, %v6804_v43  ;;  %v6765_v60 = vld [vmem:[#allocation2 + $0x1] sm:$0xff] }
 0x51b   : > { %16303 = vmatmul.mubr.f32.gmra.mrb[6].mxu1 %v24382_v14  ;;  %v6806_v14 = vld [vmem:[#allocation6 + $0xc0] sm:$0xff] }
 0x51c   : > { %16305 = vmatprep.mubr.f32.mxu1 %v24383_v57  ;;  %18312 = vmatpush3.bf16.msra.mxu1 %v18309_v1  ;;  %v5946_v1 = vld [vmem:[#allocation2 + $0x4a] sm:$0xff]  ;;  %v6807_v57 = vld [vmem:[#allocation6 + $0xc8] sm:$0xff] }
 0x51d   : > { %18314 = vmatprep.subr.bf16.mxu1 %v18313_v8  ;;  %v18345_v45 = vpack.c.bf16 %v6807_v57, %v6806_v14  ;;  %v6749_v14 = vld [vmem:[#allocation6] sm:$0xff]  ;;  %v6750_v57 = vld [vmem:[#allocation6 + $0x8] sm:$0xff] }
 0x51f   : > { %16306 = vmatmul.mubr.f32.gmra.mrb[8].mxu1 %v22052_v40  ;;  %v18329_v40 = vpack.c.bf16 %v6799_v29, %v6798_v4  ;;  %v5953_v4 = vld [vmem:[#allocation2 + $0x9a] sm:$0xff]  ;;  %v6810_v29 = vld [vmem:[#allocation6 + $0xe0] sm:$0xff] }
 0x520   : > { %16308 = vmatprep.mubr.f32.mxu1 %v22055_v13  ;;  %18316 = vmatpush3.bf16.msra.mxu1 %v18313_v8  ;;  %v5654_v13 = vld [vmem:[#allocation2 + $0xf1] sm:$0xff]  ;;  %v5948_v8 = vld [vmem:[#allocation2 + $0x62] sm:$0xff] }
 0x521   : > { %18318 = vmatprep.subr.bf16.mxu1 %v18317_v36 }
 0x523   : > { %16309 = vmatmul.mubr.f32.gmra.mrb[10].mxu1 %v22058_v9  ;;  %v5656_v9 = vld [vmem:[#allocation2 + $0x109] sm:$0xff] }
 0x524   : > { %16311 = vmatprep.mubr.f32.mxu1 %v22061_v54  ;;  %18320 = vmatpush3.bf16.msra.mxu1 %v18317_v36  ;;  %v5657_v54 = vld [vmem:[#allocation2 + $0x111] sm:$0xff]  ;;  %v5950_v36 = vld [vmem:[#allocation2 + $0x7a] sm:$0xff] }
 0x525   : > { %18322 = vmatprep.subr.bf16.mxu1 %v18321_v6 }
 0x527   : > { %16312 = vmatmul.mubr.f32.gmra.mrb[12].mxu1 %v22064_v52  ;;  %v5659_v52 = vld [vmem:[#allocation2 + $0x129] sm:$0xff] }
 0x528   : > { %16314 = vmatprep.mubr.f32.mxu1 %v22067_v31  ;;  %18324 = vmatpush3.bf16.msra.mxu1 %v18321_v6  ;;  %v5660_v31 = vld [vmem:[#allocation2 + $0x139] sm:$0xff] }
 0x529   : > { %18326 = vmatprep.subr.bf16.mxu1 %v18325_v63  ;;  %v6808_v6 = vld [vmem:[#allocation6 + $0xd0] sm:$0xff] }
 0x52b   : > { %16315 = vmatmul.mubr.f32.gmra.mrb[14].mxu1 %v22070_v21  ;;  %v5663_v21 = vld [vmem:[#allocation2 + $0x159] sm:$0xff] }
 0x52c   : > { %16317 = vmatprep.mubr.f32.mxu1 %v5654_v13  ;;  %18328 = vmatpush3.bf16.msra.mxu1 %v18325_v63  ;;  %v18349_v63 = vpack.c.bf16 %v6809_v39, %v6808_v6  ;;  %v5954_v13 = vld [vmem:[#allocation2 + $0xaa] sm:$0xff] }
 0x52d   : > { %18330 = vmatprep.subr.bf16.mxu1 %v18329_v40 }
 0x52f   : > { %16318 = vmatmul.mubr.f32.gmra.mrb[16].mxu1 %v22074_v22  ;;  %v5666_v22 = vld [vmem:[#allocation2 + $0x181] sm:$0xff] }
 0x530   : > { %16320 = vmatprep.mubr.f32.mxu1 %v5656_v9 }
 0x533   : > { %16321 = vmatmul.mubr.f32.gmra.mrb[18].mxu1 %v5657_v54  ;;  %v5955_v54 = vld [vmem:[#allocation2 + $0xb2] sm:$0xff] }
 0x534   : > { %16323 = vmatprep.mubr.f32.mxu1 %v5658_v33  ;;  %v5956_v33 = vld [vmem:[#allocation2 + $0xc2] sm:$0xff] }
 0x537   : > { %16324 = vmatmul.mubr.f32.gmra.mrb[20].mxu1 %v5659_v52  ;;  %v5957_v52 = vld [vmem:[#allocation2 + $0xca] sm:$0xff] }
 0x538   : > { %16326 = vmatprep.mubr.f32.mxu1 %v5660_v31  ;;  %v5958_v31 = vld [vmem:[#allocation2 + $0xda] sm:$0xff] }
 0x53b   : > { %16327 = vmatmul.mubr.f32.gmra.mrb[22].mxu1 %v5661_v15  ;;  %v5959_v15 = vld [vmem:[#allocation2 + $0xe2] sm:$0xff] }
 0x53c   : > { %16329 = vmatprep.mubr.f32.mxu1 %v5662_v50  ;;  %v5960_v50 = vld [vmem:[#allocation2 + $0xf2] sm:$0xff] }
 0x53f   : > { %16330 = vmatmul.mubr.f32.gmra.mrb[24].mxu1 %v5663_v21  ;;  %v5961_v21 = vld [vmem:[#allocation2 + $0xfa] sm:$0xff] }
 0x540   : > { %16332 = vmatprep.mubr.f32.mxu1 %v5664_v34  ;;  %v5962_v34 = vld [vmem:[#allocation2 + $0x10a] sm:$0xff] }
 0x543   : > { %16333 = vmatmul.mubr.f32.gmra.mrb[26].mxu1 %v5665_v5  ;;  %v5963_v5 = vld [vmem:[#allocation2 + $0x112] sm:$0xff] }
 0x544   : > { %16335 = vmatprep.mubr.f32.mxu1 %v5666_v22  ;;  %v5964_v22 = vld [vmem:[#allocation2 + $0x122] sm:$0xff] }
 0x547   : > { %16336 = vmatmul.mubr.f32.gmra.mrb[28].mxu1 %v5667_v42  ;;  %v5966_v42 = vld [vmem:[#allocation2 + $0x13a] sm:$0xff] }
 0x548   : > { %16338 = vmatprep.mubr.f32.mxu1 %v5668_v24  ;;  %v5965_v24 = vld [vmem:[#allocation2 + $0x12a] sm:$0xff] }
 0x54b   : > { %16339 = vmatmul.mubr.f32.gmra.mrb[30].mxu1 %v5669_v19  ;;  %v5967_v19 = vld [vmem:[#allocation2 + $0x142] sm:$0xff] }
 0x54c   : > { %16373 = vmatprep.mubr.f32.mxu1 %v5944_v23  ;;  %v5970_v23 = vld [vmem:[#allocation2 + $0x16a] sm:$0xff] }
 0x54f   : > { %16374 = vmatmul.mubr.f32.vlgmr.msra.gmra.mrb[0].mxu1 %v5945_v48  ;;  %v5974_v48 = vld [vmem:[#allocation2 + $0x19a] sm:$0xff] }
 0x550   : > { %16376 = vmatprep.mubr.f32.mxu1 %v5946_v1  ;;  %18332 = vmatpush3.bf16.msra.mxu1 %v18329_v40  ;;  %v6811_v40 = vld [vmem:[#allocation6 + $0xe8] sm:$0xff]  ;;  %v6813_v1 = vld [vmem:[#allocation6 + $0xf8] sm:$0xff] }
 0x551   : > { %18334 = vmatprep.subr.bf16.mxu1 %v18333_v61  ;;  %v18353_v9 = vpack.c.bf16 %v6811_v40, %v6810_v29 }
 0x553   : > { %16377 = vmatmul.mubr.f32.gmra.mrb[2].mxu1 %v5947_v3 }
 0x554   : > { %16379 = vmatprep.mubr.f32.mxu1 %v5948_v8  ;;  %18336 = vmatpush3.bf16.msra.mxu1 %v18333_v61  ;;  %v5971_v61 = vld [vmem:[#allocation2 + $0x172] sm:$0xff]  ;;  %v6766_v8 = vld [vmem:[#allocation2 + $0x9] sm:$0xff] }
 0x555   : > { %18338 = vmatprep.subr.bf16.mxu1 %v18337_v37 }
 0x557   : > { %16380 = vmatmul.mubr.f32.gmra.mrb[4].mxu1 %v5949_v47 }
 0x558   : > { %16382 = vmatprep.mubr.f32.mxu1 %v5950_v36  ;;  %18340 = vmatpush3.bf16.msra.mxu1 %v18337_v37  ;;  %v18357_v37 = vpack.c.bf16 %v6813_v1, %v6812_v10 }
 0x559   : > { %18342 = vmatprep.subr.bf16.mxu1 %v18341_v59 }
 0x55b   : > { %16383 = vmatmul.mubr.f32.gmra.mrb[6].mxu1 %v5951_v2 }
 0x55c   : > { %16385 = vmatprep.mubr.f32.mxu1 %v5952_v53  ;;  %18344 = vmatpush3.bf16.msra.mxu1 %v18341_v59  ;;  %v6751_v53 = vld [vmem:[#allocation6 + $0x10] sm:$0xff] }
 0x55d   : > { %18346 = vmatprep.subr.bf16.mxu1 %v18345_v45 }
 0x55f   : > { %16386 = vmatmul.mubr.f32.gmra.mrb[8].mxu1 %v5953_v4 }
 0x560   : > { %16388 = vmatprep.mubr.f32.mxu1 %v5954_v13  ;;  %18348 = vmatpush3.bf16.msra.mxu1 %v18345_v45  ;;  %v18361_v45 = vpack.c.bf16 %v6750_v57, %v6749_v14 }
 0x561   : > { %18350 = vmatprep.subr.bf16.mxu1 %v18349_v63 }
 0x563   : > { %16389 = vmatmul.mubr.f32.gmra.mrb[10].mxu1 %v5955_v54  ;;  %v6753_v54 = vld [vmem:[#allocation6 + $0x20] sm:$0xff] }
 0x564   : > { %16391 = vmatprep.mubr.f32.mxu1 %v5956_v33  ;;  %18352 = vmatpush3.bf16.msra.mxu1 %v18349_v63  ;;  %v22241_v3 = vpop.f32.mrb[32].mxu0  ;;  %v6752_v63 = vld [vmem:[#allocation6 + $0x18] sm:$0xff]  ;;  %v6754_v33 = vld [vmem:[#allocation6 + $0x28] sm:$0xff] }
 0x565   : > { %18354 = vmatprep.subr.bf16.mxu1 %v18353_v9  ;;  %v22243_v43 = vpop.f32.mrb[33].mxu0  ;;  %v18365_v29 = vpack.c.bf16 %v6752_v63, %v6751_v53  ;;  %v6761_v63 = vld [vmem:[#allocation6 + $0x60] sm:$0xff] }
 0x567   : > { %16392 = vmatmul.mubr.f32.gmra.mrb[12].mxu1 %v5957_v52 }
 0x568   : > { %16394 = vmatprep.mubr.f32.mxu1 %v5958_v31  ;;  %18356 = vmatpush3.bf16.msra.mxu1 %v18353_v9  ;;  %v22245_v59 = vpop.f32.mrb[34].mxu0  ;;  %v18369_v31 = vpack.c.bf16 %v6754_v33, %v6753_v54 }
 0x569   : > { %18358 = vmatprep.subr.bf16.mxu1 %v18357_v37 }
 0x56b   : > { %16395 = vmatmul.mubr.f32.gmra.mrb[14].mxu1 %v5959_v15 }
 0x56c   : > { %16397 = vmatprep.mubr.f32.mxu1 %v5960_v50  ;;  %18360 = vmatpush3.bf16.msra.mxu1 %v18357_v37  ;;  %v6759_v37 = vld [vmem:[#allocation6 + $0x50] sm:$0xff] }
 0x56d   : > { %18362 = vmatprep.subr.bf16.mxu1 %v18361_v45 }
 0x56f   : > { %16398 = vmatmul.mubr.f32.gmra.mrb[16].mxu1 %v5961_v21 }
 0x570   : > { %16400 = vmatprep.mubr.f32.mxu1 %v5962_v34  ;;  %v6755_v34 = vld [vmem:[#allocation6 + $0x30] sm:$0xff] }
 0x573   : > { %16401 = vmatmul.mubr.f32.gmra.mrb[18].mxu1 %v5963_v5  ;;  %v6756_v5 = vld [vmem:[#allocation6 + $0x38] sm:$0xff] }
 0x574   : > { %16403 = vmatprep.mubr.f32.mxu1 %v5964_v22 }
 0x577   : > { %16404 = vmatmul.mubr.f32.gmra.mrb[20].mxu1 %v5965_v24  ;;  %v18373_v24 = vpack.c.bf16 %v6756_v5, %v6755_v34  ;;  %v6764_v34 = vld [vmem:[#allocation6 + $0x78] sm:$0xff] }
 0x578   : > { %16406 = vmatprep.mubr.f32.mxu1 %v5966_v42 }
 0x57b   : > { %16407 = vmatmul.mubr.f32.gmra.mrb[22].mxu1 %v5967_v19 }
 0x57c   : > { %16409 = vmatprep.mubr.f32.mxu1 %v5968_v58 }
 0x57f   : > { %16410 = vmatmul.mubr.f32.gmra.mrb[24].mxu1 %v5969_v38  ;;  %v6757_v38 = vld [vmem:[#allocation6 + $0x40] sm:$0xff] }
 0x580   : > { %16412 = vmatprep.mubr.f32.mxu1 %v5970_v23  ;;  %v6758_v23 = vld [vmem:[#allocation6 + $0x48] sm:$0xff] }
 0x583   : > { %16413 = vmatmul.mubr.f32.gmra.mrb[26].mxu1 %v5971_v61 }
 0x584   : > { %16415 = vmatprep.mubr.f32.mxu1 %v22172_v11  ;;  %v22247_v11 = vpop.f32.mrb[35].mxu0 }
 0x587   : > { %16416 = vmatmul.mubr.f32.gmra.mrb[28].mxu1 %v22179_v55  ;;  %v22249_v55 = vpop.f32.mrb[36].mxu0 }
 0x588   : > { %16418 = vmatprep.mubr.f32.mxu1 %v5974_v48  ;;  %v22251_v47 = vpop.f32.mrb[37].mxu0  ;;  %v18377_v48 = vpack.c.bf16 %v6758_v23, %v6757_v38  ;;  %v7297_v38 = vld [vmem:[#allocation6 + $0x100] sm:$0xff]  ;;  %v7298_v23 = vld [vmem:[#allocation6 + $0x108] sm:$0xff] }
 0x589   : > { %v22253_v36 = vpop.f32.mrb[38].mxu0 }
 0x58a   : > { %v22255_v2 = vpop.f32.mrb[39].mxu0 }
 0x58b   : > { %16419 = vmatmul.mubr.f32.gmra.mrb[30].mxu1 %v5975_v56  ;;  %v22257_v6 = vpop.f32.mrb[40].mxu0 }
 0x58c   : > { %16503 = vmatprep.mubr.f32.mxu1 %v6765_v60  ;;  %v22259_v39 = vpop.f32.mrb[41].mxu0  ;;  %v6760_v60 = vld [vmem:[#allocation6 + $0x58] sm:$0xff] }
 0x58d   : > { %v22261_v4 = vpop.f32.mrb[42].mxu0  ;;  %v18381_v14 = vpack.c.bf16 %v6760_v60, %v6759_v37  ;;  %v22311_v37 = vld [vmem:[%s23924_s4] ss:$0 sm:$0xff] }
 0x58e   : > { %v22263_v40 = vpop.f32.mrb[43].mxu0 }
 0x58f   : > { %16504 = vmatmul.mubr.f32.vlgmr.msra.gmra.mrb[32].mxu1 %v6766_v8  ;;  %v22265_v13 = vpop.f32.mrb[44].mxu0 }
 0x590   : > { %18364 = vmatpush3.bf16.msra.mxu1 %v18361_v45  ;;  %v22267_v9 = vpop.f32.mrb[45].mxu0 }
 0x591   : > { %18366 = vmatprep.subr.bf16.mxu1 %v18365_v29  ;;  %v22269_v52 = vpop.f32.mrb[46].mxu0 }
 0x592   : > { %v22271_v15 = vpop.f32.mrb[47].mxu0 }
 0x593   : > { %v22273_v50 = vpop.f32.mrb[48].mxu0 }
 0x594   : > { %18368 = vmatpush3.bf16.msra.mxu1 %v18365_v29  ;;  %v22275_v21 = vpop.f32.mrb[49].mxu0  ;;  %v6762_v29 = vld [vmem:[#allocation6 + $0x68] sm:$0xff] }
 0x595   : > { %18370 = vmatprep.subr.bf16.mxu1 %v18369_v31  ;;  %v22277_v22 = vpop.f32.mrb[50].mxu0  ;;  %v18385_v54 = vpack.c.bf16 %v6762_v29, %v6761_v63 }
 0x596   : > { %v22279_v42 = vpop.f32.mrb[51].mxu0 }
 0x597   : > { %v22281_v19 = vpop.f32.mrb[52].mxu0 }
 0x598   : > { %18372 = vmatpush3.bf16.msra.mxu1 %v18369_v31  ;;  %v22283_v58 = vpop.f32.mrb[53].mxu0  ;;  %v6763_v31 = vld [vmem:[#allocation6 + $0x70] sm:$0xff] }
 0x599   : > { %18374 = vmatprep.subr.bf16.mxu1 %v18373_v24  ;;  %v22285_v61 = vpop.f32.mrb[54].mxu0 }
 0x59a   : > { %v22287_v56 = vpop.f32.mrb[55].mxu0 }
 0x59b   : > { %v22289_v10 = vpop.f32.mrb[56].mxu0 }
 0x59c   : > { %18376 = vmatpush3.bf16.msra.mxu1 %v18373_v24  ;;  %v22291_v1 = vpop.f32.mrb[57].mxu0  ;;  %v18389_v24 = vpack.c.bf16 %v6764_v34, %v6763_v31 }
 0x59d   : > { %18378 = vmatprep.subr.bf16.mxu1 %v18377_v48  ;;  %v22293_v8 = vpop.f32.mrb[58].mxu0 }
 0x59e   : > { %v22295_v57 = vpop.f32.mrb[59].mxu0 }
 0x59f   : > { %v22297_v45 = vpop.f32.mrb[60].mxu0 }
 0x5a0   : > { %18380 = vmatpush3.bf16.msra.mxu1 %v18377_v48  ;;  %v22299_v53 = vpop.f32.mrb[61].mxu0  ;;  %v22305_v48 = vpack.c.bf16 %v7298_v23, %v7297_v38  ;;  %v22319_v23 = vld [vmem:[%s23926_s6] ss:$0 sm:$0xff] }
 0x5a1   : > { %18382 = vmatprep.subr.bf16.mxu1 %v18381_v14  ;;  %v22301_v33 = vpop.f32.mrb[62].mxu0 }
 0x5a2   : > { %v22303_v5 = vpop.f32.mrb[63].mxu0 }
 0x5a4   : > { %18384 = vmatpush3.bf16.msra.mxu1 %v18381_v14 }
 0x5a5   : > { %18386 = vmatprep.subr.bf16.mxu1 %v18385_v54 }
 0x5a8   : > { %18388 = vmatpush3.bf16.msra.mxu1 %v18385_v54 }
 0x5a9   : > { %18390 = vmatprep.subr.bf16.mxu1 %v18389_v24 }
 0x5ac   : > { %18392 = vmatpush3.bf16.msra.mxu1 %v18389_v24 }
 0x5ad   : > { %18394 = vmatprep.subr.bf16.mxu1 %v22305_v48 }
 0x622   : > { %v16375_v60 = vpop.f32.mrb[0].mxu1 }
 0x623   : > { %v6258_v14 = vadd.f32 %v16375_v60, %v22311_v37  ;;  %v6059_v63 = vpop.f32.mrb[1].mxu1 }
 0x624   : > { %v6257_v29 = vadd.f32 %v22311_v37, %v6059_v63 }
 0x625   : > { %v6322_v54 = vmul.f32 0.2, %v6258_v14  ;;  %vm6290_vm8 = vcmp.ge.f32.partialorder %v6258_v14, 0.0 }
 0x626   : > { %v6321_v31 = vmul.f32 0.2, %v6257_v29  ;;  %v16378_v34 = vpop.f32.mrb[2].mxu1  ;;  %vm6289_vm9 = vcmp.ge.f32.partialorder %v6257_v29, 0.0 }
 0x627   : > { %v6260_v24 = vadd.f32 %v16378_v34, %v22311_v37  ;;  %v6354_v38 = vsel %vm6290_vm8, %v6258_v14, %v6322_v54  ;;  %v6069_v17 = vpop.f32.mrb[3].mxu1 }
 0x628   : > { %v6615_v30 = vadd.f32 %v22241_v3, %v6354_v38  ;;  %v6259_v60 = vadd.f32 %v22311_v37, %v6069_v17  ;;  %v6353_v28 = vsel %vm6289_vm9, %v6257_v29, %v6321_v31 }
 0x629   : > { %v6324_v63 = vmul.f32 0.2, %v6260_v24  ;;  %v6614_v7 = vadd.f32 %v22243_v43, %v6353_v28  ;;  %vm6292_vm10 = vcmp.ge.f32.partialorder %v6260_v24, 0.0 }
 0x62a   : > { %v22325_v16 = vadd.f32 %v22319_v23, %v6615_v30  ;;  %v6323_v34 = vmul.f32 0.2, %v6259_v60  ;;  %v16381_v14 = vpop.f32.mrb[4].mxu1  ;;  %vm6291_vm11 = vcmp.ge.f32.partialorder %v6259_v60, 0.0 }
 0x62b   : > { %v22328_v54 = vadd.f32 %v22319_v23, %v6614_v7  ;;  %v6262_v51 = vadd.f32 %v16381_v14, %v22311_v37  ;;  %v6356_v27 = vsel %vm6292_vm10, %v6260_v24, %v6324_v63  ;;  %v6079_v3 = vpop.f32.mrb[5].mxu1 }
 0x62c   : > { %24384 = vst [vmem:[#allocation63_spill] sm:$0xff] %v22325_v16  ;;  %6686 = vst [vmem:[#allocation2 + $0x21] sm:$0xff] %v22325_v16  ;;  %v6617_v17 = vadd.f32 %v22245_v59, %v6356_v27  ;;  %v6261_v28 = vadd.f32 %v22311_v37, %v6079_v3  ;;  %v6355_v43 = vsel %vm6291_vm11, %v6259_v60, %v6323_v34 }
 0x62d   : > { %24385 = vst [vmem:[#allocation52_spill] sm:$0xff] %v22328_v54  ;;  %6685 = vst [vmem:[#allocation2 + $0x19] sm:$0xff] %v22328_v54  ;;  %v6326_v30 = vmul.f32 0.2, %v6262_v51  ;;  %v6616_v29 = vadd.f32 %v22247_v11, %v6355_v43  ;;  %vm6294_vm12 = vcmp.ge.f32.partialorder %v6262_v51, 0.0  ;;  %16506 = vmatprep.mubr.f32.mxu1 %v22328_v54 }
 0x62e   : > { %v22338_v7 = vadd.f32 %v22319_v23, %v6617_v17  ;;  %v6325_v31 = vmul.f32 0.2, %v6261_v28  ;;  %v16384_v24 = vpop.f32.mrb[6].mxu1  ;;  %vm6293_vm13 = vcmp.ge.f32.partialorder %v6261_v28, 0.0  ;;  %16507 = vmatmul.mubr.f32.gmra.mrb[34].mxu1 %v22325_v16 }
 0x62f   : > { %v22342_v27 = vadd.f32 %v22319_v23, %v6616_v29  ;;  %v6264_v59 = vadd.f32 %v16384_v24, %v22311_v37  ;;  %v6358_v38 = vsel %vm6294_vm12, %v6262_v51, %v6326_v30  ;;  %v6089_v60 = vpop.f32.mrb[7].mxu1 }
 0x630   : > { %24386 = vst [vmem:[#allocation53_spill] sm:$0xff] %v22338_v7  ;;  %6688 = vst [vmem:[#allocation2 + $0x39] sm:$0xff] %v22338_v7  ;;  %v6619_v11 = vadd.f32 %v22249_v55, %v6358_v38  ;;  %v6263_v63 = vadd.f32 %v22311_v37, %v6089_v60  ;;  %v6357_v34 = vsel %vm6293_vm13, %v6261_v28, %v6325_v31 }
 0x631   : > { %24387 = vst [vmem:[#allocation54_spill] sm:$0xff] %v22342_v27  ;;  %6687 = vst [vmem:[#allocation2 + $0x31] sm:$0xff] %v22342_v27  ;;  %v6328_v14 = vmul.f32 0.2, %v6264_v59  ;;  %v6618_v3 = vadd.f32 %v22251_v47, %v6357_v34  ;;  %vm6296_vm14 = vcmp.ge.f32.partialorder %v6264_v59, 0.0  ;;  %16509 = vmatprep.mubr.f32.mxu1 %v22342_v27 }
 0x632   : > { %v22352_v17 = vadd.f32 %v22319_v23, %v6619_v11  ;;  %v6327_v51 = vmul.f32 0.2, %v6263_v63  ;;  %v16387_v43 = vpop.f32.mrb[8].mxu1  ;;  %vm6295_vm15 = vcmp.ge.f32.partialorder %v6263_v63, 0.0  ;;  %16510 = vmatmul.mubr.f32.gmra.mrb[36].mxu1 %v22338_v7  ;;  %v7608_v7 = vld [vmem:[#allocation6 + $0x1a8] sm:$0xff] }
 0x633   : > { %v22356_v55 = vadd.f32 %v22319_v23, %v6618_v3  ;;  %v6266_v28 = vadd.f32 %v16387_v43, %v22311_v37  ;;  %v6360_v30 = vsel %vm6296_vm14, %v6264_v59, %v6328_v14  ;;  %v6099_v29 = vpop.f32.mrb[9].mxu1  ;;  %v22634_v54 = vld [vmem:[#allocation2 + $0x22] sm:$0xff] }
 0x634   : > { %24388 = vst [vmem:[#allocation55_spill] sm:$0xff] %v22352_v17  ;;  %6690 = vst [vmem:[#allocation2 + $0x51] sm:$0xff] %v22352_v17  ;;  %v6621_v47 = vadd.f32 %v22253_v36, %v6360_v30  ;;  %v6265_v31 = vadd.f32 %v22311_v37, %v6099_v29  ;;  %v6359_v24 = vsel %vm6295_vm15, %v6263_v63, %v6327_v51  ;;  %v22631_v27 = vld [vmem:[#allocation2 + $0x1a] sm:$0xff] }
 0x635   : > { %24389 = vst [vmem:[#allocation56_spill] sm:$0xff] %v22356_v55  ;;  %6689 = vst [vmem:[#allocation2 + $0x49] sm:$0xff] %v22356_v55  ;;  %v6330_v38 = vmul.f32 0.2, %v6266_v28  ;;  %v6620_v60 = vadd.f32 %v22255_v2, %v6359_v24  ;;  %vm6298_vm1 = vcmp.ge.f32.partialorder %v6266_v28, 0.0  ;;  %16512 = vmatprep.mubr.f32.mxu1 %v22356_v55  ;;  %v7607_v55 = vld [vmem:[#allocation6 + $0x1a0] sm:$0xff] }
 0x636   : > { %v22366_v11 = vadd.f32 %v22319_v23, %v6621_v47  ;;  %v6329_v59 = vmul.f32 0.2, %v6265_v31  ;;  %v16390_v34 = vpop.f32.mrb[10].mxu1  ;;  %vm6297_vm3 = vcmp.ge.f32.partialorder %v6265_v31, 0.0  ;;  %16513 = vmatmul.mubr.f32.gmra.mrb[38].mxu1 %v22352_v17  ;;  %v18433_v16 = vpack.c.bf16 %v7608_v7, %v7607_v55 }
 0x637   : > { %v22370_v36 = vadd.f32 %v22319_v23, %v6620_v60  ;;  %v6268_v63 = vadd.f32 %v16390_v34, %v22311_v37  ;;  %v6362_v14 = vsel %vm6298_vm1, %v6266_v28, %v6330_v38  ;;  %v6109_v3 = vpop.f32.mrb[11].mxu1 }
 0x638   : > { %24390 = vst [vmem:[#allocation57_spill] sm:$0xff] %v22366_v11  ;;  %6692 = vst [vmem:[#allocation2 + $0x69] sm:$0xff] %v22366_v11  ;;  %v6623_v2 = vadd.f32 %v22257_v6, %v6362_v14  ;;  %v6267_v51 = vadd.f32 %v22311_v37, %v6109_v3  ;;  %v6361_v43 = vsel %vm6297_vm3, %v6265_v31, %v6329_v59  ;;  %v22637_v46 = vld [vmem:[#allocation2 + $0x32] sm:$0xff] }
 0x639   : > { %24391 = vst [vmem:[#allocation59_spill] sm:$0xff] %v22370_v36  ;;  %6691 = vst [vmem:[#allocation2 + $0x61] sm:$0xff] %v22370_v36  ;;  %v6332_v30 = vmul.f32 0.2, %v6268_v63  ;;  %v6622_v29 = vadd.f32 %v22259_v39, %v6361_v43  ;;  %vm6300_vm4 = vcmp.ge.f32.partialorder %v6268_v63, 0.0  ;;  %16515 = vmatprep.mubr.f32.mxu1 %v22370_v36  ;;  %v7265_v36 = vld [vmem:[#allocation2 + $0xa] sm:$0xff] }
 0x63a   : > { %v22380_v47 = vadd.f32 %v22319_v23, %v6623_v2  ;;  %v6331_v28 = vmul.f32 0.2, %v6267_v51  ;;  %v16393_v24 = vpop.f32.mrb[12].mxu1  ;;  %vm6299_vm5 = vcmp.ge.f32.partialorder %v6267_v51, 0.0  ;;  %16516 = vmatmul.mubr.f32.gmra.mrb[40].mxu1 %v22366_v11  ;;  %v7606_v11 = vld [vmem:[#allocation6 + $0x198] sm:$0xff] }
 0x63b   : > { %v22384_v6 = vadd.f32 %v22319_v23, %v6622_v29  ;;  %v6270_v31 = vadd.f32 %v16393_v24, %v22311_v37  ;;  %v6364_v38 = vsel %vm6300_vm4, %v6268_v63, %v6332_v30  ;;  %v6119_v60 = vpop.f32.mrb[13].mxu1 }
 0x63c   : > { %24392 = vst [vmem:[#allocation60_spill] sm:$0xff] %v22380_v47  ;;  %6694 = vst [vmem:[#allocation2 + $0x81] sm:$0xff] %v22380_v47  ;;  %v6625_v39 = vadd.f32 %v22261_v4, %v6364_v38  ;;  %v6269_v59 = vadd.f32 %v22311_v37, %v6119_v60  ;;  %v6363_v34 = vsel %vm6299_vm5, %v6267_v51, %v6331_v28  ;;  %v22643_v7 = vld [vmem:[#allocation2 + $0x4a] sm:$0xff] }
 0x63d   : > { %24393 = vst [vmem:[#allocation61_spill] sm:$0xff] %v22384_v6  ;;  %6693 = vst [vmem:[#allocation2 + $0x79] sm:$0xff] %v22384_v6  ;;  %v6334_v14 = vmul.f32 0.2, %v6270_v31  ;;  %v6624_v3 = vadd.f32 %v22263_v40, %v6363_v34  ;;  %vm6302_vm6 = vcmp.ge.f32.partialorder %v6270_v31, 0.0  ;;  %16518 = vmatprep.mubr.f32.mxu1 %v22384_v6  ;;  %v7605_v6 = vld [vmem:[#allocation6 + $0x190] sm:$0xff] }
 0x63e   : > { %v22394_v2 = vadd.f32 %v22319_v23, %v6625_v39  ;;  %v6333_v63 = vmul.f32 0.2, %v6269_v59  ;;  %v16396_v43 = vpop.f32.mrb[14].mxu1  ;;  %vm6301_vm7 = vcmp.ge.f32.partialorder %v6269_v59, 0.0  ;;  %16519 = vmatmul.mubr.f32.gmra.mrb[42].mxu1 %v22380_v47  ;;  %v18429_v17 = vpack.c.bf16 %v7606_v11, %v7605_v6  ;;  %v7611_v6 = vld [vmem:[#allocation6 + $0x1c0] sm:$0xff] }
 0x63f   : > { %v22398_v4 = vadd.f32 %v22319_v23, %v6624_v3  ;;  %v6272_v51 = vadd.f32 %v16396_v43, %v22311_v37  ;;  %v6366_v30 = vsel %vm6302_vm6, %v6270_v31, %v6334_v14  ;;  %v6129_v29 = vpop.f32.mrb[15].mxu1  ;;  %v18437_v11 = vpack.c.bf16 %v7610_v41, %v7609_v32 }
 0x640   : > { %24394 = vst [vmem:[#allocation62_spill] sm:$0xff] %v22394_v2  ;;  %6696 = vst [vmem:[#allocation2 + $0x99] sm:$0xff] %v22394_v2  ;;  %v6627_v40 = vadd.f32 %v22265_v13, %v6366_v30  ;;  %v6271_v28 = vadd.f32 %v22311_v37, %v6129_v29  ;;  %v6365_v24 = vsel %vm6301_vm7, %v6269_v59, %v6333_v63  ;;  %v22649_v41 = vld [vmem:[#allocation2 + $0x62] sm:$0xff] }
 0x641   : > { %24395 = vst [vmem:[#allocation64_spill] sm:$0xff] %v22398_v4  ;;  %6695 = vst [vmem:[#allocation2 + $0x91] sm:$0xff] %v22398_v4  ;;  %v6336_v38 = vmul.f32 0.2, %v6272_v51  ;;  %v6626_v60 = vadd.f32 %v22267_v9, %v6365_v24  ;;  %vm6304_vm8 = vcmp.ge.f32.partialorder %v6272_v51, 0.0  ;;  %16521 = vmatprep.mubr.f32.mxu1 %v22398_v4  ;;  %v7264_v4 = vld [vmem:[#allocation2 + $0x2] sm:$0xff]  ;;  %v18445_v32 = vpack.c.bf16 %v7614_v18, %v7613_v12 }
 0x642   : > { %v22408_v39 = vadd.f32 %v22319_v23, %v6627_v40  ;;  %v6335_v31 = vmul.f32 0.2, %v6271_v28  ;;  %v16399_v34 = vpop.f32.mrb[16].mxu1  ;;  %vm6303_vm9 = vcmp.ge.f32.partialorder %v6271_v28, 0.0  ;;  %16522 = vmatmul.mubr.f32.gmra.mrb[44].mxu1 %v22394_v2  ;;  %v18453_v12 = vpack.c.bf16 %v7618_v0, %v7617_v62 }
 0x643   : > { %v22412_v13 = vadd.f32 %v22319_v23, %v6626_v60  ;;  %v6274_v59 = vadd.f32 %v16399_v34, %v22311_v37  ;;  %v6368_v14 = vsel %vm6304_vm8, %v6272_v51, %v6336_v38  ;;  %v6139_v3 = vpop.f32.mrb[17].mxu1 }
 0x644   : > { %24396 = vst [vmem:[#allocation67_spill] sm:$0xff] %v22408_v39  ;;  %6698 = vst [vmem:[#allocation2 + $0xb1] sm:$0xff] %v22408_v39  ;;  %v6629_v9 = vadd.f32 %v22269_v52, %v6368_v14  ;;  %v6273_v63 = vadd.f32 %v22311_v37, %v6139_v3  ;;  %v6367_v43 = vsel %vm6303_vm9, %v6271_v28, %v6335_v31 }
 0x645   : > { %24397 = vst [vmem:[#allocation68_spill] sm:$0xff] %v22412_v13  ;;  %6697 = vst [vmem:[#allocation2 + $0xa9] sm:$0xff] %v22412_v13  ;;  %v6338_v30 = vmul.f32 0.2, %v6274_v59  ;;  %v6628_v29 = vadd.f32 %v22271_v15, %v6367_v43  ;;  %vm6306_vm10 = vcmp.ge.f32.partialorder %v6274_v59, 0.0  ;;  %16524 = vmatprep.mubr.f32.mxu1 %v22412_v13 }
 0x646   : > { %v22422_v40 = vadd.f32 %v22319_v23, %v6629_v9  ;;  %v6337_v51 = vmul.f32 0.2, %v6273_v63  ;;  %v16402_v24 = vpop.f32.mrb[18].mxu1  ;;  %vm6305_vm11 = vcmp.ge.f32.partialorder %v6273_v63, 0.0  ;;  %16525 = vmatmul.mubr.f32.gmra.mrb[46].mxu1 %v22408_v39 }
 0x647   : > { %v22426_v52 = vadd.f32 %v22319_v23, %v6628_v29  ;;  %v6276_v28 = vadd.f32 %v16402_v24, %v22311_v37  ;;  %v6370_v38 = vsel %vm6306_vm10, %v6274_v59, %v6338_v30  ;;  %v6149_v60 = vpop.f32.mrb[19].mxu1 }
 0x648   : > { %24398 = vst [vmem:[#allocation69_spill] sm:$0xff] %v22422_v40  ;;  %6700 = vst [vmem:[#allocation2 + $0xc9] sm:$0xff] %v22422_v40  ;;  %v6631_v15 = vadd.f32 %v22273_v50, %v6370_v38  ;;  %v6275_v31 = vadd.f32 %v22311_v37, %v6149_v60  ;;  %v6369_v34 = vsel %vm6305_vm11, %v6273_v63, %v6337_v51  ;;  %v22661_v18 = vld [vmem:[#allocation2 + $0x92] sm:$0xff] }
 0x649   : > { %24399 = vst [vmem:[#allocation70_spill] sm:$0xff] %v22426_v52  ;;  %6699 = vst [vmem:[#allocation2 + $0xc1] sm:$0xff] %v22426_v52  ;;  %v6340_v14 = vmul.f32 0.2, %v6276_v28  ;;  %v6630_v3 = vadd.f32 %v22275_v21, %v6369_v34  ;;  %vm6308_vm12 = vcmp.ge.f32.partialorder %v6276_v28, 0.0  ;;  %16527 = vmatprep.mubr.f32.mxu1 %v22426_v52 }
 0x64a   : > { %v22436_v9 = vadd.f32 %v22319_v23, %v6631_v15  ;;  %v6339_v59 = vmul.f32 0.2, %v6275_v31  ;;  %v16405_v43 = vpop.f32.mrb[20].mxu1  ;;  %vm6307_vm13 = vcmp.ge.f32.partialorder %v6275_v31, 0.0  ;;  %16528 = vmatmul.mubr.f32.gmra.mrb[48].mxu1 %v22422_v40 }
 0x64b   : > { %v22440_v50 = vadd.f32 %v22319_v23, %v6630_v3  ;;  %v6278_v63 = vadd.f32 %v16405_v43, %v22311_v37  ;;  %v6372_v30 = vsel %vm6308_vm12, %v6276_v28, %v6340_v14  ;;  %v6159_v29 = vpop.f32.mrb[21].mxu1 }
 0x64c   : > { %24400 = vst [vmem:[#allocation71_spill] sm:$0xff] %v22436_v9  ;;  %6702 = vst [vmem:[#allocation2 + $0xe1] sm:$0xff] %v22436_v9  ;;  %v6633_v21 = vadd.f32 %v22277_v22, %v6372_v30  ;;  %v6277_v51 = vadd.f32 %v22311_v37, %v6159_v29  ;;  %v6371_v24 = vsel %vm6307_vm13, %v6275_v31, %v6339_v59 }
 0x64d   : > { %24401 = vst [vmem:[#allocation72_spill] sm:$0xff] %v22440_v50  ;;  %6701 = vst [vmem:[#allocation2 + $0xd9] sm:$0xff] %v22440_v50  ;;  %v6342_v38 = vmul.f32 0.2, %v6278_v63  ;;  %v6632_v60 = vadd.f32 %v22279_v42, %v6371_v24  ;;  %vm6310_vm14 = vcmp.ge.f32.partialorder %v6278_v63, 0.0  ;;  %16530 = vmatprep.mubr.f32.mxu1 %v22440_v50 }
 0x64e   : > { %v22450_v15 = vadd.f32 %v22319_v23, %v6633_v21  ;;  %v6341_v28 = vmul.f32 0.2, %v6277_v51  ;;  %v16408_v34 = vpop.f32.mrb[22].mxu1  ;;  %vm6309_vm15 = vcmp.ge.f32.partialorder %v6277_v51, 0.0  ;;  %16531 = vmatmul.mubr.f32.gmra.mrb[50].mxu1 %v22436_v9 }
 0x64f   : > { %v22454_v22 = vadd.f32 %v22319_v23, %v6632_v60  ;;  %v6280_v31 = vadd.f32 %v16408_v34, %v22311_v37  ;;  %v6374_v14 = vsel %vm6310_vm14, %v6278_v63, %v6342_v38  ;;  %v6169_v3 = vpop.f32.mrb[23].mxu1  ;;  %v22676_v0 = vld [vmem:[#allocation2 + $0xca] sm:$0xff] }
 0x650   : > { %24402 = vst [vmem:[#allocation73_spill] sm:$0xff] %v22450_v15  ;;  %6704 = vst [vmem:[#allocation2 + $0xf9] sm:$0xff] %v22450_v15  ;;  %v6635_v42 = vadd.f32 %v22281_v19, %v6374_v14  ;;  %v6279_v59 = vadd.f32 %v22311_v37, %v6169_v3  ;;  %v6373_v43 = vsel %vm6309_vm15, %v6277_v51, %v6341_v28 }
 0x651   : > { %24403 = vst [vmem:[#allocation74_spill] sm:$0xff] %v22454_v22  ;;  %6703 = vst [vmem:[#allocation2 + $0xf1] sm:$0xff] %v22454_v22  ;;  %v6344_v30 = vmul.f32 0.2, %v6280_v31  ;;  %v6634_v29 = vadd.f32 %v22283_v58, %v6373_v43  ;;  %vm6312_vm1 = vcmp.ge.f32.partialorder %v6280_v31, 0.0  ;;  %16533 = vmatprep.mubr.f32.mxu1 %v22454_v22 }
 0x652   : > { %v22464_v21 = vadd.f32 %v22319_v23, %v6635_v42  ;;  %v6343_v63 = vmul.f32 0.2, %v6279_v59  ;;  %v16411_v24 = vpop.f32.mrb[24].mxu1  ;;  %vm6311_vm3 = vcmp.ge.f32.partialorder %v6279_v59, 0.0  ;;  %16534 = vmatmul.mubr.f32.gmra.mrb[52].mxu1 %v22450_v15  ;;  %v7604_v15 = vld [vmem:[#allocation6 + $0x188] sm:$0xff]  ;;  %24409 = vst [vmem:[#allocation78_spill] sm:$0xff] %v22676_v0 }
 0x653   : > { %v22468_v19 = vadd.f32 %v22319_v23, %v6634_v29  ;;  %v6282_v51 = vadd.f32 %v16411_v24, %v22311_v37  ;;  %v6376_v38 = vsel %vm6312_vm1, %v6280_v31, %v6344_v30  ;;  %v6179_v60 = vpop.f32.mrb[25].mxu1 }
 0x654   : > { %24404 = vst [vmem:[#allocation51_spill] sm:$0xff] %v22464_v21  ;;  %6706 = vst [vmem:[#allocation2 + $0x111] sm:$0xff] %v22464_v21  ;;  %v6637_v58 = vadd.f32 %v22285_v61, %v6376_v38  ;;  %v6281_v28 = vadd.f32 %v22311_v37, %v6179_v60  ;;  %v6375_v34 = vsel %vm6311_vm3, %v6279_v59, %v6343_v63  ;;  %v22679_v62 = vld [vmem:[#allocation2 + $0xda] sm:$0xff] }
 0x655   : > { %24405 = vst [vmem:[#allocation58_spill] sm:$0xff] %v22468_v19  ;;  %6705 = vst [vmem:[#allocation2 + $0x109] sm:$0xff] %v22468_v19  ;;  %v6346_v14 = vmul.f32 0.2, %v6282_v51  ;;  %v6636_v3 = vadd.f32 %v22287_v56, %v6375_v34  ;;  %vm6314_vm4 = vcmp.ge.f32.partialorder %v6282_v51, 0.0  ;;  %16536 = vmatprep.mubr.f32.mxu1 %v22468_v19  ;;  %v7603_v19 = vld [vmem:[#allocation6 + $0x180] sm:$0xff] }
 0x656   : > { %v22478_v42 = vadd.f32 %v22319_v23, %v6637_v58  ;;  %v6345_v31 = vmul.f32 0.2, %v6281_v28  ;;  %v16414_v43 = vpop.f32.mrb[26].mxu1  ;;  %vm6313_vm5 = vcmp.ge.f32.partialorder %v6281_v28, 0.0  ;;  %16537 = vmatmul.mubr.f32.gmra.mrb[54].mxu1 %v22464_v21  ;;  %v7312_v21 = vld [vmem:[#allocation6 + $0x178] sm:$0xff]  ;;  %24410 = vst [vmem:[#allocation79_spill] sm:$0xff] %v22679_v62 }
 0x657   : > { %v22482_v61 = vadd.f32 %v22319_v23, %v6636_v3  ;;  %v6284_v59 = vadd.f32 %v16414_v43, %v22311_v37  ;;  %v6378_v30 = vsel %vm6314_vm4, %v6282_v51, %v6346_v14  ;;  %v6189_v29 = vpop.f32.mrb[27].mxu1 }
 0x658   : > { %6708 = vst [vmem:[#allocation2 + $0x129] sm:$0xff] %v22478_v42  ;;  %v6639_v56 = vadd.f32 %v22289_v10, %v6378_v30  ;;  %v6283_v63 = vadd.f32 %v22311_v37, %v6189_v29  ;;  %v6377_v24 = vsel %vm6313_vm5, %v6281_v28, %v6345_v31 }
 0x659   : > { %6707 = vst [vmem:[#allocation2 + $0x121] sm:$0xff] %v22482_v61  ;;  %v6348_v38 = vmul.f32 0.2, %v6284_v59  ;;  %v6638_v60 = vadd.f32 %v22291_v1, %v6377_v24  ;;  %vm6316_vm6 = vcmp.ge.f32.partialorder %v6284_v59, 0.0  ;;  %16539 = vmatprep.mubr.f32.mxu1 %v22482_v61 }
 0x65a   : > { %v22492_v58 = vadd.f32 %v22319_v23, %v6639_v56  ;;  %v6347_v51 = vmul.f32 0.2, %v6283_v63  ;;  %v16417_v34 = vpop.f32.mrb[28].mxu1  ;;  %vm6315_vm7 = vcmp.ge.f32.partialorder %v6283_v63, 0.0  ;;  %16540 = vmatmul.mubr.f32.gmra.mrb[56].mxu1 %v22478_v42 }
 0x65b   : > { %v22496_v10 = vadd.f32 %v22319_v23, %v6638_v60  ;;  %v6286_v28 = vadd.f32 %v16417_v34, %v22311_v37  ;;  %v6380_v14 = vsel %vm6316_vm6, %v6284_v59, %v6348_v38  ;;  %v6199_v3 = vpop.f32.mrb[29].mxu1  ;;  %v22694_v26 = vld [vmem:[#allocation2 + $0x112] sm:$0xff] }
 0x65c   : > { %6710 = vst [vmem:[#allocation2 + $0x141] sm:$0xff] %v22492_v58  ;;  %v6641_v1 = vadd.f32 %v22293_v8, %v6380_v14  ;;  %v6285_v31 = vadd.f32 %v22311_v37, %v6199_v3  ;;  %v6379_v43 = vsel %vm6315_vm7, %v6283_v63, %v6347_v51  ;;  %v22604_v22 = vld [vmem:[#allocation2 + $0x110] sm:$0xff]  ;;  %24415 = vst [vmem:[#allocation84_spill] sm:$0xff] %v22694_v26 }
 0x65d   : > { %6709 = vst [vmem:[#allocation2 + $0x139] sm:$0xff] %v22496_v10  ;;  %v6350_v30 = vmul.f32 0.2, %v6286_v28  ;;  %v6640_v29 = vadd.f32 %v22295_v57, %v6379_v43  ;;  %vm6318_vm8 = vcmp.ge.f32.partialorder %v6286_v28, 0.0  ;;  %16542 = vmatprep.mubr.f32.mxu1 %v22496_v10 }
 0x65e   : > { %v22506_v56 = vadd.f32 %v22319_v23, %v6641_v1  ;;  %v6349_v59 = vmul.f32 0.2, %v6285_v31  ;;  %v16420_v24 = vpop.f32.mrb[30].mxu1  ;;  %vm6317_vm9 = vcmp.ge.f32.partialorder %v6285_v31, 0.0  ;;  %16543 = vmatmul.mubr.f32.gmra.mrb[58].mxu1 %v22492_v58 }
 0x65f   : > { %v22510_v8 = vadd.f32 %v22319_v23, %v6640_v29  ;;  %v6288_v63 = vadd.f32 %v16420_v24, %v22311_v37  ;;  %v6382_v38 = vsel %vm6318_vm8, %v6286_v28, %v6350_v30  ;;  %v6209_v60 = vpop.f32.mrb[31].mxu1  ;;  %v7299_v30 = vld [vmem:[#allocation6 + $0x110] sm:$0xff]  ;;  %v7300_v29 = vld [vmem:[#allocation6 + $0x118] sm:$0xff] }
 0x660   : > { %6712 = vst [vmem:[#allocation2 + $0x159] sm:$0xff] %v22506_v56  ;;  %v6643_v57 = vadd.f32 %v22297_v45, %v6382_v38  ;;  %v6287_v51 = vadd.f32 %v22311_v37, %v6209_v60  ;;  %v6381_v34 = vsel %vm6317_vm9, %v6285_v31, %v6349_v59  ;;  %v7302_v38 = vld [vmem:[#allocation6 + $0x128] sm:$0xff]  ;;  %v22607_v9 = vld [vmem:[#allocation2 + $0x120] sm:$0xff]  ;;  %v22610_v50 = vld [vmem:[#allocation2 + $0x128] sm:$0xff] }
 0x661   : > { %6711 = vst [vmem:[#allocation2 + $0x151] sm:$0xff] %v22510_v8  ;;  %v6352_v14 = vmul.f32 0.2, %v6288_v63  ;;  %v6642_v3 = vadd.f32 %v22299_v53, %v6381_v34  ;;  %vm6320_vm10 = vcmp.ge.f32.partialorder %v6288_v63, 0.0  ;;  %16545 = vmatprep.mubr.f32.mxu1 %v22510_v8  ;;  %v22540_v60 = vld [vmem:[#allocation2 + $0x18] sm:$0xff]  ;;  %v7304_v34 = vld [vmem:[#allocation6 + $0x138] sm:$0xff] }
 0x662   : > { %v22520_v1 = vadd.f32 %v22319_v23, %v6643_v57  ;;  %v6351_v28 = vmul.f32 0.2, %v6287_v51  ;;  %vm6319_vm11 = vcmp.ge.f32.partialorder %v6287_v51, 0.0  ;;  %16546 = vmatmul.mubr.f32.gmra.mrb[60].mxu1 %v22506_v56  ;;  %v22697_v25 = vld [vmem:[#allocation2 + $0x122] sm:$0xff] }
 0x663   : > { %v22524_v45 = vadd.f32 %v22319_v23, %v6642_v3  ;;  %v6384_v37 = vsel %vm6320_vm10, %v6288_v63, %v6352_v14  ;;  %v20150_v63 = vld [vmem:[#allocation2] sm:$0xff]  ;;  %v22547_v14 = vld [vmem:[#allocation2 + $0x30] sm:$0xff]  ;;  %24416 = vst [vmem:[#allocation85_spill] sm:$0xff] %v22697_v25 }
 0x664   : > { %6714 = vst [vmem:[#allocation2 + $0x171] sm:$0xff] %v22520_v1  ;;  %v6645_v31 = vadd.f32 %v22301_v33, %v6384_v37  ;;  %v6383_v43 = vsel %vm6319_vm11, %v6287_v51, %v6351_v28  ;;  %v18397_v33 = vpack.c.bf16 %v7300_v29, %v7299_v30  ;;  %v7303_v51 = vld [vmem:[#allocation6 + $0x130] sm:$0xff]  ;;  %v22550_v28 = vld [vmem:[#allocation2 + $0x38] sm:$0xff]  ;;  %v7308_v29 = vld [vmem:[#allocation6 + $0x158] sm:$0xff] }
 0x665   : > { %6713 = vst [vmem:[#allocation2 + $0x169] sm:$0xff] %v22524_v45  ;;  %v6644_v53 = vadd.f32 %v22303_v5, %v6383_v43  ;;  %16548 = vmatprep.mubr.f32.mxu1 %v22524_v45  ;;  %v7301_v5 = vld [vmem:[#allocation6 + $0x120] sm:$0xff]  ;;  %v18405_v3 = vpack.c.bf16 %v7304_v34, %v7303_v51  ;;  %v7306_v37 = vld [vmem:[#allocation6 + $0x148] sm:$0xff]  ;;  %v7307_v30 = vld [vmem:[#allocation6 + $0x150] sm:$0xff] }
 0x666   : > { %v22532_v59 = vadd.f32 %v22319_v23, %v6645_v31  ;;  %16549 = vmatmul.mubr.f32.gmra.mrb[62].mxu1 %v22520_v1  ;;  %v18401_v57 = vpack.c.bf16 %v7302_v38, %v7301_v5  ;;  %v22553_v31 = vld [vmem:[#allocation2 + $0x48] sm:$0xff]  ;;  %v7309_v38 = vld [vmem:[#allocation6 + $0x160] sm:$0xff]  ;;  %v7310_v51 = vld [vmem:[#allocation6 + $0x168] sm:$0xff] }
 0x667   : > { %v22536_v24 = vadd.f32 %v22319_v23, %v6644_v53  ;;  %16583 = vmatprep.mubr.f32.mxu1 %v20150_v63  ;;  %v22544_v23 = vld [vmem:[#allocation2 + $0x20] sm:$0xff]  ;;  %v22556_v53 = vld [vmem:[#allocation2 + $0x50] sm:$0xff]  ;;  %v22562_v5 = vld [vmem:[#allocation2 + $0x68] sm:$0xff]  ;;  %v18417_v34 = vpack.c.bf16 %v7310_v51, %v7309_v38  ;;  %v18425_v38 = vpack.c.bf16 %v7604_v15, %v7603_v19 }
 0x668   : > { %6716 = vst [vmem:[#allocation2 + $0x189] sm:$0xff] %v22532_v59  ;;  %v22580_v51 = vld [vmem:[#allocation2 + $0xb0] sm:$0xff]  ;;  %v22598_v19 = vld [vmem:[#allocation2 + $0xf8] sm:$0xff]  ;;  %v22616_v52 = vld [vmem:[#allocation2 + $0x140] sm:$0xff] }
 0x669   : > { %6715 = vst [vmem:[#allocation2 + $0x181] sm:$0xff] %v22536_v24  ;;  %v22595_v15 = vld [vmem:[#allocation2 + $0xf0] sm:$0xff]  ;;  %v22613_v40 = vld [vmem:[#allocation2 + $0x138] sm:$0xff] }
 0x66a   : > { %16584 = vmatmul.mubr.f32.vlgmr.msra.gmra.mrb[32].mxu1 %v20150_v63  ;;  %v22559_v63 = vld [vmem:[#allocation2 + $0x60] sm:$0xff]  ;;  %v22619_v39 = vld [vmem:[#allocation2 + $0x150] sm:$0xff]  ;;  %v22622_v13 = vld [vmem:[#allocation2 + $0x158] sm:$0xff] }
 0x66b   : > { %18396 = vmatpush3.bf16.msra.mxu1 %v22305_v48  ;;  %16586 = vmatprep.mubr.f32.mxu1 %v22540_v60  ;;  %v7305_v48 = vld [vmem:[#allocation6 + $0x140] sm:$0xff] }
 0x66c   : > { %18398 = vmatprep.subr.bf16.mxu1 %v18397_v33  ;;  %v18409_v43 = vpack.c.bf16 %v7306_v37, %v7305_v48  ;;  %v22568_v48 = vld [vmem:[#allocation2 + $0x80] sm:$0xff]  ;;  %v22625_v2 = vld [vmem:[#allocation2 + $0x168] sm:$0xff]  ;;  %v22628_v47 = vld [vmem:[#allocation2 + $0x170] sm:$0xff] }
 0x66d   : > { %v7311_v37 = vld [vmem:[#allocation6 + $0x170] sm:$0xff]  ;;  %24406 = vst [vmem:[#allocation75_spill] sm:$0xff] %v22625_v2  ;;  %24407 = vst [vmem:[#allocation76_spill] sm:$0xff] %v22628_v47 }
 0x66e   : > { %16587 = vmatmul.mubr.f32.gmra.mrb[34].mxu1 %v22544_v23 }
 0x66f   : > { %16589 = vmatprep.mubr.f32.mxu1 %v22547_v14  ;;  %18400 = vmatpush3.bf16.msra.mxu1 %v18397_v33  ;;  %v18413_v33 = vpack.c.bf16 %v7308_v29, %v7307_v30  ;;  %v18421_v30 = vpack.c.bf16 %v7312_v21, %v7311_v37  ;;  %v22574_v29 = vld [vmem:[#allocation2 + $0x98] sm:$0xff]  ;;  %v22586_v21 = vld [vmem:[#allocation2 + $0xc8] sm:$0xff] }
 0x670   : > { %18402 = vmatprep.subr.bf16.mxu1 %v18401_v57  ;;  %v22589_v37 = vld [vmem:[#allocation2 + $0xd8] sm:$0xff] }
 0x672   : > { %16590 = vmatmul.mubr.f32.gmra.mrb[36].mxu1 %v22550_v28 }
 0x673   : > { %16592 = vmatprep.mubr.f32.mxu1 %v22553_v31  ;;  %18404 = vmatpush3.bf16.msra.mxu1 %v18401_v57  ;;  %v22565_v57 = vld [vmem:[#allocation2 + $0x78] sm:$0xff] }
 0x674   : > { %18406 = vmatprep.subr.bf16.mxu1 %v18405_v3 }
 0x676   : > { %16593 = vmatmul.mubr.f32.gmra.mrb[38].mxu1 %v22556_v53 }
 0x677   : > { %16595 = vmatprep.mubr.f32.mxu1 %v22559_v63  ;;  %18408 = vmatpush3.bf16.msra.mxu1 %v18405_v3  ;;  %v22571_v3 = vld [vmem:[#allocation2 + $0x90] sm:$0xff] }
 0x678   : > { %18410 = vmatprep.subr.bf16.mxu1 %v18409_v43 }
 0x67a   : > { %16596 = vmatmul.mubr.f32.gmra.mrb[40].mxu1 %v22562_v5 }
 0x67b   : > { %16598 = vmatprep.mubr.f32.mxu1 %v22565_v57  ;;  %18412 = vmatpush3.bf16.msra.mxu1 %v18409_v43  ;;  %v22577_v43 = vld [vmem:[#allocation2 + $0xa8] sm:$0xff] }
 0x67c   : > { %18414 = vmatprep.subr.bf16.mxu1 %v18413_v33 }
 0x67e   : > { %16599 = vmatmul.mubr.f32.gmra.mrb[42].mxu1 %v22568_v48 }
 0x67f   : > { %16601 = vmatprep.mubr.f32.mxu1 %v22571_v3  ;;  %18416 = vmatpush3.bf16.msra.mxu1 %v18413_v33  ;;  %v22583_v33 = vld [vmem:[#allocation2 + $0xc0] sm:$0xff] }
 0x680   : > { %18418 = vmatprep.subr.bf16.mxu1 %v18417_v34 }
 0x682   : > { %16602 = vmatmul.mubr.f32.gmra.mrb[44].mxu1 %v22574_v29 }
 0x683   : > { %16604 = vmatprep.mubr.f32.mxu1 %v22577_v43  ;;  %18420 = vmatpush3.bf16.msra.mxu1 %v18417_v34  ;;  %v22592_v34 = vld [vmem:[#allocation2 + $0xe0] sm:$0xff] }
 0x684   : > { %18422 = vmatprep.subr.bf16.mxu1 %v18421_v30 }
 0x686   : > { %16605 = vmatmul.mubr.f32.gmra.mrb[46].mxu1 %v22580_v51 }
 0x687   : > { %16607 = vmatprep.mubr.f32.mxu1 %v22583_v33  ;;  %18424 = vmatpush3.bf16.msra.mxu1 %v18421_v30  ;;  %v22601_v30 = vld [vmem:[#allocation2 + $0x108] sm:$0xff] }
 0x688   : > { %18426 = vmatprep.subr.bf16.mxu1 %v18425_v38 }
 0x68a   : > { %16608 = vmatmul.mubr.f32.gmra.mrb[48].mxu1 %v22586_v21 }
 0x68b   : > { %16610 = vmatprep.mubr.f32.mxu1 %v22589_v37 }
 0x68e   : > { %16611 = vmatmul.mubr.f32.gmra.mrb[50].mxu1 %v22592_v34 }
 0x68f   : > { %16613 = vmatprep.mubr.f32.mxu1 %v22595_v15 }
 0x692   : > { %16614 = vmatmul.mubr.f32.gmra.mrb[52].mxu1 %v22598_v19 }
 0x693   : > { %16616 = vmatprep.mubr.f32.mxu1 %v22601_v30 }
 0x696   : > { %16617 = vmatmul.mubr.f32.gmra.mrb[54].mxu1 %v22604_v22 }
 0x697   : > { %16619 = vmatprep.mubr.f32.mxu1 %v22607_v9 }
 0x69a   : > { %16620 = vmatmul.mubr.f32.gmra.mrb[56].mxu1 %v22610_v50 }
 0x69b   : > { %16622 = vmatprep.mubr.f32.mxu1 %v22613_v40 }
 0x69e   : > { %16623 = vmatmul.mubr.f32.gmra.mrb[58].mxu1 %v22616_v52 }
 0x69f   : > { %16625 = vmatprep.mubr.f32.mxu1 %v22619_v39 }
 0x6a2   : > { %16626 = vmatmul.mubr.f32.gmra.mrb[60].mxu1 %v22622_v13 }
 0x6a3   : > { %16628 = vmatprep.mubr.f32.mxu1 %v22625_v2 }
 0x6a6   : > { %16629 = vmatmul.mubr.f32.gmra.mrb[62].mxu1 %v22628_v47 }
 0x6a7   : > { %16663 = vmatprep.mubr.f32.mxu1 %v7264_v4  ;;  %v7612_v4 = vld [vmem:[#allocation6 + $0x1c8] sm:$0xff] }
 0x6a8   : > { %v18441_v55 = vpack.c.bf16 %v7612_v4, %v7611_v6  ;;  %v18449_v6 = vpack.c.bf16 %v7616_v44, %v7615_v35  ;;  %v22658_v4 = vld [vmem:[#allocation2 + $0x82] sm:$0xff]  ;;  %v22667_v44 = vld [vmem:[#allocation2 + $0xaa] sm:$0xff]  ;;  %v18457_v35 = vpack.c.bf16 %v7910_v20, %v7909_v49  ;;  %v22685_v20 = vld [vmem:[#allocation2 + $0xf2] sm:$0xff] }
 0x6a9   : > { %24412 = vst [vmem:[#allocation81_spill] sm:$0xff] %v22685_v20  ;;  %v22688_v49 = vld [vmem:[#allocation2 + $0xfa] sm:$0xff] }
 0x6aa   : > { %16664 = vmatmul.mubr.f32.vlgmr.msra.gmra.mrb[32].mxu1 %v7265_v36  ;;  %v22640_v36 = vld [vmem:[#allocation2 + $0x3a] sm:$0xff]  ;;  %24413 = vst [vmem:[#allocation82_spill] sm:$0xff] %v22688_v49 }
 0x6ab   : > { %18428 = vmatpush3.bf16.msra.mxu1 %v18425_v38  ;;  %16666 = vmatprep.mubr.f32.mxu1 %v22631_v27  ;;  %v22646_v38 = vld [vmem:[#allocation2 + $0x52] sm:$0xff] }
 0x6ac   : > { %18430 = vmatprep.subr.bf16.mxu1 %v18429_v17 }
 0x6ae   : > { %16667 = vmatmul.mubr.f32.gmra.mrb[34].mxu1 %v22634_v54 }
 0x6af   : > { %16669 = vmatprep.mubr.f32.mxu1 %v22637_v46  ;;  %18432 = vmatpush3.bf16.msra.mxu1 %v18429_v17  ;;  %v22652_v17 = vld [vmem:[#allocation2 + $0x6a] sm:$0xff] }
 0x6b0   : > { %18434 = vmatprep.subr.bf16.mxu1 %v18433_v16 }
 0x6b2   : > { %16670 = vmatmul.mubr.f32.gmra.mrb[36].mxu1 %v22640_v36 }
 0x6b3   : > { %16672 = vmatprep.mubr.f32.mxu1 %v22643_v7  ;;  %18436 = vmatpush3.bf16.msra.mxu1 %v18433_v16  ;;  %v22655_v16 = vld [vmem:[#allocation2 + $0x7a] sm:$0xff] }
 0x6b4   : > { %18438 = vmatprep.subr.bf16.mxu1 %v18437_v11 }
 0x6b6   : > { %16673 = vmatmul.mubr.f32.gmra.mrb[38].mxu1 %v22646_v38 }
 0x6b7   : > { %16675 = vmatprep.mubr.f32.mxu1 %v22649_v41  ;;  %18440 = vmatpush3.bf16.msra.mxu1 %v18437_v11  ;;  %v22664_v11 = vld [vmem:[#allocation2 + $0x9a] sm:$0xff] }
 0x6b8   : > { %18442 = vmatprep.subr.bf16.mxu1 %v18441_v55 }
 0x6ba   : > { %16676 = vmatmul.mubr.f32.gmra.mrb[40].mxu1 %v22652_v17 }
 0x6bb   : > { %16678 = vmatprep.mubr.f32.mxu1 %v22655_v16  ;;  %18444 = vmatpush3.bf16.msra.mxu1 %v18441_v55  ;;  %v22670_v55 = vld [vmem:[#allocation2 + $0xb2] sm:$0xff] }
 0x6bc   : > { %18446 = vmatprep.subr.bf16.mxu1 %v18445_v32 }
 0x6be   : > { %16679 = vmatmul.mubr.f32.gmra.mrb[42].mxu1 %v22658_v4 }
 0x6bf   : > { %16681 = vmatprep.mubr.f32.mxu1 %v22661_v18  ;;  %18448 = vmatpush3.bf16.msra.mxu1 %v18445_v32  ;;  %v22673_v32 = vld [vmem:[#allocation2 + $0xc2] sm:$0xff] }
 0x6c0   : > { %18450 = vmatprep.subr.bf16.mxu1 %v18449_v6  ;;  %24408 = vst [vmem:[#allocation77_spill] sm:$0xff] %v22673_v32 }
 0x6c2   : > { %16682 = vmatmul.mubr.f32.gmra.mrb[44].mxu1 %v22664_v11 }
 0x6c3   : > { %16684 = vmatprep.mubr.f32.mxu1 %v22667_v44  ;;  %18452 = vmatpush3.bf16.msra.mxu1 %v18449_v6  ;;  %v22682_v6 = vld [vmem:[#allocation2 + $0xe2] sm:$0xff] }
 0x6c4   : > { %18454 = vmatprep.subr.bf16.mxu1 %v18453_v12  ;;  %24411 = vst [vmem:[#allocation80_spill] sm:$0xff] %v22682_v6 }
 0x6c6   : > { %16685 = vmatmul.mubr.f32.gmra.mrb[46].mxu1 %v22670_v55 }
 0x6c7   : > { %16687 = vmatprep.mubr.f32.mxu1 %v22673_v32  ;;  %18456 = vmatpush3.bf16.msra.mxu1 %v18453_v12  ;;  %v22691_v12 = vld [vmem:[#allocation2 + $0x10a] sm:$0xff]  ;;  %v7914_v32 = vld [vmem:[#allocation6 + $0x228] sm:$0xff] }
 0x6c8   : > { %18458 = vmatprep.subr.bf16.mxu1 %v18457_v35  ;;  %24414 = vst [vmem:[#allocation83_spill] sm:$0xff] %v22691_v12 }
 0x6ca   : > { %16688 = vmatmul.mubr.f32.gmra.mrb[48].mxu1 %v22676_v0  ;;  %v7913_v0 = vld [vmem:[#allocation6 + $0x220] sm:$0xff] }
 0x6cb   : > { %16690 = vmatprep.mubr.f32.mxu1 %v22679_v62  ;;  %v7911_v62 = vld [vmem:[#allocation6 + $0x210] sm:$0xff] }
 0x6ce   : > { %16691 = vmatmul.mubr.f32.gmra.mrb[50].mxu1 %v22682_v6  ;;  %v22700_v6 = vld [vmem:[#allocation2 + $0x12a] sm:$0xff] }
 0x6cf   : > { %16693 = vmatprep.mubr.f32.mxu1 %v22685_v20  ;;  %24417 = vst [vmem:[#allocation86_spill] sm:$0xff] %v22700_v6  ;;  %v22703_v20 = vld [vmem:[#allocation2 + $0x13a] sm:$0xff] }
 0x6d0   : > { %24418 = vst [vmem:[#allocation87_spill] sm:$0xff] %v22703_v20 }
 0x6d2   : > { %16694 = vmatmul.mubr.f32.gmra.mrb[52].mxu1 %v22688_v49  ;;  %v22706_v49 = vld [vmem:[#allocation2 + $0x142] sm:$0xff] }
 0x6d3   : > { %16696 = vmatprep.mubr.f32.mxu1 %v22691_v12  ;;  %24419 = vst [vmem:[#allocation88_spill] sm:$0xff] %v22706_v49  ;;  %v22709_v12 = vld [vmem:[#allocation2 + $0x152] sm:$0xff] }
 0x6d4   : > { %24420 = vst [vmem:[#allocation89_spill] sm:$0xff] %v22709_v12 }
 0x6d6   : > { %16697 = vmatmul.mubr.f32.gmra.mrb[54].mxu1 %v22694_v26  ;;  %v22712_v26 = vld [vmem:[#allocation2 + $0x15a] sm:$0xff] }
 0x6d7   : > { %16699 = vmatprep.mubr.f32.mxu1 %v22697_v25  ;;  %24421 = vst [vmem:[#allocation90_spill] sm:$0xff] %v22712_v26  ;;  %v22715_v25 = vld [vmem:[#allocation2 + $0x16a] sm:$0xff] }
 0x6d8   : > { %24422 = vst [vmem:[#allocation91_spill] sm:$0xff] %v22715_v25 }
 0x6da   : > { %16700 = vmatmul.mubr.f32.gmra.mrb[56].mxu1 %v22700_v6  ;;  %v22718_v6 = vld [vmem:[#allocation2 + $0x172] sm:$0xff] }
 0x6db   : > { %16702 = vmatprep.mubr.f32.mxu1 %v22703_v20  ;;  %24423 = vst [vmem:[#allocation92_spill] sm:$0xff] %v22718_v6  ;;  %v7912_v20 = vld [vmem:[#allocation6 + $0x218] sm:$0xff] }
 0x6de   : > { %16703 = vmatmul.mubr.f32.gmra.mrb[58].mxu1 %v22706_v49  ;;  %v18461_v49 = vpack.c.bf16 %v7912_v20, %v7911_v62  ;;  %v7918_v62 = vld [vmem:[#allocation6 + $0x248] sm:$0xff]  ;;  %v7921_v20 = vld [vmem:[#allocation6 + $0x260] sm:$0xff] }
 0x6df   : > { %16705 = vmatprep.mubr.f32.mxu1 %v22709_v12  ;;  %v7915_v12 = vld [vmem:[#allocation6 + $0x230] sm:$0xff] }
 0x6e2   : > { %16706 = vmatmul.mubr.f32.gmra.mrb[60].mxu1 %v22712_v26  ;;  %v18465_v26 = vpack.c.bf16 %v7914_v32, %v7913_v0  ;;  %v7920_v32 = vld [vmem:[#allocation6 + $0x258] sm:$0xff] }
 0x6e3   : > { %16708 = vmatprep.mubr.f32.mxu1 %v22715_v25  ;;  %v7916_v25 = vld [vmem:[#allocation6 + $0x238] sm:$0xff] }
 0x6e6   : > { %16709 = vmatmul.mubr.f32.gmra.mrb[62].mxu1 %v22718_v6  ;;  %v18469_v6 = vpack.c.bf16 %v7916_v25, %v7915_v12  ;;  %v7922_v25 = vld [vmem:[#allocation6 + $0x268] sm:$0xff]  ;;  %v7924_v12 = vld [vmem:[#allocation6 + $0x278] sm:$0xff] }
 0x6e7   : > { %16743 = vmatprep.mubr.f32.mxu1 %v22540_v60  ;;  %v7917_v60 = vld [vmem:[#allocation6 + $0x240] sm:$0xff] }
 0x6ea   : > { %16744 = vmatmul.mubr.f32.vlgmr.msra.gmra.mrb[32].mxu1 %v22544_v23  ;;  %v18473_v23 = vpack.c.bf16 %v7918_v62, %v7917_v60  ;;  %v8215_v60 = vld [vmem:[#allocation6 + $0x280] sm:$0xff]  ;;  %v8216_v62 = vld [vmem:[#allocation6 + $0x288] sm:$0xff] }
 0x6eb   : > { %18460 = vmatpush3.bf16.msra.mxu1 %v18457_v35  ;;  %16746 = vmatprep.mubr.f32.mxu1 %v22547_v14  ;;  %v7919_v35 = vld [vmem:[#allocation6 + $0x250] sm:$0xff] }
 0x6ec   : > { %18462 = vmatprep.subr.bf16.mxu1 %v18461_v49  ;;  %v18477_v0 = vpack.c.bf16 %v7920_v32, %v7919_v35  ;;  %v22751_v35 = vld [vmem:[#allocation2 + $0x180] sm:$0xff]  ;;  %v22754_v32 = vld [vmem:[#allocation2 + $0x188] sm:$0xff] }
 0x6ed   : > { %24424 = vst [vmem:[#allocation93_spill] sm:$0xff] %v22751_v35  ;;  %24425 = vst [vmem:[#allocation94_spill] sm:$0xff] %v22754_v32 }
 0x6ee   : > { %16747 = vmatmul.mubr.f32.gmra.mrb[34].mxu1 %v22550_v28 }
 0x6ef   : > { %16749 = vmatprep.mubr.f32.mxu1 %v22553_v31  ;;  %18464 = vmatpush3.bf16.msra.mxu1 %v18461_v49  ;;  %v7923_v49 = vld [vmem:[#allocation6 + $0x270] sm:$0xff] }
 0x6f0   : > { %18466 = vmatprep.subr.bf16.mxu1 %v18465_v26 }
 0x6f2   : > { %16750 = vmatmul.mubr.f32.gmra.mrb[36].mxu1 %v22556_v53 }
 0x6f3   : > { %16752 = vmatprep.mubr.f32.mxu1 %v22559_v63  ;;  %18468 = vmatpush3.bf16.msra.mxu1 %v18465_v26  ;;  %v18481_v26 = vpack.c.bf16 %v7922_v25, %v7921_v20  ;;  %v8218_v20 = vld [vmem:[#allocation6 + $0x298] sm:$0xff]  ;;  %v7876_v25 = vld [vmem:[#allocation2 + $0x19] sm:$0xff] }
 0x6f4   : > { %18470 = vmatprep.subr.bf16.mxu1 %v18469_v6 }
 0x6f6   : > { %16753 = vmatmul.mubr.f32.gmra.mrb[38].mxu1 %v22562_v5 }
 0x6f7   : > { %16755 = vmatprep.mubr.f32.mxu1 %v22565_v57  ;;  %18472 = vmatpush3.bf16.msra.mxu1 %v18469_v6  ;;  %v18485_v6 = vpack.c.bf16 %v7924_v12, %v7923_v49  ;;  %v7877_v49 = vld [vmem:[#allocation2 + $0x21] sm:$0xff]  ;;  %v8219_v12 = vld [vmem:[#allocation6 + $0x2a0] sm:$0xff] }
 0x6f8   : > { %18474 = vmatprep.subr.bf16.mxu1 %v18473_v23 }
 0x6fa   : > { %16756 = vmatmul.mubr.f32.gmra.mrb[40].mxu1 %v22568_v48 }
 0x6fb   : > { %16758 = vmatprep.mubr.f32.mxu1 %v22571_v3  ;;  %18476 = vmatpush3.bf16.msra.mxu1 %v18473_v23  ;;  %v18489_v23 = vpack.c.bf16 %v8216_v62, %v8215_v60  ;;  %v22757_v60 = vld [vmem:[#allocation2 + $0x31] sm:$0xff] }
 0x6fc   : > { %18478 = vmatprep.subr.bf16.mxu1 %v18477_v0 }
 0x6fe   : > { %16759 = vmatmul.mubr.f32.gmra.mrb[42].mxu1 %v22574_v29 }
 0x6ff   : > { %16761 = vmatprep.mubr.f32.mxu1 %v22577_v43  ;;  %18480 = vmatpush3.bf16.msra.mxu1 %v18477_v0  ;;  %v8217_v0 = vld [vmem:[#allocation6 + $0x290] sm:$0xff] }
 0x700   : > { %18482 = vmatprep.subr.bf16.mxu1 %v18481_v26 }
 0x702   : > { %16762 = vmatmul.mubr.f32.gmra.mrb[44].mxu1 %v22580_v51 }
 0x703   : > { %16764 = vmatprep.mubr.f32.mxu1 %v22583_v33  ;;  %18484 = vmatpush3.bf16.msra.mxu1 %v18481_v26  ;;  %v18493_v26 = vpack.c.bf16 %v8218_v20, %v8217_v0  ;;  %v22766_v20 = vld [vmem:[#allocation2 + $0x51] sm:$0xff] }
 0x704   : > { %18486 = vmatprep.subr.bf16.mxu1 %v18485_v6  ;;  %24428 = vst [vmem:[#allocation97_spill] sm:$0xff] %v22766_v20 }
 0x706   : > { %16765 = vmatmul.mubr.f32.gmra.mrb[46].mxu1 %v22586_v21 }
 0x707   : > { %16767 = vmatprep.mubr.f32.mxu1 %v22589_v37  ;;  %18488 = vmatpush3.bf16.msra.mxu1 %v18485_v6  ;;  %v8220_v6 = vld [vmem:[#allocation6 + $0x2a8] sm:$0xff] }
 0x708   : > { %18490 = vmatprep.subr.bf16.mxu1 %v18489_v23  ;;  %v18497_v62 = vpack.c.bf16 %v8220_v6, %v8219_v12  ;;  %v22772_v6 = vld [vmem:[#allocation2 + $0x69] sm:$0xff] }
 0x709   : > { %24430 = vst [vmem:[#allocation99_spill] sm:$0xff] %v22772_v6 }
 0x70a   : > { %16768 = vmatmul.mubr.f32.gmra.mrb[48].mxu1 %v22592_v34 }
 0x70b   : > { %16770 = vmatprep.mubr.f32.mxu1 %v22595_v15 }
 0x70e   : > { %16771 = vmatmul.mubr.f32.gmra.mrb[50].mxu1 %v22598_v19 }
 0x70f   : > { %16773 = vmatprep.mubr.f32.mxu1 %v22601_v30 }
 0x712   : > { %16774 = vmatmul.mubr.f32.gmra.mrb[52].mxu1 %v22604_v22 }
 0x713   : > { %16776 = vmatprep.mubr.f32.mxu1 %v22607_v9 }
 0x716   : > { %16777 = vmatmul.mubr.f32.gmra.mrb[54].mxu1 %v22610_v50 }
 0x717   : > { %16779 = vmatprep.mubr.f32.mxu1 %v22613_v40 }
 0x71a   : > { %16780 = vmatmul.mubr.f32.gmra.mrb[56].mxu1 %v22616_v52 }
 0x71b   : > { %16782 = vmatprep.mubr.f32.mxu1 %v22619_v39 }
 0x71e   : > { %16783 = vmatmul.mubr.f32.gmra.mrb[58].mxu1 %v22622_v13 }
 0x71f   : > { %16785 = vmatprep.mubr.f32.mxu1 %v22625_v2  ;;  %v8222_v2 = vld [vmem:[#allocation6 + $0x2b8] sm:$0xff] }
 0x722   : > { %16786 = vmatmul.mubr.f32.gmra.mrb[60].mxu1 %v22628_v47  ;;  %v8221_v47 = vld [vmem:[#allocation6 + $0x2b0] sm:$0xff] }
 0x723   : > { %16788 = vmatprep.mubr.f32.mxu1 %v22751_v35  ;;  %v22760_v35 = vld [vmem:[#allocation2 + $0x39] sm:$0xff]  ;;  %v18501_v0 = vpack.c.bf16 %v8222_v2, %v8221_v47 }
 0x724   : > { %24426 = vst [vmem:[#allocation95_spill] sm:$0xff] %v22760_v35  ;;  %v22775_v47 = vld [vmem:[#allocation2 + $0x79] sm:$0xff] }
 0x725   : > { %24431 = vst [vmem:[#allocation100_spill] sm:$0xff] %v22775_v47 }
 0x726   : > { %16789 = vmatmul.mubr.f32.gmra.mrb[62].mxu1 %v22754_v32  ;;  %v22763_v32 = vld [vmem:[#allocation2 + $0x49] sm:$0xff] }
 0x727   : > { %16823 = vmatprep.mubr.f32.mxu1 %v7876_v25  ;;  %24427 = vst [vmem:[#allocation96_spill] sm:$0xff] %v22763_v32  ;;  %v8224_v25 = vld [vmem:[#allocation6 + $0x2c8] sm:$0xff] }
 0x72a   : > { %16824 = vmatmul.mubr.f32.vlgmr.msra.gmra.mrb[32].mxu1 %v7877_v49  ;;  %v22769_v49 = vld [vmem:[#allocation2 + $0x61] sm:$0xff] }
 0x72b   : > { %18492 = vmatpush3.bf16.msra.mxu1 %v18489_v23  ;;  %16826 = vmatprep.mubr.f32.mxu1 %v22757_v60  ;;  %v8223_v23 = vld [vmem:[#allocation6 + $0x2c0] sm:$0xff]  ;;  %24429 = vst [vmem:[#allocation98_spill] sm:$0xff] %v22769_v49 }
 0x72c   : > { %18494 = vmatprep.subr.bf16.mxu1 %v18493_v26  ;;  %v18505_v12 = vpack.c.bf16 %v8224_v25, %v8223_v23  ;;  %v22784_v25 = vld [vmem:[#allocation2 + $0x99] sm:$0xff] }
 0x72e   : > { %16827 = vmatmul.mubr.f32.gmra.mrb[34].mxu1 %v22760_v35  ;;  %v8225_v35 = vld [vmem:[#allocation6 + $0x2d0] sm:$0xff] }
 0x72f   : > { %16829 = vmatprep.mubr.f32.mxu1 %v22763_v32  ;;  %18496 = vmatpush3.bf16.msra.mxu1 %v18493_v26  ;;  %v8226_v32 = vld [vmem:[#allocation6 + $0x2d8] sm:$0xff] }
 0x730   : > { %18498 = vmatprep.subr.bf16.mxu1 %v18497_v62  ;;  %v18509_v2 = vpack.c.bf16 %v8226_v32, %v8225_v35  ;;  %v22778_v26 = vld [vmem:[#allocation2 + $0x81] sm:$0xff]  ;;  %v22787_v35 = vld [vmem:[#allocation2 + $0xa9] sm:$0xff] }
 0x731   : > { %24432 = vst [vmem:[#allocation101_spill] sm:$0xff] %v22778_v26 }
 0x732   : > { %16830 = vmatmul.mubr.f32.gmra.mrb[36].mxu1 %v22766_v20  ;;  %v8227_v20 = vld [vmem:[#allocation6 + $0x2e0] sm:$0xff] }
 0x733   : > { %16832 = vmatprep.mubr.f32.mxu1 %v22769_v49  ;;  %18500 = vmatpush3.bf16.msra.mxu1 %v18497_v62  ;;  %v8228_v49 = vld [vmem:[#allocation6 + $0x2e8] sm:$0xff] }
 0x734   : > { %18502 = vmatprep.subr.bf16.mxu1 %v18501_v0  ;;  %v22781_v62 = vld [vmem:[#allocation2 + $0x91] sm:$0xff]  ;;  %v18513_v23 = vpack.c.bf16 %v8228_v49, %v8227_v20  ;;  %v22793_v20 = vld [vmem:[#allocation2 + $0xc1] sm:$0xff] }
 0x735   : > { %24433 = vst [vmem:[#allocation102_spill] sm:$0xff] %v22781_v62 }
 0x736   : > { %16833 = vmatmul.mubr.f32.gmra.mrb[38].mxu1 %v22772_v6  ;;  %v8229_v6 = vld [vmem:[#allocation6 + $0x2f0] sm:$0xff] }
 0x737   : > { %16835 = vmatprep.mubr.f32.mxu1 %v22775_v47  ;;  %18504 = vmatpush3.bf16.msra.mxu1 %v18501_v0  ;;  %v8230_v47 = vld [vmem:[#allocation6 + $0x2f8] sm:$0xff]  ;;  %v22790_v0 = vld [vmem:[#allocation2 + $0xb1] sm:$0xff] }
 0x738   : > { %18506 = vmatprep.subr.bf16.mxu1 %v18505_v12  ;;  %v18517_v32 = vpack.c.bf16 %v8230_v47, %v8229_v6  ;;  %v22802_v6 = vld [vmem:[#allocation2 + $0xe1] sm:$0xff]  ;;  %v22805_v47 = vld [vmem:[#allocation2 + $0xf1] sm:$0xff] }
 0x73a   : > { %16836 = vmatmul.mubr.f32.gmra.mrb[40].mxu1 %v22778_v26  ;;  %v8521_v26 = vld [vmem:[#allocation6 + $0x300] sm:$0xff] }
 0x73b   : > { %16838 = vmatprep.mubr.f32.mxu1 %v22781_v62  ;;  %18508 = vmatpush3.bf16.msra.mxu1 %v18505_v12  ;;  %v8522_v62 = vld [vmem:[#allocation6 + $0x308] sm:$0xff]  ;;  %v22796_v12 = vld [vmem:[#allocation2 + $0xc9] sm:$0xff] }
 0x73c   : > { %18510 = vmatprep.subr.bf16.mxu1 %v18509_v2  ;;  %v18521_v49 = vpack.c.bf16 %v8522_v62, %v8521_v26  ;;  %v22811_v26 = vld [vmem:[#allocation2 + $0x109] sm:$0xff]  ;;  %v22814_v62 = vld [vmem:[#allocation2 + $0x111] sm:$0xff] }
 0x73d   : > { %24434 = vst [vmem:[#allocation103_spill] sm:$0xff] %v22814_v62 }
 0x73e   : > { %16839 = vmatmul.mubr.f32.gmra.mrb[42].mxu1 %v22784_v25 }
 0x73f   : > { %16841 = vmatprep.mubr.f32.mxu1 %v22787_v35  ;;  %18512 = vmatpush3.bf16.msra.mxu1 %v18509_v2  ;;  %v22799_v2 = vld [vmem:[#allocation2 + $0xd9] sm:$0xff] }
 0x740   : > { %18514 = vmatprep.subr.bf16.mxu1 %v18513_v23 }
 0x742   : > { %16842 = vmatmul.mubr.f32.gmra.mrb[44].mxu1 %v22790_v0 }
 0x743   : > { %16844 = vmatprep.mubr.f32.mxu1 %v22793_v20  ;;  %18516 = vmatpush3.bf16.msra.mxu1 %v18513_v23  ;;  %v22808_v23 = vld [vmem:[#allocation2 + $0xf9] sm:$0xff] }
 0x744   : > { %18518 = vmatprep.subr.bf16.mxu1 %v18517_v32 }
 0x746   : > { %16845 = vmatmul.mubr.f32.gmra.mrb[46].mxu1 %v22796_v12 }
 0x747   : > { %16847 = vmatprep.mubr.f32.mxu1 %v22799_v2  ;;  %18520 = vmatpush3.bf16.msra.mxu1 %v18517_v32  ;;  %v8523_v32 = vld [vmem:[#allocation6 + $0x310] sm:$0xff] }
 0x748   : > { %18522 = vmatprep.subr.bf16.mxu1 %v18521_v49 }
 0x74a   : > { %16848 = vmatmul.mubr.f32.gmra.mrb[48].mxu1 %v22802_v6 }
 0x74b   : > { %16850 = vmatprep.mubr.f32.mxu1 %v22805_v47 }
 0x74e   : > { %16851 = vmatmul.mubr.f32.gmra.mrb[50].mxu1 %v22808_v23 }
 0x74f   : > { %16853 = vmatprep.mubr.f32.mxu1 %v22811_v26 }
 0x752   : > { %16854 = vmatmul.mubr.f32.gmra.mrb[52].mxu1 %v22814_v62  ;;  %v8524_v62 = vld [vmem:[#allocation6 + $0x318] sm:$0xff] }
 0x753   : > { %16856 = vmatprep.mubr.f32.mxu1 %v22482_v61  ;;  %v8525_v61 = vld [vmem:[#allocation6 + $0x320] sm:$0xff] }
 0x756   : > { %16857 = vmatmul.mubr.f32.gmra.mrb[54].mxu1 %v22478_v42  ;;  %v18525_v42 = vpack.c.bf16 %v8524_v62, %v8523_v32  ;;  %v8828_v62 = vld [vmem:[#allocation6 + $0x388] sm:$0xff]  ;;  %v24435_v32 = vld [vmem:[#allocation77_spill] sm:$0xff] }
 0x757   : > { %16859 = vmatprep.mubr.f32.mxu1 %v22496_v10  ;;  %v8526_v10 = vld [vmem:[#allocation6 + $0x328] sm:$0xff] }
 0x75a   : > { %16860 = vmatmul.mubr.f32.gmra.mrb[56].mxu1 %v22492_v58  ;;  %v18529_v58 = vpack.c.bf16 %v8526_v10, %v8525_v61  ;;  %v24440_v61 = vld [vmem:[#allocation82_spill] sm:$0xff]  ;;  %v24441_v10 = vld [vmem:[#allocation83_spill] sm:$0xff] }
 0x75b   : > { %16862 = vmatprep.mubr.f32.mxu1 %v22510_v8  ;;  %v8528_v8 = vld [vmem:[#allocation6 + $0x338] sm:$0xff] }
 0x75e   : > { %16863 = vmatmul.mubr.f32.gmra.mrb[58].mxu1 %v22506_v56  ;;  %v8527_v56 = vld [vmem:[#allocation6 + $0x330] sm:$0xff] }
 0x75f   : > { %16865 = vmatprep.mubr.f32.mxu1 %v22524_v45  ;;  %v8530_v45 = vld [vmem:[#allocation6 + $0x348] sm:$0xff] }
 0x762   : > { %16866 = vmatmul.mubr.f32.gmra.mrb[60].mxu1 %v22520_v1  ;;  %v18533_v1 = vpack.c.bf16 %v8528_v8, %v8527_v56  ;;  %v24444_v56 = vld [vmem:[#allocation86_spill] sm:$0xff]  ;;  %v24445_v8 = vld [vmem:[#allocation87_spill] sm:$0xff] }
 0x763   : > { %16868 = vmatprep.mubr.f32.mxu1 %v22536_v24 }
 0x766   : > { %16869 = vmatmul.mubr.f32.gmra.mrb[62].mxu1 %v22532_v59  ;;  %v8532_v59 = vld [vmem:[#allocation6 + $0x358] sm:$0xff] }
 0x767   : > { %16903 = vmatprep.mubr.f32.mxu1 %v22631_v27  ;;  %v8529_v27 = vld [vmem:[#allocation6 + $0x340] sm:$0xff] }
 0x76a   : > { %16904 = vmatmul.mubr.f32.vlgmr.msra.gmra.mrb[32].mxu1 %v22634_v54  ;;  %v8531_v54 = vld [vmem:[#allocation6 + $0x350] sm:$0xff] }
 0x76b   : > { %18524 = vmatpush3.bf16.msra.mxu1 %v18521_v49  ;;  %16906 = vmatprep.mubr.f32.mxu1 %v22637_v46  ;;  %v18537_v46 = vpack.c.bf16 %v8530_v45, %v8529_v27  ;;  %v18541_v24 = vpack.c.bf16 %v8532_v59, %v8531_v54  ;;  %v8536_v49 = vld [vmem:[#allocation6 + $0x378] sm:$0xff]  ;;  %v24447_v27 = vld [vmem:[#allocation89_spill] sm:$0xff]  ;;  %v24448_v45 = vld [vmem:[#allocation90_spill] sm:$0xff] }
 0x76c   : > { %18526 = vmatprep.subr.bf16.mxu1 %v18525_v42  ;;  %v24450_v54 = vld [vmem:[#allocation92_spill] sm:$0xff] }
 0x76d   : > { %v22857_v59 = vld [vmem:[#allocation2 + $0x182] sm:$0xff] }
 0x76e   : > { %16907 = vmatmul.mubr.f32.gmra.mrb[34].mxu1 %v22640_v36  ;;  %v8533_v36 = vld [vmem:[#allocation6 + $0x360] sm:$0xff] }
 0x76f   : > { %16909 = vmatprep.mubr.f32.mxu1 %v22643_v7  ;;  %18528 = vmatpush3.bf16.msra.mxu1 %v18525_v42  ;;  %v8534_v7 = vld [vmem:[#allocation6 + $0x368] sm:$0xff]  ;;  %v24437_v42 = vld [vmem:[#allocation79_spill] sm:$0xff] }
 0x770   : > { %18530 = vmatprep.subr.bf16.mxu1 %v18529_v58 }
 0x772   : > { %16910 = vmatmul.mubr.f32.gmra.mrb[36].mxu1 %v22646_v38  ;;  %v18545_v38 = vpack.c.bf16 %v8534_v7, %v8533_v36  ;;  %v8829_v36 = vld [vmem:[#allocation6 + $0x390] sm:$0xff]  ;;  %v8830_v7 = vld [vmem:[#allocation6 + $0x398] sm:$0xff] }
 0x773   : > { %16912 = vmatprep.mubr.f32.mxu1 %v22649_v41  ;;  %18532 = vmatpush3.bf16.msra.mxu1 %v18529_v58  ;;  %v8535_v41 = vld [vmem:[#allocation6 + $0x370] sm:$0xff]  ;;  %v24443_v58 = vld [vmem:[#allocation85_spill] sm:$0xff] }
 0x774   : > { %18534 = vmatprep.subr.bf16.mxu1 %v18533_v1 }
 0x776   : > { %16913 = vmatmul.mubr.f32.gmra.mrb[38].mxu1 %v22652_v17  ;;  %v18549_v17 = vpack.c.bf16 %v8536_v49, %v8535_v41  ;;  %v8831_v41 = vld [vmem:[#allocation6 + $0x3a0] sm:$0xff]  ;;  %v8832_v49 = vld [vmem:[#allocation6 + $0x3a8] sm:$0xff] }
 0x777   : > { %16915 = vmatprep.mubr.f32.mxu1 %v22655_v16  ;;  %18536 = vmatpush3.bf16.msra.mxu1 %v18533_v1  ;;  %v8827_v16 = vld [vmem:[#allocation6 + $0x380] sm:$0xff]  ;;  %v24446_v1 = vld [vmem:[#allocation88_spill] sm:$0xff] }
 0x778   : > { %18538 = vmatprep.subr.bf16.mxu1 %v18537_v46 }
 0x77a   : > { %16916 = vmatmul.mubr.f32.gmra.mrb[40].mxu1 %v22658_v4  ;;  %v18553_v4 = vpack.c.bf16 %v8828_v62, %v8827_v16  ;;  %v8833_v16 = vld [vmem:[#allocation6 + $0x3b0] sm:$0xff]  ;;  %v8834_v62 = vld [vmem:[#allocation6 + $0x3b8] sm:$0xff] }
 0x77b   : > { %16918 = vmatprep.mubr.f32.mxu1 %v22661_v18  ;;  %18540 = vmatpush3.bf16.msra.mxu1 %v18537_v46  ;;  %v24436_v18 = vld [vmem:[#allocation78_spill] sm:$0xff]  ;;  %v24449_v46 = vld [vmem:[#allocation91_spill] sm:$0xff] }
 0x77c   : > { %18542 = vmatprep.subr.bf16.mxu1 %v18541_v24 }
 0x77e   : > { %16919 = vmatmul.mubr.f32.gmra.mrb[42].mxu1 %v22664_v11  ;;  %v24438_v11 = vld [vmem:[#allocation80_spill] sm:$0xff] }
 0x77f   : > { %16921 = vmatprep.mubr.f32.mxu1 %v22667_v44  ;;  %18544 = vmatpush3.bf16.msra.mxu1 %v18541_v24  ;;  %v24439_v44 = vld [vmem:[#allocation81_spill] sm:$0xff] }
 0x780   : > { %18546 = vmatprep.subr.bf16.mxu1 %v18545_v38  ;;  %v22860_v24 = vld [vmem:[#allocation2 + $0x18a] sm:$0xff] }
 0x782   : > { %16922 = vmatmul.mubr.f32.gmra.mrb[44].mxu1 %v22670_v55  ;;  %v24442_v55 = vld [vmem:[#allocation84_spill] sm:$0xff] }
 0x783   : > { %16924 = vmatprep.mubr.f32.mxu1 %v24435_v32  ;;  %18548 = vmatpush3.bf16.msra.mxu1 %v18545_v38  ;;  %v18557_v38 = vpack.c.bf16 %v8830_v7, %v8829_v36  ;;  %v18565_v32 = vpack.c.bf16 %v8834_v62, %v8833_v16  ;;  %v9145_v36 = vld [vmem:[#allocation6 + $0x460] sm:$0xff]  ;;  %v9146_v7 = vld [vmem:[#allocation6 + $0x468] sm:$0xff]  ;;  %v12397_v16 = vld [vmem:[%s23931_s11] sm:$0xff] }
 0x784   : > { %18550 = vmatprep.subr.bf16.mxu1 %v18549_v17  ;;  %v8817_v62 = vld [vmem:[#allocation2 + $0x141] sm:$0xff] }
 0x786   : > { %16925 = vmatmul.mubr.f32.gmra.mrb[46].mxu1 %v24436_v18  ;;  %v8836_v18 = vld [vmem:[#allocation6 + $0x3c8] sm:$0xff] }
 0x787   : > { %16927 = vmatprep.mubr.f32.mxu1 %v24437_v42  ;;  %18552 = vmatpush3.bf16.msra.mxu1 %v18549_v17  ;;  %v18561_v17 = vpack.c.bf16 %v8832_v49, %v8831_v41  ;;  %v8840_v42 = vld [vmem:[#allocation6 + $0x3e8] sm:$0xff]  ;;  %v9147_v41 = vld [vmem:[#allocation6 + $0x470] sm:$0xff]  ;;  %v9148_v49 = vld [vmem:[#allocation6 + $0x478] sm:$0xff] }
 0x788   : > { %18554 = vmatprep.subr.bf16.mxu1 %v18553_v4 }
 0x78a   : > { %16928 = vmatmul.mubr.f32.gmra.mrb[48].mxu1 %v24438_v11  ;;  %v8842_v11 = vld [vmem:[#allocation6 + $0x3f8] sm:$0xff] }
 0x78b   : > { %16930 = vmatprep.mubr.f32.mxu1 %v24439_v44  ;;  %v9134_v44 = vld [vmem:[#allocation6 + $0x408] sm:$0xff] }
 0x78e   : > { %16931 = vmatmul.mubr.f32.gmra.mrb[50].mxu1 %v24440_v61  ;;  %v24458_v61 = vld [vmem:[#allocation98_spill] sm:$0xff] }
 0x78f   : > { %16933 = vmatprep.mubr.f32.mxu1 %v24441_v10 }
 0x792   : > { %16934 = vmatmul.mubr.f32.gmra.mrb[52].mxu1 %v24442_v55  ;;  %v9142_v55 = vld [vmem:[#allocation6 + $0x448] sm:$0xff] }
 0x793   : > { %16936 = vmatprep.mubr.f32.mxu1 %v24443_v58  ;;  %v24459_v58 = vld [vmem:[#allocation99_spill] sm:$0xff] }
 0x796   : > { %16937 = vmatmul.mubr.f32.gmra.mrb[54].mxu1 %v24444_v56  ;;  %v24460_v56 = vld [vmem:[#allocation100_spill] sm:$0xff] }
 0x797   : > { %16939 = vmatprep.mubr.f32.mxu1 %v24445_v8 }
 0x79a   : > { %16940 = vmatmul.mubr.f32.gmra.mrb[56].mxu1 %v24446_v1  ;;  %v9143_v1 = vld [vmem:[#allocation6 + $0x450] sm:$0xff] }
 0x79b   : > { %16942 = vmatprep.mubr.f32.mxu1 %v24447_v27  ;;  %v9144_v27 = vld [vmem:[#allocation6 + $0x458] sm:$0xff] }
 0x79e   : > { %16943 = vmatmul.mubr.f32.gmra.mrb[58].mxu1 %v24448_v45  ;;  %v24461_v45 = vld [vmem:[#allocation101_spill] sm:$0xff] }
 0x79f   : > { %16945 = vmatprep.mubr.f32.mxu1 %v24449_v46  ;;  %v24462_v46 = vld [vmem:[#allocation102_spill] sm:$0xff] }
 0x7a2   : > { %16946 = vmatmul.mubr.f32.gmra.mrb[60].mxu1 %v24450_v54  ;;  %v18605_v54 = vpack.c.bf16 %v9144_v27, %v9143_v1  ;;  %v12411_v1 = vld [vmem:[%s23931_s11 + $0x70] sm:$0xff] }
 0x7a3   : > { %16948 = vmatprep.mubr.f32.mxu1 %v22857_v59 }
 0x7a6   : > { %16949 = vmatmul.mubr.f32.gmra.mrb[62].mxu1 %v22860_v24 }
 0x7a7   : > { %16983 = vmatprep.mubr.f32.mxu1 %v22547_v14  ;;  %v8835_v14 = vld [vmem:[#allocation6 + $0x3c0] sm:$0xff] }
 0x7aa   : > { %16984 = vmatmul.mubr.f32.vlgmr.msra.gmra.mrb[32].mxu1 %v22550_v28  ;;  %v18569_v28 = vpack.c.bf16 %v8836_v18, %v8835_v14  ;;  %v8821_v14 = vld [vmem:[#allocation2 + $0x171] sm:$0xff]  ;;  %v8823_v18 = vld [vmem:[#allocation2 + $0x189] sm:$0xff] }
 0x7ab   : > { %18556 = vmatpush3.bf16.msra.mxu1 %v18553_v4  ;;  %16986 = vmatprep.mubr.f32.mxu1 %v22553_v31  ;;  %v8837_v31 = vld [vmem:[#allocation6 + $0x3d0] sm:$0xff]  ;;  %v8838_v4 = vld [vmem:[#allocation6 + $0x3d8] sm:$0xff] }
 0x7ac   : > { %18558 = vmatprep.subr.bf16.mxu1 %v18557_v38 }
 0x7ae   : > { %16987 = vmatmul.mubr.f32.gmra.mrb[34].mxu1 %v22556_v53  ;;  %v18573_v53 = vpack.c.bf16 %v8838_v4, %v8837_v31  ;;  %v12399_v31 = vld [vmem:[%s23931_s11 + $0x10] sm:$0xff]  ;;  %v12400_v4 = vld [vmem:[%s23931_s11 + $0x18] sm:$0xff] }
 0x7af   : > { %16989 = vmatprep.mubr.f32.mxu1 %v22559_v63  ;;  %18560 = vmatpush3.bf16.msra.mxu1 %v18557_v38  ;;  %v8839_v63 = vld [vmem:[#allocation6 + $0x3e0] sm:$0xff]  ;;  %v18609_v38 = vpack.c.bf16 %v9146_v7, %v9145_v36  ;;  %v9112_v36 = vld [vmem:[#allocation2 + $0xc2] sm:$0xff] }
 0x7b0   : > { %18562 = vmatprep.subr.bf16.mxu1 %v18561_v17 }
 0x7b2   : > { %16990 = vmatmul.mubr.f32.gmra.mrb[36].mxu1 %v22562_v5  ;;  %v18577_v5 = vpack.c.bf16 %v8840_v42, %v8839_v63  ;;  %v22928_v63 = vpack.c.bf16 %v12400_v4, %v12399_v31  ;;  %v9101_v42 = vld [vmem:[#allocation2 + $0x3a] sm:$0xff]  ;;  %v9119_v31 = vld [vmem:[#allocation2 + $0x112] sm:$0xff]  ;;  %v9120_v4 = vld [vmem:[#allocation2 + $0x122] sm:$0xff] }
 0x7b3   : > { %16992 = vmatprep.mubr.f32.mxu1 %v22565_v57  ;;  %18564 = vmatpush3.bf16.msra.mxu1 %v18561_v17  ;;  %v8841_v57 = vld [vmem:[#allocation6 + $0x3f0] sm:$0xff]  ;;  %v18613_v17 = vpack.c.bf16 %v9148_v49, %v9147_v41  ;;  %v9113_v41 = vld [vmem:[#allocation2 + $0xca] sm:$0xff] }
 0x7b4   : > { %18566 = vmatprep.subr.bf16.mxu1 %v18565_v32  ;;  %24465 = vst [vmem:[#allocation78_spill] sm:$0xff] %v22928_v63  ;;  %v9660_v49 = vld [vmem:[#allocation8 + $0xb0] sm:$0xff] }
 0x7b6   : > { %16993 = vmatmul.mubr.f32.gmra.mrb[38].mxu1 %v22568_v48  ;;  %v18581_v48 = vpack.c.bf16 %v8842_v11, %v8841_v57  ;;  %v12402_v57 = vld [vmem:[%s23931_s11 + $0x28] sm:$0xff] }
 0x7b7   : > { %16995 = vmatprep.mubr.f32.mxu1 %v22571_v3  ;;  %18568 = vmatpush3.bf16.msra.mxu1 %v18565_v32  ;;  %v9133_v3 = vld [vmem:[#allocation6 + $0x400] sm:$0xff] }
 0x7b8   : > { %18570 = vmatprep.subr.bf16.mxu1 %v18569_v28  ;;  %v8820_v32 = vld [vmem:[#allocation2 + $0x169] sm:$0xff] }
 0x7b9   : > { %v9102_v11 = vld [vmem:[#allocation2 + $0x4a] sm:$0xff] }
 0x7ba   : > { %16996 = vmatmul.mubr.f32.gmra.mrb[40].mxu1 %v22574_v29  ;;  %v18585_v29 = vpack.c.bf16 %v9134_v44, %v9133_v3  ;;  %v9103_v3 = vld [vmem:[#allocation2 + $0x52] sm:$0xff] }
 0x7bb   : > { %16998 = vmatprep.mubr.f32.mxu1 %v22577_v43  ;;  %18572 = vmatpush3.bf16.msra.mxu1 %v18569_v28  ;;  %v24451_v43 = vld [vmem:[#allocation75_spill] sm:$0xff]  ;;  %v12403_v44 = vld [vmem:[%s23931_s11 + $0x30] sm:$0xff] }
 0x7bc   : > { %18574 = vmatprep.subr.bf16.mxu1 %v18573_v53  ;;  %v8825_v28 = vld [vmem:[#allocation2 + $0x1a1] sm:$0xff] }
 0x7be   : > { %16999 = vmatmul.mubr.f32.gmra.mrb[42].mxu1 %v22580_v51  ;;  %v24452_v51 = vld [vmem:[#allocation76_spill] sm:$0xff] }
 0x7bf   : > { %17001 = vmatprep.mubr.f32.mxu1 %v22583_v33  ;;  %18576 = vmatpush3.bf16.msra.mxu1 %v18573_v53  ;;  %v24453_v33 = vld [vmem:[#allocation93_spill] sm:$0xff] }
 0x7c0   : > { %18578 = vmatprep.subr.bf16.mxu1 %v18577_v5  ;;  %v9100_v53 = vld [vmem:[#allocation2 + $0x32] sm:$0xff] }
 0x7c2   : > { %17002 = vmatmul.mubr.f32.gmra.mrb[44].mxu1 %v22586_v21  ;;  %v24454_v21 = vld [vmem:[#allocation94_spill] sm:$0xff] }
 0x7c3   : > { %17004 = vmatprep.mubr.f32.mxu1 %v22589_v37  ;;  %18580 = vmatpush3.bf16.msra.mxu1 %v18577_v5  ;;  %v24455_v37 = vld [vmem:[#allocation95_spill] sm:$0xff] }
 0x7c4   : > { %18582 = vmatprep.subr.bf16.mxu1 %v18581_v48  ;;  %v12401_v5 = vld [vmem:[%s23931_s11 + $0x20] sm:$0xff] }
 0x7c6   : > { %17005 = vmatmul.mubr.f32.gmra.mrb[46].mxu1 %v22592_v34 }
 0x7c7   : > { %17007 = vmatprep.mubr.f32.mxu1 %v22595_v15  ;;  %18584 = vmatpush3.bf16.msra.mxu1 %v18581_v48  ;;  %v9139_v15 = vld [vmem:[#allocation6 + $0x430] sm:$0xff]  ;;  %v22938_v48 = vpack.c.bf16 %v12402_v57, %v12401_v5 }
 0x7c8   : > { %18586 = vmatprep.subr.bf16.mxu1 %v18585_v29  ;;  %v9122_v5 = vld [vmem:[#allocation2 + $0x13a] sm:$0xff]  ;;  %v9123_v57 = vld [vmem:[#allocation2 + $0x142] sm:$0xff] }
 0x7c9   : > { %24466 = vst [vmem:[#allocation79_spill] sm:$0xff] %v22938_v48 }
 0x7ca   : > { %17008 = vmatmul.mubr.f32.gmra.mrb[48].mxu1 %v22598_v19  ;;  %v9140_v19 = vld [vmem:[#allocation6 + $0x438] sm:$0xff] }
 0x7cb   : > { %17010 = vmatprep.mubr.f32.mxu1 %v22601_v30  ;;  %v24457_v30 = vld [vmem:[#allocation97_spill] sm:$0xff]  ;;  %v18597_v10 = vpack.c.bf16 %v9140_v19, %v9139_v15  ;;  %v12409_v19 = vld [vmem:[%s23931_s11 + $0x60] sm:$0xff] }
 0x7cc   : > { %v9110_v15 = vld [vmem:[#allocation2 + $0xaa] sm:$0xff] }
 0x7ce   : > { %17011 = vmatmul.mubr.f32.gmra.mrb[50].mxu1 %v22604_v22  ;;  %v20151_v22 = vld [vmem:[#allocation2] sm:$0xff] }
 0x7cf   : > { %17013 = vmatprep.mubr.f32.mxu1 %v22607_v9  ;;  %v9135_v9 = vld [vmem:[#allocation6 + $0x410] sm:$0xff] }
 0x7d2   : > { %17014 = vmatmul.mubr.f32.gmra.mrb[52].mxu1 %v22610_v50  ;;  %v9136_v50 = vld [vmem:[#allocation6 + $0x418] sm:$0xff] }
 0x7d3   : > { %17016 = vmatprep.mubr.f32.mxu1 %v22613_v40  ;;  %v18589_v40 = vpack.c.bf16 %v9136_v50, %v9135_v9  ;;  %v9106_v9 = vld [vmem:[#allocation2 + $0x7a] sm:$0xff] }
 0x7d6   : > { %17017 = vmatmul.mubr.f32.gmra.mrb[54].mxu1 %v22616_v52  ;;  %v9137_v52 = vld [vmem:[#allocation6 + $0x420] sm:$0xff] }
 0x7d7   : > { %17019 = vmatprep.mubr.f32.mxu1 %v22619_v39  ;;  %v9138_v39 = vld [vmem:[#allocation6 + $0x428] sm:$0xff] }
 0x7d8   : > { %v18593_v34 = vpack.c.bf16 %v9138_v39, %v9137_v52  ;;  %v12407_v52 = vld [vmem:[%s23931_s11 + $0x50] sm:$0xff]  ;;  %v12408_v39 = vld [vmem:[%s23931_s11 + $0x58] sm:$0xff] }
 0x7da   : > { %17020 = vmatmul.mubr.f32.gmra.mrb[56].mxu1 %v22622_v13  ;;  %v24456_v13 = vld [vmem:[#allocation96_spill] sm:$0xff] }
 0x7db   : > { %17022 = vmatprep.mubr.f32.mxu1 %v24451_v43  ;;  %v9104_v43 = vld [vmem:[#allocation2 + $0x62] sm:$0xff] }
 0x7de   : > { %17023 = vmatmul.mubr.f32.gmra.mrb[58].mxu1 %v24452_v51 }
 0x7df   : > { %17025 = vmatprep.mubr.f32.mxu1 %v24453_v33  ;;  %v9105_v33 = vld [vmem:[#allocation2 + $0x6a] sm:$0xff] }
 0x7e2   : > { %17026 = vmatmul.mubr.f32.gmra.mrb[60].mxu1 %v24454_v21  ;;  %v12405_v21 = vld [vmem:[%s23931_s11 + $0x40] sm:$0xff] }
 0x7e3   : > { %17028 = vmatprep.mubr.f32.mxu1 %v20151_v22 }
 0x7e6   : > { %17029 = vmatmul.mubr.f32.gmra.mrb[62].mxu1 %v20151_v22  ;;  %v12406_v22 = vld [vmem:[%s23931_s11 + $0x48] sm:$0xff] }
 0x7e7   : > { %17063 = vmatprep.mubr.f32.mxu1 %v22757_v60  ;;  %v9141_v60 = vld [vmem:[#allocation6 + $0x440] sm:$0xff]  ;;  %v22958_v50 = vpack.c.bf16 %v12406_v22, %v12405_v21  ;;  %v20152_v21 = vld [vmem:[#allocation2 + $0x121] sm:$0xff] }
 0x7e8   : > { %v18601_v8 = vpack.c.bf16 %v9142_v55, %v9141_v60  ;;  %v9656_v60 = vld [vmem:[#allocation8 + $0x90] sm:$0xff]  ;;  %v20153_v22 = vld [vmem:[#allocation2 + $0x129] sm:$0xff] }
 0x7e9   : > { %24468 = vst [vmem:[#allocation81_spill] sm:$0xff] %v22958_v50 }
 0x7ea   : > { %17064 = vmatmul.mubr.f32.vlgmr.msra.gmra.mrb[32].mxu1 %v24455_v37  ;;  %v9108_v37 = vld [vmem:[#allocation2 + $0x92] sm:$0xff] }
 0x7eb   : > { %18588 = vmatpush3.bf16.msra.mxu1 %v18585_v29  ;;  %17066 = vmatprep.mubr.f32.mxu1 %v24456_v13  ;;  %v12404_v29 = vld [vmem:[%s23931_s11 + $0x38] sm:$0xff] }
 0x7ec   : > { %18590 = vmatprep.subr.bf16.mxu1 %v18589_v40  ;;  %v22948_v51 = vpack.c.bf16 %v12404_v29, %v12403_v44  ;;  %v9109_v13 = vld [vmem:[#allocation2 + $0x9a] sm:$0xff]  ;;  %v9126_v44 = vld [vmem:[#allocation2 + $0x16a] sm:$0xff]  ;;  %v9127_v29 = vld [vmem:[#allocation2 + $0x172] sm:$0xff] }
 0x7ee   : > { %17067 = vmatmul.mubr.f32.gmra.mrb[34].mxu1 %v24457_v30  ;;  %24467 = vst [vmem:[#allocation80_spill] sm:$0xff] %v22948_v51  ;;  %v12410_v30 = vld [vmem:[%s23931_s11 + $0x68] sm:$0xff] }
 0x7ef   : > { %17069 = vmatprep.mubr.f32.mxu1 %v24458_v61  ;;  %18592 = vmatpush3.bf16.msra.mxu1 %v18589_v40  ;;  %v9107_v40 = vld [vmem:[#allocation2 + $0x82] sm:$0xff]  ;;  %v9654_v61 = vld [vmem:[#allocation8 + $0x80] sm:$0xff] }
 0x7f0   : > { %18594 = vmatprep.subr.bf16.mxu1 %v18593_v34 }
 0x7f2   : > { %17070 = vmatmul.mubr.f32.gmra.mrb[36].mxu1 %v24459_v58  ;;  %v9657_v58 = vld [vmem:[#allocation8 + $0x98] sm:$0xff] }
 0x7f3   : > { %17072 = vmatprep.mubr.f32.mxu1 %v24460_v56  ;;  %18596 = vmatpush3.bf16.msra.mxu1 %v18593_v34  ;;  %v22968_v34 = vpack.c.bf16 %v12408_v39, %v12407_v52  ;;  %v9111_v56 = vld [vmem:[#allocation2 + $0xb2] sm:$0xff]  ;;  %v18621_v27 = vpack.c.bf16 %v9657_v58, %v9656_v60  ;;  %v24474_v60 = vld [vmem:[#allocation23_spill] sm:$0xff] }
 0x7f4   : > { %18598 = vmatprep.subr.bf16.mxu1 %v18597_v10  ;;  %v20156_v52 = vld [vmem:[#allocation2 + $0x151] sm:$0xff]  ;;  %v20157_v39 = vld [vmem:[#allocation2 + $0x159] sm:$0xff]  ;;  %v9621_v58 = vld [vmem:[#allocation2 + $0x1] sm:$0xff] }
 0x7f5   : > { %24469 = vst [vmem:[#allocation82_spill] sm:$0xff] %v22968_v34  ;;  %17223 = vmatprep.mubr.f32.mxu0 %v9621_v58 }
 0x7f6   : > { %17073 = vmatmul.mubr.f32.gmra.mrb[38].mxu1 %v24461_v45  ;;  %v12412_v45 = vld [vmem:[%s23931_s11 + $0x78] sm:$0xff] }
 0x7f7   : > { %17075 = vmatprep.mubr.f32.mxu1 %v24462_v46  ;;  %18600 = vmatpush3.bf16.msra.mxu1 %v18597_v10  ;;  %v9655_v10 = vld [vmem:[#allocation8 + $0x88] sm:$0xff]  ;;  %v9658_v46 = vld [vmem:[#allocation8 + $0xa0] sm:$0xff]  ;;  %v22988_v7 = vpack.c.bf16 %v12412_v45, %v12411_v1  ;;  %v24478_v45 = vld [vmem:[#allocation27_spill] sm:$0xff] }
 0x7f8   : > { %18602 = vmatprep.subr.bf16.mxu1 %v18601_v8  ;;  %v18617_v55 = vpack.c.bf16 %v9655_v10, %v9654_v61  ;;  %v24473_v61 = vld [vmem:[#allocation22_spill] sm:$0xff]  ;;  %v9622_v1 = vld [vmem:[#allocation2 + $0x9] sm:$0xff] }
 0x7f9   : > { %24471 = vst [vmem:[#allocation84_spill] sm:$0xff] %v22988_v7 }
 0x7fa   : > { %17076 = vmatmul.mubr.f32.gmra.mrb[40].mxu1 %v22784_v25  ;;  %v12398_v25 = vld [vmem:[%s23931_s11 + $0x8] sm:$0xff]  ;;  %18618 = vmatprep.subr.bf16.mxu0 %v18617_v55 }
 0x7fb   : > { %17078 = vmatprep.mubr.f32.mxu1 %v22787_v35  ;;  %18604 = vmatpush3.bf16.msra.mxu1 %v18601_v8  ;;  %v22914_v35 = vpack.c.bf16 %v12398_v25, %v12397_v16  ;;  %v22978_v8 = vpack.c.bf16 %v12410_v30, %v12409_v19  ;;  %v9114_v16 = vld [vmem:[#allocation2 + $0xda] sm:$0xff]  ;;  %v9669_v30 = vld [vmem:[#allocation8 + $0xf8] sm:$0xff] }
 0x7fc   : > { %18606 = vmatprep.subr.bf16.mxu1 %v18605_v54  ;;  %18620 = vmatpush3.bf16.msra.mxu0 %v18617_v55  ;;  %v9668_v19 = vld [vmem:[#allocation8 + $0xf0] sm:$0xff]  ;;  %v24475_v55 = vld [vmem:[#allocation24_spill] sm:$0xff] }
 0x7fd   : > { %24463 = vst [vmem:[#allocation77_spill] sm:$0xff] %v22914_v35  ;;  %24470 = vst [vmem:[#allocation83_spill] sm:$0xff] %v22978_v8  ;;  %18622 = vmatprep.subr.bf16.mxu0 %v18621_v27  ;;  %v18645_v10 = vpack.c.bf16 %v9669_v30, %v9668_v19  ;;  %v9619_v30 = vld [vmem:[#allocation8 + $0x70] sm:$0xff] }
 0x7fe   : > { %17079 = vmatmul.mubr.f32.gmra.mrb[42].mxu1 %v22790_v0  ;;  %v24464_v0 = vld [vmem:[#allocation103_spill] sm:$0xff] }
 0x7ff   : > { %17081 = vmatprep.mubr.f32.mxu1 %v22793_v20  ;;  %18608 = vmatpush3.bf16.msra.mxu1 %v18605_v54  ;;  %v8814_v20 = vld [vmem:[#allocation2 + $0x121] sm:$0xff]  ;;  %v9659_v54 = vld [vmem:[#allocation8 + $0xa8] sm:$0xff] }
 0x800   : > { %18610 = vmatprep.subr.bf16.mxu1 %v18609_v38  ;;  %18624 = vmatpush3.bf16.msra.mxu0 %v18621_v27  ;;  %v24477_v27 = vld [vmem:[#allocation26_spill] sm:$0xff] }
 0x802   : > { %17082 = vmatmul.mubr.f32.gmra.mrb[44].mxu1 %v22796_v12  ;;  %v8815_v12 = vld [vmem:[#allocation2 + $0x129] sm:$0xff] }
 0x803   : > { %17084 = vmatprep.mubr.f32.mxu1 %v22799_v2  ;;  %18612 = vmatpush3.bf16.msra.mxu1 %v18609_v38  ;;  %v8816_v2 = vld [vmem:[#allocation2 + $0x139] sm:$0xff]  ;;  %v18625_v38 = vpack.c.bf16 %v9659_v54, %v9658_v46  ;;  %v24479_v46 = vld [vmem:[#allocation28_spill] sm:$0xff]  ;;  %v24480_v54 = vld [vmem:[#allocation29_spill] sm:$0xff] }
 0x804   : > { %18614 = vmatprep.subr.bf16.mxu1 %v18613_v17 }
 0x805   : > { %18626 = vmatprep.subr.bf16.mxu0 %v18625_v38 }
 0x806   : > { %17085 = vmatmul.mubr.f32.gmra.mrb[46].mxu1 %v22802_v6  ;;  %v8818_v6 = vld [vmem:[#allocation2 + $0x151] sm:$0xff]  ;;  %18628 = vmatpush3.bf16.msra.mxu0 %v18625_v38 }
 0x807   : > { %17087 = vmatprep.mubr.f32.mxu1 %v22805_v47  ;;  %18616 = vmatpush3.bf16.msra.mxu1 %v18613_v17  ;;  %v8819_v47 = vld [vmem:[#allocation2 + $0x159] sm:$0xff]  ;;  %v9661_v17 = vld [vmem:[#allocation8 + $0xb8] sm:$0xff] }
 0x808   : > { %18937 = vmatprep.subr.bf16.mxu1 %v22914_v35  ;;  %v18629_v25 = vpack.c.bf16 %v9661_v17, %v9660_v49  ;;  %v9606_v38 = vld [vmem:[#allocation8 + $0x8] sm:$0xff]  ;;  %v24482_v17 = vld [vmem:[#allocation31_spill] sm:$0xff] }
 0x809   : > { %v24481_v49 = vld [vmem:[#allocation30_spill] sm:$0xff] }
 0x80a   : > { %17088 = vmatmul.mubr.f32.gmra.mrb[48].mxu1 %v22808_v23  ;;  %v8822_v23 = vld [vmem:[#allocation2 + $0x181] sm:$0xff]  ;;  %18630 = vmatprep.subr.bf16.mxu0 %v18629_v25 }
 0x80b   : > { %17090 = vmatprep.mubr.f32.mxu1 %v22811_v26  ;;  %v8824_v26 = vld [vmem:[#allocation2 + $0x199] sm:$0xff]  ;;  %18632 = vmatpush3.bf16.msra.mxu0 %v18629_v25  ;;  %v24484_v25 = vld [vmem:[#allocation33_spill] sm:$0xff] }
 0x80e   : > { %17091 = vmatmul.mubr.f32.gmra.mrb[50].mxu1 %v24464_v0  ;;  %v9662_v0 = vld [vmem:[#allocation8 + $0xc0] sm:$0xff] }
 0x80f   : > { %17093 = vmatprep.mubr.f32.mxu1 %v8814_v20  ;;  %v9663_v20 = vld [vmem:[#allocation8 + $0xc8] sm:$0xff] }
 0x812   : > { %17094 = vmatmul.mubr.f32.gmra.mrb[52].mxu1 %v8815_v12  ;;  %v9115_v12 = vld [vmem:[#allocation2 + $0xe2] sm:$0xff] }
 0x813   : > { %17096 = vmatprep.mubr.f32.mxu1 %v8816_v2  ;;  %v12709_v2 = vld [vmem:[%s23933_s13] sm:$0xf] }
 0x816   : > { %17097 = vmatmul.mubr.f32.gmra.mrb[54].mxu1 %v8817_v62  ;;  %v9116_v62 = vld [vmem:[#allocation2 + $0xf2] sm:$0xff] }
 0x817   : > { %17099 = vmatprep.mubr.f32.mxu1 %v8818_v6  ;;  %v18633_v6 = vpack.c.bf16 %v9663_v20, %v9662_v0  ;;  %v9607_v0 = vld [vmem:[#allocation8 + $0x10] sm:$0xff]  ;;  %v9608_v20 = vld [vmem:[#allocation8 + $0x18] sm:$0xff] }
 0x819   : > { %18634 = vmatprep.subr.bf16.mxu0 %v18633_v6 }
 0x81a   : > { %17100 = vmatmul.mubr.f32.gmra.mrb[56].mxu1 %v8819_v47  ;;  %v9664_v47 = vld [vmem:[#allocation8 + $0xd0] sm:$0xff]  ;;  %18636 = vmatpush3.bf16.msra.mxu0 %v18633_v6  ;;  %v24487_v6 = vld [vmem:[#allocation36_spill] sm:$0xff] }
 0x81b   : > { %17102 = vmatprep.mubr.f32.mxu1 %v8820_v32  ;;  %v9665_v32 = vld [vmem:[#allocation8 + $0xd8] sm:$0xff] }
 0x81e   : > { %17103 = vmatmul.mubr.f32.gmra.mrb[58].mxu1 %v8821_v14  ;;  %v9117_v14 = vld [vmem:[#allocation2 + $0xfa] sm:$0xff] }
 0x81f   : > { %17105 = vmatprep.mubr.f32.mxu1 %v8822_v23  ;;  %v9118_v23 = vld [vmem:[#allocation2 + $0x10a] sm:$0xff] }
 0x822   : > { %17106 = vmatmul.mubr.f32.gmra.mrb[60].mxu1 %v8823_v18  ;;  %v9666_v18 = vld [vmem:[#allocation8 + $0xe0] sm:$0xff] }
 0x823   : > { %17108 = vmatprep.mubr.f32.mxu1 %v8824_v26  ;;  %v18637_v26 = vpack.c.bf16 %v9665_v32, %v9664_v47  ;;  %v24488_v47 = vld [vmem:[#allocation37_spill] sm:$0xff] }
 0x824   : > { %v9609_v32 = vld [vmem:[#allocation8 + $0x20] sm:$0xff] }
 0x825   : > { %18638 = vmatprep.subr.bf16.mxu0 %v18637_v26 }
 0x826   : > { %17109 = vmatmul.mubr.f32.gmra.mrb[62].mxu1 %v8825_v28  ;;  %v9667_v28 = vld [vmem:[#allocation8 + $0xe8] sm:$0xff]  ;;  %18640 = vmatpush3.bf16.msra.mxu0 %v18637_v26 }
 0x827   : > { %17143 = vmatprep.mubr.f32.mxu1 %v9100_v53  ;;  %v18641_v53 = vpack.c.bf16 %v9667_v28, %v9666_v18  ;;  %v24489_v26 = vld [vmem:[#allocation38_spill] sm:$0xff]  ;;  %v24490_v18 = vld [vmem:[#allocation39_spill] sm:$0xff]  ;;  %v24491_v28 = vld [vmem:[#allocation40_spill] sm:$0xff] }
 0x829   : > { %18642 = vmatprep.subr.bf16.mxu0 %v18641_v53 }
 0x82a   : > { %17144 = vmatmul.mubr.f32.vlgmr.msra.gmra.mrb[32].mxu1 %v9101_v42  ;;  %v9121_v42 = vld [vmem:[#allocation2 + $0x12a] sm:$0xff]  ;;  %18644 = vmatpush3.bf16.msra.mxu0 %v18641_v53 }
 0x82b   : > { %17146 = vmatprep.mubr.f32.mxu1 %v9102_v11  ;;  %18945 = vmatpush3.bf16.msra.mxu1 %v22914_v35  ;;  %v9124_v11 = vld [vmem:[#allocation2 + $0x152] sm:$0xff]  ;;  %v9612_v53 = vld [vmem:[#allocation8 + $0x38] sm:$0xff] }
 0x82c   : > { %18938 = vmatprep.subr.bf16.mxu1 %v22928_v63  ;;  %18646 = vmatprep.subr.bf16.mxu0 %v18645_v10 }
 0x82e   : > { %17147 = vmatmul.mubr.f32.gmra.mrb[34].mxu1 %v9103_v3  ;;  %v9125_v3 = vld [vmem:[#allocation2 + $0x15a] sm:$0xff]  ;;  %18648 = vmatpush3.bf16.msra.mxu0 %v18645_v10 }
 0x82f   : > { %17149 = vmatprep.mubr.f32.mxu1 %v9104_v43  ;;  %18946 = vmatpush3.bf16.msra.mxu1 %v22928_v63  ;;  %v9130_v43 = vld [vmem:[#allocation2 + $0x19a] sm:$0xff] }
 0x830   : > { %18939 = vmatprep.subr.bf16.mxu1 %v22938_v48 }
 0x831   : > { %17224 = vmatmul.mubr.f32.vlgmr.msra.gmra.mrb[64].mxu0 %v9622_v1 }
 0x832   : > { %17150 = vmatmul.mubr.f32.gmra.mrb[36].mxu1 %v9105_v33  ;;  %v9131_v33 = vld [vmem:[#allocation2 + $0x1a2] sm:$0xff] }
 0x833   : > { %17152 = vmatprep.mubr.f32.mxu1 %v9106_v9  ;;  %18947 = vmatpush3.bf16.msra.mxu1 %v22938_v48  ;;  %v20154_v9 = vld [vmem:[#allocation2 + $0x139] sm:$0xff] }
 0x834   : > { %18940 = vmatprep.subr.bf16.mxu1 %v22948_v51 }
 0x836   : > { %17153 = vmatmul.mubr.f32.gmra.mrb[38].mxu1 %v9107_v40  ;;  %v20155_v40 = vld [vmem:[#allocation2 + $0x141] sm:$0xff] }
 0x837   : > { %17155 = vmatprep.mubr.f32.mxu1 %v9108_v37  ;;  %18948 = vmatpush3.bf16.msra.mxu1 %v22948_v51  ;;  %v20160_v37 = vld [vmem:[#allocation2 + $0x181] sm:$0xff]  ;;  %v10766_v51 = vld [vmem:[#allocation8 + $0x208] sm:$0xff] }
 0x838   : > { %18941 = vmatprep.subr.bf16.mxu1 %v22958_v50 }
 0x83a   : > { %17156 = vmatmul.mubr.f32.gmra.mrb[40].mxu1 %v9109_v13  ;;  %v20161_v13 = vld [vmem:[#allocation2 + $0x189] sm:$0xff] }
 0x83b   : > { %17158 = vmatprep.mubr.f32.mxu1 %v9110_v15  ;;  %18949 = vmatpush3.bf16.msra.mxu1 %v22958_v50  ;;  %v24472_v15 = vld [vmem:[#allocation21_spill] sm:$0xff] }
 0x83c   : > { %18942 = vmatprep.subr.bf16.mxu1 %v22968_v34  ;;  %v10765_v50 = vld [vmem:[#allocation8 + $0x200] sm:$0xff] }
 0x83e   : > { %17159 = vmatmul.mubr.f32.gmra.mrb[42].mxu1 %v9111_v56  ;;  %v24476_v56 = vld [vmem:[#allocation25_spill] sm:$0xff] }
 0x83f   : > { %17161 = vmatprep.mubr.f32.mxu1 %v9112_v36  ;;  %18950 = vmatpush3.bf16.msra.mxu1 %v22968_v34  ;;  %v9605_v36 = vld [vmem:[#allocation8] sm:$0xff]  ;;  %v10474_v34 = vld [vmem:[#allocation8 + $0x1f8] sm:$0xff] }
 0x840   : > { %18943 = vmatprep.subr.bf16.mxu1 %v22978_v8 }
 0x842   : > { %17162 = vmatmul.mubr.f32.gmra.mrb[44].mxu1 %v9113_v41  ;;  %v18649_v41 = vpack.c.bf16 %v9606_v38, %v9605_v36 }
 0x843   : > { %17164 = vmatprep.mubr.f32.mxu1 %v9114_v16  ;;  %18951 = vmatpush3.bf16.msra.mxu1 %v22978_v8  ;;  %v24483_v16 = vld [vmem:[#allocation32_spill] sm:$0xff] }
 0x844   : > { %18944 = vmatprep.subr.bf16.mxu1 %v22988_v7  ;;  %18650 = vmatprep.subr.bf16.mxu0 %v18649_v41 }
 0x845   : > { %18652 = vmatpush3.bf16.msra.mxu0 %v18649_v41 }
 0x846   : > { %17165 = vmatmul.mubr.f32.gmra.mrb[46].mxu1 %v9115_v12  ;;  %v18653_v12 = vpack.c.bf16 %v9608_v20, %v9607_v0 }
 0x847   : > { %17167 = vmatprep.mubr.f32.mxu1 %v9116_v62  ;;  %18952 = vmatpush3.bf16.msra.mxu1 %v22988_v7  ;;  %v24486_v62 = vld [vmem:[#allocation35_spill] sm:$0xff] }
 0x848   : > { %17991 = vmatprep.subr.msk.mxu1 %vm850_vm0, %v12709_v2  ;;  %18654 = vmatprep.subr.bf16.mxu0 %v18653_v12 }
 0x849   : > { %18656 = vmatpush3.bf16.msra.mxu0 %v18653_v12 }
 0x84a   : > { %17168 = vmatmul.mubr.f32.gmra.mrb[48].mxu1 %v9117_v14  ;;  %v9610_v14 = vld [vmem:[#allocation8 + $0x28] sm:$0xff] }
 0x84b   : > { %17170 = vmatprep.mubr.f32.mxu1 %v9118_v23  ;;  %v18657_v23 = vpack.c.bf16 %v9610_v14, %v9609_v32 }
 0x84d   : > { %18658 = vmatprep.subr.bf16.mxu0 %v18657_v23 }
 0x84e   : > { %17171 = vmatmul.mubr.f32.gmra.mrb[50].mxu1 %v9119_v31  ;;  %18660 = vmatpush3.bf16.msra.mxu0 %v18657_v23  ;;  %v24492_v31 = vld [vmem:[#allocation41_spill] sm:$0xff] }
 0x84f   : > { %17173 = vmatprep.mubr.f32.mxu1 %v9120_v4  ;;  %v9611_v4 = vld [vmem:[#allocation8 + $0x30] sm:$0xff] }
 0x852   : > { %17174 = vmatmul.mubr.f32.gmra.mrb[52].mxu1 %v9121_v42  ;;  %v18661_v42 = vpack.c.bf16 %v9612_v53, %v9611_v4 }
 0x853   : > { %17176 = vmatprep.mubr.f32.mxu1 %v9122_v5  ;;  %v24493_v5 = vld [vmem:[#allocation42_spill] sm:$0xff] }
 0x854   : > { %18662 = vmatprep.subr.bf16.mxu0 %v18661_v42 }
 0x855   : > { %18664 = vmatpush3.bf16.msra.mxu0 %v18661_v42 }
 0x856   : > { %17177 = vmatmul.mubr.f32.gmra.mrb[54].mxu1 %v9123_v57  ;;  %v24494_v57 = vld [vmem:[#allocation43_spill] sm:$0xff] }
 0x857   : > { %17179 = vmatprep.mubr.f32.mxu1 %v9124_v11  ;;  %v24495_v11 = vld [vmem:[#allocation44_spill] sm:$0xff] }
 0x85a   : > { %17180 = vmatmul.mubr.f32.gmra.mrb[56].mxu1 %v9125_v3  ;;  %v24496_v3 = vld [vmem:[#allocation45_spill] sm:$0xff] }
 0x85b   : > { %17182 = vmatprep.mubr.f32.mxu1 %v9126_v44  ;;  %v9613_v44 = vld [vmem:[#allocation8 + $0x40] sm:$0xff] }
 0x85e   : > { %17183 = vmatmul.mubr.f32.gmra.mrb[58].mxu1 %v9127_v29  ;;  %v9614_v29 = vld [vmem:[#allocation8 + $0x48] sm:$0xff] }
 0x85f   : > { %17185 = vmatprep.mubr.f32.mxu1 %v22857_v59  ;;  %v20158_v59 = vld [vmem:[#allocation2 + $0x169] sm:$0xff] }
 0x862   : > { %17186 = vmatmul.mubr.f32.gmra.mrb[60].mxu1 %v22860_v24  ;;  %v20159_v24 = vld [vmem:[#allocation2 + $0x171] sm:$0xff] }
 0x863   : > { %17188 = vmatprep.mubr.f32.mxu1 %v9130_v43  ;;  %v18665_v43 = vpack.c.bf16 %v9614_v29, %v9613_v44 }
 0x865   : > { %18666 = vmatprep.subr.bf16.mxu0 %v18665_v43 }
 0x866   : > { %17189 = vmatmul.mubr.f32.gmra.mrb[62].mxu1 %v9131_v33  ;;  %v24497_v33 = vld [vmem:[#allocation46_spill] sm:$0xff]  ;;  %18668 = vmatpush3.bf16.msra.mxu0 %v18665_v43 }
 0x867   : > { %17976 = vmatprep.mubr.f32.mxu1 %v20152_v21  ;;  %v24498_v21 = vld [vmem:[#allocation47_spill] sm:$0xff] }
 0x86a   : > { %17977 = vmatmul.mubr.f32.vlgmr.msra.gmra.mrb[64].mxu1 %v20153_v22  ;;  %v24499_v22 = vld [vmem:[#allocation48_spill] sm:$0xff] }
 0x86b   : > { %17979 = vmatprep.mubr.f32.mxu1 %v20154_v9  ;;  %17992 = vmatpush3.msk.msra.mxu1 %vm850_vm0, %v12709_v2  ;;  %v24485_v2 = vld [vmem:[#allocation34_spill] sm:$0xff]  ;;  %v24500_v9 = vld [vmem:[#allocation49_spill] sm:$0xff] }
 0x86e   : > { %17980 = vmatmul.mubr.f32.gmra.mrb[66].mxu1 %v20155_v40  ;;  %v9615_v40 = vld [vmem:[#allocation8 + $0x50] sm:$0xff] }
 0x86f   : > { %17982 = vmatprep.mubr.f32.mxu1 %v20156_v52  ;;  %v9616_v52 = vld [vmem:[#allocation8 + $0x58] sm:$0xff] }
 0x872   : > { %17983 = vmatmul.mubr.f32.gmra.mrb[68].mxu1 %v20157_v39  ;;  %v18669_v39 = vpack.c.bf16 %v9616_v52, %v9615_v40 }
 0x873   : > { %17985 = vmatprep.mubr.f32.mxu1 %v20158_v59  ;;  %v24501_v59 = vld [vmem:[#allocation50_spill] sm:$0xff] }
 0x874   : > { %18670 = vmatprep.subr.bf16.mxu0 %v18669_v39 }
 0x875   : > { %18672 = vmatpush3.bf16.msra.mxu0 %v18669_v39 }
 0x876   : > { %17986 = vmatmul.mubr.f32.gmra.mrb[70].mxu1 %v20159_v24  ;;  %v24502_v24 = vld [vmem:[#allocation65_spill] sm:$0xff] }
 0x877   : > { %17988 = vmatprep.mubr.f32.mxu1 %v20160_v37  ;;  %v9617_v37 = vld [vmem:[#allocation8 + $0x60] sm:$0xff] }
 0x87a   : > { %17989 = vmatmul.mubr.f32.gmra.mrb[72].mxu1 %v20161_v13  ;;  %v9618_v13 = vld [vmem:[#allocation8 + $0x68] sm:$0xff] }
 0x87b   : > { %17993 = vmatprep.mubr.msk.f32.mxu1 %vm785_vm2, %v24472_v15  ;;  %v24503_v15 = vld [vmem:[#allocation66_spill] sm:$0xff]  ;;  %v18673_v19 = vpack.c.bf16 %v9618_v13, %v9617_v37 }
 0x87d   : > { %18674 = vmatprep.subr.bf16.mxu0 %v18673_v19 }
 0x87e   : > { %17994 = vmatmul.mubr.msk.f32.vlgmr.msra.gmra.mrb[74].mxu1 %vm785_vm2, %v24473_v61  ;;  %18676 = vmatpush3.bf16.msra.mxu0 %v18673_v19  ;;  %v9620_v61 = vld [vmem:[#allocation8 + $0x78] sm:$0xff] }
 0x87f   : > { %17996 = vmatprep.mubr.msk.f32.mxu1 %vm785_vm2, %v24474_v60  ;;  %v18677_v10 = vpack.c.bf16 %v9620_v61, %v9619_v30  ;;  %v10153_v60 = vld [vmem:[#allocation8 + $0x100] sm:$0xff] }
 0x881   : > { %18678 = vmatprep.subr.bf16.mxu0 %v18677_v10 }
 0x882   : > { %17997 = vmatmul.mubr.msk.f32.gmra.mrb[76].mxu1 %vm785_vm2, %v24475_v55  ;;  %v10154_v55 = vld [vmem:[#allocation8 + $0x108] sm:$0xff]  ;;  %18680 = vmatpush3.bf16.msra.mxu0 %v18677_v10 }
 0x883   : > { %17999 = vmatprep.mubr.msk.f32.mxu1 %vm785_vm2, %v24476_v56  ;;  %v23064_v58 = vpack.c.bf16 %v10154_v55, %v10153_v60  ;;  %v23070_v56 = vld [vmem:[%s23928_s8] ss:$0 sm:$0xff] }
 0x885   : > { %18682 = vmatprep.subr.bf16.mxu0 %v23064_v58 }
 0x886   : > { %18000 = vmatmul.mubr.msk.f32.gmra.mrb[78].mxu1 %vm785_vm2, %v24477_v27 }
 0x887   : > { %18002 = vmatprep.mubr.msk.f32.mxu1 %vm785_vm2, %v24478_v45 }
 0x88a   : > { %18003 = vmatmul.mubr.msk.f32.gmra.mrb[80].mxu1 %vm785_vm2, %v24479_v46 }
 0x88b   : > { %18005 = vmatprep.mubr.msk.f32.mxu1 %vm785_vm2, %v24480_v54 }
 0x88e   : > { %18006 = vmatmul.mubr.msk.f32.gmra.mrb[82].mxu1 %vm785_vm2, %v24481_v49 }
 0x88f   : > { %18008 = vmatprep.mubr.msk.f32.mxu1 %vm785_vm2, %v24482_v17 }
 0x892   : > { %18009 = vmatmul.mubr.msk.f32.gmra.mrb[84].mxu1 %vm785_vm2, %v24483_v16 }
 0x893   : > { %18011 = vmatprep.mubr.msk.f32.mxu1 %vm785_vm2, %v24484_v25 }
 0x896   : > { %18012 = vmatmul.mubr.msk.f32.gmra.mrb[86].mxu1 %vm785_vm2, %v24485_v2 }
 0x897   : > { %18014 = vmatprep.mubr.msk.f32.mxu1 %vm785_vm2, %v24486_v62 }
 0x89a   : > { %18015 = vmatmul.mubr.msk.f32.gmra.mrb[88].mxu1 %vm785_vm2, %v24487_v6 }
 0x89b   : > { %18017 = vmatprep.mubr.msk.f32.mxu1 %vm785_vm2, %v24488_v47 }
 0x89e   : > { %18018 = vmatmul.mubr.msk.f32.gmra.mrb[90].mxu1 %vm785_vm2, %v24489_v26 }
 0x89f   : > { %18020 = vmatprep.mubr.msk.f32.mxu1 %vm785_vm2, %v24490_v18 }
 0x8a2   : > { %18021 = vmatmul.mubr.msk.f32.gmra.mrb[92].mxu1 %vm785_vm2, %v24491_v28 }
 0x8a3   : > { %18023 = vmatprep.mubr.msk.f32.mxu1 %vm785_vm2, %v24492_v31 }
 0x8a6   : > { %18024 = vmatmul.mubr.msk.f32.gmra.mrb[94].mxu1 %vm785_vm2, %v24493_v5 }
 0x8a7   : > { %18026 = vmatprep.mubr.msk.f32.mxu1 %vm785_vm2, %v24494_v57 }
 0x8aa   : > { %18027 = vmatmul.mubr.msk.f32.gmra.mrb[64].mxu1 %vm785_vm2, %v24495_v11 }
 0x8ab   : > { %18029 = vmatprep.mubr.msk.f32.mxu1 %vm785_vm2, %v24496_v3 }
 0x8ae   : > { %18030 = vmatmul.mubr.msk.f32.gmra.mrb[66].mxu1 %vm785_vm2, %v24497_v33 }
 0x8af   : > { %18032 = vmatprep.mubr.msk.f32.mxu1 %vm785_vm2, %v24498_v21 }
 0x8b2   : > { %18033 = vmatmul.mubr.msk.f32.gmra.mrb[68].mxu1 %vm785_vm2, %v24499_v22 }
 0x8b3   : > { %18035 = vmatprep.mubr.msk.f32.mxu1 %vm785_vm2, %v24500_v9 }
 0x8b6   : > { %18036 = vmatmul.mubr.msk.f32.gmra.mrb[70].mxu1 %vm785_vm2, %v24501_v59 }
 0x8b7   : > { %18038 = vmatprep.mubr.msk.f32.mxu1 %vm785_vm2, %v24502_v24 }
 0x8ba   : > { %18039 = vmatmul.mubr.msk.f32.gmra.mrb[72].mxu1 %vm785_vm2, %v24503_v15 }
 0x8fd   : > { %v17145_v1 = vpop.f32.mrb[32].mxu1 }
 0x8fe   : > { %v9414_v27 = vadd.f32 %v17145_v1, %v23070_v56  ;;  %v9215_v45 = vpop.f32.mrb[33].mxu1 }
 0x8ff   : > { %v9413_v46 = vadd.f32 %v23070_v56, %v9215_v45 }
 0x900   : > { %vm9446_vm0 = vcmp.ge.f32.partialorder %v9414_v27, 0.0  ;;  %v9478_v54 = vmul.f32 0.2, %v9414_v27 }
 0x901   : > { %vm9445_vm2 = vcmp.ge.f32.partialorder %v9413_v46, 0.0  ;;  %v9477_v36 = vmul.f32 0.2, %v9413_v46  ;;  %v17148_v38 = vpop.f32.mrb[34].mxu1 }
 0x902   : > { %v9510_v41 = vsel %vm9446_vm0, %v9414_v27, %v9478_v54  ;;  %v9416_v49 = vadd.f32 %v17148_v38, %v23070_v56  ;;  %v9225_v17 = vpop.f32.mrb[35].mxu1 }
 0x903   : > { %9542 = vst [vmem:[#allocation2 + $0x21] sm:$0xff] %v9510_v41  ;;  %v9509_v16 = vsel %vm9445_vm2, %v9413_v46, %v9477_v36  ;;  %v9415_v25 = vadd.f32 %v23070_v56, %v9225_v17 }
 0x904   : > { %9541 = vst [vmem:[#allocation2 + $0x19] sm:$0xff] %v9509_v16  ;;  %vm9448_vm12 = vcmp.ge.f32.partialorder %v9416_v49, 0.0  ;;  %v9480_v0 = vmul.f32 0.2, %v9416_v49  ;;  %17226 = vmatprep.mubr.f32.mxu0 %v9509_v16 }
 0x905   : > { %vm9447_vm13 = vcmp.ge.f32.partialorder %v9415_v25, 0.0  ;;  %v9479_v20 = vmul.f32 0.2, %v9415_v25  ;;  %v17151_v12 = vpop.f32.mrb[36].mxu1  ;;  %17227 = vmatmul.mubr.f32.gmra.mrb[66].mxu0 %v9510_v41 }
 0x906   : > { %v9512_v2 = vsel %vm9448_vm12, %v9416_v49, %v9480_v0  ;;  %v9418_v62 = vadd.f32 %v17151_v12, %v23070_v56  ;;  %v9235_v6 = vpop.f32.mrb[37].mxu1 }
 0x907   : > { %9544 = vst [vmem:[#allocation2 + $0x39] sm:$0xff] %v9512_v2  ;;  %v9511_v47 = vsel %vm9447_vm13, %v9415_v25, %v9479_v20  ;;  %v9417_v32 = vadd.f32 %v23070_v56, %v9235_v6 }
 0x908   : > { %9543 = vst [vmem:[#allocation2 + $0x31] sm:$0xff] %v9511_v47  ;;  %vm9450_vm14 = vcmp.ge.f32.partialorder %v9418_v62, 0.0  ;;  %v9482_v14 = vmul.f32 0.2, %v9418_v62  ;;  %17229 = vmatprep.mubr.f32.mxu0 %v9511_v47 }
 0x909   : > { %vm9449_vm15 = vcmp.ge.f32.partialorder %v9417_v32, 0.0  ;;  %v9481_v23 = vmul.f32 0.2, %v9417_v32  ;;  %v17154_v26 = vpop.f32.mrb[38].mxu1  ;;  %17230 = vmatmul.mubr.f32.gmra.mrb[68].mxu0 %v9512_v2 }
 0x90a   : > { %v9514_v18 = vsel %vm9450_vm14, %v9418_v62, %v9482_v14  ;;  %v9420_v28 = vadd.f32 %v17154_v26, %v23070_v56  ;;  %v9245_v31 = vpop.f32.mrb[39].mxu1 }
 0x90b   : > { %9546 = vst [vmem:[#allocation2 + $0x51] sm:$0xff] %v9514_v18  ;;  %v9513_v4 = vsel %vm9449_vm15, %v9417_v32, %v9481_v23  ;;  %v9419_v53 = vadd.f32 %v23070_v56, %v9245_v31 }
 0x90c   : > { %9545 = vst [vmem:[#allocation2 + $0x49] sm:$0xff] %v9513_v4  ;;  %vm9452_vm1 = vcmp.ge.f32.partialorder %v9420_v28, 0.0  ;;  %v9484_v42 = vmul.f32 0.2, %v9420_v28  ;;  %17232 = vmatprep.mubr.f32.mxu0 %v9513_v4 }
 0x90d   : > { %vm9451_vm3 = vcmp.ge.f32.partialorder %v9419_v53, 0.0  ;;  %v9483_v5 = vmul.f32 0.2, %v9419_v53  ;;  %v17157_v57 = vpop.f32.mrb[40].mxu1  ;;  %17233 = vmatmul.mubr.f32.gmra.mrb[70].mxu0 %v9514_v18 }
 0x90e   : > { %v9516_v11 = vsel %vm9452_vm1, %v9420_v28, %v9484_v42  ;;  %v9422_v3 = vadd.f32 %v17157_v57, %v23070_v56  ;;  %v9255_v44 = vpop.f32.mrb[41].mxu1 }
 0x90f   : > { %9548 = vst [vmem:[#allocation2 + $0x69] sm:$0xff] %v9516_v11  ;;  %v9515_v29 = vsel %vm9451_vm3, %v9419_v53, %v9483_v5  ;;  %v9421_v43 = vadd.f32 %v23070_v56, %v9255_v44 }
 0x910   : > { %9547 = vst [vmem:[#allocation2 + $0x61] sm:$0xff] %v9515_v29  ;;  %vm9454_vm4 = vcmp.ge.f32.partialorder %v9422_v3, 0.0  ;;  %v9486_v33 = vmul.f32 0.2, %v9422_v3  ;;  %17235 = vmatprep.mubr.f32.mxu0 %v9515_v29 }
 0x911   : > { %vm9453_vm5 = vcmp.ge.f32.partialorder %v9421_v43, 0.0  ;;  %v9485_v21 = vmul.f32 0.2, %v9421_v43  ;;  %v17160_v22 = vpop.f32.mrb[42].mxu1  ;;  %17236 = vmatmul.mubr.f32.gmra.mrb[72].mxu0 %v9516_v11 }
 0x912   : > { %v9518_v9 = vsel %vm9454_vm4, %v9422_v3, %v9486_v33  ;;  %v9424_v40 = vadd.f32 %v17160_v22, %v23070_v56  ;;  %v9265_v52 = vpop.f32.mrb[43].mxu1 }
 0x913   : > { %9550 = vst [vmem:[#allocation2 + $0x81] sm:$0xff] %v9518_v9  ;;  %v9517_v39 = vsel %vm9453_vm5, %v9421_v43, %v9485_v21  ;;  %v9423_v59 = vadd.f32 %v23070_v56, %v9265_v52 }
 0x914   : > { %9549 = vst [vmem:[#allocation2 + $0x79] sm:$0xff] %v9517_v39  ;;  %vm9456_vm6 = vcmp.ge.f32.partialorder %v9424_v40, 0.0  ;;  %v9488_v24 = vmul.f32 0.2, %v9424_v40  ;;  %17238 = vmatprep.mubr.f32.mxu0 %v9517_v39 }
 0x915   : > { %vm9455_vm7 = vcmp.ge.f32.partialorder %v9423_v59, 0.0  ;;  %v9487_v37 = vmul.f32 0.2, %v9423_v59  ;;  %v17163_v13 = vpop.f32.mrb[44].mxu1  ;;  %17239 = vmatmul.mubr.f32.gmra.mrb[74].mxu0 %v9518_v9 }
 0x916   : > { %v9520_v15 = vsel %vm9456_vm6, %v9424_v40, %v9488_v24  ;;  %v9426_v19 = vadd.f32 %v17163_v13, %v23070_v56  ;;  %v9275_v30 = vpop.f32.mrb[45].mxu1 }
 0x917   : > { %9552 = vst [vmem:[#allocation2 + $0x99] sm:$0xff] %v9520_v15  ;;  %v9519_v61 = vsel %vm9455_vm7, %v9423_v59, %v9487_v37  ;;  %v9425_v10 = vadd.f32 %v23070_v56, %v9275_v30 }
 0x918   : > { %9551 = vst [vmem:[#allocation2 + $0x91] sm:$0xff] %v9519_v61  ;;  %vm9458_vm8 = vcmp.ge.f32.partialorder %v9426_v19, 0.0  ;;  %v9490_v60 = vmul.f32 0.2, %v9426_v19  ;;  %17241 = vmatprep.mubr.f32.mxu0 %v9519_v61 }
 0x919   : > { %vm9457_vm9 = vcmp.ge.f32.partialorder %v9425_v10, 0.0  ;;  %v9489_v55 = vmul.f32 0.2, %v9425_v10  ;;  %v17166_v1 = vpop.f32.mrb[46].mxu1  ;;  %17242 = vmatmul.mubr.f32.gmra.mrb[76].mxu0 %v9520_v15 }
 0x91a   : > { %v9522_v27 = vsel %vm9458_vm8, %v9426_v19, %v9490_v60  ;;  %v9428_v45 = vadd.f32 %v17166_v1, %v23070_v56  ;;  %v9285_v46 = vpop.f32.mrb[47].mxu1  ;;  %v23324_v8 = vld [vmem:[#allocation2 + $0x82] sm:$0xff] }
 0x91b   : > { %9554 = vst [vmem:[#allocation2 + $0xb1] sm:$0xff] %v9522_v27  ;;  %v9521_v54 = vsel %vm9457_vm9, %v9425_v10, %v9489_v55  ;;  %v9427_v36 = vadd.f32 %v23070_v56, %v9285_v46  ;;  %v23321_v7 = vld [vmem:[#allocation2 + $0x7a] sm:$0xff] }
 0x91c   : > { %9553 = vst [vmem:[#allocation2 + $0xa9] sm:$0xff] %v9521_v54  ;;  %vm9460_vm10 = vcmp.ge.f32.partialorder %v9428_v45, 0.0  ;;  %v9492_v38 = vmul.f32 0.2, %v9428_v45  ;;  %17244 = vmatprep.mubr.f32.mxu0 %v9521_v54 }
 0x91d   : > { %vm9459_vm11 = vcmp.ge.f32.partialorder %v9427_v36, 0.0  ;;  %v9491_v41 = vmul.f32 0.2, %v9427_v36  ;;  %v17169_v49 = vpop.f32.mrb[48].mxu1  ;;  %17245 = vmatmul.mubr.f32.gmra.mrb[78].mxu0 %v9522_v27 }
 0x91e   : > { %v9524_v17 = vsel %vm9460_vm10, %v9428_v45, %v9492_v38  ;;  %v9430_v16 = vadd.f32 %v17169_v49, %v23070_v56  ;;  %v9295_v25 = vpop.f32.mrb[49].mxu1 }
 0x91f   : > { %9556 = vst [vmem:[#allocation2 + $0xc9] sm:$0xff] %v9524_v17  ;;  %v9523_v0 = vsel %vm9459_vm11, %v9427_v36, %v9491_v41  ;;  %v9429_v20 = vadd.f32 %v23070_v56, %v9295_v25 }
 0x920   : > { %9555 = vst [vmem:[#allocation2 + $0xc1] sm:$0xff] %v9523_v0  ;;  %vm9462_vm0 = vcmp.ge.f32.partialorder %v9430_v16, 0.0  ;;  %v9494_v12 = vmul.f32 0.2, %v9430_v16  ;;  %17247 = vmatprep.mubr.f32.mxu0 %v9523_v0 }
 0x921   : > { %vm9461_vm2 = vcmp.ge.f32.partialorder %v9429_v20, 0.0  ;;  %v9493_v2 = vmul.f32 0.2, %v9429_v20  ;;  %v17172_v62 = vpop.f32.mrb[50].mxu1  ;;  %17248 = vmatmul.mubr.f32.gmra.mrb[80].mxu0 %v9524_v17 }
 0x922   : > { %v9526_v6 = vsel %vm9462_vm0, %v9430_v16, %v9494_v12  ;;  %v9432_v47 = vadd.f32 %v17172_v62, %v23070_v56  ;;  %v9305_v32 = vpop.f32.mrb[51].mxu1 }
 0x923   : > { %9558 = vst [vmem:[#allocation2 + $0xe1] sm:$0xff] %v9526_v6  ;;  %v9525_v14 = vsel %vm9461_vm2, %v9429_v20, %v9493_v2  ;;  %v9431_v23 = vadd.f32 %v23070_v56, %v9305_v32 }
 0x924   : > { %9557 = vst [vmem:[#allocation2 + $0xd9] sm:$0xff] %v9525_v14  ;;  %vm9464_vm12 = vcmp.ge.f32.partialorder %v9432_v47, 0.0  ;;  %v9496_v26 = vmul.f32 0.2, %v9432_v47  ;;  %17250 = vmatprep.mubr.f32.mxu0 %v9525_v14 }
 0x925   : > { %vm9463_vm13 = vcmp.ge.f32.partialorder %v9431_v23, 0.0  ;;  %v9495_v18 = vmul.f32 0.2, %v9431_v23  ;;  %v17175_v28 = vpop.f32.mrb[52].mxu1  ;;  %17251 = vmatmul.mubr.f32.gmra.mrb[82].mxu0 %v9526_v6  ;;  %v10155_v6 = vld [vmem:[#allocation8 + $0x110] sm:$0xff] }
 0x926   : > { %v9528_v31 = vsel %vm9464_vm12, %v9432_v47, %v9496_v26  ;;  %v9434_v4 = vadd.f32 %v17175_v28, %v23070_v56  ;;  %v9315_v53 = vpop.f32.mrb[53].mxu1  ;;  %v10156_v47 = vld [vmem:[#allocation8 + $0x118] sm:$0xff]  ;;  %v10158_v28 = vld [vmem:[#allocation8 + $0x128] sm:$0xff] }
 0x927   : > { %9560 = vst [vmem:[#allocation2 + $0xf9] sm:$0xff] %v9528_v31  ;;  %v9527_v42 = vsel %vm9463_vm13, %v9431_v23, %v9495_v18  ;;  %v9433_v5 = vadd.f32 %v23070_v56, %v9315_v53  ;;  %v20162_v23 = vld [vmem:[#allocation2] sm:$0xff]  ;;  %v10157_v18 = vld [vmem:[#allocation8 + $0x120] sm:$0xff] }
 0x928   : > { %9559 = vst [vmem:[#allocation2 + $0xf1] sm:$0xff] %v9527_v42  ;;  %vm9466_vm14 = vcmp.ge.f32.partialorder %v9434_v4, 0.0  ;;  %v9498_v57 = vmul.f32 0.2, %v9434_v4  ;;  %17253 = vmatprep.mubr.f32.mxu0 %v9527_v42  ;;  %v23142_v53 = vld [vmem:[#allocation2 + $0x20] sm:$0xff] }
 0x929   : > { %vm9465_vm15 = vcmp.ge.f32.partialorder %v9433_v5, 0.0  ;;  %v9497_v11 = vmul.f32 0.2, %v9433_v5  ;;  %v17178_v3 = vpop.f32.mrb[54].mxu1  ;;  %17254 = vmatmul.mubr.f32.gmra.mrb[84].mxu0 %v9528_v31  ;;  %v23138_v31 = vld [vmem:[#allocation2 + $0x18] sm:$0xff]  ;;  %v10159_v42 = vld [vmem:[#allocation8 + $0x130] sm:$0xff] }
 0x92a   : > { %v9530_v44 = vsel %vm9466_vm14, %v9434_v4, %v9498_v57  ;;  %v9436_v29 = vadd.f32 %v17178_v3, %v23070_v56  ;;  %v9325_v43 = vpop.f32.mrb[55].mxu1  ;;  %v18689_v4 = vpack.c.bf16 %v10158_v28, %v10157_v18  ;;  %v23145_v57 = vld [vmem:[#allocation2 + $0x30] sm:$0xff]  ;;  %v23148_v3 = vld [vmem:[#allocation2 + $0x38] sm:$0xff] }
 0x92b   : > { %9562 = vst [vmem:[#allocation2 + $0x111] sm:$0xff] %v9530_v44  ;;  %v9529_v33 = vsel %vm9465_vm15, %v9433_v5, %v9497_v11  ;;  %v9435_v21 = vadd.f32 %v23070_v56, %v9325_v43  ;;  %v10160_v5 = vld [vmem:[#allocation8 + $0x138] sm:$0xff]  ;;  %v23213_v28 = vld [vmem:[#allocation2 + $0xe0] sm:$0xff] }
 0x92c   : > { %9561 = vst [vmem:[#allocation2 + $0x109] sm:$0xff] %v9529_v33  ;;  %vm9468_vm1 = vcmp.ge.f32.partialorder %v9436_v29, 0.0  ;;  %v9500_v22 = vmul.f32 0.2, %v9436_v29  ;;  %17256 = vmatprep.mubr.f32.mxu0 %v9529_v33  ;;  %v18693_v11 = vpack.c.bf16 %v10160_v5, %v10159_v42  ;;  %v23154_v33 = vld [vmem:[#allocation2 + $0x50] sm:$0xff] }
 0x92d   : > { %vm9467_vm3 = vcmp.ge.f32.partialorder %v9435_v21, 0.0  ;;  %v9499_v9 = vmul.f32 0.2, %v9435_v21  ;;  %v17181_v40 = vpop.f32.mrb[56].mxu1  ;;  %17257 = vmatmul.mubr.f32.gmra.mrb[86].mxu0 %v9530_v44  ;;  %v10162_v44 = vld [vmem:[#allocation8 + $0x148] sm:$0xff] }
 0x92e   : > { %v9532_v52 = vsel %vm9468_vm1, %v9436_v29, %v9500_v22  ;;  %v9438_v39 = vadd.f32 %v17181_v40, %v23070_v56  ;;  %v9335_v59 = vpop.f32.mrb[57].mxu1  ;;  %v23151_v29 = vld [vmem:[#allocation2 + $0x48] sm:$0xff] }
 0x92f   : > { %9564 = vst [vmem:[#allocation2 + $0x129] sm:$0xff] %v9532_v52  ;;  %v23097_v24 = vsel %vm9467_vm3, %v9435_v21, %v9499_v9  ;;  %v9437_v37 = vadd.f32 %v23070_v56, %v9335_v59  ;;  %v10163_v21 = vld [vmem:[#allocation8 + $0x150] sm:$0xff]  ;;  %v10164_v22 = vld [vmem:[#allocation8 + $0x158] sm:$0xff]  ;;  %v10166_v59 = vld [vmem:[#allocation8 + $0x168] sm:$0xff] }
 0x930   : > { %9563 = vst [vmem:[#allocation2 + $0x121] sm:$0xff] %v23097_v24  ;;  %vm9470_vm4 = vcmp.ge.f32.partialorder %v9438_v39, 0.0  ;;  %v9502_v13 = vmul.f32 0.2, %v9438_v39  ;;  %17259 = vmatprep.mubr.f32.mxu0 %v23097_v24  ;;  %v23157_v9 = vld [vmem:[#allocation2 + $0x60] sm:$0xff]  ;;  %v18701_v40 = vpack.c.bf16 %v10164_v22, %v10163_v21 }
 0x931   : > { %vm9469_vm5 = vcmp.ge.f32.partialorder %v9437_v37, 0.0  ;;  %v9501_v15 = vmul.f32 0.2, %v9437_v37  ;;  %v17184_v19 = vpop.f32.mrb[58].mxu1  ;;  %17260 = vmatmul.mubr.f32.gmra.mrb[88].mxu0 %v9532_v52  ;;  %v23160_v52 = vld [vmem:[#allocation2 + $0x68] sm:$0xff] }
 0x932   : > { %v23102_v30 = vsel %vm9470_vm4, %v9438_v39, %v9502_v13  ;;  %v9440_v61 = vadd.f32 %v17184_v19, %v23070_v56  ;;  %v9345_v10 = vpop.f32.mrb[59].mxu1  ;;  %v10165_v39 = vld [vmem:[#allocation8 + $0x160] sm:$0xff] }
 0x933   : > { %9566 = vst [vmem:[#allocation2 + $0x141] sm:$0xff] %v23102_v30  ;;  %v23106_v60 = vsel %vm9469_vm5, %v9437_v37, %v9501_v15  ;;  %v9439_v55 = vadd.f32 %v23070_v56, %v9345_v10  ;;  %v23163_v37 = vld [vmem:[#allocation2 + $0x78] sm:$0xff]  ;;  %v18705_v19 = vpack.c.bf16 %v10166_v59, %v10165_v39  ;;  %v10167_v10 = vld [vmem:[#allocation8 + $0x170] sm:$0xff]  ;;  %v23233_v21 = vld [vmem:[#allocation2 + $0x110] sm:$0xff] }
 0x934   : > { %9565 = vst [vmem:[#allocation2 + $0x139] sm:$0xff] %v23106_v60  ;;  %vm9472_vm6 = vcmp.ge.f32.partialorder %v9440_v61, 0.0  ;;  %v9504_v1 = vmul.f32 0.2, %v9440_v61  ;;  %17262 = vmatprep.mubr.f32.mxu0 %v23106_v60  ;;  %v23360_v48 = vld [vmem:[#allocation2 + $0x112] sm:$0xff] }
 0x935   : > { %vm9471_vm7 = vcmp.ge.f32.partialorder %v9439_v55, 0.0  ;;  %v9503_v27 = vmul.f32 0.2, %v9439_v55  ;;  %v17187_v45 = vpop.f32.mrb[60].mxu1  ;;  %17263 = vmatmul.mubr.f32.gmra.mrb[90].mxu0 %v23102_v30  ;;  %24542 = vst [vmem:[#allocation38_spill] sm:$0xff] %v23360_v48 }
 0x936   : > { %v23112_v46 = vsel %vm9472_vm6, %v9440_v61, %v9504_v1  ;;  %v9442_v54 = vadd.f32 %v17187_v45, %v23070_v56  ;;  %v9355_v36 = vpop.f32.mrb[61].mxu1  ;;  %v23170_v61 = vld [vmem:[#allocation2 + $0x80] sm:$0xff]  ;;  %v23173_v1 = vld [vmem:[#allocation2 + $0x90] sm:$0xff] }
 0x937   : > { %9568 = vst [vmem:[#allocation2 + $0x159] sm:$0xff] %v23112_v46  ;;  %v23116_v38 = vsel %vm9471_vm7, %v9439_v55, %v9503_v27  ;;  %v9441_v41 = vadd.f32 %v23070_v56, %v9355_v36  ;;  %v10168_v55 = vld [vmem:[#allocation8 + $0x178] sm:$0xff]  ;;  %v23180_v36 = vld [vmem:[#allocation2 + $0x98] sm:$0xff] }
 0x938   : > { %9567 = vst [vmem:[#allocation2 + $0x151] sm:$0xff] %v23116_v38  ;;  %vm9474_vm8 = vcmp.ge.f32.partialorder %v9442_v54, 0.0  ;;  %v9506_v49 = vmul.f32 0.2, %v9442_v54  ;;  %17265 = vmatprep.mubr.f32.mxu0 %v23116_v38  ;;  %v23243_v59 = vld [vmem:[#allocation2 + $0x128] sm:$0xff] }
 0x939   : > { %vm9473_vm9 = vcmp.ge.f32.partialorder %v9441_v41, 0.0  ;;  %v9505_v17 = vmul.f32 0.2, %v9441_v41  ;;  %v17190_v16 = vpop.f32.mrb[62].mxu1  ;;  %17266 = vmatmul.mubr.f32.gmra.mrb[92].mxu0 %v23112_v46  ;;  %v23363_v63 = vld [vmem:[#allocation2 + $0x122] sm:$0xff]  ;;  %v23366_v35 = vld [vmem:[#allocation2 + $0x12a] sm:$0xff] }
 0x93a   : > { %v23122_v25 = vsel %vm9474_vm8, %v9442_v54, %v9506_v49  ;;  %v9444_v0 = vadd.f32 %v17190_v16, %v23070_v56  ;;  %v9365_v20 = vpop.f32.mrb[63].mxu1  ;;  %v18709_v54 = vpack.c.bf16 %v10168_v55, %v10167_v10  ;;  %v10460_v49 = vld [vmem:[#allocation8 + $0x188] sm:$0xff]  ;;  %24543 = vst [vmem:[#allocation39_spill] sm:$0xff] %v23363_v63  ;;  %24544 = vst [vmem:[#allocation40_spill] sm:$0xff] %v23366_v35 }
 0x93b   : > { %9570 = vst [vmem:[#allocation2 + $0x171] sm:$0xff] %v23122_v25  ;;  %v23126_v12 = vsel %vm9473_vm9, %v9441_v41, %v9505_v17  ;;  %v9443_v2 = vadd.f32 %v23070_v56, %v9365_v20  ;;  %v18685_v56 = vpack.c.bf16 %v10156_v47, %v10155_v6  ;;  %v10459_v41 = vld [vmem:[#allocation8 + $0x180] sm:$0xff]  ;;  %v23183_v17 = vld [vmem:[#allocation2 + $0xa8] sm:$0xff]  ;;  %v23248_v10 = vld [vmem:[#allocation2 + $0x138] sm:$0xff] }
 0x93c   : > { %9569 = vst [vmem:[#allocation2 + $0x169] sm:$0xff] %v23126_v12  ;;  %vm9476_vm10 = vcmp.ge.f32.partialorder %v9444_v0, 0.0  ;;  %v9508_v62 = vmul.f32 0.2, %v9444_v0  ;;  %17268 = vmatprep.mubr.f32.mxu0 %v23126_v12  ;;  %v23190_v20 = vpack.c.bf16 %v10460_v49, %v10459_v41 }
 0x93d   : > { %vm9475_vm11 = vcmp.ge.f32.partialorder %v9443_v2, 0.0  ;;  %v9507_v32 = vmul.f32 0.2, %v9443_v2  ;;  %17269 = vmatmul.mubr.f32.gmra.mrb[94].mxu0 %v23122_v25 }
 0x93e   : > { %v23132_v14 = vsel %vm9476_vm10, %v9444_v0, %v9508_v62  ;;  %17303 = vmatprep.mubr.f32.mxu0 %v20162_v23  ;;  %v23195_v62 = vld [vmem:[#allocation2 + $0xc0] sm:$0xff] }
 0x93f   : > { %9572 = vst [vmem:[#allocation2 + $0x189] sm:$0xff] %v23132_v14  ;;  %v23135_v26 = vsel %vm9475_vm11, %v9443_v2, %v9507_v32  ;;  %v23192_v2 = vld [vmem:[#allocation2 + $0xb0] sm:$0xff]  ;;  %v23203_v32 = vld [vmem:[#allocation2 + $0xc8] sm:$0xff] }
 0x940   : > { %9571 = vst [vmem:[#allocation2 + $0x181] sm:$0xff] %v23135_v26  ;;  %v23258_v49 = vld [vmem:[#allocation2 + $0x150] sm:$0xff] }
 0x941   : > { %17304 = vmatmul.mubr.f32.vlgmr.msra.gmra.mrb[64].mxu0 %v20162_v23  ;;  %v23206_v23 = vld [vmem:[#allocation2 + $0xd8] sm:$0xff] }
 0x942   : > { %18684 = vmatpush3.bf16.msra.mxu0 %v23064_v58  ;;  %17306 = vmatprep.mubr.f32.mxu0 %v23138_v31  ;;  %v10161_v58 = vld [vmem:[#allocation8 + $0x140] sm:$0xff] }
 0x943   : > { %18686 = vmatprep.subr.bf16.mxu0 %v18685_v56  ;;  %v18697_v43 = vpack.c.bf16 %v10162_v44, %v10161_v58  ;;  %v23226_v58 = vld [vmem:[#allocation2 + $0x108] sm:$0xff] }
 0x945   : > { %17307 = vmatmul.mubr.f32.gmra.mrb[66].mxu0 %v23142_v53 }
 0x946   : > { %17309 = vmatprep.mubr.f32.mxu0 %v23145_v57  ;;  %18688 = vmatpush3.bf16.msra.mxu0 %v18685_v56 }
 0x947   : > { %18690 = vmatprep.subr.bf16.mxu0 %v18689_v4 }
 0x949   : > { %17310 = vmatmul.mubr.f32.gmra.mrb[68].mxu0 %v23148_v3 }
 0x94a   : > { %17312 = vmatprep.mubr.f32.mxu0 %v23151_v29  ;;  %18692 = vmatpush3.bf16.msra.mxu0 %v18689_v4  ;;  %v23216_v4 = vld [vmem:[#allocation2 + $0xf0] sm:$0xff] }
 0x94b   : > { %18694 = vmatprep.subr.bf16.mxu0 %v18693_v11 }
 0x94d   : > { %17313 = vmatmul.mubr.f32.gmra.mrb[70].mxu0 %v23154_v33 }
 0x94e   : > { %17315 = vmatprep.mubr.f32.mxu0 %v23157_v9  ;;  %18696 = vmatpush3.bf16.msra.mxu0 %v18693_v11  ;;  %v23223_v11 = vld [vmem:[#allocation2 + $0xf8] sm:$0xff] }
 0x94f   : > { %18698 = vmatprep.subr.bf16.mxu0 %v18697_v43 }
 0x951   : > { %17316 = vmatmul.mubr.f32.gmra.mrb[72].mxu0 %v23160_v52  ;;  %v23165_v13 = vpop.f32.mrb[74].mxu1 }
 0x952   : > { %24504 = vst [vmem:[#allocation85_spill] sm:$0xff] %v23165_v13  ;;  %17318 = vmatprep.mubr.f32.mxu0 %v23163_v37  ;;  %v23168_v15 = vpop.f32.mrb[75].mxu1  ;;  %18700 = vmatpush3.bf16.msra.mxu0 %v18697_v43  ;;  %v23298_v13 = vld [vmem:[#allocation2 + $0x3a] sm:$0xff] }
 0x953   : > { %24505 = vst [vmem:[#allocation86_spill] sm:$0xff] %v23168_v15  ;;  %18702 = vmatprep.subr.bf16.mxu0 %v18701_v40  ;;  %v10466_v15 = vld [vmem:[#allocation8 + $0x1b8] sm:$0xff] }
 0x955   : > { %17319 = vmatmul.mubr.f32.gmra.mrb[74].mxu0 %v23170_v61  ;;  %v23175_v27 = vpop.f32.mrb[76].mxu1 }
 0x956   : > { %24506 = vst [vmem:[#allocation87_spill] sm:$0xff] %v23175_v27  ;;  %17321 = vmatprep.mubr.f32.mxu0 %v23173_v1  ;;  %v23178_v45 = vpop.f32.mrb[77].mxu1  ;;  %18704 = vmatpush3.bf16.msra.mxu0 %v18701_v40  ;;  %v23238_v40 = vld [vmem:[#allocation2 + $0x120] sm:$0xff] }
 0x957   : > { %24507 = vst [vmem:[#allocation88_spill] sm:$0xff] %v23178_v45  ;;  %18706 = vmatprep.subr.bf16.mxu0 %v18705_v19  ;;  %v23288_v27 = vld [vmem:[#allocation2 + $0x22] sm:$0xff] }
 0x959   : > { %17322 = vmatmul.mubr.f32.gmra.mrb[76].mxu0 %v23180_v36  ;;  %v23185_v16 = vpop.f32.mrb[78].mxu1 }
 0x95a   : > { %24508 = vst [vmem:[#allocation89_spill] sm:$0xff] %v23185_v16  ;;  %17324 = vmatprep.mubr.f32.mxu0 %v23183_v17  ;;  %v23188_v0 = vpop.f32.mrb[79].mxu1  ;;  %18708 = vmatpush3.bf16.msra.mxu0 %v18705_v19 }
 0x95b   : > { %24509 = vst [vmem:[#allocation90_spill] sm:$0xff] %v23188_v0  ;;  %18710 = vmatprep.subr.bf16.mxu0 %v18709_v54 }
 0x95d   : > { %17325 = vmatmul.mubr.f32.gmra.mrb[78].mxu0 %v23192_v2  ;;  %v23197_v6 = vpop.f32.mrb[80].mxu1 }
 0x95e   : > { %24510 = vst [vmem:[#allocation91_spill] sm:$0xff] %v23197_v6  ;;  %17327 = vmatprep.mubr.f32.mxu0 %v23195_v62  ;;  %v23200_v47 = vpop.f32.mrb[81].mxu1  ;;  %18712 = vmatpush3.bf16.msra.mxu0 %v18709_v54  ;;  %v23253_v54 = vld [vmem:[#allocation2 + $0x140] sm:$0xff]  ;;  %v10464_v6 = vld [vmem:[#allocation8 + $0x1a8] sm:$0xff] }
 0x95f   : > { %24511 = vst [vmem:[#allocation92_spill] sm:$0xff] %v23200_v47  ;;  %18714 = vmatprep.subr.bf16.mxu0 %v23190_v20  ;;  %v10463_v47 = vld [vmem:[#allocation8 + $0x1a0] sm:$0xff] }
 0x960   : > { %v18721_v45 = vpack.c.bf16 %v10464_v6, %v10463_v47  ;;  %v10467_v6 = vld [vmem:[#allocation8 + $0x1c0] sm:$0xff]  ;;  %v10468_v47 = vld [vmem:[#allocation8 + $0x1c8] sm:$0xff] }
 0x961   : > { %17328 = vmatmul.mubr.f32.gmra.mrb[80].mxu0 %v23203_v32  ;;  %v23208_v56 = vpop.f32.mrb[82].mxu1 }
 0x962   : > { %24512 = vst [vmem:[#allocation75_spill] sm:$0xff] %v23208_v56  ;;  %17330 = vmatprep.mubr.f32.mxu0 %v23206_v23  ;;  %v23211_v18 = vpop.f32.mrb[83].mxu1 }
 0x963   : > { %24513 = vst [vmem:[#allocation76_spill] sm:$0xff] %v23211_v18 }
 0x965   : > { %17331 = vmatmul.mubr.f32.gmra.mrb[82].mxu0 %v23213_v28  ;;  %v23218_v42 = vpop.f32.mrb[84].mxu1 }
 0x966   : > { %24514 = vst [vmem:[#allocation93_spill] sm:$0xff] %v23218_v42  ;;  %17333 = vmatprep.mubr.f32.mxu0 %v23216_v4  ;;  %v23221_v5 = vpop.f32.mrb[85].mxu1  ;;  %v10462_v42 = vld [vmem:[#allocation8 + $0x198] sm:$0xff] }
 0x967   : > { %24515 = vst [vmem:[#allocation94_spill] sm:$0xff] %v23221_v5  ;;  %v10461_v5 = vld [vmem:[#allocation8 + $0x190] sm:$0xff] }
 0x968   : > { %v18717_v56 = vpack.c.bf16 %v10462_v42, %v10461_v5  ;;  %v23293_v5 = vld [vmem:[#allocation2 + $0x32] sm:$0xff] }
 0x969   : > { %17334 = vmatmul.mubr.f32.gmra.mrb[84].mxu0 %v23223_v11  ;;  %v23228_v44 = vpop.f32.mrb[86].mxu1 }
 0x96a   : > { %24516 = vst [vmem:[#allocation95_spill] sm:$0xff] %v23228_v44  ;;  %17336 = vmatprep.mubr.f32.mxu0 %v23226_v58  ;;  %v23231_v43 = vpop.f32.mrb[87].mxu1  ;;  %v23273_v44 = vld [vmem:[#allocation2 + $0x170] sm:$0xff] }
 0x96b   : > { %24517 = vst [vmem:[#allocation96_spill] sm:$0xff] %v23231_v43 }
 0x96d   : > { %17337 = vmatmul.mubr.f32.gmra.mrb[86].mxu0 %v23233_v21  ;;  %v23236_v22 = vpop.f32.mrb[88].mxu1 }
 0x96e   : > { %24518 = vst [vmem:[#allocation97_spill] sm:$0xff] %v23236_v22  ;;  %17339 = vmatprep.mubr.f32.mxu0 %v23238_v40  ;;  %v23241_v39 = vpop.f32.mrb[89].mxu1 }
 0x96f   : > { %24519 = vst [vmem:[#allocation98_spill] sm:$0xff] %v23241_v39 }
 0x971   : > { %v23245_v19 = vpop.f32.mrb[90].mxu1  ;;  %17340 = vmatmul.mubr.f32.gmra.mrb[88].mxu0 %v23243_v59 }
 0x972   : > { %24520 = vst [vmem:[#allocation99_spill] sm:$0xff] %v23245_v19  ;;  %v23250_v55 = vpop.f32.mrb[91].mxu1  ;;  %17342 = vmatprep.mubr.f32.mxu0 %v23248_v10  ;;  %v23263_v19 = vld [vmem:[#allocation2 + $0x158] sm:$0xff] }
 0x973   : > { %24521 = vst [vmem:[#allocation100_spill] sm:$0xff] %v23250_v55  ;;  %v23268_v55 = vld [vmem:[#allocation2 + $0x168] sm:$0xff] }
 0x975   : > { %v23255_v41 = vpop.f32.mrb[92].mxu1  ;;  %17343 = vmatmul.mubr.f32.gmra.mrb[90].mxu0 %v23253_v54 }
 0x976   : > { %24522 = vst [vmem:[#allocation101_spill] sm:$0xff] %v23255_v41  ;;  %v23260_v39 = vpop.f32.mrb[93].mxu1  ;;  %17345 = vmatprep.mubr.f32.mxu0 %v23258_v49  ;;  %v10120_v41 = vld [vmem:[#allocation2 + $0x2] sm:$0xff] }
 0x977   : > { %24523 = vst [vmem:[#allocation102_spill] sm:$0xff] %v23260_v39 }
 0x979   : > { %v23265_v22 = vpop.f32.mrb[94].mxu1  ;;  %17346 = vmatmul.mubr.f32.gmra.mrb[92].mxu0 %v23263_v19 }
 0x97a   : > { %24524 = vst [vmem:[#allocation103_spill] sm:$0xff] %v23265_v22  ;;  %v23270_v43 = vpop.f32.mrb[95].mxu1  ;;  %17348 = vmatprep.mubr.f32.mxu0 %v23268_v55  ;;  %v10121_v22 = vld [vmem:[#allocation2 + $0xa] sm:$0xff] }
 0x97b   : > { %24525 = vst [vmem:[#allocation21_spill] sm:$0xff] %v23270_v43  ;;  %v23282_v43 = vld [vmem:[#allocation2 + $0x1a] sm:$0xff] }
 0x97d   : > { %v23275_v39 = vpop.f32.mrb[64].mxu1  ;;  %17349 = vmatmul.mubr.f32.gmra.mrb[94].mxu0 %v23273_v44 }
 0x97e   : > { %24526 = vst [vmem:[#allocation22_spill] sm:$0xff] %v23275_v39  ;;  %v23278_v18 = vpop.f32.mrb[65].mxu1  ;;  %17383 = vmatprep.mubr.f32.mxu0 %v10120_v41  ;;  %v10465_v41 = vld [vmem:[#allocation8 + $0x1b0] sm:$0xff] }
 0x97f   : > { %24527 = vst [vmem:[#allocation23_spill] sm:$0xff] %v23278_v18 }
 0x981   : > { %v23280_v0 = vpop.f32.mrb[66].mxu1  ;;  %17384 = vmatmul.mubr.f32.vlgmr.msra.gmra.mrb[64].mxu0 %v10121_v22 }
 0x982   : > { %24528 = vst [vmem:[#allocation24_spill] sm:$0xff] %v23280_v0  ;;  %v23284_v16 = vpop.f32.mrb[67].mxu1  ;;  %18716 = vmatpush3.bf16.msra.mxu0 %v23190_v20  ;;  %17386 = vmatprep.mubr.f32.mxu0 %v23282_v43  ;;  %v18725_v20 = vpack.c.bf16 %v10466_v15, %v10465_v41  ;;  %v10469_v15 = vld [vmem:[#allocation8 + $0x1d0] sm:$0xff]  ;;  %v10470_v41 = vld [vmem:[#allocation8 + $0x1d8] sm:$0xff] }
 0x983   : > { %24529 = vst [vmem:[#allocation25_spill] sm:$0xff] %v23284_v16  ;;  %18718 = vmatprep.subr.bf16.mxu0 %v18717_v56 }
 0x985   : > { %v23290_v42 = vpop.f32.mrb[68].mxu1  ;;  %17387 = vmatmul.mubr.f32.gmra.mrb[66].mxu0 %v23288_v27 }
 0x986   : > { %24530 = vst [vmem:[#allocation26_spill] sm:$0xff] %v23290_v42  ;;  %v23295_v22 = vpop.f32.mrb[69].mxu1  ;;  %17389 = vmatprep.mubr.f32.mxu0 %v23293_v5  ;;  %18720 = vmatpush3.bf16.msra.mxu0 %v18717_v56  ;;  %v23303_v42 = vld [vmem:[#allocation2 + $0x4a] sm:$0xff]  ;;  %v23308_v56 = vld [vmem:[#allocation2 + $0x52] sm:$0xff] }
 0x987   : > { %24531 = vst [vmem:[#allocation27_spill] sm:$0xff] %v23295_v22  ;;  %18722 = vmatprep.subr.bf16.mxu0 %v18721_v45  ;;  %v18729_v22 = vpack.c.bf16 %v10468_v47, %v10467_v6  ;;  %v10471_v6 = vld [vmem:[#allocation8 + $0x1e0] sm:$0xff]  ;;  %v10472_v47 = vld [vmem:[#allocation8 + $0x1e8] sm:$0xff] }
 0x989   : > { %v23300_v16 = vpop.f32.mrb[70].mxu1  ;;  %17390 = vmatmul.mubr.f32.gmra.mrb[68].mxu0 %v23298_v13 }
 0x98a   : > { %24532 = vst [vmem:[#allocation28_spill] sm:$0xff] %v23300_v16  ;;  %v23305_v0 = vpop.f32.mrb[71].mxu1  ;;  %17392 = vmatprep.mubr.f32.mxu0 %v23303_v42  ;;  %18724 = vmatpush3.bf16.msra.mxu0 %v18721_v45  ;;  %v23313_v16 = vld [vmem:[#allocation2 + $0x62] sm:$0xff]  ;;  %v23318_v45 = vld [vmem:[#allocation2 + $0x6a] sm:$0xff] }
 0x98b   : > { %24533 = vst [vmem:[#allocation29_spill] sm:$0xff] %v23305_v0  ;;  %18726 = vmatprep.subr.bf16.mxu0 %v18725_v20  ;;  %v18733_v0 = vpack.c.bf16 %v10470_v41, %v10469_v15  ;;  %v23330_v41 = vld [vmem:[#allocation2 + $0x9a] sm:$0xff] }
 0x98d   : > { %v23310_v18 = vpop.f32.mrb[72].mxu1  ;;  %17393 = vmatmul.mubr.f32.gmra.mrb[70].mxu0 %v23308_v56 }
 0x98e   : > { %24534 = vst [vmem:[#allocation30_spill] sm:$0xff] %v23310_v18  ;;  %v23315_v39 = vpop.f32.mrb[73].mxu1  ;;  %17395 = vmatprep.mubr.f32.mxu0 %v23313_v16  ;;  %18728 = vmatpush3.bf16.msra.mxu0 %v18725_v20  ;;  %v18737_v18 = vpack.c.bf16 %v10472_v47, %v10471_v6  ;;  %v23327_v20 = vld [vmem:[#allocation2 + $0x92] sm:$0xff]  ;;  %v18745_v6 = vpack.c.bf16 %v10766_v51, %v10765_v50  ;;  %v23354_v50 = vld [vmem:[#allocation2 + $0xfa] sm:$0xff] }
 0x98f   : > { %24535 = vst [vmem:[#allocation31_spill] sm:$0xff] %v23315_v39  ;;  %18730 = vmatprep.subr.bf16.mxu0 %v18729_v22  ;;  %v10473_v39 = vld [vmem:[#allocation8 + $0x1f0] sm:$0xff]  ;;  %v23336_v47 = vld [vmem:[#allocation2 + $0xb2] sm:$0xff]  ;;  %24540 = vst [vmem:[#allocation36_spill] sm:$0xff] %v23354_v50 }
 0x990   : > { %v18741_v15 = vpack.c.bf16 %v10474_v34, %v10473_v39  ;;  %v23342_v34 = vld [vmem:[#allocation2 + $0xca] sm:$0xff]  ;;  %v23345_v39 = vld [vmem:[#allocation2 + $0xda] sm:$0xff]  ;;  %v23351_v51 = vld [vmem:[#allocation2 + $0xf2] sm:$0xff] }
 0x991   : > { %17396 = vmatmul.mubr.f32.gmra.mrb[72].mxu0 %v23318_v45  ;;  %24536 = vst [vmem:[#allocation32_spill] sm:$0xff] %v23342_v34  ;;  %24537 = vst [vmem:[#allocation33_spill] sm:$0xff] %v23345_v39 }
 0x992   : > { %17398 = vmatprep.mubr.f32.mxu0 %v23321_v7  ;;  %18732 = vmatpush3.bf16.msra.mxu0 %v18729_v22  ;;  %v23333_v22 = vld [vmem:[#allocation2 + $0xaa] sm:$0xff]  ;;  %24539 = vst [vmem:[#allocation35_spill] sm:$0xff] %v23351_v51 }
 0x993   : > { %18734 = vmatprep.subr.bf16.mxu0 %v18733_v0 }
 0x995   : > { %17399 = vmatmul.mubr.f32.gmra.mrb[74].mxu0 %v23324_v8 }
 0x996   : > { %17401 = vmatprep.mubr.f32.mxu0 %v23327_v20  ;;  %18736 = vmatpush3.bf16.msra.mxu0 %v18733_v0  ;;  %v23339_v0 = vld [vmem:[#allocation2 + $0xc2] sm:$0xff] }
 0x997   : > { %18738 = vmatprep.subr.bf16.mxu0 %v18737_v18 }
 0x999   : > { %17402 = vmatmul.mubr.f32.gmra.mrb[76].mxu0 %v23330_v41 }
 0x99a   : > { %17404 = vmatprep.mubr.f32.mxu0 %v23333_v22  ;;  %18740 = vmatpush3.bf16.msra.mxu0 %v18737_v18  ;;  %v23348_v18 = vld [vmem:[#allocation2 + $0xe2] sm:$0xff] }
 0x99b   : > { %18742 = vmatprep.subr.bf16.mxu0 %v18741_v15  ;;  %24538 = vst [vmem:[#allocation34_spill] sm:$0xff] %v23348_v18 }
 0x99d   : > { %17405 = vmatmul.mubr.f32.gmra.mrb[78].mxu0 %v23336_v47 }
 0x99e   : > { %17407 = vmatprep.mubr.f32.mxu0 %v23339_v0  ;;  %18744 = vmatpush3.bf16.msra.mxu0 %v18741_v15  ;;  %v23357_v15 = vld [vmem:[#allocation2 + $0x10a] sm:$0xff] }
 0x99f   : > { %18746 = vmatprep.subr.bf16.mxu0 %v18745_v6  ;;  %24541 = vst [vmem:[#allocation37_spill] sm:$0xff] %v23357_v15 }
 0x9a1   : > { %17408 = vmatmul.mubr.f32.gmra.mrb[80].mxu0 %v23342_v34  ;;  %v10770_v34 = vld [vmem:[#allocation8 + $0x228] sm:$0xff] }
 0x9a2   : > { %17410 = vmatprep.mubr.f32.mxu0 %v23345_v39  ;;  %v10769_v39 = vld [vmem:[#allocation8 + $0x220] sm:$0xff] }
 0x9a5   : > { %17411 = vmatmul.mubr.f32.gmra.mrb[82].mxu0 %v23348_v18  ;;  %v10767_v18 = vld [vmem:[#allocation8 + $0x210] sm:$0xff] }
 0x9a6   : > { %17413 = vmatprep.mubr.f32.mxu0 %v23351_v51  ;;  %v23369_v51 = vld [vmem:[#allocation2 + $0x13a] sm:$0xff] }
 0x9a7   : > { %24545 = vst [vmem:[#allocation41_spill] sm:$0xff] %v23369_v51 }
 0x9a9   : > { %17414 = vmatmul.mubr.f32.gmra.mrb[84].mxu0 %v23354_v50  ;;  %v23372_v50 = vld [vmem:[#allocation2 + $0x142] sm:$0xff] }
 0x9aa   : > { %17416 = vmatprep.mubr.f32.mxu0 %v23357_v15  ;;  %24546 = vst [vmem:[#allocation42_spill] sm:$0xff] %v23372_v50  ;;  %v23375_v15 = vld [vmem:[#allocation2 + $0x152] sm:$0xff] }
 0x9ab   : > { %24547 = vst [vmem:[#allocation43_spill] sm:$0xff] %v23375_v15 }
 0x9ad   : > { %17417 = vmatmul.mubr.f32.gmra.mrb[86].mxu0 %v23360_v48  ;;  %v23378_v48 = vld [vmem:[#allocation2 + $0x15a] sm:$0xff] }
 0x9ae   : > { %17419 = vmatprep.mubr.f32.mxu0 %v23363_v63  ;;  %24548 = vst [vmem:[#allocation44_spill] sm:$0xff] %v23378_v48  ;;  %v23381_v63 = vld [vmem:[#allocation2 + $0x16a] sm:$0xff] }
 0x9af   : > { %24549 = vst [vmem:[#allocation45_spill] sm:$0xff] %v23381_v63 }
 0x9b1   : > { %17420 = vmatmul.mubr.f32.gmra.mrb[88].mxu0 %v23366_v35  ;;  %v23384_v35 = vld [vmem:[#allocation2 + $0x172] sm:$0xff] }
 0x9b2   : > { %17422 = vmatprep.mubr.f32.mxu0 %v23369_v51  ;;  %24550 = vst [vmem:[#allocation46_spill] sm:$0xff] %v23384_v35  ;;  %v10768_v51 = vld [vmem:[#allocation8 + $0x218] sm:$0xff] }
 0x9b5   : > { %17423 = vmatmul.mubr.f32.gmra.mrb[90].mxu0 %v23372_v50  ;;  %v18749_v50 = vpack.c.bf16 %v10768_v51, %v10767_v18  ;;  %v10774_v18 = vld [vmem:[#allocation8 + $0x248] sm:$0xff]  ;;  %v11081_v51 = vld [vmem:[#allocation8 + $0x2d0] sm:$0xff] }
 0x9b6   : > { %17425 = vmatprep.mubr.f32.mxu0 %v23375_v15  ;;  %v10771_v15 = vld [vmem:[#allocation8 + $0x230] sm:$0xff] }
 0x9b9   : > { %17426 = vmatmul.mubr.f32.gmra.mrb[92].mxu0 %v23378_v48  ;;  %v18753_v48 = vpack.c.bf16 %v10770_v34, %v10769_v39  ;;  %v23438_v39 = vld [vmem:[#allocation2 + $0x69] sm:$0xff] }
 0x9ba   : > { %17428 = vmatprep.mubr.f32.mxu0 %v23381_v63  ;;  %v10772_v63 = vld [vmem:[#allocation8 + $0x238] sm:$0xff] }
 0x9bd   : > { %17429 = vmatmul.mubr.f32.gmra.mrb[94].mxu0 %v23384_v35  ;;  %v18757_v35 = vpack.c.bf16 %v10772_v63, %v10771_v15  ;;  %v10778_v63 = vld [vmem:[#allocation8 + $0x268] sm:$0xff] }
 0x9be   : > { %17463 = vmatprep.mubr.f32.mxu0 %v23138_v31  ;;  %v10773_v31 = vld [vmem:[#allocation8 + $0x240] sm:$0xff]  ;;  %v23441_v15 = vld [vmem:[#allocation2 + $0x79] sm:$0xff] }
 0x9c1   : > { %17464 = vmatmul.mubr.f32.vlgmr.msra.gmra.mrb[64].mxu0 %v23142_v53  ;;  %v18761_v53 = vpack.c.bf16 %v10774_v18, %v10773_v31  ;;  %v23444_v18 = vld [vmem:[#allocation2 + $0x81] sm:$0xff] }
 0x9c2   : > { %18748 = vmatpush3.bf16.msra.mxu0 %v18745_v6  ;;  %17466 = vmatprep.mubr.f32.mxu0 %v23145_v57  ;;  %v10775_v57 = vld [vmem:[#allocation8 + $0x250] sm:$0xff]  ;;  %v10776_v6 = vld [vmem:[#allocation8 + $0x258] sm:$0xff] }
 0x9c3   : > { %18750 = vmatprep.subr.bf16.mxu0 %v18749_v50 }
 0x9c5   : > { %17467 = vmatmul.mubr.f32.gmra.mrb[66].mxu0 %v23148_v3  ;;  %v18765_v3 = vpack.c.bf16 %v10776_v6, %v10775_v57  ;;  %v11084_v57 = vld [vmem:[#allocation8 + $0x2e8] sm:$0xff] }
 0x9c6   : > { %17469 = vmatprep.mubr.f32.mxu0 %v23151_v29  ;;  %18752 = vmatpush3.bf16.msra.mxu0 %v18749_v50  ;;  %v10777_v29 = vld [vmem:[#allocation8 + $0x260] sm:$0xff]  ;;  %v11082_v50 = vld [vmem:[#allocation8 + $0x2d8] sm:$0xff] }
 0x9c7   : > { %18754 = vmatprep.subr.bf16.mxu0 %v18753_v48  ;;  %v18797_v31 = vpack.c.bf16 %v11082_v50, %v11081_v51  ;;  %v23447_v6 = vld [vmem:[#allocation2 + $0x91] sm:$0xff]  ;;  %v24555_v50 = vld [vmem:[#allocation36_spill] sm:$0xff] }
 0x9c8   : > { %v24552_v51 = vld [vmem:[#allocation33_spill] sm:$0xff] }
 0x9c9   : > { %17470 = vmatmul.mubr.f32.gmra.mrb[68].mxu0 %v23154_v33  ;;  %v10779_v33 = vld [vmem:[#allocation8 + $0x270] sm:$0xff] }
 0x9ca   : > { %17472 = vmatprep.mubr.f32.mxu0 %v23157_v9  ;;  %18756 = vmatpush3.bf16.msra.mxu0 %v18753_v48  ;;  %v18769_v48 = vpack.c.bf16 %v10778_v63, %v10777_v29  ;;  %v10780_v9 = vld [vmem:[#allocation8 + $0x278] sm:$0xff]  ;;  %v23450_v29 = vld [vmem:[#allocation2 + $0x99] sm:$0xff] }
 0x9cb   : > { %18758 = vmatprep.subr.bf16.mxu0 %v18757_v35  ;;  %v11085_v63 = vld [vmem:[#allocation8 + $0x2f0] sm:$0xff] }
 0x9cd   : > { %17473 = vmatmul.mubr.f32.gmra.mrb[70].mxu0 %v23160_v52  ;;  %v11071_v52 = vld [vmem:[#allocation8 + $0x280] sm:$0xff] }
 0x9ce   : > { %17475 = vmatprep.mubr.f32.mxu0 %v23163_v37  ;;  %18760 = vmatpush3.bf16.msra.mxu0 %v18757_v35  ;;  %v18773_v35 = vpack.c.bf16 %v10780_v9, %v10779_v33  ;;  %v11072_v37 = vld [vmem:[#allocation8 + $0x288] sm:$0xff]  ;;  %v23453_v33 = vld [vmem:[#allocation2 + $0xa9] sm:$0xff] }
 0x9cf   : > { %18762 = vmatprep.subr.bf16.mxu0 %v18761_v53 }
 0x9d1   : > { %17476 = vmatmul.mubr.f32.gmra.mrb[72].mxu0 %v23170_v61  ;;  %v18777_v61 = vpack.c.bf16 %v11072_v37, %v11071_v52  ;;  %v11377_v52 = vld [vmem:[#allocation8 + $0x300] sm:$0xff]  ;;  %v11378_v37 = vld [vmem:[#allocation8 + $0x308] sm:$0xff] }
 0x9d2   : > { %17478 = vmatprep.mubr.f32.mxu0 %v23173_v1  ;;  %18764 = vmatpush3.bf16.msra.mxu0 %v18761_v53  ;;  %v23417_v1 = vld [vmem:[#allocation2 + $0x180] sm:$0xff]  ;;  %v11083_v53 = vld [vmem:[#allocation8 + $0x2e0] sm:$0xff] }
 0x9d3   : > { %18766 = vmatprep.subr.bf16.mxu0 %v18765_v3 }
 0x9d5   : > { %17479 = vmatmul.mubr.f32.gmra.mrb[74].mxu0 %v23180_v36  ;;  %v23420_v36 = vld [vmem:[#allocation2 + $0x188] sm:$0xff] }
 0x9d6   : > { %17481 = vmatprep.mubr.f32.mxu0 %v23183_v17  ;;  %18768 = vmatpush3.bf16.msra.mxu0 %v18765_v3  ;;  %v11073_v17 = vld [vmem:[#allocation8 + $0x290] sm:$0xff]  ;;  %v18801_v3 = vpack.c.bf16 %v11084_v57, %v11083_v53  ;;  %v24559_v53 = vld [vmem:[#allocation40_spill] sm:$0xff]  ;;  %v24560_v57 = vld [vmem:[#allocation41_spill] sm:$0xff] }
 0x9d7   : > { %18770 = vmatprep.subr.bf16.mxu0 %v18769_v48 }
 0x9d9   : > { %17482 = vmatmul.mubr.f32.gmra.mrb[76].mxu0 %v23192_v2  ;;  %v11074_v2 = vld [vmem:[#allocation8 + $0x298] sm:$0xff] }
 0x9da   : > { %17484 = vmatprep.mubr.f32.mxu0 %v23195_v62  ;;  %18772 = vmatpush3.bf16.msra.mxu0 %v18769_v48  ;;  %v10732_v62 = vld [vmem:[#allocation2 + $0x19] sm:$0xff]  ;;  %v11086_v48 = vld [vmem:[#allocation8 + $0x2f8] sm:$0xff] }
 0x9db   : > { %18774 = vmatprep.subr.bf16.mxu0 %v18773_v35  ;;  %v18805_v9 = vpack.c.bf16 %v11086_v48, %v11085_v63  ;;  %v24562_v63 = vld [vmem:[#allocation43_spill] sm:$0xff]  ;;  %v24563_v48 = vld [vmem:[#allocation44_spill] sm:$0xff] }
 0x9dd   : > { %17485 = vmatmul.mubr.f32.gmra.mrb[78].mxu0 %v23203_v32  ;;  %v18781_v32 = vpack.c.bf16 %v11074_v2, %v11073_v17  ;;  %v18809_v17 = vpack.c.bf16 %v11378_v37, %v11377_v52  ;;  %v23462_v2 = vld [vmem:[#allocation2 + $0xc9] sm:$0xff]  ;;  %v24565_v52 = vld [vmem:[#allocation46_spill] sm:$0xff] }
 0x9de   : > { %17487 = vmatprep.mubr.f32.mxu0 %v23206_v23  ;;  %18776 = vmatpush3.bf16.msra.mxu0 %v18773_v35  ;;  %v10733_v23 = vld [vmem:[#allocation2 + $0x21] sm:$0xff]  ;;  %v23456_v35 = vld [vmem:[#allocation2 + $0xb1] sm:$0xff] }
 0x9df   : > { %18778 = vmatprep.subr.bf16.mxu0 %v18777_v61  ;;  %v23525_v37 = vld [vmem:[#allocation2 + $0x182] sm:$0xff] }
 0x9e1   : > { %17488 = vmatmul.mubr.f32.gmra.mrb[80].mxu0 %v23213_v28  ;;  %v11075_v28 = vld [vmem:[#allocation8 + $0x2a0] sm:$0xff] }
 0x9e2   : > { %17490 = vmatprep.mubr.f32.mxu0 %v23216_v4  ;;  %v11076_v4 = vld [vmem:[#allocation8 + $0x2a8] sm:$0xff] }
 0x9e5   : > { %17491 = vmatmul.mubr.f32.gmra.mrb[82].mxu0 %v23223_v11  ;;  %v23423_v11 = vld [vmem:[#allocation2 + $0x31] sm:$0xff] }
 0x9e6   : > { %17493 = vmatprep.mubr.f32.mxu0 %v23226_v58  ;;  %v18785_v58 = vpack.c.bf16 %v11076_v4, %v11075_v28  ;;  %v23474_v28 = vld [vmem:[#allocation2 + $0xf9] sm:$0xff]  ;;  %v23477_v4 = vld [vmem:[#allocation2 + $0x109] sm:$0xff] }
 0x9e9   : > { %17494 = vmatmul.mubr.f32.gmra.mrb[84].mxu0 %v23233_v21  ;;  %v11077_v21 = vld [vmem:[#allocation8 + $0x2b0] sm:$0xff] }
 0x9ea   : > { %17496 = vmatprep.mubr.f32.mxu0 %v23238_v40  ;;  %v11078_v40 = vld [vmem:[#allocation8 + $0x2b8] sm:$0xff] }
 0x9ed   : > { %17497 = vmatmul.mubr.f32.gmra.mrb[86].mxu0 %v23243_v59  ;;  %v23429_v59 = vld [vmem:[#allocation2 + $0x49] sm:$0xff] }
 0x9ee   : > { %17499 = vmatprep.mubr.f32.mxu0 %v23248_v10  ;;  %v23432_v10 = vld [vmem:[#allocation2 + $0x51] sm:$0xff] }
 0x9f1   : > { %17500 = vmatmul.mubr.f32.gmra.mrb[88].mxu0 %v23253_v54  ;;  %v11080_v54 = vld [vmem:[#allocation8 + $0x2c8] sm:$0xff] }
 0x9f2   : > { %17502 = vmatprep.mubr.f32.mxu0 %v23258_v49  ;;  %v23435_v49 = vld [vmem:[#allocation2 + $0x61] sm:$0xff] }
 0x9f5   : > { %17503 = vmatmul.mubr.f32.gmra.mrb[90].mxu0 %v23263_v19  ;;  %v18789_v19 = vpack.c.bf16 %v11078_v40, %v11077_v21  ;;  %v23484_v21 = vld [vmem:[#allocation2 + $0x129] sm:$0xff]  ;;  %v11379_v40 = vld [vmem:[#allocation8 + $0x310] sm:$0xff] }
 0x9f6   : > { %17505 = vmatprep.mubr.f32.mxu0 %v23268_v55  ;;  %v11079_v55 = vld [vmem:[#allocation8 + $0x2c0] sm:$0xff] }
 0x9f7   : > { %v18793_v34 = vpack.c.bf16 %v11080_v54, %v11079_v55  ;;  %v11382_v55 = vld [vmem:[#allocation8 + $0x328] sm:$0xff]  ;;  %v11392_v54 = vld [vmem:[#allocation8 + $0x378] sm:$0xff] }
 0x9f9   : > { %17506 = vmatmul.mubr.f32.gmra.mrb[92].mxu0 %v23273_v44  ;;  %v23426_v44 = vld [vmem:[#allocation2 + $0x39] sm:$0xff] }
 0x9fa   : > { %17508 = vmatprep.mubr.f32.mxu0 %v23417_v1 }
 0x9fd   : > { %17509 = vmatmul.mubr.f32.gmra.mrb[94].mxu0 %v23420_v36 }
 0x9fe   : > { %17543 = vmatprep.mubr.f32.mxu0 %v10732_v62  ;;  %v23465_v62 = vld [vmem:[#allocation2 + $0xd9] sm:$0xff] }
 0xa01   : > { %17544 = vmatmul.mubr.f32.vlgmr.msra.gmra.mrb[64].mxu0 %v10733_v23  ;;  %v23471_v23 = vld [vmem:[#allocation2 + $0xf1] sm:$0xff] }
 0xa02   : > { %18780 = vmatpush3.bf16.msra.mxu0 %v18777_v61  ;;  %17546 = vmatprep.mubr.f32.mxu0 %v23423_v11  ;;  %v23459_v61 = vld [vmem:[#allocation2 + $0xc1] sm:$0xff] }
 0xa03   : > { %18782 = vmatprep.subr.bf16.mxu0 %v18781_v32 }
 0xa05   : > { %17547 = vmatmul.mubr.f32.gmra.mrb[66].mxu0 %v23426_v44 }
 0xa06   : > { %17549 = vmatprep.mubr.f32.mxu0 %v23429_v59  ;;  %18784 = vmatpush3.bf16.msra.mxu0 %v18781_v32  ;;  %v23468_v32 = vld [vmem:[#allocation2 + $0xe1] sm:$0xff] }
 0xa07   : > { %18786 = vmatprep.subr.bf16.mxu0 %v18785_v58 }
 0xa09   : > { %17550 = vmatmul.mubr.f32.gmra.mrb[68].mxu0 %v23432_v10 }
 0xa0a   : > { %17552 = vmatprep.mubr.f32.mxu0 %v23435_v49  ;;  %18788 = vmatpush3.bf16.msra.mxu0 %v18785_v58  ;;  %v23480_v58 = vld [vmem:[#allocation2 + $0x111] sm:$0xff] }
 0xa0b   : > { %18790 = vmatprep.subr.bf16.mxu0 %v18789_v19 }
 0xa0d   : > { %17553 = vmatmul.mubr.f32.gmra.mrb[70].mxu0 %v23438_v39 }
 0xa0e   : > { %17555 = vmatprep.mubr.f32.mxu0 %v23441_v15  ;;  %18792 = vmatpush3.bf16.msra.mxu0 %v18789_v19 }
 0xa0f   : > { %18794 = vmatprep.subr.bf16.mxu0 %v18793_v34 }
 0xa11   : > { %17556 = vmatmul.mubr.f32.gmra.mrb[72].mxu0 %v23444_v18 }
 0xa12   : > { %17558 = vmatprep.mubr.f32.mxu0 %v23447_v6  ;;  %18796 = vmatpush3.bf16.msra.mxu0 %v18793_v34  ;;  %v11684_v34 = vld [vmem:[#allocation8 + $0x388] sm:$0xff] }
 0xa13   : > { %18798 = vmatprep.subr.bf16.mxu0 %v18797_v31 }
 0xa15   : > { %17559 = vmatmul.mubr.f32.gmra.mrb[74].mxu0 %v23450_v29 }
 0xa16   : > { %17561 = vmatprep.mubr.f32.mxu0 %v23453_v33  ;;  %18800 = vmatpush3.bf16.msra.mxu0 %v18797_v31  ;;  %v24556_v31 = vld [vmem:[#allocation37_spill] sm:$0xff] }
 0xa17   : > { %18802 = vmatprep.subr.bf16.mxu0 %v18801_v3 }
 0xa19   : > { %17562 = vmatmul.mubr.f32.gmra.mrb[76].mxu0 %v23456_v35 }
 0xa1a   : > { %17564 = vmatprep.mubr.f32.mxu0 %v23459_v61  ;;  %18804 = vmatpush3.bf16.msra.mxu0 %v18801_v3  ;;  %v24561_v3 = vld [vmem:[#allocation42_spill] sm:$0xff] }
 0xa1b   : > { %18806 = vmatprep.subr.bf16.mxu0 %v18805_v9 }
 0xa1d   : > { %17565 = vmatmul.mubr.f32.gmra.mrb[78].mxu0 %v23462_v2 }
 0xa1e   : > { %17567 = vmatprep.mubr.f32.mxu0 %v23465_v62  ;;  %18808 = vmatpush3.bf16.msra.mxu0 %v18805_v9  ;;  %v24564_v9 = vld [vmem:[#allocation45_spill] sm:$0xff] }
 0xa1f   : > { %18810 = vmatprep.subr.bf16.mxu0 %v18809_v17 }
 0xa21   : > { %17568 = vmatmul.mubr.f32.gmra.mrb[80].mxu0 %v23468_v32 }
 0xa22   : > { %17570 = vmatprep.mubr.f32.mxu0 %v23471_v23 }
 0xa25   : > { %17571 = vmatmul.mubr.f32.gmra.mrb[82].mxu0 %v23474_v28 }
 0xa26   : > { %17573 = vmatprep.mubr.f32.mxu0 %v23477_v4 }
 0xa29   : > { %17574 = vmatmul.mubr.f32.gmra.mrb[84].mxu0 %v23480_v58 }
 0xa2a   : > { %17576 = vmatprep.mubr.f32.mxu0 %v23097_v24  ;;  %v11380_v24 = vld [vmem:[#allocation8 + $0x318] sm:$0xff] }
 0xa2b   : > { %v18813_v19 = vpack.c.bf16 %v11380_v24, %v11379_v40  ;;  %v11685_v40 = vld [vmem:[#allocation8 + $0x390] sm:$0xff]  ;;  %v11686_v24 = vld [vmem:[#allocation8 + $0x398] sm:$0xff] }
 0xa2d   : > { %17577 = vmatmul.mubr.f32.gmra.mrb[86].mxu0 %v23484_v21 }
 0xa2e   : > { %17579 = vmatprep.mubr.f32.mxu0 %v23106_v60  ;;  %v11381_v60 = vld [vmem:[#allocation8 + $0x320] sm:$0xff] }
 0xa31   : > { %17580 = vmatmul.mubr.f32.gmra.mrb[88].mxu0 %v23102_v30  ;;  %v18817_v30 = vpack.c.bf16 %v11382_v55, %v11381_v60  ;;  %v18845_v60 = vpack.c.bf16 %v11686_v24, %v11685_v40  ;;  %v11345_v55 = vld [vmem:[#allocation2 + $0x38] sm:$0xff]  ;;  %v11359_v40 = vld [vmem:[#allocation2 + $0xe0] sm:$0xff]  ;;  %v11360_v24 = vld [vmem:[#allocation2 + $0xf0] sm:$0xff] }
 0xa32   : > { %17582 = vmatprep.mubr.f32.mxu0 %v23116_v38  ;;  %v11384_v38 = vld [vmem:[#allocation8 + $0x338] sm:$0xff] }
 0xa35   : > { %17583 = vmatmul.mubr.f32.gmra.mrb[90].mxu0 %v23112_v46  ;;  %v11383_v46 = vld [vmem:[#allocation8 + $0x330] sm:$0xff] }
 0xa36   : > { %17585 = vmatprep.mubr.f32.mxu0 %v23126_v12  ;;  %v11385_v12 = vld [vmem:[#allocation8 + $0x340] sm:$0xff] }
 0xa39   : > { %17586 = vmatmul.mubr.f32.gmra.mrb[92].mxu0 %v23122_v25  ;;  %v18821_v25 = vpack.c.bf16 %v11384_v38, %v11383_v46  ;;  %v11688_v46 = vld [vmem:[#allocation8 + $0x3a8] sm:$0xff]  ;;  %v11346_v38 = vld [vmem:[#allocation2 + $0x48] sm:$0xff] }
 0xa3a   : > { %17588 = vmatprep.mubr.f32.mxu0 %v23135_v26 }
 0xa3d   : > { %17589 = vmatmul.mubr.f32.gmra.mrb[94].mxu0 %v23132_v14  ;;  %v11386_v14 = vld [vmem:[#allocation8 + $0x348] sm:$0xff] }
 0xa3e   : > { %17623 = vmatprep.mubr.f32.mxu0 %v23282_v43  ;;  %v18825_v26 = vpack.c.bf16 %v11386_v14, %v11385_v12  ;;  %v11388_v43 = vld [vmem:[#allocation8 + $0x358] sm:$0xff]  ;;  %v11347_v12 = vld [vmem:[#allocation2 + $0x50] sm:$0xff]  ;;  %v11689_v14 = vld [vmem:[#allocation8 + $0x3b0] sm:$0xff] }
 0xa41   : > { %17624 = vmatmul.mubr.f32.vlgmr.msra.gmra.mrb[64].mxu0 %v23288_v27  ;;  %v11387_v27 = vld [vmem:[#allocation8 + $0x350] sm:$0xff] }
 0xa42   : > { %18812 = vmatpush3.bf16.msra.mxu0 %v18809_v17  ;;  %17626 = vmatprep.mubr.f32.mxu0 %v23293_v5  ;;  %v11390_v5 = vld [vmem:[#allocation8 + $0x368] sm:$0xff]  ;;  %v23528_v17 = vld [vmem:[#allocation2 + $0x18a] sm:$0xff] }
 0xa43   : > { %18814 = vmatprep.subr.bf16.mxu0 %v18813_v19 }
 0xa45   : > { %17627 = vmatmul.mubr.f32.gmra.mrb[66].mxu0 %v23298_v13  ;;  %v18829_v13 = vpack.c.bf16 %v11388_v43, %v11387_v27  ;;  %v11348_v27 = vld [vmem:[#allocation2 + $0x60] sm:$0xff] }
 0xa46   : > { %17629 = vmatprep.mubr.f32.mxu0 %v23303_v42  ;;  %18816 = vmatpush3.bf16.msra.mxu0 %v18813_v19  ;;  %v11389_v42 = vld [vmem:[#allocation8 + $0x360] sm:$0xff] }
 0xa47   : > { %18818 = vmatprep.subr.bf16.mxu0 %v18817_v30  ;;  %v11344_v19 = vld [vmem:[#allocation2 + $0x30] sm:$0xff] }
 0xa49   : > { %17630 = vmatmul.mubr.f32.gmra.mrb[68].mxu0 %v23308_v56  ;;  %v11391_v56 = vld [vmem:[#allocation8 + $0x370] sm:$0xff] }
 0xa4a   : > { %17632 = vmatprep.mubr.f32.mxu0 %v23313_v16  ;;  %18820 = vmatpush3.bf16.msra.mxu0 %v18817_v30  ;;  %v18833_v16 = vpack.c.bf16 %v11390_v5, %v11389_v42  ;;  %v11687_v30 = vld [vmem:[#allocation8 + $0x3a0] sm:$0xff]  ;;  %v11692_v5 = vld [vmem:[#allocation8 + $0x3c8] sm:$0xff] }
 0xa4b   : > { %18822 = vmatprep.subr.bf16.mxu0 %v18821_v25  ;;  %v11691_v42 = vld [vmem:[#allocation8 + $0x3c0] sm:$0xff] }
 0xa4d   : > { %17633 = vmatmul.mubr.f32.gmra.mrb[70].mxu0 %v23318_v45  ;;  %v11683_v45 = vld [vmem:[#allocation8 + $0x380] sm:$0xff] }
 0xa4e   : > { %17635 = vmatprep.mubr.f32.mxu0 %v23321_v7  ;;  %18824 = vmatpush3.bf16.msra.mxu0 %v18821_v25  ;;  %v18837_v7 = vpack.c.bf16 %v11392_v54, %v11391_v56  ;;  %v18849_v25 = vpack.c.bf16 %v11688_v46, %v11687_v30  ;;  %v18857_v56 = vpack.c.bf16 %v11692_v5, %v11691_v42  ;;  %v11351_v54 = vld [vmem:[#allocation2 + $0x80] sm:$0xff]  ;;  %v11365_v46 = vld [vmem:[#allocation2 + $0x128] sm:$0xff] }
 0xa4f   : > { %18826 = vmatprep.subr.bf16.mxu0 %v18825_v26  ;;  %v11364_v30 = vld [vmem:[#allocation2 + $0x120] sm:$0xff]  ;;  %v11992_v42 = vld [vmem:[#allocation8 + $0x418] sm:$0xff] }
 0xa51   : > { %17636 = vmatmul.mubr.f32.gmra.mrb[72].mxu0 %v23324_v8  ;;  %v18841_v8 = vpack.c.bf16 %v11684_v34, %v11683_v45  ;;  %v11694_v45 = vld [vmem:[#allocation8 + $0x3d8] sm:$0xff]  ;;  %v11352_v34 = vld [vmem:[#allocation2 + $0x90] sm:$0xff] }
 0xa52   : > { %17638 = vmatprep.mubr.f32.mxu0 %v23327_v20  ;;  %18828 = vmatpush3.bf16.msra.mxu0 %v18825_v26  ;;  %v24551_v20 = vld [vmem:[#allocation32_spill] sm:$0xff] }
 0xa53   : > { %18830 = vmatprep.subr.bf16.mxu0 %v18829_v13  ;;  %v11690_v26 = vld [vmem:[#allocation8 + $0x3b8] sm:$0xff] }
 0xa54   : > { %v18853_v43 = vpack.c.bf16 %v11690_v26, %v11689_v14  ;;  %v11369_v14 = vld [vmem:[#allocation2 + $0x158] sm:$0xff]  ;;  %v11370_v26 = vld [vmem:[#allocation2 + $0x168] sm:$0xff] }
 0xa55   : > { %17639 = vmatmul.mubr.f32.gmra.mrb[74].mxu0 %v23330_v41  ;;  %v24553_v41 = vld [vmem:[#allocation34_spill] sm:$0xff] }
 0xa56   : > { %17641 = vmatprep.mubr.f32.mxu0 %v23333_v22  ;;  %18832 = vmatpush3.bf16.msra.mxu0 %v18829_v13  ;;  %v24554_v22 = vld [vmem:[#allocation35_spill] sm:$0xff]  ;;  %v11349_v13 = vld [vmem:[#allocation2 + $0x68] sm:$0xff] }
 0xa57   : > { %18834 = vmatprep.subr.bf16.mxu0 %v18833_v16 }
 0xa59   : > { %17642 = vmatmul.mubr.f32.gmra.mrb[76].mxu0 %v23336_v47  ;;  %v24557_v47 = vld [vmem:[#allocation38_spill] sm:$0xff] }
 0xa5a   : > { %17644 = vmatprep.mubr.f32.mxu0 %v23339_v0  ;;  %18836 = vmatpush3.bf16.msra.mxu0 %v18833_v16  ;;  %v24558_v0 = vld [vmem:[#allocation39_spill] sm:$0xff]  ;;  %v11350_v16 = vld [vmem:[#allocation2 + $0x78] sm:$0xff] }
 0xa5b   : > { %18838 = vmatprep.subr.bf16.mxu0 %v18837_v7 }
 0xa5d   : > { %17645 = vmatmul.mubr.f32.gmra.mrb[78].mxu0 %v24551_v20  ;;  %v11353_v20 = vld [vmem:[#allocation2 + $0x98] sm:$0xff] }
 0xa5e   : > { %17647 = vmatprep.mubr.f32.mxu0 %v24552_v51  ;;  %18840 = vmatpush3.bf16.msra.mxu0 %v18837_v7  ;;  %v11693_v7 = vld [vmem:[#allocation8 + $0x3d0] sm:$0xff]  ;;  %v11695_v51 = vld [vmem:[#allocation8 + $0x3e0] sm:$0xff] }
 0xa5f   : > { %18842 = vmatprep.subr.bf16.mxu0 %v18841_v8 }
 0xa61   : > { %17648 = vmatmul.mubr.f32.gmra.mrb[80].mxu0 %v24553_v41  ;;  %v11696_v41 = vld [vmem:[#allocation8 + $0x3e8] sm:$0xff] }
 0xa62   : > { %17650 = vmatprep.mubr.f32.mxu0 %v24554_v22  ;;  %v11354_v22 = vld [vmem:[#allocation2 + $0xa8] sm:$0xff] }
 0xa65   : > { %17651 = vmatmul.mubr.f32.gmra.mrb[82].mxu0 %v24555_v50  ;;  %v18865_v50 = vpack.c.bf16 %v11696_v41, %v11695_v51  ;;  %v11957_v51 = vld [vmem:[#allocation2 + $0x3a] sm:$0xff]  ;;  %v11958_v41 = vld [vmem:[#allocation2 + $0x4a] sm:$0xff] }
 0xa66   : > { %17653 = vmatprep.mubr.f32.mxu0 %v24556_v31  ;;  %v11355_v31 = vld [vmem:[#allocation2 + $0xb0] sm:$0xff] }
 0xa69   : > { %17654 = vmatmul.mubr.f32.gmra.mrb[84].mxu0 %v24557_v47  ;;  %v11697_v47 = vld [vmem:[#allocation8 + $0x3f0] sm:$0xff] }
 0xa6a   : > { %17656 = vmatprep.mubr.f32.mxu0 %v24558_v0  ;;  %v11698_v0 = vld [vmem:[#allocation8 + $0x3f8] sm:$0xff] }
 0xa6d   : > { %17657 = vmatmul.mubr.f32.gmra.mrb[86].mxu0 %v24559_v53  ;;  %v11356_v53 = vld [vmem:[#allocation2 + $0xc0] sm:$0xff] }
 0xa6e   : > { %17659 = vmatprep.mubr.f32.mxu0 %v24560_v57  ;;  %v18869_v57 = vpack.c.bf16 %v11698_v0, %v11697_v47  ;;  %v24568_v47 = vld [vmem:[#allocation79_spill] sm:$0xff]  ;;  %v11961_v0 = vld [vmem:[#allocation2 + $0x6a] sm:$0xff] }
 0xa71   : > { %17660 = vmatmul.mubr.f32.gmra.mrb[88].mxu0 %v24561_v3  ;;  %v11357_v3 = vld [vmem:[#allocation2 + $0xc8] sm:$0xff] }
 0xa72   : > { %17662 = vmatprep.mubr.f32.mxu0 %v24562_v63  ;;  %v11989_v63 = vld [vmem:[#allocation8 + $0x400] sm:$0xff] }
 0xa75   : > { %17663 = vmatmul.mubr.f32.gmra.mrb[90].mxu0 %v24563_v48  ;;  %v11990_v48 = vld [vmem:[#allocation8 + $0x408] sm:$0xff] }
 0xa76   : > { %17665 = vmatprep.mubr.f32.mxu0 %v24564_v9  ;;  %v11358_v9 = vld [vmem:[#allocation2 + $0xd8] sm:$0xff] }
 0xa79   : > { %17666 = vmatmul.mubr.f32.gmra.mrb[92].mxu0 %v24565_v52  ;;  %v18873_v52 = vpack.c.bf16 %v11990_v48, %v11989_v63  ;;  %v11964_v63 = vld [vmem:[#allocation2 + $0x92] sm:$0xff] }
 0xa7a   : > { %17668 = vmatprep.mubr.f32.mxu0 %v23525_v37  ;;  %v24570_v48 = vld [vmem:[#allocation81_spill] sm:$0xff] }
 0xa7d   : > { %17669 = vmatmul.mubr.f32.gmra.mrb[94].mxu0 %v23528_v17 }
 0xa7e   : > { %17703 = vmatprep.mubr.f32.mxu0 %v11344_v19  ;;  %v11361_v19 = vld [vmem:[#allocation2 + $0xf8] sm:$0xff] }
 0xa81   : > { %17704 = vmatmul.mubr.f32.vlgmr.msra.gmra.mrb[64].mxu0 %v11345_v55  ;;  %v11363_v55 = vld [vmem:[#allocation2 + $0x110] sm:$0xff] }
 0xa82   : > { %18844 = vmatpush3.bf16.msra.mxu0 %v18841_v8  ;;  %17706 = vmatprep.mubr.f32.mxu0 %v11346_v38  ;;  %v18861_v8 = vpack.c.bf16 %v11694_v45, %v11693_v7  ;;  %v11366_v38 = vld [vmem:[#allocation2 + $0x138] sm:$0xff]  ;;  %v11996_v7 = vld [vmem:[#allocation8 + $0x438] sm:$0xff] }
 0xa83   : > { %18846 = vmatprep.subr.bf16.mxu0 %v18845_v60  ;;  %v11998_v45 = vld [vmem:[#allocation8 + $0x448] sm:$0xff] }
 0xa85   : > { %17707 = vmatmul.mubr.f32.gmra.mrb[66].mxu0 %v11347_v12  ;;  %v11368_v12 = vld [vmem:[#allocation2 + $0x150] sm:$0xff] }
 0xa86   : > { %17709 = vmatprep.mubr.f32.mxu0 %v11348_v27  ;;  %18848 = vmatpush3.bf16.msra.mxu0 %v18845_v60  ;;  %v11362_v60 = vld [vmem:[#allocation2 + $0x108] sm:$0xff]  ;;  %v11371_v27 = vld [vmem:[#allocation2 + $0x170] sm:$0xff] }
 0xa87   : > { %18850 = vmatprep.subr.bf16.mxu0 %v18849_v25 }
 0xa89   : > { %17710 = vmatmul.mubr.f32.gmra.mrb[68].mxu0 %v11349_v13  ;;  %v11991_v13 = vld [vmem:[#allocation8 + $0x410] sm:$0xff] }
 0xa8a   : > { %17712 = vmatprep.mubr.f32.mxu0 %v11350_v16  ;;  %18852 = vmatpush3.bf16.msra.mxu0 %v18849_v25  ;;  %v11367_v25 = vld [vmem:[#allocation2 + $0x140] sm:$0xff]  ;;  %v18877_v5 = vpack.c.bf16 %v11992_v42, %v11991_v13  ;;  %v11993_v16 = vld [vmem:[#allocation8 + $0x420] sm:$0xff] }
 0xa8b   : > { %18854 = vmatprep.subr.bf16.mxu0 %v18853_v43  ;;  %v11978_v13 = vld [vmem:[#allocation2 + $0x13a] sm:$0xff]  ;;  %v11979_v42 = vld [vmem:[#allocation2 + $0x142] sm:$0xff] }
 0xa8d   : > { %17713 = vmatmul.mubr.f32.gmra.mrb[70].mxu0 %v11351_v54 }
 0xa8e   : > { %17715 = vmatprep.mubr.f32.mxu0 %v11352_v34  ;;  %18856 = vmatpush3.bf16.msra.mxu0 %v18853_v43  ;;  %v20163_v43 = vld [vmem:[#allocation2] sm:$0xff]  ;;  %v12000_v34 = vld [vmem:[#allocation8 + $0x458] sm:$0xff] }
 0xa8f   : > { %18858 = vmatprep.subr.bf16.mxu0 %v18857_v56 }
 0xa91   : > { %17716 = vmatmul.mubr.f32.gmra.mrb[72].mxu0 %v11353_v20  ;;  %v12004_v20 = vld [vmem:[#allocation8 + $0x478] sm:$0xff] }
 0xa92   : > { %17718 = vmatprep.mubr.f32.mxu0 %v11354_v22  ;;  %18860 = vmatpush3.bf16.msra.mxu0 %v18857_v56  ;;  %v11994_v56 = vld [vmem:[#allocation8 + $0x428] sm:$0xff] }
 0xa93   : > { %18862 = vmatprep.subr.bf16.mxu0 %v18861_v8  ;;  %v18881_v54 = vpack.c.bf16 %v11994_v56, %v11993_v16  ;;  %v24567_v22 = vld [vmem:[#allocation78_spill] sm:$0xff]  ;;  %v11982_v56 = vld [vmem:[#allocation2 + $0x16a] sm:$0xff] }
 0xa94   : > { %v11981_v16 = vld [vmem:[#allocation2 + $0x15a] sm:$0xff] }
 0xa95   : > { %17719 = vmatmul.mubr.f32.gmra.mrb[74].mxu0 %v11355_v31  ;;  %v11960_v31 = vld [vmem:[#allocation2 + $0x62] sm:$0xff] }
 0xa96   : > { %17721 = vmatprep.mubr.f32.mxu0 %v11356_v53  ;;  %18864 = vmatpush3.bf16.msra.mxu0 %v18861_v8  ;;  %v12002_v8 = vld [vmem:[#allocation8 + $0x468] sm:$0xff] }
 0xa97   : > { %18866 = vmatprep.subr.bf16.mxu0 %v18865_v50  ;;  %v11962_v53 = vld [vmem:[#allocation2 + $0x7a] sm:$0xff] }
 0xa99   : > { %17722 = vmatmul.mubr.f32.gmra.mrb[76].mxu0 %v11357_v3  ;;  %v11963_v3 = vld [vmem:[#allocation2 + $0x82] sm:$0xff] }
 0xa9a   : > { %17724 = vmatprep.mubr.f32.mxu0 %v11358_v9  ;;  %18868 = vmatpush3.bf16.msra.mxu0 %v18865_v50  ;;  %v11959_v50 = vld [vmem:[#allocation2 + $0x52] sm:$0xff]  ;;  %v11965_v9 = vld [vmem:[#allocation2 + $0x9a] sm:$0xff] }
 0xa9b   : > { %18870 = vmatprep.subr.bf16.mxu0 %v18869_v57 }
 0xa9d   : > { %17725 = vmatmul.mubr.f32.gmra.mrb[78].mxu0 %v11359_v40  ;;  %v24571_v40 = vld [vmem:[#allocation82_spill] sm:$0xff] }
 0xa9e   : > { %17727 = vmatprep.mubr.f32.mxu0 %v11360_v24  ;;  %18872 = vmatpush3.bf16.msra.mxu0 %v18869_v57  ;;  %v24569_v57 = vld [vmem:[#allocation80_spill] sm:$0xff]  ;;  %v11967_v24 = vld [vmem:[#allocation2 + $0xb2] sm:$0xff] }
 0xa9f   : > { %18874 = vmatprep.subr.bf16.mxu0 %v18873_v52 }
 0xaa1   : > { %17728 = vmatmul.mubr.f32.gmra.mrb[80].mxu0 %v11361_v19  ;;  %v11968_v19 = vld [vmem:[#allocation2 + $0xc2] sm:$0xff] }
 0xaa2   : > { %17730 = vmatprep.mubr.f32.mxu0 %v11362_v60  ;;  %v24572_v60 = vld [vmem:[#allocation83_spill] sm:$0xff] }
 0xaa5   : > { %17731 = vmatmul.mubr.f32.gmra.mrb[82].mxu0 %v11363_v55  ;;  %v11969_v55 = vld [vmem:[#allocation2 + $0xca] sm:$0xff] }
 0xaa6   : > { %17733 = vmatprep.mubr.f32.mxu0 %v11364_v30  ;;  %v11970_v30 = vld [vmem:[#allocation2 + $0xda] sm:$0xff] }
 0xaa9   : > { %17734 = vmatmul.mubr.f32.gmra.mrb[84].mxu0 %v11365_v46  ;;  %v24573_v46 = vld [vmem:[#allocation84_spill] sm:$0xff] }
 0xaaa   : > { %17736 = vmatprep.mubr.f32.mxu0 %v11366_v38  ;;  %v11971_v38 = vld [vmem:[#allocation2 + $0xe2] sm:$0xff] }
 0xaad   : > { %17737 = vmatmul.mubr.f32.gmra.mrb[86].mxu0 %v11367_v25  ;;  %v11972_v25 = vld [vmem:[#allocation2 + $0xf2] sm:$0xff] }
 0xaae   : > { %17739 = vmatprep.mubr.f32.mxu0 %v11368_v12  ;;  %v11973_v12 = vld [vmem:[#allocation2 + $0xfa] sm:$0xff] }
 0xab1   : > { %17740 = vmatmul.mubr.f32.gmra.mrb[88].mxu0 %v11369_v14  ;;  %v11974_v14 = vld [vmem:[#allocation2 + $0x10a] sm:$0xff] }
 0xab2   : > { %17742 = vmatprep.mubr.f32.mxu0 %v11370_v26  ;;  %v11975_v26 = vld [vmem:[#allocation2 + $0x112] sm:$0xff] }
 0xab5   : > { %17743 = vmatmul.mubr.f32.gmra.mrb[90].mxu0 %v11371_v27  ;;  %v11976_v27 = vld [vmem:[#allocation2 + $0x122] sm:$0xff] }
 0xab6   : > { %17745 = vmatprep.mubr.f32.mxu0 %v23417_v1  ;;  %v11995_v1 = vld [vmem:[#allocation8 + $0x430] sm:$0xff] }
 0xab9   : > { %17746 = vmatmul.mubr.f32.gmra.mrb[92].mxu0 %v23420_v36  ;;  %v18885_v36 = vpack.c.bf16 %v11996_v7, %v11995_v1  ;;  %v11986_v1 = vld [vmem:[#allocation2 + $0x19a] sm:$0xff]  ;;  %v11987_v7 = vld [vmem:[#allocation2 + $0x1a2] sm:$0xff] }
 0xaba   : > { %17748 = vmatprep.mubr.f32.mxu0 %v20163_v43 }
 0xabd   : > { %17749 = vmatmul.mubr.f32.gmra.mrb[94].mxu0 %v20163_v43  ;;  %v11977_v43 = vld [vmem:[#allocation2 + $0x12a] sm:$0xff] }
 0xabe   : > { %17783 = vmatprep.mubr.f32.mxu0 %v23423_v11  ;;  %v11997_v11 = vld [vmem:[#allocation8 + $0x440] sm:$0xff] }
 0xac1   : > { %17784 = vmatmul.mubr.f32.vlgmr.msra.gmra.mrb[64].mxu0 %v23426_v44  ;;  %v18889_v44 = vpack.c.bf16 %v11998_v45, %v11997_v11  ;;  %v24575_v11 = vld [vmem:[#allocation63_spill] sm:$0xff]  ;;  %v24576_v45 = vld [vmem:[#allocation54_spill] sm:$0xff] }
 0xac2   : > { %18876 = vmatpush3.bf16.msra.mxu0 %v18873_v52  ;;  %17786 = vmatprep.mubr.f32.mxu0 %v23429_v59  ;;  %v11999_v59 = vld [vmem:[#allocation8 + $0x450] sm:$0xff]  ;;  %v11966_v52 = vld [vmem:[#allocation2 + $0xaa] sm:$0xff] }
 0xac3   : > { %18878 = vmatprep.subr.bf16.mxu0 %v18877_v5 }
 0xac5   : > { %17787 = vmatmul.mubr.f32.gmra.mrb[66].mxu0 %v23432_v10  ;;  %v18893_v10 = vpack.c.bf16 %v12000_v34, %v11999_v59  ;;  %v24578_v59 = vld [vmem:[#allocation56_spill] sm:$0xff]  ;;  %v24579_v34 = vld [vmem:[#allocation55_spill] sm:$0xff] }
 0xac6   : > { %17789 = vmatprep.mubr.f32.mxu0 %v23435_v49  ;;  %18880 = vmatpush3.bf16.msra.mxu0 %v18877_v5  ;;  %v12001_v49 = vld [vmem:[#allocation8 + $0x460] sm:$0xff] }
 0xac7   : > { %18882 = vmatprep.subr.bf16.mxu0 %v18881_v54  ;;  %v11980_v5 = vld [vmem:[#allocation2 + $0x152] sm:$0xff] }
 0xac9   : > { %17790 = vmatmul.mubr.f32.gmra.mrb[68].mxu0 %v23438_v39  ;;  %v18897_v39 = vpack.c.bf16 %v12002_v8, %v12001_v49  ;;  %v24583_v49 = vld [vmem:[#allocation60_spill] sm:$0xff] }
 0xaca   : > { %17792 = vmatprep.mubr.f32.mxu0 %v23441_v15  ;;  %18884 = vmatpush3.bf16.msra.mxu0 %v18881_v54  ;;  %v12003_v15 = vld [vmem:[#allocation8 + $0x470] sm:$0xff]  ;;  %v11983_v54 = vld [vmem:[#allocation2 + $0x172] sm:$0xff]  ;;  %v24584_v8 = vld [vmem:[#allocation64_spill] sm:$0xff] }
 0xacb   : > { %18886 = vmatprep.subr.bf16.mxu0 %v18885_v36 }
 0xacd   : > { %17793 = vmatmul.mubr.f32.gmra.mrb[70].mxu0 %v23444_v18  ;;  %v18901_v18 = vpack.c.bf16 %v12004_v20, %v12003_v15  ;;  %v24586_v15 = vld [vmem:[#allocation68_spill] sm:$0xff]  ;;  %v24587_v20 = vld [vmem:[#allocation67_spill] sm:$0xff] }
 0xace   : > { %17795 = vmatprep.mubr.f32.mxu0 %v23447_v6  ;;  %18888 = vmatpush3.bf16.msra.mxu0 %v18885_v36  ;;  %v24566_v6 = vld [vmem:[#allocation77_spill] sm:$0xff]  ;;  %v24574_v36 = vld [vmem:[#allocation52_spill] sm:$0xff] }
 0xacf   : > { %18890 = vmatprep.subr.bf16.mxu0 %v18889_v44 }
 0xad1   : > { %17796 = vmatmul.mubr.f32.gmra.mrb[72].mxu0 %v23450_v29  ;;  %v11670_v29 = vld [vmem:[#allocation2 + $0x121] sm:$0xff] }
 0xad2   : > { %17798 = vmatprep.mubr.f32.mxu0 %v23453_v33  ;;  %18892 = vmatpush3.bf16.msra.mxu0 %v18889_v44  ;;  %v11672_v33 = vld [vmem:[#allocation2 + $0x139] sm:$0xff]  ;;  %v24577_v44 = vld [vmem:[#allocation53_spill] sm:$0xff] }
 0xad3   : > { %18894 = vmatprep.subr.bf16.mxu0 %v18893_v10 }
 0xad5   : > { %17799 = vmatmul.mubr.f32.gmra.mrb[74].mxu0 %v23456_v35  ;;  %v11673_v35 = vld [vmem:[#allocation2 + $0x141] sm:$0xff] }
 0xad6   : > { %17801 = vmatprep.mubr.f32.mxu0 %v23459_v61  ;;  %18896 = vmatpush3.bf16.msra.mxu0 %v18893_v10  ;;  %v11674_v61 = vld [vmem:[#allocation2 + $0x151] sm:$0xff]  ;;  %v24580_v10 = vld [vmem:[#allocation59_spill] sm:$0xff] }
 0xad7   : > { %18898 = vmatprep.subr.bf16.mxu0 %v18897_v39 }
 0xad9   : > { %17802 = vmatmul.mubr.f32.gmra.mrb[76].mxu0 %v23462_v2  ;;  %v11675_v2 = vld [vmem:[#allocation2 + $0x159] sm:$0xff] }
 0xada   : > { %17804 = vmatprep.mubr.f32.mxu0 %v23465_v62  ;;  %18900 = vmatpush3.bf16.msra.mxu0 %v18897_v39  ;;  %v11676_v62 = vld [vmem:[#allocation2 + $0x169] sm:$0xff]  ;;  %v24585_v39 = vld [vmem:[#allocation62_spill] sm:$0xff] }
 0xadb   : > { %18902 = vmatprep.subr.bf16.mxu0 %v18901_v18 }
 0xadd   : > { %17805 = vmatmul.mubr.f32.gmra.mrb[78].mxu0 %v23468_v32  ;;  %v11677_v32 = vld [vmem:[#allocation2 + $0x171] sm:$0xff] }
 0xade   : > { %17807 = vmatprep.mubr.f32.mxu0 %v23471_v23  ;;  %18904 = vmatpush3.bf16.msra.mxu0 %v18901_v18  ;;  %v11678_v23 = vld [vmem:[#allocation2 + $0x181] sm:$0xff]  ;;  %v24588_v18 = vld [vmem:[#allocation70_spill] sm:$0xff] }
 0xadf   : > { %18906 = vmatprep.subr.bf16.mxu0 %v24566_v6 }
 0xae1   : > { %17808 = vmatmul.mubr.f32.gmra.mrb[80].mxu0 %v23474_v28  ;;  %v11680_v28 = vld [vmem:[#allocation2 + $0x199] sm:$0xff] }
 0xae2   : > { %17810 = vmatprep.mubr.f32.mxu0 %v23477_v4  ;;  %v11679_v4 = vld [vmem:[#allocation2 + $0x189] sm:$0xff] }
 0xae5   : > { %17811 = vmatmul.mubr.f32.gmra.mrb[82].mxu0 %v23480_v58  ;;  %v11681_v58 = vld [vmem:[#allocation2 + $0x1a1] sm:$0xff] }
 0xae6   : > { %17813 = vmatprep.mubr.f32.mxu0 %v11670_v29  ;;  %v24590_v29 = vld [vmem:[#allocation72_spill] sm:$0xff] }
 0xae9   : > { %17814 = vmatmul.mubr.f32.gmra.mrb[84].mxu0 %v23484_v21  ;;  %v11956_v21 = vld [vmem:[#allocation2 + $0x32] sm:$0xff] }
 0xaea   : > { %17816 = vmatprep.mubr.f32.mxu0 %v11672_v33  ;;  %v24591_v33 = vld [vmem:[#allocation71_spill] sm:$0xff] }
 0xaed   : > { %17817 = vmatmul.mubr.f32.gmra.mrb[86].mxu0 %v11673_v35  ;;  %v24592_v35 = vld [vmem:[#allocation74_spill] sm:$0xff] }
 0xaee   : > { %17819 = vmatprep.mubr.f32.mxu0 %v11674_v61  ;;  %v24593_v61 = vld [vmem:[#allocation73_spill] sm:$0xff] }
 0xaf1   : > { %17820 = vmatmul.mubr.f32.gmra.mrb[88].mxu0 %v11675_v2  ;;  %v24594_v2 = vld [vmem:[#allocation58_spill] sm:$0xff] }
 0xaf2   : > { %17822 = vmatprep.mubr.f32.mxu0 %v11676_v62  ;;  %v24595_v62 = vld [vmem:[#allocation51_spill] sm:$0xff] }
 0xaf5   : > { %17823 = vmatmul.mubr.f32.gmra.mrb[90].mxu0 %v11677_v32 }
 0xaf6   : > { %17825 = vmatprep.mubr.f32.mxu0 %v11678_v23 }
 0xaf9   : > { %17826 = vmatmul.mubr.f32.gmra.mrb[92].mxu0 %v11679_v4 }
 0xafa   : > { %17828 = vmatprep.mubr.f32.mxu0 %v11680_v28 }
 0xafd   : > { %17829 = vmatmul.mubr.f32.gmra.mrb[94].mxu0 %v11681_v58 }
 0xafe   : > { %17863 = vmatprep.mubr.f32.mxu0 %v11956_v21 }
 0xb01   : > { %17864 = vmatmul.mubr.f32.vlgmr.msra.gmra.mrb[64].mxu0 %v11957_v51 }
 0xb02   : > { %18908 = vmatpush3.bf16.msra.mxu0 %v24566_v6  ;;  %17866 = vmatprep.mubr.f32.mxu0 %v11958_v41  ;;  %v24589_v6 = vld [vmem:[#allocation69_spill] sm:$0xff] }
 0xb03   : > { %18910 = vmatprep.subr.bf16.mxu0 %v24567_v22 }
 0xb05   : > { %17867 = vmatmul.mubr.f32.gmra.mrb[66].mxu0 %v11959_v50 }
 0xb06   : > { %17869 = vmatprep.mubr.f32.mxu0 %v11960_v31  ;;  %18912 = vmatpush3.bf16.msra.mxu0 %v24567_v22 }
 0xb07   : > { %18914 = vmatprep.subr.bf16.mxu0 %v24568_v47 }
 0xb09   : > { %17870 = vmatmul.mubr.f32.gmra.mrb[68].mxu0 %v11961_v0 }
 0xb0a   : > { %17872 = vmatprep.mubr.f32.mxu0 %v11962_v53  ;;  %18916 = vmatpush3.bf16.msra.mxu0 %v24568_v47 }
 0xb0b   : > { %18918 = vmatprep.subr.bf16.mxu0 %v24569_v57 }
 0xb0d   : > { %17873 = vmatmul.mubr.f32.gmra.mrb[70].mxu0 %v11963_v3 }
 0xb0e   : > { %17875 = vmatprep.mubr.f32.mxu0 %v11964_v63  ;;  %18920 = vmatpush3.bf16.msra.mxu0 %v24569_v57 }
 0xb0f   : > { %18922 = vmatprep.subr.bf16.mxu0 %v24570_v48 }
 0xb11   : > { %17876 = vmatmul.mubr.f32.gmra.mrb[72].mxu0 %v11965_v9 }
 0xb12   : > { %17878 = vmatprep.mubr.f32.mxu0 %v11966_v52  ;;  %18924 = vmatpush3.bf16.msra.mxu0 %v24570_v48  ;;  %v23625_v52 = vld [vmem:[%s23930_s10] ss:$0 sm:$0xff] }
 0xb13   : > { %18926 = vmatprep.subr.bf16.mxu0 %v24571_v40 }
 0xb15   : > { %17879 = vmatmul.mubr.f32.gmra.mrb[74].mxu0 %v11967_v24 }
 0xb16   : > { %17881 = vmatprep.mubr.f32.mxu0 %v11968_v19  ;;  %18928 = vmatpush3.bf16.msra.mxu0 %v24571_v40 }
 0xb17   : > { %18930 = vmatprep.subr.bf16.mxu0 %v24572_v60 }
 0xb19   : > { %17882 = vmatmul.mubr.f32.gmra.mrb[76].mxu0 %v11969_v55 }
 0xb1a   : > { %17884 = vmatprep.mubr.f32.mxu0 %v11970_v30  ;;  %18932 = vmatpush3.bf16.msra.mxu0 %v24572_v60 }
 0xb1b   : > { %18934 = vmatprep.subr.bf16.mxu0 %v24573_v46 }
 0xb1d   : > { %17885 = vmatmul.mubr.f32.gmra.mrb[78].mxu0 %v11971_v38 }
 0xb1e   : > { %17887 = vmatprep.mubr.f32.mxu0 %v11972_v25  ;;  %18936 = vmatpush3.bf16.msra.mxu0 %v24573_v46 }
 0xb21   : > { %17888 = vmatmul.mubr.f32.gmra.mrb[80].mxu0 %v11973_v12 }
 0xb22   : > { %17890 = vmatprep.mubr.f32.mxu0 %v11974_v14 }
 0xb25   : > { %17891 = vmatmul.mubr.f32.gmra.mrb[82].mxu0 %v11975_v26 }
 0xb26   : > { %17893 = vmatprep.mubr.f32.mxu0 %v11976_v27 }
 0xb29   : > { %17894 = vmatmul.mubr.f32.gmra.mrb[84].mxu0 %v11977_v43 }
 0xb2a   : > { %17896 = vmatprep.mubr.f32.mxu0 %v11978_v13  ;;  %v23643_v13 = vld [vmem:[%s24597_s14] ss:$0 sm:$0xff]  ;;  %s20252_s14 = sshll.u32 %s20326_s18, 4  ;;  %s20253_s14 = int_to_ptr.vmem [resolvable:$false] %s20252_s14 }
 0xb2b   : > { %s20254_s24 = scalar_lea.vmem %s20253_s14, 8192  ;;  %p20255_p13 = scmp.lt.s32.totalorder %s23872_s21, %s20253_s14 }
 0xb2c   : > { %p20256_p1 = scmp.lt.s32.totalorder %s20254_s24, %s20248_s23 }
 0xb2d   : > { %17897 = vmatmul.mubr.f32.gmra.mrb[86].mxu0 %v11979_v42 }
 0xb2e   : > { %17899 = vmatprep.mubr.f32.mxu0 %v11980_v5  ;;  %p20257_p6 = por %p20256_p1, %p20255_p13 }
 0xb30   : > { %p20258_p9 = pnand %p20257_p6, %p20251_p11 }
 0xb31   : > { %17900 = vmatmul.mubr.f32.gmra.mrb[88].mxu0 %v11981_v16 }
 0xb32   : > { %17902 = vmatprep.mubr.f32.mxu0 %v11982_v56 }
 0xb35   : > { %17903 = vmatmul.mubr.f32.gmra.mrb[90].mxu0 %v11983_v54 }
 0xb36   : > { %17905 = vmatprep.mubr.f32.mxu0 %v23525_v37  ;;  %v24581_v37 = vld [vmem:[#allocation57_spill] sm:$0xff] }
 0xb39   : > { %17906 = vmatmul.mubr.f32.gmra.mrb[92].mxu0 %v23528_v17  ;;  %v24582_v17 = vld [vmem:[#allocation61_spill] sm:$0xff] }
 0xb3a   : > { %17908 = vmatprep.mubr.f32.mxu0 %v11986_v1 }
 0xb3d   : > { %17909 = vmatmul.mubr.f32.gmra.mrb[94].mxu0 %v11987_v7 }
 0xb3e   : > { %17943 = vmatprep.mubr.f32.mxu0 %v24574_v36 }
 0xb41   : > { %17944 = vmatmul.mubr.f32.vlgmr.msra.gmra.mrb[96].mxu0 %v24575_v11 }
 0xb42   : > { %17946 = vmatprep.mubr.f32.mxu0 %v24576_v45 }
 0xb45   : > { %17947 = vmatmul.mubr.f32.gmra.mrb[98].mxu0 %v24577_v44 }
 0xb46   : > { %17949 = vmatprep.mubr.f32.mxu0 %v24578_v59 }
 0xb49   : > { %17950 = vmatmul.mubr.f32.gmra.mrb[100].mxu0 %v24579_v34  ;;  %v23657_v34 = vld [vmem:[%s24598_s29] ss:$0 sm:$0xff] }
 0xb4a   : > { %17952 = vmatprep.mubr.f32.mxu0 %v24580_v10 }
 0xb4d   : > { %17953 = vmatmul.mubr.f32.gmra.mrb[102].mxu0 %v24581_v37 }
 0xb4e   : > { %17955 = vmatprep.mubr.f32.mxu0 %v24582_v17 }
 0xb51   : > { %17956 = vmatmul.mubr.f32.gmra.mrb[104].mxu0 %v24583_v49  ;;  %v24599_v49 = vld [vmem:[#allocation22_spill] sm:$0xff] }
 0xb52   : > { %17958 = vmatprep.mubr.f32.mxu0 %v24584_v8 }
 0xb55   : > { %17959 = vmatmul.mubr.f32.gmra.mrb[106].mxu0 %v24585_v39 }
 0xb56   : > { %17961 = vmatprep.mubr.f32.mxu0 %v24586_v15 }
 0xb59   : > { %17962 = vmatmul.mubr.f32.gmra.mrb[108].mxu0 %v24587_v20  ;;  %v24600_v20 = vld [vmem:[#allocation23_spill] sm:$0xff] }
 0xb5a   : > { %17964 = vmatprep.mubr.f32.mxu0 %v24588_v18 }
 0xb5d   : > { %17965 = vmatmul.mubr.f32.gmra.mrb[110].mxu0 %v24589_v6 }
 0xb5e   : > { %17967 = vmatprep.mubr.f32.mxu0 %v24590_v29 }
 0xb61   : > { %17968 = vmatmul.mubr.f32.gmra.mrb[112].mxu0 %v24591_v33 }
 0xb62   : > { %17970 = vmatprep.mubr.f32.mxu0 %v24592_v35 }
 0xb65   : > { %17971 = vmatmul.mubr.f32.gmra.mrb[114].mxu0 %v24593_v61 }
 0xb66   : > { %17973 = vmatprep.mubr.f32.mxu0 %v24594_v2 }
 0xb69   : > { %17974 = vmatmul.mubr.f32.gmra.mrb[116].mxu0 %v24595_v62 }
 0xbd4   : > { %v17865_v32 = vpop.f32.mrb[64].mxu0 }
 0xbd5   : > { %v12071_v23 = vpop.f32.mrb[65].mxu0  ;;  %v12270_v24 = vadd.f32 %v17865_v32, %v23625_v52 }
 0xbd6   : > { %v12269_v19 = vadd.f32 %v23625_v52, %v12071_v23 }
 0xbd7   : > { %v12334_v30 = vmul.f32 0.2, %v12270_v24  ;;  %vm12302_vm0 = vcmp.ge.f32.partialorder %v12270_v24, 0.0 }
 0xbd8   : > { %v17868_v28 = vpop.f32.mrb[66].mxu0  ;;  %v12333_v46 = vmul.f32 0.2, %v12269_v19  ;;  %vm12301_vm2 = vcmp.ge.f32.partialorder %v12269_v19, 0.0 }
 0xbd9   : > { %v12081_v4 = vpop.f32.mrb[67].mxu0  ;;  %v12272_v25 = vadd.f32 %v17868_v28, %v23625_v52  ;;  %v23645_v16 = vsel %vm12302_vm0, %v12270_v24, %v12334_v30  ;;  %v24601_v24 = vld [vmem:[#allocation24_spill] sm:$0xff] }
 0xbda   : > { %v12271_v26 = vadd.f32 %v23625_v52, %v12081_v4  ;;  %v23647_v56 = vsel %vm12301_vm2, %v12269_v19, %v12333_v46 }
 0xbdb   : > { %v12336_v54 = vmul.f32 0.2, %v12272_v25  ;;  %vm12304_vm14 = vcmp.ge.f32.partialorder %v12272_v25, 0.0 }
 0xbdc   : > { %v17871_v58 = vpop.f32.mrb[68].mxu0  ;;  %v12335_v11 = vmul.f32 0.2, %v12271_v26  ;;  %vm12303_vm1 = vcmp.ge.f32.partialorder %v12271_v26, 0.0 }
 0xbdd   : > { %v23594_v21 = vpop.f32.mrb[69].mxu0  ;;  %v23661_v17 = vadd.f32 %v17871_v58, %v23625_v52  ;;  %v23667_v35 = vsel %vm12304_vm14, %v12272_v25, %v12336_v54 }
 0xbde   : > { %v23676_v58 = vadd.f32 %v23625_v52, %v23594_v21  ;;  %v23686_v21 = vsel %vm12303_vm1, %v12271_v26, %v12335_v11  ;;  %v24603_v26 = vld [vmem:[#allocation26_spill] sm:$0xff] }
 0xbdf   : > { %vm12306_vm8 = vcmp.ge.f32.partialorder %v23661_v17, 0.0 }
 0xbe0   : > { %v23596_v51 = vpop.f32.mrb[70].mxu0  ;;  %vm12305_vm11 = vcmp.ge.f32.partialorder %v23676_v58, 0.0 }
 0xbe1   : > { %v23598_v41 = vpop.f32.mrb[71].mxu0 }
 0xbe4   : > { %v23600_v22 = vpop.f32.mrb[72].mxu0 }
 0xbe5   : > { %v23602_v50 = vpop.f32.mrb[73].mxu0 }
 0xbe8   : > { %v23604_v31 = vpop.f32.mrb[74].mxu0 }
 0xbe9   : > { %v23606_v47 = vpop.f32.mrb[75].mxu0 }
 0xbec   : > { %v23608_v0 = vpop.f32.mrb[76].mxu0 }
 0xbed   : > { %v23610_v53 = vpop.f32.mrb[77].mxu0 }
 0xbf0   : > { %v23612_v57 = vpop.f32.mrb[78].mxu0 }
 0xbf1   : > { %v23614_v3 = vpop.f32.mrb[79].mxu0 }
 0xbf4   : > { %v23616_v63 = vpop.f32.mrb[80].mxu0 }
 0xbf5   : > { %v23618_v48 = vpop.f32.mrb[81].mxu0 }
 0xbf8   : > { %v23620_v9 = vpop.f32.mrb[82].mxu0 }
 0xbf9   : > { %v23627_v40 = vpop.f32.mrb[83].mxu0 }
 0xbfc   : > { %v23631_v60 = vpop.f32.mrb[84].mxu0 }
 0xbfd   : > { %v23633_v55 = vpop.f32.mrb[85].mxu0 }
 0xc00   : > { %v17898_v38 = vpop.f32.mrb[86].mxu0 }
 0xc01   : > { %v12292_v12 = vadd.f32 %v17898_v38, %v23625_v52  ;;  %v12181_v14 = vpop.f32.mrb[87].mxu0  ;;  %v24602_v38 = vld [vmem:[#allocation25_spill] sm:$0xff] }
 0xc02   : > { %v12291_v27 = vadd.f32 %v23625_v52, %v12181_v14 }
 0xc03   : > { %vm12324_vm12 = vcmp.ge.f32.partialorder %v12292_v12, 0.0  ;;  %v12356_v43 = vmul.f32 0.2, %v12292_v12 }
 0xc04   : > { %vm12323_vm13 = vcmp.ge.f32.partialorder %v12291_v27, 0.0  ;;  %v12355_v42 = vmul.f32 0.2, %v12291_v27  ;;  %v17901_v5 = vpop.f32.mrb[88].mxu0 }
 0xc05   : > { %v12388_v1 = vsel %vm12324_vm12, %v12292_v12, %v12356_v43  ;;  %v12294_v7 = vadd.f32 %v17901_v5, %v23625_v52  ;;  %v12191_v36 = vpop.f32.mrb[89].mxu0 }
 0xc06   : > { %v19019_v45 = vadd.f32 %v23643_v13, %v12388_v1  ;;  %v12387_v44 = vsel %vm12323_vm13, %v12291_v27, %v12355_v42  ;;  %v12293_v59 = vadd.f32 %v23625_v52, %v12191_v36 }
 0xc07   : > { %v19021_v10 = vadd.f32 %v23643_v13, %v12387_v44  ;;  %vm12326_vm15 = vcmp.ge.f32.partialorder %v12294_v7, 0.0  ;;  %v12358_v37 = vmul.f32 0.2, %v12294_v7 }
 0xc08   : > { %v19020_v8 = vadd.f32 %v19019_v45, %v24599_v49  ;;  %vm12325_vm3 = vcmp.ge.f32.partialorder %v12293_v59, 0.0  ;;  %v12357_v39 = vmul.f32 0.2, %v12293_v59  ;;  %v17904_v15 = vpop.f32.mrb[90].mxu0  ;;  %v23694_v45 = vmul.f32 0.2, %v23661_v17 }
 0xc09   : > { %v19022_v18 = vadd.f32 %v19021_v10, %v24600_v20  ;;  %v12390_v6 = vsel %vm12326_vm15, %v12294_v7, %v12358_v37  ;;  %v12296_v29 = vadd.f32 %v17904_v15, %v23625_v52  ;;  %v12201_v33 = vpop.f32.mrb[91].mxu0  ;;  %v23699_v10 = vmul.f32 0.2, %v23676_v58  ;;  %v24604_v37 = vld [vmem:[#allocation27_spill] sm:$0xff] }
 0xc0a   : > { %v13000_v61 = vadd.f32 %v19020_v8, %v23657_v34  ;;  %v19023_v2 = vadd.f32 %v23643_v13, %v12390_v6  ;;  %v12389_v62 = vsel %vm12325_vm3, %v12293_v59, %v12357_v39  ;;  %v12295_v32 = vadd.f32 %v23625_v52, %v12201_v33 }
 0xc0b   : > { %v12999_v23 = vadd.f32 %v19022_v18, %v23657_v34  ;;  %v19025_v28 = vadd.f32 %v23643_v13, %v12389_v62  ;;  %vm12328_vm4 = vcmp.ge.f32.partialorder %v12296_v29, 0.0  ;;  %v12360_v4 = vmul.f32 0.2, %v12296_v29 }
 0xc0c   : > { %13032 = vst [vmem:[%s23678_s16 + $0xb8] sm:$0xff] %v13000_v61  ;;  %v19024_v19 = vadd.f32 %v19023_v2, %v24601_v24  ;;  %vm12327_vm5 = vcmp.ge.f32.partialorder %v12295_v32, 0.0  ;;  %v12359_v30 = vmul.f32 0.2, %v12295_v32  ;;  %v17907_v46 = vpop.f32.mrb[92].mxu0  ;;  %v12276_v62 = vadd.f32 %v23596_v51, %v23625_v52 }
 0xc0d   : > { %13031 = vst [vmem:[%s23678_s16 + $0xb0] sm:$0xff] %v12999_v23  ;;  %v19026_v25 = vadd.f32 %v19025_v28, %v24602_v38  ;;  %v12392_v12 = vsel %vm12328_vm4, %v12296_v29, %v12360_v4  ;;  %v12298_v14 = vadd.f32 %v17907_v46, %v23625_v52  ;;  %v12211_v27 = vpop.f32.mrb[93].mxu0  ;;  %v12275_v24 = vadd.f32 %v23625_v52, %v23598_v41 }
 0xc0e   : > { %v13002_v43 = vadd.f32 %v19024_v19, %v23657_v34  ;;  %v19027_v42 = vadd.f32 %v23643_v13, %v12392_v12  ;;  %v12391_v5 = vsel %vm12327_vm5, %v12295_v32, %v12359_v30  ;;  %v12297_v54 = vadd.f32 %v23625_v52, %v12211_v27  ;;  %v24605_v32 = vld [vmem:[#allocation28_spill] sm:$0xff]  ;;  %v24606_v19 = vld [vmem:[#allocation29_spill] sm:$0xff] }
 0xc0f   : > { %v13001_v1 = vadd.f32 %v19026_v25, %v23657_v34  ;;  %v19029_v7 = vadd.f32 %v23643_v13, %v12391_v5  ;;  %vm12330_vm6 = vcmp.ge.f32.partialorder %v12298_v14, 0.0  ;;  %v12362_v36 = vmul.f32 0.2, %v12298_v14 }
 0xc10   : > { %13034 = vst [vmem:[%s23678_s16 + $0xc8] sm:$0xff] %v13002_v43  ;;  %v19028_v11 = vadd.f32 %v19027_v42, %v24603_v26  ;;  %vm12329_vm7 = vcmp.ge.f32.partialorder %v12297_v54, 0.0  ;;  %v12361_v44 = vmul.f32 0.2, %v12297_v54  ;;  %v17910_v59 = vpop.f32.mrb[94].mxu0  ;;  %vm12308_vm0 = vcmp.ge.f32.partialorder %v12276_v62, 0.0 }
 0xc11   : > { %13033 = vst [vmem:[%s23678_s16 + $0xc0] sm:$0xff] %v13001_v1  ;;  %v19030_v49 = vadd.f32 %v19029_v7, %v24604_v37  ;;  %v12394_v8 = vsel %vm12330_vm6, %v12298_v14, %v12362_v36  ;;  %v12300_v39 = vadd.f32 %v17910_v59, %v23625_v52  ;;  %v12221_v15 = vpop.f32.mrb[95].mxu0  ;;  %v12340_v5 = vmul.f32 0.2, %v12276_v62 }
 0xc12   : > { %v13004_v20 = vadd.f32 %v19028_v11, %v23657_v34  ;;  %v19031_v18 = vadd.f32 %v23643_v13, %v12394_v8  ;;  %v12393_v6 = vsel %vm12329_vm7, %v12297_v54, %v12361_v44  ;;  %v12299_v29 = vadd.f32 %v23625_v52, %v12221_v15  ;;  %v24609_v11 = vld [vmem:[#allocation85_spill] sm:$0xff]  ;;  %v24610_v8 = vld [vmem:[#allocation86_spill] sm:$0xff] }
 0xc13   : > { %v13003_v33 = vadd.f32 %v19030_v49, %v23657_v34  ;;  %v19033_v61 = vadd.f32 %v23643_v13, %v12393_v6  ;;  %vm12332_vm9 = vcmp.ge.f32.partialorder %v12300_v39, 0.0  ;;  %v12364_v2 = vmul.f32 0.2, %v12300_v39 }
 0xc14   : > { %13036 = vst [vmem:[%s23678_s16 + $0xd8] sm:$0xff] %v13004_v20  ;;  %v19032_v23 = vadd.f32 %v19031_v18, %v24605_v32  ;;  %vm12331_vm10 = vcmp.ge.f32.partialorder %v12299_v29, 0.0  ;;  %v12363_v28 = vmul.f32 0.2, %v12299_v29  ;;  %v17945_v4 = vpop.f32.mrb[96].mxu0  ;;  %vm12307_vm2 = vcmp.ge.f32.partialorder %v12275_v24, 0.0 }
 0xc15   : > { %13035 = vst [vmem:[%s23678_s16 + $0xd0] sm:$0xff] %v13003_v33  ;;  %v19034_v30 = vadd.f32 %v19033_v61, %v24606_v19  ;;  %v12396_v46 = vsel %vm12332_vm9, %v12300_v39, %v12364_v2  ;;  %v12639_v38 = vadd.f32 %v17945_v4, %v23645_v16  ;;  %v12479_v25 = vpop.f32.mrb[97].mxu0  ;;  %v24607_v16 = vld [vmem:[#allocation30_spill] sm:$0xff]  ;;  %v12339_v36 = vmul.f32 0.2, %v12275_v24  ;;  %v24611_v32 = vld [vmem:[#allocation87_spill] sm:$0xff] }
 0xc16   : > { %v13006_v51 = vadd.f32 %v19032_v23, %v23657_v34  ;;  %v19035_v12 = vadd.f32 %v23643_v13, %v12396_v46  ;;  %v12395_v14 = vsel %vm12331_vm10, %v12299_v29, %v12363_v28  ;;  %v12638_v27 = vadd.f32 %v12479_v25, %v23647_v56  ;;  %v24608_v56 = vld [vmem:[#allocation31_spill] sm:$0xff]  ;;  %v24612_v19 = vld [vmem:[#allocation88_spill] sm:$0xff] }
 0xc17   : > { %v13005_v43 = vadd.f32 %v19034_v30, %v23657_v34  ;;  %v19037_v42 = vadd.f32 %v23643_v13, %v12395_v14  ;;  %v12678_v41 = vadd.f32 %v23643_v13, %v12639_v38  ;;  %v12278_v20 = vadd.f32 %v23600_v22, %v23625_v52 }
 0xc18   : > { %13038 = vst [vmem:[%s23678_s16 + $0xe8] sm:$0xff] %v13006_v51  ;;  %v19036_v54 = vadd.f32 %v19035_v12, %v24607_v16  ;;  %v12677_v1 = vadd.f32 %v23643_v13, %v12638_v27  ;;  %v17948_v7 = vpop.f32.mrb[98].mxu0  ;;  %v12277_v29 = vadd.f32 %v23625_v52, %v23602_v50  ;;  %v12370_v22 = vsel %vm12306_vm8, %v23661_v17, %v23694_v45 }
 0xc19   : > { %13037 = vst [vmem:[%s23678_s16 + $0xe0] sm:$0xff] %v13005_v43  ;;  %v19038_v26 = vadd.f32 %v19037_v42, %v24608_v56  ;;  %v12939_v44 = vadd.f32 %v24609_v11, %v12678_v41  ;;  %v12641_v59 = vadd.f32 %v17948_v7, %v23667_v35  ;;  %v12489_v37 = vpop.f32.mrb[99].mxu0  ;;  %v12280_v2 = vadd.f32 %v23604_v31, %v23625_v52 }
 0xc1a   : > { %v13008_v49 = vadd.f32 %v19036_v54, %v23657_v34  ;;  %v12938_v39 = vadd.f32 %v24610_v8, %v12677_v1  ;;  %v12640_v15 = vadd.f32 %v12489_v37, %v23686_v21  ;;  %v12369_v50 = vsel %vm12305_vm11, %v23676_v58, %v23699_v10 }
 0xc1b   : > { %v13007_v18 = vadd.f32 %v19038_v26, %v23657_v34  ;;  %v12978_v6 = vadd.f32 %v23657_v34, %v12939_v44  ;;  %v12680_v35 = vadd.f32 %v23643_v13, %v12641_v59  ;;  %v12372_v45 = vsel %vm12308_vm0, %v12276_v62, %v12340_v5  ;;  %v24613_v62 = vld [vmem:[#allocation89_spill] sm:$0xff]  ;;  %v24614_v5 = vld [vmem:[#allocation90_spill] sm:$0xff]  ;;  %v24615_v59 = vld [vmem:[#allocation91_spill] sm:$0xff] }
 0xc1c   : > { %13040 = vst [vmem:[%s23678_s16 + $0xf8] sm:$0xff] %v13008_v49  ;;  %v12977_v33 = vadd.f32 %v23657_v34, %v12938_v39  ;;  %v12679_v61 = vadd.f32 %v23643_v13, %v12640_v15  ;;  %v17951_v21 = vpop.f32.mrb[100].mxu0  ;;  %v12371_v31 = vsel %vm12307_vm2, %v12275_v24, %v12339_v36  ;;  %v12342_v46 = vmul.f32 0.2, %v12278_v20  ;;  %v24616_v15 = vld [vmem:[#allocation92_spill] sm:$0xff] }
 0xc1d   : > { %13039 = vst [vmem:[%s23678_s16 + $0xf0] sm:$0xff] %v13007_v18  ;;  %13010 = vst [vmem:[%s23678_s16 + $0x8] sm:$0xff] %v12978_v6  ;;  %v12941_v23 = vadd.f32 %v24611_v32, %v12680_v35  ;;  %v12643_v28 = vadd.f32 %v17951_v21, %v12370_v22  ;;  %v12499_v4 = vpop.f32.mrb[101].mxu0  ;;  %vm12310_vm12 = vcmp.ge.f32.partialorder %v12278_v20, 0.0  ;;  %v12341_v51 = vmul.f32 0.2, %v12277_v29 }
 0xc1e   : > { %13009 = vst [vmem:[%s23678_s16] sm:$0xff] %v12977_v33  ;;  %v12940_v30 = vadd.f32 %v24612_v19, %v12679_v61  ;;  %v12642_v17 = vadd.f32 %v12499_v4, %v12369_v50  ;;  %v12279_v58 = vadd.f32 %v23625_v52, %v23606_v47  ;;  %v12344_v27 = vmul.f32 0.2, %v12280_v2  ;;  %v24618_v19 = vld [vmem:[#allocation76_spill] sm:$0xff] }
 0xc1f   : > { %v12980_v38 = vadd.f32 %v23657_v34, %v12941_v23  ;;  %v12682_v25 = vadd.f32 %v23643_v13, %v12643_v28  ;;  %vm12309_vm13 = vcmp.ge.f32.partialorder %v12277_v29, 0.0  ;;  %v12282_v41 = vadd.f32 %v23608_v0, %v23625_v52  ;;  %v24617_v23 = vld [vmem:[#allocation75_spill] sm:$0xff] }
 0xc20   : > { %v12979_v10 = vadd.f32 %v23657_v34, %v12940_v30  ;;  %v12681_v12 = vadd.f32 %v23643_v13, %v12642_v17  ;;  %v17954_v14 = vpop.f32.mrb[102].mxu0  ;;  %vm12312_vm14 = vcmp.ge.f32.partialorder %v12280_v2, 0.0  ;;  %v12281_v54 = vadd.f32 %v23625_v52, %v23610_v53 }
 0xc21   : > { %13012 = vst [vmem:[%s23678_s16 + $0x18] sm:$0xff] %v12980_v38  ;;  %v12943_v24 = vadd.f32 %v24613_v62, %v12682_v25  ;;  %v12645_v43 = vadd.f32 %v17954_v14, %v12372_v45  ;;  %v12509_v42 = vpop.f32.mrb[103].mxu0  ;;  %v12374_v36 = vsel %vm12310_vm12, %v12278_v20, %v12342_v46  ;;  %v12343_v56 = vmul.f32 0.2, %v12279_v58 }
 0xc22   : > { %13011 = vst [vmem:[%s23678_s16 + $0x10] sm:$0xff] %v12979_v10  ;;  %v12942_v16 = vadd.f32 %v24614_v5, %v12681_v12  ;;  %v12644_v47 = vadd.f32 %v12509_v42, %v12371_v31  ;;  %v12373_v44 = vsel %vm12309_vm13, %v12277_v29, %v12341_v51  ;;  %v12376_v53 = vsel %vm12312_vm14, %v12280_v2, %v12344_v27  ;;  %v24619_v12 = vld [vmem:[#allocation93_spill] sm:$0xff] }
 0xc23   : > { %v12982_v1 = vadd.f32 %v23657_v34, %v12943_v24  ;;  %v12684_v7 = vadd.f32 %v23643_v13, %v12645_v43  ;;  %vm12311_vm15 = vcmp.ge.f32.partialorder %v12279_v58, 0.0  ;;  %v12346_v39 = vmul.f32 0.2, %v12282_v41  ;;  %v24620_v43 = vld [vmem:[#allocation94_spill] sm:$0xff] }
 0xc24   : > { %v12981_v26 = vadd.f32 %v23657_v34, %v12942_v16  ;;  %v12683_v0 = vadd.f32 %v23643_v13, %v12644_v47  ;;  %v17957_v11 = vpop.f32.mrb[104].mxu0  ;;  %vm12314_vm1 = vcmp.ge.f32.partialorder %v12282_v41, 0.0  ;;  %v12345_v6 = vmul.f32 0.2, %v12281_v54 }
 0xc25   : > { %13014 = vst [vmem:[%s23678_s16 + $0x28] sm:$0xff] %v12982_v1  ;;  %v12945_v37 = vadd.f32 %v24615_v59, %v12684_v7  ;;  %v12647_v49 = vadd.f32 %v17957_v11, %v12374_v36  ;;  %v12519_v8 = vpop.f32.mrb[105].mxu0  ;;  %v12284_v35 = vadd.f32 %v23612_v57, %v23625_v52  ;;  %v12283_v61 = vadd.f32 %v23625_v52, %v23614_v3  ;;  %v24622_v59 = vld [vmem:[#allocation96_spill] sm:$0xff] }
 0xc26   : > { %13013 = vst [vmem:[%s23678_s16 + $0x20] sm:$0xff] %v12981_v26  ;;  %v12944_v18 = vadd.f32 %v24616_v15, %v12683_v0  ;;  %v12646_v20 = vadd.f32 %v12519_v8, %v12373_v44  ;;  %vm12313_vm3 = vcmp.ge.f32.partialorder %v12281_v54, 0.0  ;;  %v12286_v32 = vadd.f32 %v23616_v63, %v23625_v52  ;;  %v24621_v26 = vld [vmem:[#allocation95_spill] sm:$0xff] }
 0xc27   : > { %v12984_v29 = vadd.f32 %v23657_v34, %v12945_v37  ;;  %v12686_v33 = vadd.f32 %v23643_v13, %v12647_v49  ;;  %v12375_v50 = vsel %vm12311_vm15, %v12279_v58, %v12343_v56  ;;  %v12285_v3 = vadd.f32 %v23625_v52, %v23618_v48 }
 0xc28   : > { %v12983_v22 = vadd.f32 %v23657_v34, %v12944_v18  ;;  %v12685_v21 = vadd.f32 %v23643_v13, %v12646_v20  ;;  %v17960_v2 = vpop.f32.mrb[106].mxu0  ;;  %v12378_v45 = vsel %vm12314_vm1, %v12282_v41, %v12346_v39  ;;  %v12348_v31 = vmul.f32 0.2, %v12284_v35 }
 0xc29   : > { %13016 = vst [vmem:[%s23678_s16 + $0x38] sm:$0xff] %v12984_v29  ;;  %v12947_v28 = vadd.f32 %v24617_v23, %v12686_v33  ;;  %v12649_v57 = vadd.f32 %v17960_v2, %v12376_v53  ;;  %v12529_v4 = vpop.f32.mrb[107].mxu0  ;;  %v12377_v38 = vsel %vm12313_vm3, %v12281_v54, %v12345_v6  ;;  %v12347_v25 = vmul.f32 0.2, %v12283_v61 }
 0xc2a   : > { %13015 = vst [vmem:[%s23678_s16 + $0x30] sm:$0xff] %v12983_v22  ;;  %v12946_v30 = vadd.f32 %v24618_v19, %v12685_v21  ;;  %v12648_v17 = vadd.f32 %v12529_v4, %v12375_v50  ;;  %vm12316_vm4 = vcmp.ge.f32.partialorder %v12284_v35, 0.0  ;;  %v12350_v48 = vmul.f32 0.2, %v12286_v32 }
 0xc2b   : > { %v12986_v63 = vadd.f32 %v23657_v34, %v12947_v28  ;;  %v12688_v46 = vadd.f32 %v23643_v13, %v12649_v57  ;;  %vm12315_vm5 = vcmp.ge.f32.partialorder %v12283_v61, 0.0  ;;  %v12349_v24 = vmul.f32 0.2, %v12285_v3 }
 0xc2c   : > { %v12985_v51 = vadd.f32 %v23657_v34, %v12946_v30  ;;  %v12687_v58 = vadd.f32 %v23643_v13, %v12648_v17  ;;  %v17963_v10 = vpop.f32.mrb[108].mxu0  ;;  %vm12318_vm6 = vcmp.ge.f32.partialorder %v12286_v32, 0.0  ;;  %v12288_v5 = vadd.f32 %v23620_v9, %v23625_v52  ;;  %v24625_v17 = vld [vmem:[#allocation99_spill] sm:$0xff] }
 0xc2d   : > { %13018 = vst [vmem:[%s23678_s16 + $0x48] sm:$0xff] %v12986_v63  ;;  %v12949_v14 = vadd.f32 %v24619_v12, %v12688_v46  ;;  %v12651_v27 = vadd.f32 %v17963_v10, %v12378_v45  ;;  %v12539_v62 = vpop.f32.mrb[109].mxu0  ;;  %vm12317_vm7 = vcmp.ge.f32.partialorder %v12285_v3, 0.0  ;;  %v12287_v54 = vadd.f32 %v23625_v52, %v23627_v40  ;;  %v24626_v46 = vld [vmem:[#allocation100_spill] sm:$0xff] }
 0xc2e   : > { %13017 = vst [vmem:[%s23678_s16 + $0x40] sm:$0xff] %v12985_v51  ;;  %v12948_v42 = vadd.f32 %v24620_v43, %v12687_v58  ;;  %v12650_v41 = vadd.f32 %v12539_v62, %v12377_v38  ;;  %v12380_v36 = vsel %vm12316_vm4, %v12284_v35, %v12348_v31  ;;  %v12379_v9 = vsel %vm12315_vm5, %v12283_v61, %v12347_v25  ;;  %v24623_v61 = vld [vmem:[#allocation97_spill] sm:$0xff] }
 0xc2f   : > { %v12988_v16 = vadd.f32 %v23657_v34, %v12949_v14  ;;  %v12690_v47 = vadd.f32 %v23643_v13, %v12651_v27  ;;  %v12382_v40 = vsel %vm12318_vm6, %v12286_v32, %v12350_v48  ;;  %v12381_v8 = vsel %vm12317_vm7, %v12285_v3, %v12349_v24  ;;  %v24624_v32 = vld [vmem:[#allocation98_spill] sm:$0xff]  ;;  %v24627_v27 = vld [vmem:[#allocation101_spill] sm:$0xff] }
 0xc30   : > { %v12987_v1 = vadd.f32 %v23657_v34, %v12948_v42  ;;  %v12689_v7 = vadd.f32 %v23643_v13, %v12650_v41  ;;  %v17966_v56 = vpop.f32.mrb[110].mxu0  ;;  %v12352_v53 = vmul.f32 0.2, %v12288_v5  ;;  %vm12320_vm8 = vcmp.ge.f32.partialorder %v12288_v5, 0.0  ;;  %v24628_v41 = vld [vmem:[#allocation102_spill] sm:$0xff] }
 0xc31   : > { %13020 = vst [vmem:[%s23678_s16 + $0x58] sm:$0xff] %v12988_v16  ;;  %v12951_v0 = vadd.f32 %v24621_v26, %v12690_v47  ;;  %v12653_v11 = vadd.f32 %v17966_v56, %v12380_v36  ;;  %v12549_v44 = vpop.f32.mrb[111].mxu0  ;;  %v12351_v18 = vmul.f32 0.2, %v12287_v54  ;;  %v12290_v20 = vadd.f32 %v23631_v60, %v23625_v52  ;;  %v24630_v36 = vld [vmem:[#allocation103_spill] sm:$0xff]  ;;  %v24631_v26 = vld [vmem:[#allocation21_spill] sm:$0xff] }
 0xc32   : > { %13019 = vst [vmem:[%s23678_s16 + $0x50] sm:$0xff] %v12987_v1  ;;  %v12950_v37 = vadd.f32 %v24622_v59, %v12689_v7  ;;  %v12652_v49 = vadd.f32 %v12549_v44, %v12379_v9  ;;  %v12289_v33 = vadd.f32 %v23625_v52, %v23633_v55  ;;  %vm12319_vm9 = vcmp.ge.f32.partialorder %v12287_v54, 0.0 }
 0xc33   : > { %v12990_v39 = vadd.f32 %v23657_v34, %v12951_v0  ;;  %v12692_v15 = vadd.f32 %v23643_v13, %v12653_v11  ;;  %v12384_v50 = vsel %vm12320_vm8, %v12288_v5, %v12352_v53  ;;  %v12354_v4 = vmul.f32 0.2, %v12290_v20 }
 0xc34   : > { %v12989_v6 = vadd.f32 %v23657_v34, %v12950_v37  ;;  %v12691_v35 = vadd.f32 %v23643_v13, %v12652_v49  ;;  %v17969_v29 = vpop.f32.mrb[112].mxu0  ;;  %v12383_v19 = vsel %vm12319_vm9, %v12287_v54, %v12351_v18  ;;  %v12353_v30 = vmul.f32 0.2, %v12289_v33 }
 0xc35   : > { %13022 = vst [vmem:[%s23678_s16 + $0x68] sm:$0xff] %v12990_v39  ;;  %v12953_v22 = vadd.f32 %v24623_v61, %v12692_v15  ;;  %v12655_v21 = vadd.f32 %v17969_v29, %v12382_v40  ;;  %v12559_v2 = vpop.f32.mrb[113].mxu0  ;;  %vm12322_vm10 = vcmp.ge.f32.partialorder %v12290_v20, 0.0  ;;  %vm12321_vm11 = vcmp.ge.f32.partialorder %v12289_v33, 0.0 }
 0xc36   : > { %13021 = vst [vmem:[%s23678_s16 + $0x60] sm:$0xff] %v12989_v6  ;;  %v12952_v23 = vadd.f32 %v24624_v32, %v12691_v35  ;;  %v12654_v60 = vadd.f32 %v12559_v2, %v12381_v8  ;;  %v12386_v12 = vsel %vm12322_vm10, %v12290_v20, %v12354_v4  ;;  %v12385_v43 = vsel %vm12321_vm11, %v12289_v33, %v12353_v30 }
 0xc37   : > { %v12992_v28 = vadd.f32 %v23657_v34, %v12953_v22  ;;  %v12694_v57 = vadd.f32 %v23643_v13, %v12655_v21 }
 0xc38   : > { %v12991_v52 = vadd.f32 %v23657_v34, %v12952_v23  ;;  %v12693_v55 = vadd.f32 %v23643_v13, %v12654_v60  ;;  %v17972_v3 = vpop.f32.mrb[114].mxu0 }
 0xc39   : > { %13024 = vst [vmem:[%s23678_s16 + $0x78] sm:$0xff] %v12992_v28  ;;  %v12955_v45 = vadd.f32 %v24625_v17, %v12694_v57  ;;  %v12657_v31 = vadd.f32 %v17972_v3, %v12384_v50  ;;  %v12569_v63 = vpop.f32.mrb[115].mxu0 }
 0xc3a   : > { %13023 = vst [vmem:[%s23678_s16 + $0x70] sm:$0xff] %v12991_v52  ;;  %v12954_v38 = vadd.f32 %v24626_v46, %v12693_v55  ;;  %v12656_v25 = vadd.f32 %v12569_v63, %v12383_v19 }
 0xc3b   : > { %v12994_v51 = vadd.f32 %v23657_v34, %v12955_v45  ;;  %v12696_v58 = vadd.f32 %v23643_v13, %v12657_v31 }
 0xc3c   : > { %v12993_v10 = vadd.f32 %v23657_v34, %v12954_v38  ;;  %v12695_v48 = vadd.f32 %v23643_v13, %v12656_v25  ;;  %v17975_v14 = vpop.f32.mrb[116].mxu0 }
 0xc3d   : > { %13026 = vst [vmem:[%s23678_s16 + $0x88] sm:$0xff] %v12994_v51  ;;  %v12957_v62 = vadd.f32 %v24627_v27, %v12696_v58  ;;  %v12659_v24 = vadd.f32 %v17975_v14, %v12386_v12  ;;  %v12579_v42 = vpop.f32.mrb[117].mxu0 }
 0xc3e   : > { %13025 = vst [vmem:[%s23678_s16 + $0x80] sm:$0xff] %v12993_v10  ;;  %v12956_v5 = vadd.f32 %v24628_v41, %v12695_v48  ;;  %v12658_v16 = vadd.f32 %v12579_v42, %v12385_v43 }
 0xc3f   : > { %v12996_v47 = vadd.f32 %v23657_v34, %v12957_v62  ;;  %v12698_v54 = vadd.f32 %v23643_v13, %v12659_v24 }
 0xc40   : > { %v12995_v1 = vadd.f32 %v23657_v34, %v12956_v5  ;;  %v12697_v7 = vadd.f32 %v23643_v13, %v12658_v16 }
 0xc41   : > { %13028 = vst [vmem:[%s23678_s16 + $0x98] sm:$0xff] %v12996_v47  ;;  %v12959_v56 = vadd.f32 %v24630_v36, %v12698_v54 }
 0xc42   : > { %13027 = vst [vmem:[%s23678_s16 + $0x90] sm:$0xff] %v12995_v1  ;;  %v12958_v0 = vadd.f32 %v24631_v26, %v12697_v7 }
 0xc43   : > { %v12998_v11 = vadd.f32 %v23657_v34, %v12959_v56 }
 0xc44   : > { %v12997_v13 = vadd.f32 %v23657_v34, %v12958_v0 }
 0xc45   : > { %13030 = vst [vmem:[%s23678_s16 + $0xa8] sm:$0xff] %v12998_v11 }
 0xc46   : > { %13029 = vst [vmem:[%s23678_s16 + $0xa0] sm:$0xff] %v12997_v13 }
 0xc47   : > { %20261 = shalt.err (!%p20258_p9)
}
 0xc48   : > { %s20262_s20 = scalar_lea.hbm %s23870_s15, 4096  ;;  %s20266_s28 = scalar_lea.hbm %s24632_s12, 8192 }
 0xc49   : > { %p20263_p2 = scmp.ne.s32.totalorder %s23870_s15, %s20262_s20  ;;  %p20267_p5 = scmp.lt.u32.totalorder %s23870_s15, %s24632_s12 }
 0xc4a   : > { %p20268_p10 = scmp.lt.u32.totalorder %s20266_s28, %s20262_s20  ;;  %p20270_p12 = scmp.lt.u32.totalorder %s20262_s20, %s23870_s15 }
 0xc4b   : > { %p20264_p0 = pnand %p20263_p2, %p24633_p7 }
 0xc4c   : > { %p20269_p4 = por %p20268_p10, %p20267_p5 }
 0xc4d   : > { %p20265_p3 = pneg %p20264_p0 }
 0xc4e   : > { %p20271_p8 = por %p20270_p12, %p20269_p4 }
 0xc50   : > { %p20272_p11 = pnand %p20271_p8, %p20265_p3 }
 0xc52   : > { %20275 = shalt.err (!%p20272_p11)
}
 0xc53   : > { %s20327_s27 = smov 128   ;;  %s20328_s17 = smov 8  }
 0xc54   : > { %20086 = dma.vmem_to_hbm [thread:$0]  (%p24633_p7), %s23872_s21, 4096, %s23870_s15, %s23879_s22, %s20327_s27, %s20327_s27, %s20328_s17  }
 0xc55 PF: > { %s24634_s26 = sld [smem:[#allocation16_spill]]  ;;  %s24635_s23 = sld [smem:[#allocation13_spill]] }
 0xc56   : > { %s24636_s18 = sld [smem:[#allocation20_spill]] }
 0xc5b   : > { %p20108_p13 = scmp.ge.s32.totalorder %s24634_s26, 2  ;;  %s13070_s14 = sand.u32 1, %s24635_s23  }
 0xc5c   : > { %p24637_p1 = scmp.ne.s32.totalorder %s24636_s18, 0  ;;  %s13071_s24 = scalar_lea.sflag [#allocation5], %s13070_s14 }
 0xc5e   : > { %p20099_p6 = pnand %p20108_p13, %p24637_p1 }
 0xc60   : > { %20301 = dma.done.wait (!%p20099_p6), %s13071_s24, 4096  }
 0xc61   : > { %20303 = vsyncadd (!%p20099_p6), %s13071_s24, 4294963200  ;;  %s24638_s21 = sld [smem:[#allocation17_spill]]  ;;  %s24639_s18 = sld [smem:[#allocation14_spill]] }
 0xc62   : > { %s24640_s19 = sld [smem:[#allocation15_spill]]  ;;  %s24641_s20 = sld [smem:[#allocation18_spill]] }
 0xc67   : > { %p27_p9 = scmp.ge.s32.totalorder %s24638_s21, 4  }
 0xc69   :  { %29 = sbr.rel (!%p27_p9) target bundleno = 9 (0x9), region = 162 }
 0xc70   :  { %13076 = vsyncpa [#allocation4], 1 }
 0xc71   :  { %13078 = vsyncpa [#allocation4 + $0x1], 1 }
 0xc72   :  { %13079 = vsyncpa [#allocation7], 1 }
 0xc73   :  { %13080 = vsyncpa [#allocation5], 1 }
 0xc74   :  { %13082 = vsyncpa [#allocation5 + $0x1], 1 }

</bundles_post_ra>
